<compile_context>
chip_gen: v7x
topology: tpu7x:2x2x1
jax: 0.10.0
libtpu: 0.0.40
codegen_flags: <defaults>
</compile_context>

<pallas_src>
import jax
import jax.numpy as jnp
from jax.experimental import pallas as pl
from jax.experimental.pallas import tpu as pltpu

HIDDEN = 384
INTERMEDIATE = 1536
NUM_HEADS = 6
HEAD_DIM = HIDDEN // NUM_HEADS
LN_EPS = 1e-12  # HF BertConfig default layer_norm_eps

# Row indices inside the packed (11, 384) small-parameter array.
_R_CLS, _R_TOK, _R_LNE_G, _R_LNE_B, _R_B_AO, _R_LNA_G, _R_LNA_B, \
    _R_B_FO, _R_LNO_G, _R_LNO_B, _R_B_POOL = range(11)
_N_SMALL_ROWS = 11


def _layernorm(x, g, b):
    mu = jnp.mean(x, axis=-1, keepdims=True)
    var = jnp.mean((x - mu) ** 2, axis=-1, keepdims=True)
    return (x - mu) * jax.lax.rsqrt(var + LN_EPS) * g + b


# ----------------------------------------------------------------------------
# Single fused kernel: proj_in + sequence build + 1-layer BERT classifier.
# ----------------------------------------------------------------------------
def _wit_kernel(
    # demographic indices (SMEM scalars)
    sex_ref, age_ref, org_ref,
    # activations / tables
    h_ref, pos_ref, sex_tbl, age_tbl, org_tbl,
    # packed tiny f32 params (11, 384)
    rows_ref,
    # big VMEM-resident weights
    wproj_ref, wqkv_ref, bqkv_ref, wo_ref, b_inter_ref,
    # HBM (pl.ANY) weights streamed manually so their DMA hides under attention
    wi_hbm, wfo_hbm, wp_hbm,
    # classifier
    wcls_ref, bcls_ref,
    # output
    out_ref,
    # scratch
    wi_vmem, wfo_vmem, wp_vmem, dma_sem,
):
    # --- Kick off FFN / pooler weight DMAs immediately; they stream under the
    #     projection + embedding + attention compute below.
    cp_wi = pltpu.make_async_copy(wi_hbm, wi_vmem, dma_sem.at[0])
    cp_wfo = pltpu.make_async_copy(wfo_hbm, wfo_vmem, dma_sem.at[1])
    cp_wp = pltpu.make_async_copy(wp_hbm, wp_vmem, dma_sem.at[2])
    cp_wi.start()
    cp_wfo.start()
    cp_wp.start()

    # --- proj_in (no bias): bf16 weights, f32 accumulation.
    proj = jnp.dot(h_ref[...].astype(jnp.bfloat16), wproj_ref[...],
                   preferred_element_type=jnp.float32)                 # (N, H)

    # --- demographic token rows (dynamic row reads; indices live in SMEM).
    sex_row = sex_tbl[pl.ds(sex_ref[0], 1), :]                         # (1, H)
    age_row = age_tbl[pl.ds(age_ref[0], 1), :]
    org_row = org_tbl[pl.ds(org_ref[0], 1), :]

    # --- sequence assembly in registers: [cls, proj(h), sex, age, origin].
    seq = jnp.concatenate(
        [rows_ref[_R_CLS:_R_CLS + 1, :], proj, sex_row, age_row, org_row], axis=0)

    # --- BertEmbeddings: inputs_embeds + position + token_type(=0), then LayerNorm.
    x = seq + pos_ref[...] + rows_ref[_R_TOK:_R_TOK + 1, :]            # (S, H)
    hid = _layernorm(x, rows_ref[_R_LNE_G:_R_LNE_G + 1, :],
                     rows_ref[_R_LNE_B:_R_LNE_B + 1, :])
    # (dropout layers are identity in eval / deterministic mode)

    # --- Self-attention: one fused QKV matmul, lane-dense (S, 1152) output.
    h_bf = hid.astype(jnp.bfloat16)
    qkv = jnp.dot(h_bf, wqkv_ref[...],
                  preferred_element_type=jnp.float32) + bqkv_ref[...]  # (S, 3H)
    scale = 1.0 / float(HEAD_DIM) ** 0.5
    q = qkv[:, 0:HIDDEN] * scale
    k = qkv[:, HIDDEN:2 * HIDDEN]
    v = qkv[:, 2 * HIDDEN:3 * HIDDEN]

    # Head split of the (tiny) f32 activations only — the weight matmuls stay fused.
    qh = jnp.stack([q[:, i * HEAD_DIM:(i + 1) * HEAD_DIM] for i in range(NUM_HEADS)], 0)
    kh = jnp.stack([k[:, i * HEAD_DIM:(i + 1) * HEAD_DIM] for i in range(NUM_HEADS)], 0)
    vh = jnp.stack([v[:, i * HEAD_DIM:(i + 1) * HEAD_DIM] for i in range(NUM_HEADS)], 0)

    sc = jnp.einsum('nqd,nkd->nqk', qh, kh,
                    preferred_element_type=jnp.float32)                # (NH, S, S)
    sc = sc - jnp.max(sc, axis=-1, keepdims=True)
    p = jnp.exp(sc)
    p = p * pl.reciprocal(jnp.sum(p, axis=-1, keepdims=True), approx=True)
    ctx = jnp.einsum('nqk,nkd->nqd', p, vh,
                     preferred_element_type=jnp.float32)               # (NH, S, HD)

    # Single K=384 output projection on the lane-concatenated context.
    ctx_flat = jnp.concatenate([ctx[i] for i in range(NUM_HEADS)], axis=-1)  # (S, H)
    attn = jnp.dot(ctx_flat.astype(jnp.bfloat16), wo_ref[...],
                   preferred_element_type=jnp.float32) \
        + rows_ref[_R_B_AO:_R_B_AO + 1, :]
    hid = _layernorm(attn + hid, rows_ref[_R_LNA_G:_R_LNA_G + 1, :],
                     rows_ref[_R_LNA_B:_R_LNA_B + 1, :])

    # --- Feed-forward (weights were streaming while attention ran).
    # TODO(synk): HF Bert uses exact erf-GELU; tanh-approx GELU kept here for
    # guaranteed Mosaic lowering (max abs deviation ~1e-3).
    cp_wi.wait()
    inter = jax.nn.gelu(
        jnp.dot(hid.astype(jnp.bfloat16), wi_vmem[...],
                preferred_element_type=jnp.float32) + b_inter_ref[...],
        approximate=True,
    )
    cp_wfo.wait()
    ffn = jnp.dot(inter.astype(jnp.bfloat16), wfo_vmem[...],
                  preferred_element_type=jnp.float32) \
        + rows_ref[_R_B_FO:_R_B_FO + 1, :]
    hid = _layernorm(ffn + hid, rows_ref[_R_LNO_G:_R_LNO_G + 1, :],
                     rows_ref[_R_LNO_B:_R_LNO_B + 1, :])

    # --- Pooler (first token) + classifier head.
    cp_wp.wait()
    pooled = jnp.tanh(
        jnp.dot(hid[0:1, :].astype(jnp.bfloat16), wp_vmem[...],
                preferred_element_type=jnp.float32)
        + rows_ref[_R_B_POOL:_R_B_POOL + 1, :])
    logits = jnp.dot(pooled, wcls_ref[...],
                     preferred_element_type=jnp.float32) + bcls_ref[...]
    out_ref[...] = logits.astype(out_ref.dtype)


def _wit_pallas(h, sex, age, origin, pos, p):
    n, din = h.shape
    s = n + 4
    n_classes = p["w_cls"].shape[1]

    inputs = (
        sex, age, origin,
        h, pos, p["sex_emb"], p["age_emb"], p["origin_emb"],
        p["small_rows"],
        p["w_proj"], p["w_qkv"], p["b_qkv"], p["w_attn_out"], p["b_inter"],
        p["w_inter"], p["w_ffn_out"], p["w_pool"],
        p["w_cls"], p["b_cls"],
    )

    smem = pl.BlockSpec(memory_space=pltpu.MemorySpace.SMEM)
    vmem = pl.BlockSpec(memory_space=pltpu.MemorySpace.VMEM)
    hbm = pl.BlockSpec(memory_space=pl.ANY)
    in_specs = [
        smem, smem, smem,                 # sex, age, origin indices
        vmem, vmem, vmem, vmem, vmem,     # h, pos, sex/age/origin tables
        vmem,                             # packed small rows
        vmem, vmem, vmem, vmem, vmem,     # w_proj, w_qkv, b_qkv, w_attn_out, b_inter
        hbm, hbm, hbm,                    # w_inter, w_ffn_out, w_pool (manual DMA)
        vmem, vmem,                       # w_cls, b_cls
    ]

    flops = 2 * (
        n * din * HIDDEN                                  # proj_in
        + s * HIDDEN * 3 * HIDDEN                         # fused qkv
        + 2 * NUM_HEADS * s * s * HEAD_DIM                # scores + ctx
        + s * HIDDEN * HIDDEN                             # attn output proj
        + 2 * s * HIDDEN * INTERMEDIATE                   # FFN
        + HIDDEN * HIDDEN                                 # pooler
        + HIDDEN * n_classes                              # classifier
    )
    transcendentals = NUM_HEADS * s * s + s * INTERMEDIATE + HIDDEN + 4 * s
    bytes_accessed = (
        sum(int(a.size) * a.dtype.itemsize for a in inputs) + 4 * n_classes
    )

    # VMEM footprint: ~1.4 MB of in_specs + ~2.5 MB of streamed-weight scratch —
    # far below the 32 MiB scoped limit on every generation (incl. v7x 64 MiB VMEM).
    return pl.pallas_call(
        _wit_kernel,
        out_shape=jax.ShapeDtypeStruct((1, n_classes), jnp.float32),
        in_specs=in_specs,
        out_specs=vmem,
        scratch_shapes=[
            pltpu.VMEM((HIDDEN, INTERMEDIATE), jnp.bfloat16),   # w_inter landing buf
            pltpu.VMEM((INTERMEDIATE, HIDDEN), jnp.bfloat16),   # w_ffn_out landing buf
            pltpu.VMEM((HIDDEN, HIDDEN), jnp.bfloat16),         # w_pool landing buf
            pltpu.SemaphoreType.DMA((3,)),
        ],
        compiler_params=pltpu.CompilerParams(vmem_limit_bytes=32 * 1024 * 1024),
        cost_estimate=pl.CostEstimate(
            flops=int(flops),
            transcendentals=int(transcendentals),
            bytes_accessed=int(bytes_accessed),
        ),
    )(*inputs)


# ----------------------------------------------------------------------------
# Parameters (deterministic synthetic init, stored in kernel-ready layout).
# ----------------------------------------------------------------------------
def make_params(key, input_dim, n_classes, max_pos=64):
    keys = jax.random.split(key, 16)
    it = iter(keys)

    def w(shape, scale=0.02):
        return (scale * jax.random.normal(next(it), shape)).astype(jnp.float32)

    def zeros(shape):
        return jnp.zeros(shape, jnp.float32)

    def ones(shape):
        return jnp.ones(shape, jnp.float32)

    w_proj = w((input_dim, HIDDEN))            # proj_in.weight.T (bias-free)
    sex_emb = w((2, HIDDEN), 1.0)
    age_emb = w((100, HIDDEN), 1.0)
    origin_emb = w((2, HIDDEN), 1.0)
    pos_emb = w((max_pos, HIDDEN))
    tok_row = w((1, HIDDEN))                   # token_type_ids == 0 row
    w_q = w((HIDDEN, HIDDEN))
    w_k = w((HIDDEN, HIDDEN))
    w_v = w((HIDDEN, HIDDEN))
    w_ao = w((HIDDEN, HIDDEN))
    w_inter = w((HIDDEN, INTERMEDIATE))
    w_ffn_out = w((INTERMEDIATE, HIDDEN))
    w_pool = w((HIDDEN, HIDDEN))
    w_cls = w((HIDDEN, n_classes))

    # Packed tiny (1, 384) rows: see _R_* index constants.
    small_rows = jnp.concatenate(
        [
            zeros((1, HIDDEN)),   # cls_token (nn.Parameter(torch.zeros(1, 384)))
            tok_row,              # token-type-0 embedding row
            ones((1, HIDDEN)),    # ln_emb gamma
            zeros((1, HIDDEN)),   # ln_emb beta
            zeros((1, HIDDEN)),   # attn output bias
            ones((1, HIDDEN)),    # ln_attn gamma
            zeros((1, HIDDEN)),   # ln_attn beta
            zeros((1, HIDDEN)),   # ffn output bias
            ones((1, HIDDEN)),    # ln_out gamma
            zeros((1, HIDDEN)),   # ln_out beta
            zeros((1, HIDDEN)),   # pooler bias
        ],
        axis=0,
    )
    assert small_rows.shape == (_N_SMALL_ROWS, HIDDEN)

    return dict(
        # ---- WIT level ----
        w_proj=w_proj.astype(jnp.bfloat16),
        sex_emb=sex_emb, age_emb=age_emb, origin_emb=origin_emb,
        # ---- Bert embeddings ----
        pos_emb=pos_emb,
        small_rows=small_rows,
        # ---- Self-attention (fused QKV, standard-layout output proj, bf16) ----
        w_qkv=jnp.concatenate([w_q, w_k, w_v], axis=1).astype(jnp.bfloat16),
        b_qkv=zeros((1, 3 * HIDDEN)),
        w_attn_out=w_ao.astype(jnp.bfloat16),
        # ---- FFN ----
        w_inter=w_inter.astype(jnp.bfloat16),
        b_inter=zeros((1, INTERMEDIATE)),
        w_ffn_out=w_ffn_out.astype(jnp.bfloat16),
        # ---- Pooler + classifier ----
        w_pool=w_pool.astype(jnp.bfloat16),
        w_cls=w_cls,                       # tiny; keep f32 for logit precision
        b_cls=zeros((1, n_classes)),
    )


# ----------------------------------------------------------------------------
# Forward (mirrors WIT.forward with sex/age/origin provided).
# ----------------------------------------------------------------------------
@jax.jit
def wit_forward(params, h, sex, age, origin):
    n = h.shape[0]
    s = n + 4                                   # [cls] + proj(h) + [sex, age, origin]
    if s > params["pos_emb"].shape[0]:
        raise ValueError(f"sequence length {s} exceeds max position embeddings "
                         f"{params['pos_emb'].shape[0]}")
    pos = params["pos_emb"][:s]                 # static slice (S, H)
    return _wit_pallas(h,
                       sex.astype(jnp.int32),
                       age.astype(jnp.int32),
                       origin.astype(jnp.int32),
                       pos, params)


if __name__ == "__main__":
    INPUT_DIM = 256     # constructor arg (default 1024), kept small
    N_CLASSES = 2
    N_PATCHES = 8       # number of input feature rows h: (N, input_dim)

    key = jax.random.PRNGKey(0)
    k_params, k_h = jax.random.split(key)

    params = make_params(k_params, INPUT_DIM, N_CLASSES)
    h = jax.random.normal(k_h, (N_PATCHES, INPUT_DIM), dtype=jnp.float32)
    sex = jnp.array([1], dtype=jnp.int32)
    age = jnp.array([42], dtype=jnp.int32)
    origin = jnp.array([0], dtype=jnp.int32)

    logits = wit_forward(params, h, sex, age, origin)
    jax.block_until_ready(logits)
    assert logits.shape == (1, N_CLASSES), logits.shape
    assert bool(jnp.all(jnp.isfinite(logits)))
    print("KERNEL_OK")
</pallas_src>

<mosaic_0001>
module attributes {stable_mosaic.version = 11 : i64} {
  func.func @_wit_kernel(%arg0: memref<1xi32, #tpu.memory_space<smem>>, %arg1: memref<1xi32, #tpu.memory_space<smem>>, %arg2: memref<1xi32, #tpu.memory_space<smem>>, %arg3: memref<8x256xf32, #tpu.memory_space<vmem>>, %arg4: memref<12x384xf32, #tpu.memory_space<vmem>>, %arg5: memref<2x384xf32, #tpu.memory_space<vmem>>, %arg6: memref<100x384xf32, #tpu.memory_space<vmem>>, %arg7: memref<2x384xf32, #tpu.memory_space<vmem>>, %arg8: memref<11x384xf32, #tpu.memory_space<vmem>>, %arg9: memref<256x384xbf16, #tpu.memory_space<vmem>>, %arg10: memref<384x1152xbf16, #tpu.memory_space<vmem>>, %arg11: memref<1x1152xf32, #tpu.memory_space<vmem>>, %arg12: memref<384x384xbf16, #tpu.memory_space<vmem>>, %arg13: memref<1x1536xf32, #tpu.memory_space<vmem>>, %arg14: memref<384x1536xbf16, #tpu.memory_space<any>>, %arg15: memref<1536x384xbf16, #tpu.memory_space<any>>, %arg16: memref<384x384xbf16, #tpu.memory_space<any>>, %arg17: memref<384x2xf32, #tpu.memory_space<vmem>>, %arg18: memref<1x2xf32, #tpu.memory_space<vmem>>, %arg19: memref<1x2xf32, #tpu.memory_space<vmem>>, %arg20: memref<384x1536xbf16, #tpu.memory_space<vmem>>, %arg21: memref<1536x384xbf16, #tpu.memory_space<vmem>>, %arg22: memref<384x384xbf16, #tpu.memory_space<vmem>>, %arg23: memref<3x!tpu.dma_semaphore, #tpu.memory_space<semaphore_mem>>) attributes {dimension_semantics = [], scalar_prefetch = 0 : i64, scratch_operands = 4 : i64, tpu.core_type = #tpu.core_type<tc>} {
    %c0_i32 = arith.constant 0 : i32
    %0 = tpu.memref_slice %arg23[%c0_i32] : memref<3x!tpu.dma_semaphore, #tpu.memory_space<semaphore_mem>> -> memref<1x!tpu.dma_semaphore, #tpu.memory_space<semaphore_mem>>
    %1 = tpu.memref_squeeze %0 : memref<1x!tpu.dma_semaphore, #tpu.memory_space<semaphore_mem>> -> memref<!tpu.dma_semaphore, #tpu.memory_space<semaphore_mem>>
    tpu.enqueue_dma source(%arg14 : memref<384x1536xbf16, #tpu.memory_space<any>>) target(%arg20 : memref<384x1536xbf16, #tpu.memory_space<vmem>>) target_semaphore(%1 : memref<!tpu.dma_semaphore, #tpu.memory_space<semaphore_mem>>)
    %c1_i32 = arith.constant 1 : i32
    %2 = tpu.memref_slice %arg23[%c1_i32] : memref<3x!tpu.dma_semaphore, #tpu.memory_space<semaphore_mem>> -> memref<1x!tpu.dma_semaphore, #tpu.memory_space<semaphore_mem>>
    %3 = tpu.memref_squeeze %2 : memref<1x!tpu.dma_semaphore, #tpu.memory_space<semaphore_mem>> -> memref<!tpu.dma_semaphore, #tpu.memory_space<semaphore_mem>>
    tpu.enqueue_dma source(%arg15 : memref<1536x384xbf16, #tpu.memory_space<any>>) target(%arg21 : memref<1536x384xbf16, #tpu.memory_space<vmem>>) target_semaphore(%3 : memref<!tpu.dma_semaphore, #tpu.memory_space<semaphore_mem>>)
    %c2_i32 = arith.constant 2 : i32
    %4 = tpu.memref_slice %arg23[%c2_i32] : memref<3x!tpu.dma_semaphore, #tpu.memory_space<semaphore_mem>> -> memref<1x!tpu.dma_semaphore, #tpu.memory_space<semaphore_mem>>
    %5 = tpu.memref_squeeze %4 : memref<1x!tpu.dma_semaphore, #tpu.memory_space<semaphore_mem>> -> memref<!tpu.dma_semaphore, #tpu.memory_space<semaphore_mem>>
    tpu.enqueue_dma source(%arg16 : memref<384x384xbf16, #tpu.memory_space<any>>) target(%arg22 : memref<384x384xbf16, #tpu.memory_space<vmem>>) target_semaphore(%5 : memref<!tpu.dma_semaphore, #tpu.memory_space<semaphore_mem>>)
    %c0 = arith.constant 0 : index
    %c0_0 = arith.constant 0 : index
    %6 = vector.load %arg3[%c0, %c0_0] : memref<8x256xf32, #tpu.memory_space<vmem>>, vector<8x256xf32>
    %7 = arith.truncf %6 : vector<8x256xf32> to vector<8x256xbf16>
    %c0_1 = arith.constant 0 : index
    %c0_2 = arith.constant 0 : index
    %8 = vector.load %arg9[%c0_1, %c0_2] : memref<256x384xbf16, #tpu.memory_space<vmem>>, vector<256x384xbf16>
    %cst = arith.constant dense<0.000000e+00> : vector<8x384xf32>
    %9 = tpu.matmul %7, %8, %cst {dimension_numbers = #tpu.dot_dimension_numbers<[1], [0], [0], [1], [0, 0, 1, 1], [], []>} : vector<8x256xbf16>, vector<256x384xbf16>, vector<8x384xf32> -> vector<8x384xf32>
    %c0_3 = arith.constant 0 : index
    %10 = memref.load %arg0[%c0_3] : memref<1xi32, #tpu.memory_space<smem>>
    %11 = arith.index_cast %10 : i32 to index
    %c0_4 = arith.constant 0 : index
    %12 = vector.load %arg5[%11, %c0_4] : memref<2x384xf32, #tpu.memory_space<vmem>>, vector<1x384xf32>
    %c0_5 = arith.constant 0 : index
    %13 = memref.load %arg1[%c0_5] : memref<1xi32, #tpu.memory_space<smem>>
    %14 = arith.index_cast %13 : i32 to index
    %c0_6 = arith.constant 0 : index
    %15 = vector.load %arg6[%14, %c0_6] : memref<100x384xf32, #tpu.memory_space<vmem>>, vector<1x384xf32>
    %c0_7 = arith.constant 0 : index
    %16 = memref.load %arg2[%c0_7] : memref<1xi32, #tpu.memory_space<smem>>
    %17 = arith.index_cast %16 : i32 to index
    %c0_8 = arith.constant 0 : index
    %18 = vector.load %arg7[%17, %c0_8] : memref<2x384xf32, #tpu.memory_space<vmem>>, vector<1x384xf32>
    %c0_9 = arith.constant 0 : index
    %c0_10 = arith.constant 0 : index
    %19 = vector.load %arg8[%c0_9, %c0_10] : memref<11x384xf32, #tpu.memory_space<vmem>>, vector<1x384xf32>
    %20 = tpu.concatenate %19, %9, %12, %15, %18 in 0 : vector<1x384xf32>, vector<8x384xf32>, vector<1x384xf32>, vector<1x384xf32>, vector<1x384xf32> -> vector<12x384xf32>
    %c0_11 = arith.constant 0 : index
    %c0_12 = arith.constant 0 : index
    %21 = vector.load %arg4[%c0_11, %c0_12] : memref<12x384xf32, #tpu.memory_space<vmem>>, vector<12x384xf32>
    %22 = arith.addf %20, %21 : vector<12x384xf32>
    %c1 = arith.constant 1 : index
    %c0_13 = arith.constant 0 : index
    %23 = vector.load %arg8[%c1, %c0_13] : memref<11x384xf32, #tpu.memory_space<vmem>>, vector<1x384xf32>
    %24 = vector.broadcast %23 : vector<1x384xf32> to vector<12x384xf32>
    %25 = arith.addf %22, %24 : vector<12x384xf32>
    %c2 = arith.constant 2 : index
    %c0_14 = arith.constant 0 : index
    %26 = vector.load %arg8[%c2, %c0_14] : memref<11x384xf32, #tpu.memory_space<vmem>>, vector<1x384xf32>
    %c3 = arith.constant 3 : index
    %c0_15 = arith.constant 0 : index
    %27 = vector.load %arg8[%c3, %c0_15] : memref<11x384xf32, #tpu.memory_space<vmem>>, vector<1x384xf32>
    %cst_16 = arith.constant dense<0.000000e+00> : vector<12xf32>
    %28 = vector.multi_reduction <add>, %25, %cst_16 [1] : vector<12x384xf32> to vector<12xf32>
    %29 = vector.shape_cast %28 : vector<12xf32> to vector<12x1xf32>
    %cst_17 = arith.constant 3.840000e+02 : f32
    %30 = vector.broadcast %cst_17 : f32 to vector<12x1xf32>
    %31 = arith.divf %29, %30 : vector<12x1xf32>
    %32 = vector.broadcast %31 : vector<12x1xf32> to vector<12x384xf32>
    %33 = arith.subf %25, %32 : vector<12x384xf32>
    %34 = arith.mulf %33, %33 : vector<12x384xf32>
    %cst_18 = arith.constant dense<0.000000e+00> : vector<12xf32>
    %35 = vector.multi_reduction <add>, %34, %cst_18 [1] : vector<12x384xf32> to vector<12xf32>
    %36 = vector.shape_cast %35 : vector<12xf32> to vector<12x1xf32>
    %cst_19 = arith.constant 3.840000e+02 : f32
    %37 = vector.broadcast %cst_19 : f32 to vector<12x1xf32>
    %38 = arith.divf %36, %37 : vector<12x1xf32>
    %39 = vector.broadcast %31 : vector<12x1xf32> to vector<12x384xf32>
    %40 = arith.subf %25, %39 : vector<12x384xf32>
    %cst_20 = arith.constant 9.99999996E-13 : f32
    %41 = vector.broadcast %cst_20 : f32 to vector<12x1xf32>
    %42 = arith.addf %38, %41 : vector<12x1xf32>
    %43 = math.rsqrt %42 : vector<12x1xf32>
    %44 = vector.broadcast %43 : vector<12x1xf32> to vector<12x384xf32>
    %45 = arith.mulf %40, %44 : vector<12x384xf32>
    %46 = vector.broadcast %26 : vector<1x384xf32> to vector<12x384xf32>
    %47 = arith.mulf %45, %46 : vector<12x384xf32>
    %48 = vector.broadcast %27 : vector<1x384xf32> to vector<12x384xf32>
    %49 = arith.addf %47, %48 : vector<12x384xf32>
    %50 = arith.truncf %49 : vector<12x384xf32> to vector<12x384xbf16>
    %c0_21 = arith.constant 0 : index
    %c0_22 = arith.constant 0 : index
    %51 = vector.load %arg10[%c0_21, %c0_22] : memref<384x1152xbf16, #tpu.memory_space<vmem>>, vector<384x1152xbf16>
    %cst_23 = arith.constant dense<0.000000e+00> : vector<12x1152xf32>
    %52 = tpu.matmul %50, %51, %cst_23 {dimension_numbers = #tpu.dot_dimension_numbers<[1], [0], [0], [1], [0, 0, 1, 1], [], []>} : vector<12x384xbf16>, vector<384x1152xbf16>, vector<12x1152xf32> -> vector<12x1152xf32>
    %c0_24 = arith.constant 0 : index
    %c0_25 = arith.constant 0 : index
    %53 = vector.load %arg11[%c0_24, %c0_25] : memref<1x1152xf32, #tpu.memory_space<vmem>>, vector<1x1152xf32>
    %54 = vector.broadcast %53 : vector<1x1152xf32> to vector<12x1152xf32>
    %55 = arith.addf %52, %54 : vector<12x1152xf32>
    %56 = vector.extract_strided_slice %55 {offsets = [0, 0], sizes = [12, 384], strides = [1, 1]} : vector<12x1152xf32> to vector<12x384xf32>
    %cst_26 = arith.constant 1.250000e-01 : f32
    %57 = vector.broadcast %cst_26 : f32 to vector<12x384xf32>
    %58 = arith.mulf %56, %57 : vector<12x384xf32>
    %59 = vector.extract_strided_slice %55 {offsets = [0, 384], sizes = [12, 384], strides = [1, 1]} : vector<12x1152xf32> to vector<12x384xf32>
    %60 = vector.extract_strided_slice %55 {offsets = [0, 768], sizes = [12, 384], strides = [1, 1]} : vector<12x1152xf32> to vector<12x384xf32>
    %61 = vector.extract_strided_slice %58 {offsets = [0, 0], sizes = [12, 64], strides = [1, 1]} : vector<12x384xf32> to vector<12x64xf32>
    %62 = vector.extract_strided_slice %58 {offsets = [0, 64], sizes = [12, 64], strides = [1, 1]} : vector<12x384xf32> to vector<12x64xf32>
    %63 = vector.extract_strided_slice %58 {offsets = [0, 128], sizes = [12, 64], strides = [1, 1]} : vector<12x384xf32> to vector<12x64xf32>
    %64 = vector.extract_strided_slice %58 {offsets = [0, 192], sizes = [12, 64], strides = [1, 1]} : vector<12x384xf32> to vector<12x64xf32>
    %65 = vector.extract_strided_slice %58 {offsets = [0, 256], sizes = [12, 64], strides = [1, 1]} : vector<12x384xf32> to vector<12x64xf32>
    %66 = vector.extract_strided_slice %58 {offsets = [0, 320], sizes = [12, 64], strides = [1, 1]} : vector<12x384xf32> to vector<12x64xf32>
    %67 = vector.shape_cast %61 : vector<12x64xf32> to vector<1x12x64xf32>
    %68 = vector.shape_cast %62 : vector<12x64xf32> to vector<1x12x64xf32>
    %69 = vector.shape_cast %63 : vector<12x64xf32> to vector<1x12x64xf32>
    %70 = vector.shape_cast %64 : vector<12x64xf32> to vector<1x12x64xf32>
    %71 = vector.shape_cast %65 : vector<12x64xf32> to vector<1x12x64xf32>
    %72 = vector.shape_cast %66 : vector<12x64xf32> to vector<1x12x64xf32>
    %73 = tpu.concatenate %67, %68, %69, %70, %71, %72 in 0 : vector<1x12x64xf32>, vector<1x12x64xf32>, vector<1x12x64xf32>, vector<1x12x64xf32>, vector<1x12x64xf32>, vector<1x12x64xf32> -> vector<6x12x64xf32>
    %74 = vector.extract_strided_slice %59 {offsets = [0, 0], sizes = [12, 64], strides = [1, 1]} : vector<12x384xf32> to vector<12x64xf32>
    %75 = vector.extract_strided_slice %59 {offsets = [0, 64], sizes = [12, 64], strides = [1, 1]} : vector<12x384xf32> to vector<12x64xf32>
    %76 = vector.extract_strided_slice %59 {offsets = [0, 128], sizes = [12, 64], strides = [1, 1]} : vector<12x384xf32> to vector<12x64xf32>
    %77 = vector.extract_strided_slice %59 {offsets = [0, 192], sizes = [12, 64], strides = [1, 1]} : vector<12x384xf32> to vector<12x64xf32>
    %78 = vector.extract_strided_slice %59 {offsets = [0, 256], sizes = [12, 64], strides = [1, 1]} : vector<12x384xf32> to vector<12x64xf32>
    %79 = vector.extract_strided_slice %59 {offsets = [0, 320], sizes = [12, 64], strides = [1, 1]} : vector<12x384xf32> to vector<12x64xf32>
    %80 = vector.shape_cast %74 : vector<12x64xf32> to vector<1x12x64xf32>
    %81 = vector.shape_cast %75 : vector<12x64xf32> to vector<1x12x64xf32>
    %82 = vector.shape_cast %76 : vector<12x64xf32> to vector<1x12x64xf32>
    %83 = vector.shape_cast %77 : vector<12x64xf32> to vector<1x12x64xf32>
    %84 = vector.shape_cast %78 : vector<12x64xf32> to vector<1x12x64xf32>
    %85 = vector.shape_cast %79 : vector<12x64xf32> to vector<1x12x64xf32>
    %86 = tpu.concatenate %80, %81, %82, %83, %84, %85 in 0 : vector<1x12x64xf32>, vector<1x12x64xf32>, vector<1x12x64xf32>, vector<1x12x64xf32>, vector<1x12x64xf32>, vector<1x12x64xf32> -> vector<6x12x64xf32>
    %87 = vector.extract_strided_slice %60 {offsets = [0, 0], sizes = [12, 64], strides = [1, 1]} : vector<12x384xf32> to vector<12x64xf32>
    %88 = vector.extract_strided_slice %60 {offsets = [0, 64], sizes = [12, 64], strides = [1, 1]} : vector<12x384xf32> to vector<12x64xf32>
    %89 = vector.extract_strided_slice %60 {offsets = [0, 128], sizes = [12, 64], strides = [1, 1]} : vector<12x384xf32> to vector<12x64xf32>
    %90 = vector.extract_strided_slice %60 {offsets = [0, 192], sizes = [12, 64], strides = [1, 1]} : vector<12x384xf32> to vector<12x64xf32>
    %91 = vector.extract_strided_slice %60 {offsets = [0, 256], sizes = [12, 64], strides = [1, 1]} : vector<12x384xf32> to vector<12x64xf32>
    %92 = vector.extract_strided_slice %60 {offsets = [0, 320], sizes = [12, 64], strides = [1, 1]} : vector<12x384xf32> to vector<12x64xf32>
    %93 = vector.shape_cast %87 : vector<12x64xf32> to vector<1x12x64xf32>
    %94 = vector.shape_cast %88 : vector<12x64xf32> to vector<1x12x64xf32>
    %95 = vector.shape_cast %89 : vector<12x64xf32> to vector<1x12x64xf32>
    %96 = vector.shape_cast %90 : vector<12x64xf32> to vector<1x12x64xf32>
    %97 = vector.shape_cast %91 : vector<12x64xf32> to vector<1x12x64xf32>
    %98 = vector.shape_cast %92 : vector<12x64xf32> to vector<1x12x64xf32>
    %99 = tpu.concatenate %93, %94, %95, %96, %97, %98 in 0 : vector<1x12x64xf32>, vector<1x12x64xf32>, vector<1x12x64xf32>, vector<1x12x64xf32>, vector<1x12x64xf32>, vector<1x12x64xf32> -> vector<6x12x64xf32>
    "tpu.trace_start"() <{level = 10 : i32, message = "nqd,nkd->nqk"}> : () -> ()
    %cst_27 = arith.constant dense<0.000000e+00> : vector<6x12x12xf32>
    %100 = tpu.matmul %73, %86, %cst_27 {dimension_numbers = #tpu.dot_dimension_numbers<[2], [2], [1], [1], [0, 0, 0, 1, 1, 1], [0], [0]>} : vector<6x12x64xf32>, vector<6x12x64xf32>, vector<6x12x12xf32> -> vector<6x12x12xf32>
    "tpu.trace_stop"() : () -> ()
    %cst_28 = arith.constant dense<0xFF800000> : vector<6x12xf32>
    %101 = vector.multi_reduction <maximumf>, %100, %cst_28 [2] : vector<6x12x12xf32> to vector<6x12xf32>
    %102 = vector.shape_cast %101 : vector<6x12xf32> to vector<6x12x1xf32>
    %103 = vector.broadcast %102 : vector<6x12x1xf32> to vector<6x12x12xf32>
    %104 = arith.subf %100, %103 : vector<6x12x12xf32>
    %105 = math.exp %104 : vector<6x12x12xf32>
    %cst_29 = arith.constant dense<0.000000e+00> : vector<6x12xf32>
    %106 = vector.multi_reduction <add>, %105, %cst_29 [2] : vector<6x12x12xf32> to vector<6x12xf32>
    %107 = vector.shape_cast %106 : vector<6x12xf32> to vector<6x12x1xf32>
    %108 = tpu.reciprocal %107 {approx = true} : vector<6x12x1xf32> -> vector<6x12x1xf32>
    %109 = vector.broadcast %108 : vector<6x12x1xf32> to vector<6x12x12xf32>
    %110 = arith.mulf %105, %109 : vector<6x12x12xf32>
    "tpu.trace_start"() <{level = 10 : i32, message = "nqk,nkd->nqd"}> : () -> ()
    %cst_30 = arith.constant dense<0.000000e+00> : vector<6x12x64xf32>
    %111 = tpu.matmul %110, %99, %cst_30 {dimension_numbers = #tpu.dot_dimension_numbers<[2], [1], [1], [2], [0, 0, 0, 1, 1, 2], [0], [0]>} : vector<6x12x12xf32>, vector<6x12x64xf32>, vector<6x12x64xf32> -> vector<6x12x64xf32>
    "tpu.trace_stop"() : () -> ()
    %112 = vector.extract_strided_slice %111 {offsets = [0, 0, 0], sizes = [1, 12, 64], strides = [1, 1, 1]} : vector<6x12x64xf32> to vector<1x12x64xf32>
    %113 = vector.shape_cast %112 : vector<1x12x64xf32> to vector<12x64xf32>
    %114 = vector.extract_strided_slice %111 {offsets = [1, 0, 0], sizes = [1, 12, 64], strides = [1, 1, 1]} : vector<6x12x64xf32> to vector<1x12x64xf32>
    %115 = vector.shape_cast %114 : vector<1x12x64xf32> to vector<12x64xf32>
    %116 = vector.extract_strided_slice %111 {offsets = [2, 0, 0], sizes = [1, 12, 64], strides = [1, 1, 1]} : vector<6x12x64xf32> to vector<1x12x64xf32>
    %117 = vector.shape_cast %116 : vector<1x12x64xf32> to vector<12x64xf32>
    %118 = vector.extract_strided_slice %111 {offsets = [3, 0, 0], sizes = [1, 12, 64], strides = [1, 1, 1]} : vector<6x12x64xf32> to vector<1x12x64xf32>
    %119 = vector.shape_cast %118 : vector<1x12x64xf32> to vector<12x64xf32>
    %120 = vector.extract_strided_slice %111 {offsets = [4, 0, 0], sizes = [1, 12, 64], strides = [1, 1, 1]} : vector<6x12x64xf32> to vector<1x12x64xf32>
    %121 = vector.shape_cast %120 : vector<1x12x64xf32> to vector<12x64xf32>
    %122 = vector.extract_strided_slice %111 {offsets = [5, 0, 0], sizes = [1, 12, 64], strides = [1, 1, 1]} : vector<6x12x64xf32> to vector<1x12x64xf32>
    %123 = vector.shape_cast %122 : vector<1x12x64xf32> to vector<12x64xf32>
    %124 = tpu.concatenate %113, %115, %117, %119, %121, %123 in 1 : vector<12x64xf32>, vector<12x64xf32>, vector<12x64xf32>, vector<12x64xf32>, vector<12x64xf32>, vector<12x64xf32> -> vector<12x384xf32>
    %125 = arith.truncf %124 : vector<12x384xf32> to vector<12x384xbf16>
    %c0_31 = arith.constant 0 : index
    %c0_32 = arith.constant 0 : index
    %126 = vector.load %arg12[%c0_31, %c0_32] : memref<384x384xbf16, #tpu.memory_space<vmem>>, vector<384x384xbf16>
    %cst_33 = arith.constant dense<0.000000e+00> : vector<12x384xf32>
    %127 = tpu.matmul %125, %126, %cst_33 {dimension_numbers = #tpu.dot_dimension_numbers<[1], [0], [0], [1], [0, 0, 1, 1], [], []>} : vector<12x384xbf16>, vector<384x384xbf16>, vector<12x384xf32> -> vector<12x384xf32>
    %c4 = arith.constant 4 : index
    %c0_34 = arith.constant 0 : index
    %128 = vector.load %arg8[%c4, %c0_34] : memref<11x384xf32, #tpu.memory_space<vmem>>, vector<1x384xf32>
    %129 = vector.broadcast %128 : vector<1x384xf32> to vector<12x384xf32>
    %130 = arith.addf %127, %129 : vector<12x384xf32>
    %131 = arith.addf %130, %49 : vector<12x384xf32>
    %c5 = arith.constant 5 : index
    %c0_35 = arith.constant 0 : index
    %132 = vector.load %arg8[%c5, %c0_35] : memref<11x384xf32, #tpu.memory_space<vmem>>, vector<1x384xf32>
    %c6 = arith.constant 6 : index
    %c0_36 = arith.constant 0 : index
    %133 = vector.load %arg8[%c6, %c0_36] : memref<11x384xf32, #tpu.memory_space<vmem>>, vector<1x384xf32>
    %cst_37 = arith.constant dense<0.000000e+00> : vector<12xf32>
    %134 = vector.multi_reduction <add>, %131, %cst_37 [1] : vector<12x384xf32> to vector<12xf32>
    %135 = vector.shape_cast %134 : vector<12xf32> to vector<12x1xf32>
    %cst_38 = arith.constant 3.840000e+02 : f32
    %136 = vector.broadcast %cst_38 : f32 to vector<12x1xf32>
    %137 = arith.divf %135, %136 : vector<12x1xf32>
    %138 = vector.broadcast %137 : vector<12x1xf32> to vector<12x384xf32>
    %139 = arith.subf %131, %138 : vector<12x384xf32>
    %140 = arith.mulf %139, %139 : vector<12x384xf32>
    %cst_39 = arith.constant dense<0.000000e+00> : vector<12xf32>
    %141 = vector.multi_reduction <add>, %140, %cst_39 [1] : vector<12x384xf32> to vector<12xf32>
    %142 = vector.shape_cast %141 : vector<12xf32> to vector<12x1xf32>
    %cst_40 = arith.constant 3.840000e+02 : f32
    %143 = vector.broadcast %cst_40 : f32 to vector<12x1xf32>
    %144 = arith.divf %142, %143 : vector<12x1xf32>
    %145 = vector.broadcast %137 : vector<12x1xf32> to vector<12x384xf32>
    %146 = arith.subf %131, %145 : vector<12x384xf32>
    %cst_41 = arith.constant 9.99999996E-13 : f32
    %147 = vector.broadcast %cst_41 : f32 to vector<12x1xf32>
    %148 = arith.addf %144, %147 : vector<12x1xf32>
    %149 = math.rsqrt %148 : vector<12x1xf32>
    %150 = vector.broadcast %149 : vector<12x1xf32> to vector<12x384xf32>
    %151 = arith.mulf %146, %150 : vector<12x384xf32>
    %152 = vector.broadcast %132 : vector<1x384xf32> to vector<12x384xf32>
    %153 = arith.mulf %151, %152 : vector<12x384xf32>
    %154 = vector.broadcast %133 : vector<1x384xf32> to vector<12x384xf32>
    %155 = arith.addf %153, %154 : vector<12x384xf32>
    %c0_i32_42 = arith.constant 0 : i32
    %156 = tpu.memref_slice %arg23[%c0_i32_42] : memref<3x!tpu.dma_semaphore, #tpu.memory_space<semaphore_mem>> -> memref<1x!tpu.dma_semaphore, #tpu.memory_space<semaphore_mem>>
    %157 = tpu.memref_squeeze %156 : memref<1x!tpu.dma_semaphore, #tpu.memory_space<semaphore_mem>> -> memref<!tpu.dma_semaphore, #tpu.memory_space<semaphore_mem>>
    tpu.wait_dma2 semaphore(%157 : memref<!tpu.dma_semaphore, #tpu.memory_space<semaphore_mem>>) src(%arg14 : memref<384x1536xbf16, #tpu.memory_space<any>>) dst(%arg20 : memref<384x1536xbf16, #tpu.memory_space<vmem>>)
    %158 = arith.truncf %155 : vector<12x384xf32> to vector<12x384xbf16>
    %c0_43 = arith.constant 0 : index
    %c0_44 = arith.constant 0 : index
    %159 = vector.load %arg20[%c0_43, %c0_44] : memref<384x1536xbf16, #tpu.memory_space<vmem>>, vector<384x1536xbf16>
    %cst_45 = arith.constant dense<0.000000e+00> : vector<12x1536xf32>
    %160 = tpu.matmul %158, %159, %cst_45 {dimension_numbers = #tpu.dot_dimension_numbers<[1], [0], [0], [1], [0, 0, 1, 1], [], []>} : vector<12x384xbf16>, vector<384x1536xbf16>, vector<12x1536xf32> -> vector<12x1536xf32>
    %c0_46 = arith.constant 0 : index
    %c0_47 = arith.constant 0 : index
    %161 = vector.load %arg13[%c0_46, %c0_47] : memref<1x1536xf32, #tpu.memory_space<vmem>>, vector<1x1536xf32>
    %162 = vector.broadcast %161 : vector<1x1536xf32> to vector<12x1536xf32>
    %163 = arith.addf %160, %162 : vector<12x1536xf32>
    %164 = arith.mulf %163, %163 : vector<12x1536xf32>
    %165 = arith.mulf %163, %164 : vector<12x1536xf32>
    %cst_48 = arith.constant 4.471500e-02 : f32
    %166 = vector.broadcast %cst_48 : f32 to vector<12x1536xf32>
    %167 = arith.mulf %166, %165 : vector<12x1536xf32>
    %168 = arith.addf %163, %167 : vector<12x1536xf32>
    %cst_49 = arith.constant 0.797884583 : f32
    %169 = vector.broadcast %cst_49 : f32 to vector<12x1536xf32>
    %170 = arith.mulf %169, %168 : vector<12x1536xf32>
    %171 = math.tanh %170 : vector<12x1536xf32>
    %cst_50 = arith.constant 1.000000e+00 : f32
    %172 = vector.broadcast %cst_50 : f32 to vector<12x1536xf32>
    %173 = arith.addf %172, %171 : vector<12x1536xf32>
    %cst_51 = arith.constant 5.000000e-01 : f32
    %174 = vector.broadcast %cst_51 : f32 to vector<12x1536xf32>
    %175 = arith.mulf %174, %173 : vector<12x1536xf32>
    %176 = arith.mulf %163, %175 : vector<12x1536xf32>
    %c1_i32_52 = arith.constant 1 : i32
    %177 = tpu.memref_slice %arg23[%c1_i32_52] : memref<3x!tpu.dma_semaphore, #tpu.memory_space<semaphore_mem>> -> memref<1x!tpu.dma_semaphore, #tpu.memory_space<semaphore_mem>>
    %178 = tpu.memref_squeeze %177 : memref<1x!tpu.dma_semaphore, #tpu.memory_space<semaphore_mem>> -> memref<!tpu.dma_semaphore, #tpu.memory_space<semaphore_mem>>
    tpu.wait_dma2 semaphore(%178 : memref<!tpu.dma_semaphore, #tpu.memory_space<semaphore_mem>>) src(%arg15 : memref<1536x384xbf16, #tpu.memory_space<any>>) dst(%arg21 : memref<1536x384xbf16, #tpu.memory_space<vmem>>)
    %179 = arith.truncf %176 : vector<12x1536xf32> to vector<12x1536xbf16>
    %c0_53 = arith.constant 0 : index
    %c0_54 = arith.constant 0 : index
    %180 = vector.load %arg21[%c0_53, %c0_54] : memref<1536x384xbf16, #tpu.memory_space<vmem>>, vector<1536x384xbf16>
    %cst_55 = arith.constant dense<0.000000e+00> : vector<12x384xf32>
    %181 = tpu.matmul %179, %180, %cst_55 {dimension_numbers = #tpu.dot_dimension_numbers<[1], [0], [0], [1], [0, 0, 1, 1], [], []>} : vector<12x1536xbf16>, vector<1536x384xbf16>, vector<12x384xf32> -> vector<12x384xf32>
    %c7 = arith.constant 7 : index
    %c0_56 = arith.constant 0 : index
    %182 = vector.load %arg8[%c7, %c0_56] : memref<11x384xf32, #tpu.memory_space<vmem>>, vector<1x384xf32>
    %183 = vector.broadcast %182 : vector<1x384xf32> to vector<12x384xf32>
    %184 = arith.addf %181, %183 : vector<12x384xf32>
    %185 = arith.addf %184, %155 : vector<12x384xf32>
    %c8 = arith.constant 8 : index
    %c0_57 = arith.constant 0 : index
    %186 = vector.load %arg8[%c8, %c0_57] : memref<11x384xf32, #tpu.memory_space<vmem>>, vector<1x384xf32>
    %c9 = arith.constant 9 : index
    %c0_58 = arith.constant 0 : index
    %187 = vector.load %arg8[%c9, %c0_58] : memref<11x384xf32, #tpu.memory_space<vmem>>, vector<1x384xf32>
    %cst_59 = arith.constant dense<0.000000e+00> : vector<12xf32>
    %188 = vector.multi_reduction <add>, %185, %cst_59 [1] : vector<12x384xf32> to vector<12xf32>
    %189 = vector.shape_cast %188 : vector<12xf32> to vector<12x1xf32>
    %cst_60 = arith.constant 3.840000e+02 : f32
    %190 = vector.broadcast %cst_60 : f32 to vector<12x1xf32>
    %191 = arith.divf %189, %190 : vector<12x1xf32>
    %192 = vector.broadcast %191 : vector<12x1xf32> to vector<12x384xf32>
    %193 = arith.subf %185, %192 : vector<12x384xf32>
    %194 = arith.mulf %193, %193 : vector<12x384xf32>
    %cst_61 = arith.constant dense<0.000000e+00> : vector<12xf32>
    %195 = vector.multi_reduction <add>, %194, %cst_61 [1] : vector<12x384xf32> to vector<12xf32>
    %196 = vector.shape_cast %195 : vector<12xf32> to vector<12x1xf32>
    %cst_62 = arith.constant 3.840000e+02 : f32
    %197 = vector.broadcast %cst_62 : f32 to vector<12x1xf32>
    %198 = arith.divf %196, %197 : vector<12x1xf32>
    %199 = vector.broadcast %191 : vector<12x1xf32> to vector<12x384xf32>
    %200 = arith.subf %185, %199 : vector<12x384xf32>
    %cst_63 = arith.constant 9.99999996E-13 : f32
    %201 = vector.broadcast %cst_63 : f32 to vector<12x1xf32>
    %202 = arith.addf %198, %201 : vector<12x1xf32>
    %203 = math.rsqrt %202 : vector<12x1xf32>
    %204 = vector.broadcast %203 : vector<12x1xf32> to vector<12x384xf32>
    %205 = arith.mulf %200, %204 : vector<12x384xf32>
    %206 = vector.broadcast %186 : vector<1x384xf32> to vector<12x384xf32>
    %207 = arith.mulf %205, %206 : vector<12x384xf32>
    %208 = vector.broadcast %187 : vector<1x384xf32> to vector<12x384xf32>
    %209 = arith.addf %207, %208 : vector<12x384xf32>
    %c2_i32_64 = arith.constant 2 : i32
    %210 = tpu.memref_slice %arg23[%c2_i32_64] : memref<3x!tpu.dma_semaphore, #tpu.memory_space<semaphore_mem>> -> memref<1x!tpu.dma_semaphore, #tpu.memory_space<semaphore_mem>>
    %211 = tpu.memref_squeeze %210 : memref<1x!tpu.dma_semaphore, #tpu.memory_space<semaphore_mem>> -> memref<!tpu.dma_semaphore, #tpu.memory_space<semaphore_mem>>
    tpu.wait_dma2 semaphore(%211 : memref<!tpu.dma_semaphore, #tpu.memory_space<semaphore_mem>>) src(%arg16 : memref<384x384xbf16, #tpu.memory_space<any>>) dst(%arg22 : memref<384x384xbf16, #tpu.memory_space<vmem>>)
    %212 = vector.extract_strided_slice %209 {offsets = [0, 0], sizes = [1, 384], strides = [1, 1]} : vector<12x384xf32> to vector<1x384xf32>
    %213 = arith.truncf %212 : vector<1x384xf32> to vector<1x384xbf16>
    %c0_65 = arith.constant 0 : index
    %c0_66 = arith.constant 0 : index
    %214 = vector.load %arg22[%c0_65, %c0_66] : memref<384x384xbf16, #tpu.memory_space<vmem>>, vector<384x384xbf16>
    %cst_67 = arith.constant dense<0.000000e+00> : vector<1x384xf32>
    %215 = tpu.matmul %213, %214, %cst_67 {dimension_numbers = #tpu.dot_dimension_numbers<[1], [0], [0], [1], [0, 0, 1, 1], [], []>} : vector<1x384xbf16>, vector<384x384xbf16>, vector<1x384xf32> -> vector<1x384xf32>
    %c10 = arith.constant 10 : index
    %c0_68 = arith.constant 0 : index
    %216 = vector.load %arg8[%c10, %c0_68] : memref<11x384xf32, #tpu.memory_space<vmem>>, vector<1x384xf32>
    %217 = arith.addf %215, %216 : vector<1x384xf32>
    %218 = math.tanh %217 : vector<1x384xf32>
    %c0_69 = arith.constant 0 : index
    %c0_70 = arith.constant 0 : index
    %219 = vector.load %arg17[%c0_69, %c0_70] : memref<384x2xf32, #tpu.memory_space<vmem>>, vector<384x2xf32>
    %cst_71 = arith.constant dense<0.000000e+00> : vector<1x2xf32>
    %220 = tpu.matmul %218, %219, %cst_71 {dimension_numbers = #tpu.dot_dimension_numbers<[1], [0], [0], [1], [0, 0, 1, 1], [], []>} : vector<1x384xf32>, vector<384x2xf32>, vector<1x2xf32> -> vector<1x2xf32>
    %c0_72 = arith.constant 0 : index
    %c0_73 = arith.constant 0 : index
    %221 = vector.load %arg18[%c0_72, %c0_73] : memref<1x2xf32, #tpu.memory_space<vmem>>, vector<1x2xf32>
    %222 = arith.addf %220, %221 : vector<1x2xf32>
    %c0_74 = arith.constant 0 : index
    %c0_75 = arith.constant 0 : index
    %223 = vector.load %arg19[%c0_74, %c0_75] : memref<1x2xf32, #tpu.memory_space<vmem>>, vector<1x2xf32>
    tpu.vector_store %arg19[%c0_74, %c0_75], %222 {strides = array<i32>} : memref<1x2xf32, #tpu.memory_space<vmem>>, vector<1x2xf32>,
    return
  }
}

</mosaic_0001>

<bundles_post_ra>
// kernel: wit_forward.1
= control target key start
LH: loop header
LB: loop body
LE: loop exit
PB: predicated region body
PF: predicated region fallthrough
CT: control target
= control target key end

     0   :  { %s10726_s0 = inlined_call_operand.<no memory space> [shape: s32[1], index: 0, kind: input, shape index: {}]   ;;  %s10727_s1 = inlined_call_operand.<no memory space> [shape: s32[1], index: 1, kind: input, shape index: {}]   ;;  %s10728_s2 = inlined_call_operand.<no memory space> [shape: s32[1], index: 2, kind: input, shape index: {}]   ;;  %s10729_s3 = inlined_call_operand.hbm [shape: f32[8,256], index: 3, kind: input, shape index: {}]   ;;  %s10730_s4 = inlined_call_operand.vmem [shape: f32[12,384], index: 4, kind: input, shape index: {}]   ;;  %s10731_s5 = inlined_call_operand.hbm [shape: f32[2,384], index: 5, kind: input, shape index: {}]   ;;  %s10732_s6 = inlined_call_operand.hbm [shape: f32[100,384], index: 6, kind: input, shape index: {}]   ;;  %s10733_s7 = inlined_call_operand.hbm [shape: f32[2,384], index: 7, kind: input, shape index: {}]   ;;  %s10734_s8 = inlined_call_operand.hbm [shape: f32[11,384], index: 8, kind: input, shape index: {}]   ;;  %s10735_s9 = inlined_call_operand.hbm [shape: bf16[256,384], index: 9, kind: input, shape index: {}]   ;;  %s10736_s10 = inlined_call_operand.hbm [shape: bf16[384,1152], index: 10, kind: input, shape index: {}]   ;;  %s10737_s11 = inlined_call_operand.hbm [shape: f32[1,1152], index: 11, kind: input, shape index: {}]   ;;  %s10738_s12 = inlined_call_operand.hbm [shape: bf16[384,384], index: 12, kind: input, shape index: {}]   ;;  %s10739_s13 = inlined_call_operand.hbm [shape: f32[1,1536], index: 13, kind: input, shape index: {}]   ;;  %s10740_s14 = inlined_call_operand.hbm [shape: bf16[384,1536], index: 14, kind: input, shape index: {}]   ;;  %s10741_s15 = inlined_call_operand.hbm [shape: bf16[1536,384], index: 15, kind: input, shape index: {}]   ;;  %s10742_s16 = inlined_call_operand.hbm [shape: bf16[384,384], index: 16, kind: input, shape index: {}]   ;;  %s10743_s17 = inlined_call_operand.vmem [shape: f32[384,2], index: 17, kind: input, shape index: {}]   ;;  %s10744_s18 = inlined_call_operand.hbm [shape: f32[1,2], index: 18, kind: input, shape index: {}]   ;;  %s10745_s19 = inlined_call_operand.hbm [shape: f32[1,2], index: 19, kind: output, shape index: {}]  }
   0x1   :  { %10750 = sst [smem:[#allocation44_spill]] %s10726_s0 }
   0x2   :  { %10751 = sst [smem:[#allocation45_spill]] %s10727_s1 }
   0x3   :  { %10752 = sst [smem:[#allocation46_spill]] %s10728_s2 }
   0x4   :  { %10753 = sst [smem:[#allocation47_spill]] %s10729_s3 }
   0x5   :  { %27 = vsyncpa [#allocation10], 0 }
   0x6   :  { %28 = vsyncpa [#allocation13], 0 }
   0x7   :  { %29 = vsyncpa [#allocation16], 0 }
   0x8   :  { %30 = vsyncpa [#allocation19], 0 }
   0x9   :  { %31 = vsyncpa [#allocation22], 0 }
   0xa   :  { %32 = vsyncpa [#allocation25], 0 }
   0xb   :  { %33 = vsyncpa [#allocation11], 0  ;;  %s9335_s0 = smov [#allocation12]   ;;  %s9336_s20 = smov [#allocation15]  }
   0xc   :  { %s58_s30 = sshll.u32 %s9335_s0, 4  ;;  %s80_s21 = sshll.u32 %s9336_s20, 4  ;;  %s59_s30 = int_to_ptr.vmem [resolvable:$true] %s58_s30  ;;  %s81_s21 = int_to_ptr.vmem [resolvable:$true] %s80_s21 }
   0xd   :  { %s9051_s2 = scalar_lea.hbm %s10731_s5, 96 }
   0xe   :  { %p9052_p0 = scmp.ne.s32.totalorder %s10731_s5, %s9051_s2  ;;  %p9055_p1 = scmp.lt.u32.totalorder %s9051_s2, %s10731_s5 }
  0x10   :  { %p9057_p2 = pnand %p9055_p1, %p9052_p0 }
  0x12   :  { %9060 = shalt.err (!%p9057_p2)
}
  0x13   :  { %s9061_s26 = scalar_lea.vmem %s59_s30, 96  ;;  %p9066_p4 = scmp.lt.s32.totalorder %s59_s30, %s59_s30 }
  0x14   :  { %p9062_p3 = scmp.ne.s32.totalorder %s59_s30, %s9061_s26  ;;  %p9067_p5 = scmp.lt.s32.totalorder %s9061_s26, %s9061_s26 }
  0x16   :  { %p9068_p6 = por %p9067_p5, %p9066_p4 }
  0x18   :  { %p9069_p7 = pnand %p9068_p6, %p9062_p3 }
  0x1a   :  { %9072 = shalt.err (!%p9069_p7)
}
  0x1b   :  { %61 = dma.hbm_to_vmem [thread:$0]  %s10731_s5, 96, %s59_s30, [#allocation13]  }
  0x1c   :  { %s9073_s20 = scalar_lea.hbm %s10733_s7, 96 }
  0x1d   :  { %p9074_p8 = scmp.ne.s32.totalorder %s10733_s7, %s9073_s20  ;;  %p9077_p9 = scmp.lt.u32.totalorder %s9073_s20, %s10733_s7 }
  0x1f   :  { %p9079_p10 = pnand %p9077_p9, %p9074_p8 }
  0x21   :  { %9082 = shalt.err (!%p9079_p10)
}
  0x22   :  { %s9083_s24 = scalar_lea.vmem %s81_s21, 96  ;;  %p9088_p12 = scmp.lt.s32.totalorder %s81_s21, %s81_s21 }
  0x23   :  { %p9084_p11 = scmp.ne.s32.totalorder %s81_s21, %s9083_s24  ;;  %p9089_p13 = scmp.lt.s32.totalorder %s9083_s24, %s9083_s24 }
  0x25   :  { %p9090_p0 = por %p9089_p13, %p9088_p12 }
  0x27   :  { %p9091_p1 = pnand %p9090_p0, %p9084_p11 }
  0x29   :  { %9094 = shalt.err (!%p9091_p1)
}
  0x2a   :  { %83 = dma.hbm_to_vmem [thread:$0]  %s10733_s7, 96, %s81_s21, [#allocation16]  }
  0x2b   :  { %s9337_s25 = smov [#allocation18]   ;;  %s9095_s28 = scalar_lea.hbm %s10735_s9, 6144 }
  0x2c   :  { %s101_s3 = sshll.u32 %s9337_s25, 4  ;;  %p9096_p2 = scmp.ne.s32.totalorder %s10735_s9, %s9095_s28  ;;  %s102_s3 = int_to_ptr.vmem [resolvable:$true] %s101_s3 }
  0x2d   :  { %p9099_p3 = scmp.lt.u32.totalorder %s9095_s28, %s10735_s9 }
  0x2f   :  { %p9101_p4 = pnand %p9099_p3, %p9096_p2 }
  0x31   :  { %9104 = shalt.err (!%p9101_p4)
}
  0x32   :  { %s9105_s22 = scalar_lea.vmem %s102_s3, 6144  ;;  %p9110_p6 = scmp.lt.s32.totalorder %s102_s3, %s102_s3 }
  0x33   :  { %p9106_p5 = scmp.ne.s32.totalorder %s102_s3, %s9105_s22  ;;  %p9111_p7 = scmp.lt.s32.totalorder %s9105_s22, %s9105_s22 }
  0x35   :  { %p9112_p8 = por %p9111_p7, %p9110_p6 }
  0x37   :  { %p9113_p9 = pnand %p9112_p8, %p9106_p5 }
  0x39   :  { %9116 = shalt.err (!%p9113_p9)
}
  0x3a   :  { %s9338_s7 = smov 192   ;;  %s9339_s21 = smov 12  }
  0x3b   :  { %107 = dma.hbm_to_vmem [thread:$0]  %s10735_s9, 6144, %s102_s3, [#allocation19], %s9338_s7, %s9338_s7, %s9339_s21  }
  0x3c   :  { %s9340_s24 = smov [#allocation21]   ;;  %s9341_s30 = smov [#allocation24]  }
  0x3d   :  { %s126_s5 = sshll.u32 %s9340_s24, 4  ;;  %s148_s25 = sshll.u32 %s9341_s30, 4  ;;  %s127_s5 = int_to_ptr.vmem [resolvable:$true] %s126_s5  ;;  %s149_s25 = int_to_ptr.vmem [resolvable:$true] %s148_s25 }
  0x3e   :  { %s9117_s28 = scalar_lea.hbm %s10737_s11, 144 }
  0x3f   :  { %p9118_p10 = scmp.ne.s32.totalorder %s10737_s11, %s9117_s28  ;;  %p9121_p11 = scmp.lt.u32.totalorder %s9117_s28, %s10737_s11 }
  0x41   :  { %p9123_p12 = pnand %p9121_p11, %p9118_p10 }
  0x43   :  { %9126 = shalt.err (!%p9123_p12)
}
  0x44   :  { %s9127_s9 = scalar_lea.vmem %s127_s5, 144  ;;  %s9131_s3 = scalar_lea.vmem %s127_s5, 160 }
  0x45   :  { %p9128_p13 = scmp.ne.s32.totalorder %s127_s5, %s9127_s9  ;;  %p9132_p0 = scmp.lt.s32.totalorder %s127_s5, %s127_s5 }
  0x46   :  { %p9133_p1 = scmp.lt.s32.totalorder %s9131_s3, %s9127_s9 }
  0x48   :  { %p9134_p2 = por %p9133_p1, %p9132_p0 }
  0x4a   :  { %p9135_p3 = pnand %p9134_p2, %p9128_p13 }
  0x4c   :  { %9138 = shalt.err (!%p9135_p3)
}
  0x4d   :  { %129 = dma.hbm_to_vmem [thread:$0]  %s10737_s11, 144, %s127_s5, [#allocation22]  }
  0x4e   :  { %s9139_s30 = scalar_lea.hbm %s10739_s13, 192 }
  0x4f   :  { %p9140_p4 = scmp.ne.s32.totalorder %s10739_s13, %s9139_s30  ;;  %p9143_p5 = scmp.lt.u32.totalorder %s9139_s30, %s10739_s13 }
  0x51   :  { %p9145_p6 = pnand %p9143_p5, %p9140_p4 }
  0x53   :  { %9148 = shalt.err (!%p9145_p6)
}
  0x54   :  { %s9149_s0 = scalar_lea.vmem %s149_s25, 192  ;;  %p9154_p8 = scmp.lt.s32.totalorder %s149_s25, %s149_s25 }
  0x55   :  { %p9150_p7 = scmp.ne.s32.totalorder %s149_s25, %s9149_s0  ;;  %p9155_p9 = scmp.lt.s32.totalorder %s9149_s0, %s9149_s0 }
  0x57   :  { %p9156_p10 = por %p9155_p9, %p9154_p8 }
  0x59   :  { %p9157_p11 = pnand %p9156_p10, %p9150_p7 }
  0x5b   :  { %9160 = shalt.err (!%p9157_p11)
}
  0x5c   :  { %151 = dma.hbm_to_vmem [thread:$0]  %s10739_s13, 192, %s149_s25, [#allocation25]  }
  0x5d   :  { %s9342_s20 = smov [#allocation9]   ;;  %s9343_s9 = smov [#allocation14]  }
  0x5e   :  { %s46_s1 = sshll.u32 %s9342_s20, 4  ;;  %s67_s3 = sshll.u32 %s9343_s9, 4  ;;  %s47_s1 = int_to_ptr.vmem [resolvable:$true] %s46_s1  ;;  %s68_s3 = int_to_ptr.vmem [resolvable:$true] %s67_s3 }
  0x5f   :  { %s10754_s23 = sld [smem:[#allocation47_spill]] }
  0x65   :  { %s9161_s24 = scalar_lea.hbm %s10754_s23, 256 }
  0x66   :  { %p9162_p12 = scmp.ne.s32.totalorder %s10754_s23, %s9161_s24  ;;  %p9165_p13 = scmp.lt.u32.totalorder %s9161_s24, %s10754_s23 }
  0x68   :  { %p9167_p0 = pnand %p9165_p13, %p9162_p12 }
  0x6a   :  { %9170 = shalt.err (!%p9167_p0)
}
  0x6b   :  { %s9171_s13 = scalar_lea.vmem %s47_s1, 256  ;;  %p9176_p2 = scmp.lt.s32.totalorder %s47_s1, %s47_s1 }
  0x6c   :  { %p9172_p1 = scmp.ne.s32.totalorder %s47_s1, %s9171_s13  ;;  %p9177_p3 = scmp.lt.s32.totalorder %s9171_s13, %s9171_s13 }
  0x6e   :  { %p9178_p4 = por %p9177_p3, %p9176_p2 }
  0x70   :  { %p9179_p5 = pnand %p9178_p4, %p9172_p1 }
  0x72   :  { %9182 = shalt.err (!%p9179_p5)
}
  0x73   :  { %49 = dma.hbm_to_vmem [thread:$0]  %s10754_s23, 256, %s47_s1, [#allocation10]  }
  0x74   :  { %s9183_s5 = scalar_lea.hbm %s10732_s6, 4992 }
  0x75   :  { %p9184_p6 = scmp.ne.s32.totalorder %s10732_s6, %s9183_s5  ;;  %p9187_p7 = scmp.lt.u32.totalorder %s9183_s5, %s10732_s6 }
  0x77   :  { %p9189_p8 = pnand %p9187_p7, %p9184_p6 }
  0x79   :  { %9192 = shalt.err (!%p9189_p8)
}
  0x7a   :  { %s9193_s24 = scalar_lea.vmem %s68_s3, 4992  ;;  %p9198_p10 = scmp.lt.s32.totalorder %s68_s3, %s68_s3 }
  0x7b   :  { %p9194_p9 = scmp.ne.s32.totalorder %s68_s3, %s9193_s24  ;;  %p9199_p11 = scmp.lt.s32.totalorder %s9193_s24, %s9193_s24 }
  0x7d   :  { %p9200_p12 = por %p9199_p11, %p9198_p10 }
  0x7f   :  { %p9201_p13 = pnand %p9200_p12, %p9194_p9 }
  0x81   :  { %9204 = shalt.err (!%p9201_p13)
}
  0x82   :  { %s9344_s1 = smov 384   ;;  %s9345_s23 = smov 24  }
  0x83   :  { %73 = dma.hbm_to_vmem [thread:$0]  %s10732_s6, 4992, %s68_s3, [#allocation13], %s9344_s1, %s9344_s1, %s9345_s23  }
  0x84   :  { %s9346_s27 = smov [#allocation17]   ;;  %s9347_s13 = smov [#allocation20]  }
  0x85   :  { %s89_s28 = sshll.u32 %s9346_s27, 4  ;;  %s113_s25 = sshll.u32 %s9347_s13, 4  ;;  %s90_s28 = int_to_ptr.vmem [resolvable:$true] %s89_s28  ;;  %s114_s25 = int_to_ptr.vmem [resolvable:$true] %s113_s25 }
  0x86   :  { %s9205_s11 = scalar_lea.hbm %s10734_s8, 768 }
  0x87   :  { %p9206_p0 = scmp.ne.s32.totalorder %s10734_s8, %s9205_s11  ;;  %p9209_p1 = scmp.lt.u32.totalorder %s9205_s11, %s10734_s8 }
  0x89   :  { %p9211_p2 = pnand %p9209_p1, %p9206_p0 }
  0x8b   :  { %9214 = shalt.err (!%p9211_p2)
}
  0x8c   :  { %s9215_s6 = scalar_lea.vmem %s90_s28, 768  ;;  %p9220_p4 = scmp.lt.s32.totalorder %s90_s28, %s90_s28 }
  0x8d   :  { %p9216_p3 = scmp.ne.s32.totalorder %s90_s28, %s9215_s6  ;;  %p9221_p5 = scmp.lt.s32.totalorder %s9215_s6, %s9215_s6 }
  0x8f   :  { %p9222_p6 = por %p9221_p5, %p9220_p4 }
  0x91   :  { %p9223_p7 = pnand %p9222_p6, %p9216_p3 }
  0x93   :  { %9226 = shalt.err (!%p9223_p7)
}
  0x94   :  { %95 = dma.hbm_to_vmem [thread:$0]  %s10734_s8, 768, %s90_s28, [#allocation16], %s9344_s1, %s9344_s1, %s9345_s23  }
  0x95   :  { %s9227_s26 = scalar_lea.hbm %s10736_s10, 27648 }
  0x96   :  { %p9228_p8 = scmp.ne.s32.totalorder %s10736_s10, %s9227_s26  ;;  %p9231_p9 = scmp.lt.u32.totalorder %s9227_s26, %s10736_s10 }
  0x98   :  { %p9233_p10 = pnand %p9231_p9, %p9228_p8 }
  0x9a   :  { %9236 = shalt.err (!%p9233_p10)
}
  0x9b   :  { %s9237_s11 = scalar_lea.vmem %s114_s25, 27648  ;;  %p9242_p12 = scmp.lt.s32.totalorder %s114_s25, %s114_s25 }
  0x9c   :  { %p9238_p11 = scmp.ne.s32.totalorder %s114_s25, %s9237_s11  ;;  %p9243_p13 = scmp.lt.s32.totalorder %s9237_s11, %s9237_s11 }
  0x9e   :  { %p9244_p0 = por %p9243_p13, %p9242_p12 }
  0xa0   :  { %p9245_p1 = pnand %p9244_p0, %p9238_p11 }
  0xa2   :  { %9248 = shalt.err (!%p9245_p1)
}
  0xa3   :  { %s9348_s8 = smov 576   ;;  %s9349_s23 = smov 36  }
  0xa4   :  { %119 = dma.hbm_to_vmem [thread:$0]  %s10736_s10, 27648, %s114_s25, [#allocation19], %s9348_s8, %s9348_s8, %s9349_s23  }
  0xa5   :  { %s9350_s20 = smov [#allocation23]   ;;  %s9351_s22 = smov [#allocation26]  }
  0xa6   :  { %s135_s9 = sshll.u32 %s9350_s20, 4  ;;  %s160_s6 = sshll.u32 %s9351_s22, 4  ;;  %s136_s9 = int_to_ptr.vmem [resolvable:$true] %s135_s9  ;;  %s161_s6 = int_to_ptr.vmem [resolvable:$true] %s160_s6 }
  0xa7   :  { %s9249_s24 = scalar_lea.hbm %s10738_s12, 9216 }
  0xa8   :  { %p9250_p2 = scmp.ne.s32.totalorder %s10738_s12, %s9249_s24  ;;  %p9253_p3 = scmp.lt.u32.totalorder %s9249_s24, %s10738_s12 }
  0xaa   :  { %p9255_p4 = pnand %p9253_p3, %p9250_p2 }
  0xac   :  { %9258 = shalt.err (!%p9255_p4)
}
  0xad   :  { %s9259_s10 = scalar_lea.vmem %s136_s9, 9216  ;;  %p9264_p6 = scmp.lt.s32.totalorder %s136_s9, %s136_s9 }
  0xae   :  { %p9260_p5 = scmp.ne.s32.totalorder %s136_s9, %s9259_s10  ;;  %p9265_p7 = scmp.lt.s32.totalorder %s9259_s10, %s9259_s10 }
  0xb0   :  { %p9266_p8 = por %p9265_p7, %p9264_p6 }
  0xb2   :  { %p9267_p9 = pnand %p9266_p8, %p9260_p5 }
  0xb4   :  { %9270 = shalt.err (!%p9267_p9)
}
  0xb5   :  { %141 = dma.hbm_to_vmem [thread:$0]  %s10738_s12, 9216, %s136_s9, [#allocation22], %s9338_s7, %s9338_s7, %s9339_s21  }
  0xb6   :  { %s9271_s8 = scalar_lea.hbm %s10744_s18, 16 }
  0xb7   :  { %p9272_p10 = scmp.ne.s32.totalorder %s10744_s18, %s9271_s8  ;;  %p9275_p11 = scmp.lt.u32.totalorder %s9271_s8, %s10744_s18 }
  0xb9   :  { %p9277_p12 = pnand %p9275_p11, %p9272_p10 }
  0xbb   :  { %9280 = shalt.err (!%p9277_p12)
}
  0xbc   :  { %s9281_s22 = scalar_lea.vmem %s161_s6, 16  ;;  %s9285_s3 = scalar_lea.vmem %s161_s6, 32 }
  0xbd   :  { %p9282_p13 = scmp.ne.s32.totalorder %s161_s6, %s9281_s22  ;;  %p9286_p0 = scmp.lt.s32.totalorder %s161_s6, %s161_s6 }
  0xbe   :  { %p9287_p1 = scmp.lt.s32.totalorder %s9285_s3, %s9281_s22 }
  0xc0   :  { %p9288_p2 = por %p9287_p1, %p9286_p0 }
  0xc2   :  { %p9289_p3 = pnand %p9288_p2, %p9282_p13 }
  0xc4   :  { %9292 = shalt.err (!%p9289_p3)
}
  0xc5   :  { %163 = dma.hbm_to_vmem [thread:$0]  %s10744_s18, 16, %s161_s6, [#allocation25]  }
  0xc6   :  { %9315 = dma.done.wait [#allocation10], 256  }
  0xc7   :  { %9316 = vsyncadd [#allocation10], 4294967040 }
  0xc8   :  { %9317 = dma.done.wait [#allocation13], 5088  }
  0xc9   :  { %9318 = vsyncadd [#allocation13], 4294962208 }
  0xca   :  { %9319 = dma.done.wait [#allocation16], 864  }
  0xcb   :  { %9320 = vsyncadd [#allocation16], 4294966432 }
  0xcc   :  { %9321 = dma.done.wait [#allocation19], 33792  }
  0xcd   :  { %9322 = vsyncadd [#allocation19], 4294933504 }
  0xce   :  { %9323 = dma.done.wait [#allocation22], 9360  }
  0xcf   :  { %9324 = vsyncadd [#allocation22], 4294957936 }
  0xd0   :  { %9325 = dma.done.wait [#allocation25], 208  }
  0xd1   :  { %9326 = vsyncadd [#allocation25], 4294967088  ;;  %s202_s2 = sld [smem:[#allocation0]]   ;;  %s9352_s24 = smov 1536   ;;  %v740_v54 = vlaneseq  ;;  %vm812_vm0 = vcmask 1040384   ;;  %vm819_vm1 = vcmask 1041408  }
  0xd2   :  { %214 = sst [smem:[#allocation29]] %s9352_s24  ;;  %s9353_s30 = smov 64   ;;  %vm823_vm2 = vcmask 1042432   ;;  %vm871_vm3 = vcmask 1043456   ;;  %vm9370_vm4 = vmmov 0   ;;  %vm2846_vm5 = vcmask 523264  }
  0xd3   :  { %216 = sst [smem:[#allocation29 + $0x1]] %s9352_s24  ;;  %s9354_s18 = smov [#allocation2]   ;;  %v9669_v58 = vshrl.u32 %v740_v54, 7  ;;  %vm9881_vm6 = vmpackc.low %vm2846_vm5, %vm2846_vm5  ;;  %vm9371_vm7 = vmmov 1   ;;  %vm3349_vm9 = vcmask 93184   ;;  %vm3345_vm10 = vcmask 97280  }
  0xd4   :  { %218 = sst [smem:[#allocation29 + $0x2]] %s9339_s21  ;;  %s210_s6 = sshll.u32 %s9354_s18, 4  ;;  %vm9930_vm8 = vmpackc.low %vm871_vm3, %vm9371_vm7  ;;  %s211_s6 = int_to_ptr.vmem [resolvable:$true] %s210_s6 }
  0xd5   :  { %220 = sst [smem:[#allocation29 + $0x3]] %s9353_s30  ;;  %s9355_s26 = smov 768   ;;  %v9672_v59 = vsub.s32 2, %v9669_v58 }
  0xd6   :  { %226 = sst [smem:[#allocation29 + $0x6]] %s9355_s26  ;;  %s9356_s13 = smov 128  }
  0xd7   :  { %228 = sst [smem:[#allocation29 + $0x7]] %s9353_s30  ;;  %s7244_s27 = sshll.u32 %s202_s2, 26 }
  0xd8   :  { %222 = sst [smem:[#allocation29 + $0x4]] %s9356_s13  ;;  %s9620_s10 = sadd.s32 134217728, %s7244_s27 }
  0xd9   :  { %s9357_s25 = smov 2   ;;  %s9358_s21 = smov 4  }
  0xda   :  { %224 = sst [smem:[#allocation29 + $0x5]] %s9357_s25  ;;  %s9359_s29 = smov [#allocation5]  }
  0xdb   :  { %230 = sst [smem:[#allocation29 + $0x8]] %s9358_s21  ;;  %s9360_s0 = smov [#allocation28]  }
  0xdc   :  { %232 = dma.general %s10740_s14, 36864, %s211_s6, %s9359_s29, %s9360_s0, [#allocation29], %s9620_s10, 0  }
  0xdd   :  { %249 = sst [smem:[#allocation31]] %s9344_s1  ;;  %s9361_s23 = smov [#allocation3]  }
  0xde   :  { %251 = sst [smem:[#allocation31 + $0x1]] %s9344_s1  ;;  %s245_s28 = sshll.u32 %s9361_s23, 4  ;;  %s246_s28 = int_to_ptr.vmem [resolvable:$true] %s245_s28 }
  0xdf   :  { %s9362_s5 = smov 3   ;;  %255 = sst [smem:[#allocation31 + $0x3]] %s9353_s30 }
  0xe0   :  { %253 = sst [smem:[#allocation31 + $0x2]] %s9362_s5  ;;  %s9363_s14 = smov [#allocation5 + $0x1]  }
  0xe1   :  { %257 = sst [smem:[#allocation31 + $0x4]] %s9356_s13  ;;  %s9364_s20 = smov [#allocation30]  }
  0xe2   :  { %259 = sst [smem:[#allocation31 + $0x5]] %s9357_s25  ;;  %s9365_s12 = smov [#allocation4]  }
  0xe3   :  { %261 = sst [smem:[#allocation31 + $0x6]] %s9338_s7  ;;  %s280_s9 = sshll.u32 %s9365_s12, 4  ;;  %s281_s9 = int_to_ptr.vmem [resolvable:$true] %s280_s9 }
  0xe4   :  { %263 = sst [smem:[#allocation31 + $0x7]] %s9353_s30  ;;  %s9367_s2 = smov [#allocation32]  }
  0xe5   :  { %265 = sst [smem:[#allocation31 + $0x8]] %s9358_s21 }
  0xe6   :  { %267 = dma.general %s10741_s15, 36864, %s246_s28, %s9363_s14, %s9364_s20, [#allocation31], %s9620_s10, 0  }
  0xe7   :  { %284 = sst [smem:[#allocation33]] %s9344_s1  ;;  %s9366_s15 = smov [#allocation5 + $0x2]  }
  0xe8   :  { %286 = sst [smem:[#allocation33 + $0x1]] %s9344_s1 }
  0xe9   :  { %288 = sst [smem:[#allocation33 + $0x2]] %s9362_s5 }
  0xea   :  { %290 = sst [smem:[#allocation33 + $0x3]] %s9353_s30 }
  0xeb   :  { %292 = sst [smem:[#allocation33 + $0x4]] %s9356_s13 }
  0xec   :  { %294 = sst [smem:[#allocation33 + $0x5]] %s9357_s25 }
  0xed   :  { %296 = sst [smem:[#allocation33 + $0x6]] %s9338_s7 }
  0xee   :  { %298 = sst [smem:[#allocation33 + $0x7]] %s9353_s30 }
  0xef   :  { %300 = sst [smem:[#allocation33 + $0x8]] %s9358_s21 }
  0xf0   :  { %302 = dma.general %s10742_s16, 9216, %s281_s9, %s9366_s15, %s9367_s2, [#allocation33], %s9620_s10, 0  }
  0xf1   :  { %v8467_v0 = vld [vmem:[#allocation18 + $0x4] ss:$12 sps:$4 sm:$0xff]   ;;  %v8469_v1 = vld [vmem:[#allocation18] ss:$12 sps:$4 sm:$0xff]   ;;  %v8470_v2 = vld [vmem:[#allocation18 + $0x1c] ss:$12 sps:$4 sm:$0xff]  }
  0xf2   :  { %627 = vmatprep.subr.bf16.mxu0 %v8467_v0  ;;  %v8472_v3 = vld [vmem:[#allocation18 + $0x18] ss:$12 sps:$4 sm:$0xff]   ;;  %v8473_v4 = vld [vmem:[#allocation18 + $0x34] ss:$12 sps:$4 sm:$0xff]   ;;  %v8475_v5 = vld [vmem:[#allocation18 + $0x30] ss:$12 sps:$4 sm:$0xff]  }
  0xf3   :  { %628 = vmatpush1.bf16.msra.mxu0 %v8469_v1  ;;  %v8476_v6 = vld [vmem:[#allocation18 + $0x4c] ss:$12 sps:$4 sm:$0xff]   ;;  %v8478_v7 = vld [vmem:[#allocation18 + $0x48] ss:$12 sps:$4 sm:$0xff]   ;;  %v8479_v8 = vld [vmem:[#allocation18 + $0x64] ss:$12 sps:$4 sm:$0xff]  }
  0xf4   :  { %629 = vmatprep.subr.bf16.mxu0 %v8470_v2  ;;  %v8491_v9 = vld [vmem:[#allocation18 + $0xc8] ss:$12 sps:$4 sm:$0xff]   ;;  %v8481_v11 = vld [vmem:[#allocation18 + $0x60] ss:$12 sps:$4 sm:$0xff]   ;;  %v8484_v15 = vld [vmem:[#allocation18 + $0x78] ss:$12 sps:$4 sm:$0xff]  }
  0xf5   :  { %v8492_v10 = vld [vmem:[#allocation18 + $0x8] ss:$12 sps:$4 sm:$0xff]   ;;  %7635 = vmatprep.subr.bf16.mxu1 %v8491_v9  ;;  %v8496_v12 = vld [vmem:[#allocation18 + $0xe0] ss:$12 sps:$4 sm:$0xff]   ;;  %v8501_v16 = vld [vmem:[#allocation18 + $0xf8] ss:$12 sps:$4 sm:$0xff]  }
  0xf6   :  { %7636 = vmatpush3.bf16.msra.mxu1 %v8492_v10  ;;  %v8497_v13 = vld [vmem:[#allocation18 + $0x20] ss:$12 sps:$4 sm:$0xff]   ;;  %v8482_v14 = vld [vmem:[#allocation18 + $0x7c] ss:$12 sps:$4 sm:$0xff]   ;;  %v8502_v17 = vld [vmem:[#allocation18 + $0x38] ss:$12 sps:$4 sm:$0xff]  }
  0xf7   :  { %630 = vmatpush1.bf16.msra.mxu0 %v8472_v3  ;;  %7637 = vmatprep.subr.bf16.mxu1 %v8496_v12  ;;  %v8485_v18 = vld [vmem:[#allocation18 + $0x94] ss:$12 sps:$4 sm:$0xff]   ;;  %v8506_v19 = vld [vmem:[#allocation18 + $0x110] ss:$12 sps:$4 sm:$0xff]   ;;  %v8488_v22 = vld [vmem:[#allocation18 + $0xac] ss:$12 sps:$4 sm:$0xff]  }
  0xf8   :  { %631 = vmatprep.subr.bf16.mxu0 %v8473_v4  ;;  %v8507_v20 = vld [vmem:[#allocation18 + $0x50] ss:$12 sps:$4 sm:$0xff]   ;;  %v8511_v23 = vld [vmem:[#allocation18 + $0x128] ss:$12 sps:$4 sm:$0xff]   ;;  %v8516_v27 = vld [vmem:[#allocation18 + $0x140] ss:$12 sps:$4 sm:$0xff]  }
  0xf9   :  { %v8487_v21 = vld [vmem:[#allocation18 + $0x90] ss:$12 sps:$4 sm:$0xff]   ;;  %v8490_v24 = vld [vmem:[#allocation18 + $0xa8] ss:$12 sps:$4 sm:$0xff]   ;;  %v8495_v28 = vld [vmem:[#allocation18 + $0xc0] ss:$12 sps:$4 sm:$0xff]  }
  0xfa   :  { %7638 = vmatpush3.bf16.msra.mxu1 %v8497_v13  ;;  %v8512_v25 = vld [vmem:[#allocation18 + $0x68] ss:$12 sps:$4 sm:$0xff]   ;;  %v8493_v26 = vld [vmem:[#allocation18 + $0xc4] ss:$12 sps:$4 sm:$0xff]   ;;  %v8517_v29 = vld [vmem:[#allocation18 + $0x80] ss:$12 sps:$4 sm:$0xff]  }
  0xfb   :  { %632 = vmatpush1.bf16.msra.mxu0 %v8475_v5  ;;  %7639 = vmatprep.subr.bf16.mxu1 %v8501_v16  ;;  %v8521_v30 = vld [vmem:[#allocation18 + $0x158] ss:$12 sps:$4 sm:$0xff]   ;;  %v8498_v31 = vld [vmem:[#allocation18 + $0xdc] ss:$12 sps:$4 sm:$0xff]   ;;  %v8503_v35 = vld [vmem:[#allocation18 + $0xf4] ss:$12 sps:$4 sm:$0xff]  }
  0xfc   :  { %633 = vmatprep.subr.bf16.mxu0 %v8476_v6  ;;  %v8500_v32 = vld [vmem:[#allocation18 + $0xd8] ss:$12 sps:$4 sm:$0xff]   ;;  %v8526_v34 = vld [vmem:[#allocation18 + $0x170] ss:$12 sps:$4 sm:$0xff]   ;;  %v8510_v42 = vld [vmem:[#allocation18 + $0x108] ss:$12 sps:$4 sm:$0xff]  }
  0xfd   :  { %v8522_v33 = vld [vmem:[#allocation18 + $0x98] ss:$12 sps:$4 sm:$0xff]   ;;  %v8505_v36 = vld [vmem:[#allocation18 + $0xf0] ss:$12 sps:$4 sm:$0xff]   ;;  %v8515_v45 = vld [vmem:[#allocation18 + $0x120] ss:$12 sps:$4 sm:$0xff]  }
  0xfe   :  { %7640 = vmatpush3.bf16.msra.mxu1 %v8502_v17  ;;  %v8527_v37 = vld [vmem:[#allocation18 + $0xb0] ss:$12 sps:$4 sm:$0xff]   ;;  %v304_v38 = vld [vmem:[#allocation9 + $0x8] sm:$0xff]  ;;  %v8508_v40 = vld [vmem:[#allocation18 + $0x10c] ss:$12 sps:$4 sm:$0xff]   ;;  %s10755_s18 = sld [smem:[#allocation44_spill]] }
  0xff   :  { %634 = vmatpush1.bf16.msra.mxu0 %v8478_v7  ;;  %7641 = vmatprep.subr.bf16.mxu1 %v8506_v19  ;;  %v303_v39 = vld [vmem:[#allocation9] sm:$0xff]  ;;  %v306_v41 = vpack.c.bf16 %v304_v38, %v304_v38  ;;  %v8513_v44 = vld [vmem:[#allocation18 + $0x124] ss:$12 sps:$4 sm:$0xff]   ;;  %v8528_v50 = vld [vmem:[#allocation18 + $0x16c] ss:$12 sps:$4 sm:$0xff]   ;;  %s10756_s10 = sld [smem:[#allocation45_spill]] }
 0x100   :  { %635 = vmatprep.subr.bf16.mxu0 %v8479_v8  ;;  %v305_v43 = vpack.c.bf16 %v303_v39, %v303_v39  ;;  %v8518_v46 = vld [vmem:[#allocation18 + $0x13c] ss:$12 sps:$4 sm:$0xff]   ;;  %v8520_v47 = vld [vmem:[#allocation18 + $0x138] ss:$12 sps:$4 sm:$0xff]   ;;  %v8523_v48 = vld [vmem:[#allocation18 + $0x154] ss:$12 sps:$4 sm:$0xff]  }
 0x101   :  { %700 = vmatprep.mubr.bf16.mxu1 %v306_v41  ;;  %659 = vmatprep.mubr.bf16.mxu0 %v306_v41  ;;  %v8525_v49 = vld [vmem:[#allocation18 + $0x150] ss:$12 sps:$4 sm:$0xff]   ;;  %v8530_v51 = vld [vmem:[#allocation18 + $0x168] ss:$12 sps:$4 sm:$0xff]   ;;  %s10757_s5 = sld [smem:[#allocation46_spill]]  ;;  %v9682_v2 = vsub.s32 0, %v9669_v58 }
 0x102   :  { %7642 = vmatpush3.bf16.msra.mxu1 %v8507_v20  ;;  %v738_v4 = vld [vmem:[#allocation17] ss:$8 sm:$0x7]  ;;  %v9685_v5 = vsub.s32 1, %v9669_v58 }
 0x103   :  { %636 = vmatpush1.bf16.msra.mxu0 %v8481_v11  ;;  %7643 = vmatprep.subr.bf16.mxu1 %v8511_v23  ;;  %v743_v8 = vrot.slane %v738_v4, %v9682_v2  ;;  %v840_v20 = vld [vmem:[#allocation17 + $0x1] ss:$8 sm:$0x7] }
 0x104   :  { %637 = vmatprep.subr.bf16.mxu0 %v8482_v14  ;;  %s709_s6 = sshra.s32 %s10755_s18, 1  ;;  %s712_s0 = sand.u32 1, %s10755_s18  ;;  %v747_v12 = vrot.slane %v738_v4, %v9685_v5  ;;  %v849_v39 = vrot.slane %v840_v20, %v9685_v5 }
 0x105   :  { %s7298_s26 = smul.u32 6, %s709_s6  ;;  %s719_s25 = sshra.s32 %s10756_s10, 3 }
 0x106   :  { %7644 = vmatpush3.bf16.msra.mxu1 %v8512_v25  ;;  %s7299_s11 = smul.u32 24, %s719_s25  ;;  %s722_s3 = sand.u32 7, %s10756_s10 }
 0x107   :  { %638 = vmatpush1.bf16.msra.mxu0 %v8484_v15  ;;  %7645 = vmatprep.subr.bf16.mxu1 %v8516_v27  ;;  %s715_s8 = sadd.s32 %s7298_s26, %s712_s0  ;;  %s729_s14 = sshra.s32 %s10757_s5, 1  ;;  %v832_v15 = vld [vmem:[%s10730_s4 + $0x28] sm:$0xf]  ;;  %v827_v27 = vld [vmem:[%s10730_s4] sm:$0xff] }
 0x108   :  { %639 = vmatprep.subr.bf16.mxu0 %v8485_v18  ;;  %s7300_s12 = smul.u32 6, %s729_s14  ;;  %s725_s9 = sadd.s32 %s7299_s11, %s722_s3 }
 0x109   :  { %s732_s24 = sand.u32 1, %s10757_s5  ;;  %s716_s1 = scalar_lea.vmem [#allocation12], %s715_s8 }
 0x10a   :  { %7646 = vmatpush3.bf16.msra.mxu1 %v8517_v29  ;;  %v717_v60 = vld [vmem:[%s716_s1] ss:$2 sm:$0x7]  ;;  %s735_s16 = sadd.s32 %s7300_s12, %s732_s24  ;;  %s726_s7 = scalar_lea.vmem [#allocation14], %s725_s9 }
 0x10b   :  { %640 = vmatpush1.bf16.msra.mxu0 %v8487_v21  ;;  %7647 = vmatprep.subr.bf16.mxu1 %v8521_v30  ;;  %v776_v62 = vrot.slane %v717_v60, %v9672_v59  ;;  %v727_v63 = vld [vmem:[%s726_s7] ss:$8 sm:$0x7]  ;;  %s736_s18 = scalar_lea.vmem [#allocation15], %s735_s16  ;;  %v768_v9 = vrot.slane %v717_v60, %v9682_v2  ;;  %v772_v13 = vrot.slane %v717_v60, %v9685_v5  ;;  %v830_v30 = vld [vmem:[%s10730_s4 + $0x18] sm:$0xf] }
 0x10c   :  { %641 = vmatprep.subr.bf16.mxu0 %v8488_v22  ;;  %v792_v0 = vrot.slane %v727_v63, %v9672_v59  ;;  %v737_v3 = vld [vmem:[%s736_s18] ss:$2 sm:$0x7]  ;;  %v784_v11 = vrot.slane %v727_v63, %v9682_v2  ;;  %v788_v18 = vrot.slane %v727_v63, %v9685_v5 }
 0x10d   :  { %v808_v6 = vrot.slane %v737_v3, %v9672_v59  ;;  %v800_v19 = vrot.slane %v737_v3, %v9682_v2  ;;  %v804_v23 = vrot.slane %v737_v3, %v9685_v5  ;;  %v8534_v3 = vld [vmem:[#allocation20 + $0x8] ss:$36 sps:$4 sm:$0xff]  }
 0x10e   :  { %7648 = vmatpush3.bf16.msra.mxu1 %v8522_v33 }
 0x10f   :  { %642 = vmatpush1.bf16.msra.mxu0 %v8490_v24  ;;  %7649 = vmatprep.subr.bf16.mxu1 %v8526_v34  ;;  %v751_v24 = vrot.slane %v738_v4, %v9672_v59  ;;  %v8536_v4 = vld [vmem:[#allocation20 + $0xc] ss:$36 sps:$4 sm:$0xff]  }
 0x110   :  { %643 = vmatprep.subr.bf16.mxu0 %v8493_v26 }
 0x112   :  { %7650 = vmatpush3.bf16.msra.mxu1 %v8527_v37 }
 0x113   :  { %644 = vmatpush1.bf16.msra.mxu0 %v8495_v28  ;;  %v828_v28 = vld [vmem:[%s10730_s4 + $0x8] sm:$0xff] }
 0x114   :  { %645 = vmatprep.subr.bf16.mxu0 %v8498_v31 }
 0x115   :  { %701 = vmatmul.mubr.bf16.vlgmr.msra.gmra.mrb[0].mxu1 %v305_v43 }
 0x117   :  { %646 = vmatpush1.bf16.msra.mxu0 %v8500_v32 }
 0x118   :  { %647 = vmatprep.subr.bf16.mxu0 %v8503_v35  ;;  %v831_v35 = vld [vmem:[%s10730_s4 + $0x20] sm:$0xf] }
 0x11b   :  { %648 = vmatpush1.bf16.msra.mxu0 %v8505_v36  ;;  %v845_v36 = vrot.slane %v840_v20, %v9682_v2 }
 0x11c   :  { %649 = vmatprep.subr.bf16.mxu0 %v8508_v40  ;;  %v853_v40 = vrot.slane %v840_v20, %v9672_v59  ;;  %v8555_v20 = vld [vmem:[#allocation20 + $0x120] ss:$36 sps:$4 sm:$0xff]  }
 0x11f   :  { %650 = vmatpush1.bf16.msra.mxu0 %v8510_v42 }
 0x120   :  { %651 = vmatprep.subr.bf16.mxu0 %v8513_v44 }
 0x123   :  { %652 = vmatpush1.bf16.msra.mxu0 %v8515_v45 }
 0x124   :  { %653 = vmatprep.subr.bf16.mxu0 %v8518_v46 }
 0x127   :  { %654 = vmatpush1.bf16.msra.mxu0 %v8520_v47 }
 0x128   :  { %655 = vmatprep.subr.bf16.mxu0 %v8523_v48  ;;  %v829_v48 = vld [vmem:[%s10730_s4 + $0x10] sm:$0xff] }
 0x12b   :  { %656 = vmatpush1.bf16.msra.mxu0 %v8525_v49 }
 0x12c   :  { %657 = vmatprep.subr.bf16.mxu0 %v8528_v50 }
 0x12f   :  { %658 = vmatpush1.bf16.msra.mxu0 %v8530_v51 }
 0x130   :  { %2443 = vmatprep.subr.bf16.mxu0 %v8536_v4  ;;  %v8593_v4 = vld [vmem:[#allocation20 + $0x2d4] ss:$36 sps:$4 sm:$0xff]  }
 0x132   :  { %660 = vmatmul.mubr.bf16.vlgmr.msra.gmra.mrb[0].mxu0 %v305_v43 }
 0x133   :  { %2444 = vmatpush1.bf16.msra.mxu0 %v8534_v3 }
 0x1e8   :  { %v7651_v52 = vpop.f32.mrb[0].mxu1 }
 0x1e9   :  { %v7652_v53 = vpop.f32.mrb[1].mxu1 }
 0x1ea   :  { %v9661_v55 = vadd.f32 %v7652_v53, %v7651_v52  ;;  %v7654_v56 = vpop.f32.mrb[2].mxu1 }
 0x1eb   :  { %v7655_v57 = vpop.f32.mrb[3].mxu1 }
 0x1ec   :  { %v760_v61 = vrot.slane %v9661_v55, 7 }
 0x1ee   :  { %v818_v1 = vsel %vm812_vm0, %v760_v61, %v776_v62  ;;  %v815_v45 = vsel %vm812_vm0, %v751_v24, %v760_v61  ;;  %v8561_v24 = vld [vmem:[#allocation20 + $0x168] ss:$36 sps:$4 sm:$0xff]  }
 0x1ef   :  { %v822_v7 = vsel %vm819_vm1, %v818_v1, %v792_v0  ;;  %v835_v52 = vadd.f32 %v829_v48, %v815_v45  ;;  %v8531_v0 = vld [vmem:[#allocation20] ss:$36 sps:$4 sm:$0xff]  }
 0x1f0   :  { %v826_v14 = vsel %vm823_vm2, %v822_v7, %v808_v6  ;;  %v8533_v1 = vld [vmem:[#allocation20 + $0x4] ss:$36 sps:$4 sm:$0xff]   ;;  %v8539_v6 = vld [vmem:[#allocation20 + $0x4c] ss:$36 sps:$4 sm:$0xff]   ;;  %v8542_v7 = vld [vmem:[#allocation20 + $0x54] ss:$36 sps:$4 sm:$0xff]  }
 0x1f1   :  { %v838_v31 = vadd.f32 %v832_v15, %v826_v14  ;;  %v9745_v61 = vadd.f32 %v853_v40, %v835_v52  ;;  %2357 = vmatprep.subr.bf16.mxu1 %v8533_v1  ;;  %2445 = vmatprep.subr.bf16.mxu0 %v8542_v7  ;;  %v8551_v14 = vld [vmem:[#allocation20 + $0xdc] ss:$36 sps:$4 sm:$0xff]   ;;  %v8554_v15 = vld [vmem:[#allocation20 + $0xe4] ss:$36 sps:$4 sm:$0xff]   ;;  %v8591_v7 = vld [vmem:[#allocation20 + $0x2d0] ss:$36 sps:$4 sm:$0xff]  }
 0x1f2   :  { %2358 = vmatpush1.bf16.msra.mxu1 %v8531_v0 }
 0x1f3   :  { %v9726_v47 = vadd.f32 %v853_v40, %v838_v31  ;;  %2359 = vmatprep.subr.bf16.mxu1 %v8539_v6  ;;  %v8578_v31 = vld [vmem:[#allocation20 + $0x204] ss:$36 sps:$4 sm:$0xff]   ;;  %v8596_v6 = vld [vmem:[#allocation20 + $0x2dc] ss:$36 sps:$4 sm:$0xff]  }
 0x1f4   :  { %v8585_v40 = vld [vmem:[#allocation20 + $0x288] ss:$36 sps:$4 sm:$0xff]  }
 0x1f5   :  { %v875_v56 = vsel %vm871_vm3, %v9726_v47, 0.0 }
 0x205   :  { %v661_v10 = vpop.f32.mrb[0].mxu0 }
 0x206   :  { %v758_v16 = vrot.slane %v661_v10, 7  ;;  %v663_v17 = vpop.f32.mrb[1].mxu0  ;;  %v8545_v10 = vld [vmem:[#allocation20 + $0x94] ss:$36 sps:$4 sm:$0xff]  }
 0x207   :  { %v759_v21 = vrot.slane %v663_v17, 7  ;;  %v665_v22 = vpop.f32.mrb[2].mxu0  ;;  %v8552_v17 = vld [vmem:[#allocation20 + $0xe0] ss:$36 sps:$4 sm:$0xff]  }
 0x208   :  { %v813_v25 = vsel %vm812_vm0, %v743_v8, %v758_v16  ;;  %v816_v26 = vsel %vm812_vm0, %v758_v16, %v768_v9  ;;  %v666_v29 = vpop.f32.mrb[3].mxu0  ;;  %v8537_v8 = vld [vmem:[#allocation20 + $0x48] ss:$36 sps:$4 sm:$0xff]   ;;  %v8540_v9 = vld [vmem:[#allocation20 + $0x50] ss:$36 sps:$4 sm:$0xff]  }
 0x209   :  { %v820_v32 = vsel %vm819_vm1, %v816_v26, %v784_v11  ;;  %v814_v33 = vsel %vm812_vm0, %v747_v12, %v759_v21  ;;  %v817_v34 = vsel %vm812_vm0, %v759_v21, %v772_v13  ;;  %v833_v41 = vadd.f32 %v827_v27, %v813_v25  ;;  %v8548_v11 = vld [vmem:[#allocation20 + $0x9c] ss:$36 sps:$4 sm:$0xff]   ;;  %2360 = vmatpush1.bf16.msra.mxu1 %v8537_v8  ;;  %v8543_v12 = vld [vmem:[#allocation20 + $0x90] ss:$36 sps:$4 sm:$0xff]   ;;  %v8558_v21 = vld [vmem:[#allocation20 + $0x128] ss:$36 sps:$4 sm:$0xff]  }
 0x20a   :  { %v821_v37 = vsel %vm819_vm1, %v817_v34, %v788_v18  ;;  %v824_v38 = vsel %vm823_vm2, %v820_v32, %v800_v19  ;;  %v834_v42 = vadd.f32 %v828_v28, %v814_v33  ;;  %2446 = vmatpush1.bf16.msra.mxu0 %v8540_v9  ;;  %2361 = vmatprep.subr.bf16.mxu1 %v8545_v10  ;;  %v8546_v13 = vld [vmem:[#allocation20 + $0x98] ss:$36 sps:$4 sm:$0xff]   ;;  %v8557_v18 = vld [vmem:[#allocation20 + $0x124] ss:$36 sps:$4 sm:$0xff]   ;;  %v8560_v19 = vld [vmem:[#allocation20 + $0x12c] ss:$36 sps:$4 sm:$0xff]  }
 0x20b   :  { %v825_v43 = vsel %vm823_vm2, %v821_v37, %v804_v23  ;;  %v836_v44 = vadd.f32 %v830_v30, %v824_v38  ;;  %v9737_v53 = vadd.f32 %v845_v36, %v833_v41  ;;  %2447 = vmatprep.subr.bf16.mxu0 %v8548_v11  ;;  %v8549_v16 = vld [vmem:[#allocation20 + $0xd8] ss:$36 sps:$4 sm:$0xff]   ;;  %v8563_v22 = vld [vmem:[#allocation20 + $0x16c] ss:$36 sps:$4 sm:$0xff]   ;;  %v8576_v33 = vld [vmem:[#allocation20 + $0x200] ss:$36 sps:$4 sm:$0xff]  }
 0x20c   :  { %v837_v46 = vadd.f32 %v831_v35, %v825_v43  ;;  %v9739_v54 = vadd.f32 %v849_v39, %v834_v42  ;;  %v8566_v23 = vld [vmem:[#allocation20 + $0x174] ss:$36 sps:$4 sm:$0xff]   ;;  %v8572_v27 = vld [vmem:[#allocation20 + $0x1bc] ss:$36 sps:$4 sm:$0xff]   ;;  %v8581_v34 = vld [vmem:[#allocation20 + $0x244] ss:$36 sps:$4 sm:$0xff]  }
 0x20d   :  { %v9731_v49 = vadd.f32 %v845_v36, %v836_v44  ;;  %2362 = vmatpush1.bf16.msra.mxu1 %v8543_v12  ;;  %v8564_v25 = vld [vmem:[#allocation20 + $0x170] ss:$36 sps:$4 sm:$0xff]   ;;  %v8570_v29 = vld [vmem:[#allocation20 + $0x1b8] ss:$36 sps:$4 sm:$0xff]   ;;  %v8579_v36 = vld [vmem:[#allocation20 + $0x240] ss:$36 sps:$4 sm:$0xff]  }
 0x20e   :  { %v9733_v50 = vadd.f32 %v849_v39, %v837_v46  ;;  %v867_v62 = vadd.f32 %v9739_v54, %v9737_v53  ;;  %2448 = vmatpush1.bf16.msra.mxu0 %v8546_v13  ;;  %2363 = vmatprep.subr.bf16.mxu1 %v8551_v14  ;;  %v8569_v26 = vld [vmem:[#allocation20 + $0x1b4] ss:$36 sps:$4 sm:$0xff]   ;;  %v8575_v30 = vld [vmem:[#allocation20 + $0x1fc] ss:$36 sps:$4 sm:$0xff]   ;;  %v8584_v35 = vld [vmem:[#allocation20 + $0x24c] ss:$36 sps:$4 sm:$0xff]  }
 0x20f   :  { %v872_v51 = vsel %vm871_vm3, %v9731_v49, 0.0  ;;  %2449 = vmatprep.subr.bf16.mxu0 %v8554_v15  ;;  %v8567_v28 = vld [vmem:[#allocation20 + $0x1b0] ss:$36 sps:$4 sm:$0xff]   ;;  %v8573_v32 = vld [vmem:[#allocation20 + $0x1f8] ss:$36 sps:$4 sm:$0xff]  }
 0x210   :  { %v873_v55 = vsel %vm871_vm3, %v9733_v50, 0.0  ;;  %v868_v63 = vadd.f32 %v867_v62, %v9745_v61  ;;  %v8582_v37 = vld [vmem:[#allocation20 + $0x248] ss:$36 sps:$4 sm:$0xff]   ;;  %v8590_v39 = vld [vmem:[#allocation20 + $0x294] ss:$36 sps:$4 sm:$0xff]  }
 0x211   :  { %v874_v57 = vadd.f32 %v873_v55, %v872_v51  ;;  %2364 = vmatpush1.bf16.msra.mxu1 %v8549_v16  ;;  %v8587_v38 = vld [vmem:[#allocation20 + $0x28c] ss:$36 sps:$4 sm:$0xff]   ;;  %v8594_v8 = vld [vmem:[#allocation20 + $0x2d8] ss:$36 sps:$4 sm:$0xff]   ;;  %v8602_v10 = vld [vmem:[#allocation20 + $0x324] ss:$36 sps:$4 sm:$0xff]  }
 0x212   :  { %2450 = vmatpush1.bf16.msra.mxu0 %v8552_v17  ;;  %2365 = vmatprep.subr.bf16.mxu1 %v8557_v18  ;;  %v8588_v41 = vld [vmem:[#allocation20 + $0x290] ss:$36 sps:$4 sm:$0xff]   ;;  %v8599_v9 = vld [vmem:[#allocation20 + $0x31c] ss:$36 sps:$4 sm:$0xff]   ;;  %v8605_v13 = vld [vmem:[#allocation20 + $0x364] ss:$36 sps:$4 sm:$0xff]  }
 0x213   :  { %v876_v60 = vadd.f32 %v875_v56, %v874_v57  ;;  %2451 = vmatprep.subr.bf16.mxu0 %v8560_v19  ;;  %v8597_v11 = vld [vmem:[#allocation20 + $0x318] ss:$36 sps:$4 sm:$0xff]   ;;  %v8600_v12 = vld [vmem:[#allocation20 + $0x320] ss:$36 sps:$4 sm:$0xff]   ;;  %v8606_v15 = vld [vmem:[#allocation20 + $0x368] ss:$36 sps:$4 sm:$0xff]  }
 0x214   :  { %v8603_v14 = vld [vmem:[#allocation20 + $0x360] ss:$36 sps:$4 sm:$0xff]   ;;  %v8608_v16 = vld [vmem:[#allocation20 + $0x36c] ss:$36 sps:$4 sm:$0xff]   ;;  %v8614_v18 = vld [vmem:[#allocation20 + $0x3b4] ss:$36 sps:$4 sm:$0xff]  }
 0x215   :  { %877 = vadd.xlane.f32.xlu0 %v876_v60  ;;  %2366 = vmatpush1.bf16.msra.mxu1 %v8555_v20  ;;  %v8611_v17 = vld [vmem:[#allocation20 + $0x3ac] ss:$36 sps:$4 sm:$0xff]  }
 0x216   :  { %2452 = vmatpush1.bf16.msra.mxu0 %v8558_v21  ;;  %2367 = vmatprep.subr.bf16.mxu1 %v8563_v22  ;;  %v8609_v19 = vld [vmem:[#allocation20 + $0x3a8] ss:$36 sps:$4 sm:$0xff]   ;;  %v8612_v20 = vld [vmem:[#allocation20 + $0x3b0] ss:$36 sps:$4 sm:$0xff]   ;;  %v8620_v22 = vld [vmem:[#allocation20 + $0x3fc] ss:$36 sps:$4 sm:$0xff]  }
 0x217   :  { %2453 = vmatprep.subr.bf16.mxu0 %v8566_v23  ;;  %v8617_v21 = vld [vmem:[#allocation20 + $0x3f4] ss:$36 sps:$4 sm:$0xff]  }
 0x218   :  { %v8615_v23 = vld [vmem:[#allocation20 + $0x3f0] ss:$36 sps:$4 sm:$0xff]  }
 0x219   :  { %869 = vadd.xlane.f32.xlu0 %v868_v63  ;;  %2368 = vmatpush1.bf16.msra.mxu1 %v8561_v24  ;;  %v8618_v24 = vld [vmem:[#allocation20 + $0x3f8] ss:$36 sps:$4 sm:$0xff]  }
 0x21a   :  { %2454 = vmatpush1.bf16.msra.mxu0 %v8564_v25  ;;  %2369 = vmatprep.subr.bf16.mxu1 %v8569_v26  ;;  %v8623_v25 = vld [vmem:[#allocation20 + $0x43c] ss:$36 sps:$4 sm:$0xff]   ;;  %v8626_v26 = vld [vmem:[#allocation20 + $0x444] ss:$36 sps:$4 sm:$0xff]  }
 0x21b   :  { %2455 = vmatprep.subr.bf16.mxu0 %v8572_v27  ;;  %v8621_v27 = vld [vmem:[#allocation20 + $0x438] ss:$36 sps:$4 sm:$0xff]  }
 0x21d   :  { %2370 = vmatpush1.bf16.msra.mxu1 %v8567_v28  ;;  %v8624_v28 = vld [vmem:[#allocation20 + $0x440] ss:$36 sps:$4 sm:$0xff]  }
 0x21e   :  { %2456 = vmatpush1.bf16.msra.mxu0 %v8570_v29  ;;  %2371 = vmatprep.subr.bf16.mxu1 %v8575_v30  ;;  %v8629_v29 = vld [vmem:[#allocation20 + $0x484] ss:$36 sps:$4 sm:$0xff]   ;;  %v8632_v30 = vld [vmem:[#allocation20 + $0x48c] ss:$36 sps:$4 sm:$0xff]  }
 0x21f   :  { %2457 = vmatprep.subr.bf16.mxu0 %v8578_v31 }
 0x221   :  { %2372 = vmatpush1.bf16.msra.mxu1 %v8573_v32 }
 0x222   :  { %2458 = vmatpush1.bf16.msra.mxu0 %v8576_v33  ;;  %2373 = vmatprep.subr.bf16.mxu1 %v8581_v34 }
 0x223   :  { %2459 = vmatprep.subr.bf16.mxu0 %v8584_v35 }
 0x225   :  { %2374 = vmatpush1.bf16.msra.mxu1 %v8579_v36 }
 0x226   :  { %2460 = vmatpush1.bf16.msra.mxu0 %v8582_v37  ;;  %2375 = vmatprep.subr.bf16.mxu1 %v8587_v38  ;;  %v9783_v37 = vld [vmem:[#allocation17 + $0x2] ss:$8 sm:$0x7] }
 0x227   :  { %2461 = vmatprep.subr.bf16.mxu0 %v8590_v39  ;;  %v9787_v39 = vld [vmem:[#allocation17 + $0x3] ss:$8 sm:$0x7] }
 0x229   :  { %2376 = vmatpush1.bf16.msra.mxu1 %v8585_v40 }
 0x22a   :  { %2462 = vmatpush1.bf16.msra.mxu0 %v8588_v41  ;;  %2377 = vmatprep.subr.bf16.mxu1 %v8593_v4  ;;  %v925_v41 = vrot.slane %v9783_v37, %v9685_v5  ;;  %v8633_v4 = vld [vmem:[#allocation20 + $0x4c8] ss:$36 sps:$4 sm:$0xff]  }
 0x22b   :  { %2463 = vmatprep.subr.bf16.mxu0 %v8596_v6  ;;  %v8636_v6 = vld [vmem:[#allocation20 + $0x4d0] ss:$36 sps:$4 sm:$0xff]  }
 0x22d   :  { %2378 = vmatpush1.bf16.msra.mxu1 %v8591_v7  ;;  %v8641_v7 = vld [vmem:[#allocation20 + $0x514] ss:$36 sps:$4 sm:$0xff]  }
 0x22e   :  { %2464 = vmatpush1.bf16.msra.mxu0 %v8594_v8  ;;  %2379 = vmatprep.subr.bf16.mxu1 %v8599_v9  ;;  %v8644_v8 = vld [vmem:[#allocation20 + $0x51c] ss:$36 sps:$4 sm:$0xff]   ;;  %v9368_v9 = vmov 0  }
 0x22f   :  { %2465 = vmatprep.subr.bf16.mxu0 %v8602_v10  ;;  %v8639_v10 = vld [vmem:[#allocation20 + $0x510] ss:$36 sps:$4 sm:$0xff]  }
 0x231   :  { %2380 = vmatpush1.bf16.msra.mxu1 %v8597_v11  ;;  %v8642_v11 = vld [vmem:[#allocation20 + $0x518] ss:$36 sps:$4 sm:$0xff]  }
 0x232   :  { %2466 = vmatpush1.bf16.msra.mxu0 %v8600_v12  ;;  %2381 = vmatprep.subr.bf16.mxu1 %v8605_v13  ;;  %v8647_v12 = vld [vmem:[#allocation20 + $0x55c] ss:$36 sps:$4 sm:$0xff]   ;;  %v8650_v13 = vld [vmem:[#allocation20 + $0x564] ss:$36 sps:$4 sm:$0xff]  }
 0x233   :  { %2467 = vmatprep.subr.bf16.mxu0 %v8608_v16  ;;  %v8653_v16 = vld [vmem:[#allocation20 + $0x5a4] ss:$36 sps:$4 sm:$0xff]  }
 0x235   :  { %2382 = vmatpush1.bf16.msra.mxu1 %v8603_v14  ;;  %v8645_v14 = vld [vmem:[#allocation20 + $0x558] ss:$36 sps:$4 sm:$0xff]  }
 0x236   :  { %2468 = vmatpush1.bf16.msra.mxu0 %v8606_v15  ;;  %2383 = vmatprep.subr.bf16.mxu1 %v8611_v17  ;;  %v8648_v15 = vld [vmem:[#allocation20 + $0x560] ss:$36 sps:$4 sm:$0xff]   ;;  %v8656_v17 = vld [vmem:[#allocation20 + $0x5ac] ss:$36 sps:$4 sm:$0xff]  }
 0x237   :  { %2469 = vmatprep.subr.bf16.mxu0 %v8614_v18  ;;  %v8651_v18 = vld [vmem:[#allocation20 + $0x5a0] ss:$36 sps:$4 sm:$0xff]  }
 0x239   :  { %2384 = vmatpush1.bf16.msra.mxu1 %v8609_v19  ;;  %v8654_v19 = vld [vmem:[#allocation20 + $0x5a8] ss:$36 sps:$4 sm:$0xff]  }
 0x23a   :  { %2470 = vmatpush1.bf16.msra.mxu0 %v8612_v20  ;;  %2385 = vmatprep.subr.bf16.mxu1 %v8617_v21  ;;  %v8659_v20 = vld [vmem:[#allocation20 + $0x5ec] ss:$36 sps:$4 sm:$0xff]   ;;  %v8662_v21 = vld [vmem:[#allocation20 + $0x5f4] ss:$36 sps:$4 sm:$0xff]  }
 0x23b   :  { %2471 = vmatprep.subr.bf16.mxu0 %v8620_v22  ;;  %v8657_v22 = vld [vmem:[#allocation20 + $0x5e8] ss:$36 sps:$4 sm:$0xff]  }
 0x23d   :  { %2386 = vmatpush1.bf16.msra.mxu1 %v8615_v23  ;;  %v8660_v23 = vld [vmem:[#allocation20 + $0x5f0] ss:$36 sps:$4 sm:$0xff]  }
 0x23e   :  { %2472 = vmatpush1.bf16.msra.mxu0 %v8618_v24  ;;  %2387 = vmatprep.subr.bf16.mxu1 %v8623_v25  ;;  %v8665_v24 = vld [vmem:[#allocation20 + $0x634] ss:$36 sps:$4 sm:$0xff]   ;;  %v8668_v25 = vld [vmem:[#allocation20 + $0x63c] ss:$36 sps:$4 sm:$0xff]  }
 0x23f   :  { %2473 = vmatprep.subr.bf16.mxu0 %v8626_v26 }
 0x241   :  { %2388 = vmatpush1.bf16.msra.mxu1 %v8621_v27 }
 0x242   :  { %2474 = vmatpush1.bf16.msra.mxu0 %v8624_v28  ;;  %2400 = vmatprep.subr.bf16.mxu1 %v8629_v29  ;;  %v929_v28 = vrot.slane %v9783_v37, %v9672_v59  ;;  %v8663_v29 = vld [vmem:[#allocation20 + $0x630] ss:$36 sps:$4 sm:$0xff]  }
 0x243   :  { %2486 = vmatprep.subr.bf16.mxu0 %v8632_v30  ;;  %v8666_v30 = vld [vmem:[#allocation20 + $0x638] ss:$36 sps:$4 sm:$0xff]  }
 0x2a2   :  { %v878_v42 = vpop.xlane.xlu0 %877 }
 0x2a3   :  { %v881_v43 = vmul.f32 0.0026041667, %v878_v42 }
 0x2a5   :  { %v9751_v44 = vsub.f32 %v9731_v49, %v881_v43  ;;  %v9754_v45 = vsub.f32 %v9733_v50, %v881_v43  ;;  %v9770_v50 = vsub.f32 %v9726_v47, %v881_v43  ;;  %v921_v43 = vrot.slane %v9783_v37, %v9682_v2  ;;  %v8677_v37 = vld [vmem:[#allocation20 + $0x14] ss:$36 sps:$4 sm:$0xff]  }
 0x2a6   :  { %v870_v46 = vpop.xlane.xlu0 %869 }
 0x2a7   :  { %v880_v48 = vmul.f32 0.0026041667, %v870_v46  ;;  %v891_v51 = vmul.f32 %v9751_v44, %v9751_v44  ;;  %v892_v52 = vmul.f32 %v9754_v45, %v9754_v45 }
 0x2a9   :  { %v9761_v55 = vsub.f32 %v9737_v53, %v880_v48  ;;  %v9764_v56 = vsub.f32 %v9739_v54, %v880_v48  ;;  %v9767_v49 = vsub.f32 %v9745_v61, %v880_v48  ;;  %v898_v62 = vsel %vm871_vm3, %v891_v51, 0.0 }
 0x2aa   :  { %v899_v53 = vsel %vm871_vm3, %v892_v52, 0.0  ;;  %v893_v61 = vmul.f32 %v9770_v50, %v9770_v50  ;;  %v947_v48 = vrot.slane %v9787_v39, %v9685_v5  ;;  %v943_v51 = vrot.slane %v9787_v39, %v9682_v2 }
 0x2ab   :  { %v888_v57 = vmul.f32 %v9761_v55, %v9761_v55  ;;  %v889_v60 = vmul.f32 %v9764_v56, %v9764_v56  ;;  %v890_v54 = vmul.f32 %v9767_v49, %v9767_v49  ;;  %v900_v47 = vadd.f32 %v899_v53, %v898_v62 }
 0x2ac   :  { %v901_v1 = vsel %vm871_vm3, %v893_v61, 0.0 }
 0x2ad   :  { %v894_v63 = vadd.f32 %v889_v60, %v888_v57  ;;  %v902_v3 = vadd.f32 %v901_v1, %v900_v47  ;;  %v8630_v47 = vld [vmem:[#allocation20 + $0x488] ss:$36 sps:$4 sm:$0xff]  }
 0x2ae   :  { %v8635_v1 = vld [vmem:[#allocation20 + $0x4cc] ss:$36 sps:$4 sm:$0xff]  }
 0x2af   :  { %v895_v0 = vadd.f32 %v894_v63, %v890_v54 }
 0x2b1   :  { %896 = vadd.xlane.f32.xlu1 %v895_v0 }
 0x2b5   :  { %903 = vadd.xlane.f32.xlu1 %v902_v3  ;;  %v8638_v3 = vld [vmem:[#allocation20 + $0x4d4] ss:$36 sps:$4 sm:$0xff]  }
 0x33e   :  { %v897_v31 = vpop.xlane.xlu1 %896 }
 0x33f   :  { %v905_v32 = vmul.f32 0.0026041667, %v897_v31  ;;  %v8671_v31 = vld [vmem:[#allocation20 + $0x67c] ss:$36 sps:$4 sm:$0xff]  }
 0x341   :  { %v907_v33 = vadd.f32 1e-12, %v905_v32  ;;  %v8674_v32 = vld [vmem:[#allocation20 + $0x684] ss:$36 sps:$4 sm:$0xff]  }
 0x342   :  { %v904_v34 = vpop.xlane.xlu1 %903 }
 0x343   :  { %8939 = vrsqrt.f32 %v907_v33  ;;  %v906_v35 = vmul.f32 0.0026041667, %v904_v34 }
 0x345   :  { %v908_v36 = vadd.f32 1e-12, %v906_v35  ;;  %v951_v35 = vrot.slane %v9787_v39, %v9672_v59  ;;  %v8678_v39 = vld [vmem:[#allocation20 + $0x18] ss:$36 sps:$4 sm:$0xff]  }
 0x347   :  { %8941 = vrsqrt.f32 %v908_v36 }
 0x34d   :  { %v9785_v38 = vpop.eup %8939 }
 0x34e   :  { %v912_v40 = vmul.f32 %v9785_v38, %v9764_v56  ;;  %v911_v42 = vmul.f32 %v9785_v38, %v9761_v55  ;;  %v913_v27 = vmul.f32 %v9785_v38, %v9767_v49  ;;  %v8672_v49 = vld [vmem:[#allocation20 + $0x680] ss:$36 sps:$4 sm:$0xff]  }
 0x34f   :  { %v8680_v38 = vld [vmem:[#allocation20 + $0x1c] ss:$36 sps:$4 sm:$0xff]  }
 0x350   :  { %v934_v56 = vmul.f32 %v925_v41, %v912_v40  ;;  %v933_v60 = vmul.f32 %v921_v43, %v911_v42  ;;  %v935_v34 = vmul.f32 %v929_v28, %v913_v27  ;;  %v8732_v27 = vld [vmem:[#allocation20 + $0x2a0] ss:$36 sps:$4 sm:$0xff]  }
 0x351   :  { %v9797_v46 = vpop.eup %8941 }
 0x352   :  { %v915_v52 = vmul.f32 %v9797_v46, %v9754_v45  ;;  %v914_v57 = vmul.f32 %v9797_v46, %v9751_v44  ;;  %v9807_v53 = vadd.f32 %v947_v48, %v934_v56  ;;  %v9811_v63 = vadd.f32 %v943_v51, %v933_v60  ;;  %v8627_v45 = vld [vmem:[#allocation20 + $0x480] ss:$36 sps:$4 sm:$0xff]   ;;  %v8692_v56 = vld [vmem:[#allocation20 + $0xac] ss:$36 sps:$4 sm:$0xff]  }
 0x353   :  { %v916_v26 = vmul.f32 %v9797_v46, %v9770_v50  ;;  %v8669_v50 = vld [vmem:[#allocation20 + $0x678] ss:$36 sps:$4 sm:$0xff]   ;;  %v9839_v40 = vadd.f32 %v951_v35, %v935_v34  ;;  %v8686_v46 = vld [vmem:[#allocation20 + $0x64] ss:$36 sps:$4 sm:$0xff]  }
 0x354   :  { %v937_v55 = vmul.f32 %v925_v41, %v915_v52  ;;  %v936_v62 = vmul.f32 %v921_v43, %v914_v57  ;;  %v8675_v41 = vld [vmem:[#allocation20 + $0x10] ss:$36 sps:$4 sm:$0xff]   ;;  %v8683_v43 = vld [vmem:[#allocation20 + $0x5c] ss:$36 sps:$4 sm:$0xff]   ;;  %v8689_v52 = vld [vmem:[#allocation20 + $0xa4] ss:$36 sps:$4 sm:$0xff]  }
 0x355   :  { %v938_v33 = vmul.f32 %v929_v28, %v916_v26  ;;  %v8687_v57 = vld [vmem:[#allocation20 + $0xa0] ss:$36 sps:$4 sm:$0xff]   ;;  %v8690_v60 = vld [vmem:[#allocation20 + $0xa8] ss:$36 sps:$4 sm:$0xff]   ;;  %v8729_v26 = vld [vmem:[#allocation20 + $0x298] ss:$36 sps:$4 sm:$0xff]  }
 0x356   :  { %v9809_v54 = vadd.f32 %v947_v48, %v937_v55  ;;  %v9813_v61 = vadd.f32 %v943_v51, %v936_v62  ;;  %v8681_v48 = vld [vmem:[#allocation20 + $0x58] ss:$36 sps:$4 sm:$0xff]   ;;  %v8684_v51 = vld [vmem:[#allocation20 + $0x60] ss:$36 sps:$4 sm:$0xff]   ;;  %v8695_v55 = vld [vmem:[#allocation20 + $0xec] ss:$36 sps:$4 sm:$0xff]  }
 0x357   :  { %v9837_v36 = vadd.f32 %v951_v35, %v938_v33  ;;  %v8698_v62 = vld [vmem:[#allocation20 + $0xf4] ss:$36 sps:$4 sm:$0xff]   ;;  %v8737_v28 = vld [vmem:[#allocation20 + $0x2e4] ss:$36 sps:$4 sm:$0xff]  }
 0x358   :  { %v9817_v0 = vpack.c.bf16 %v9809_v54, %v9807_v53  ;;  %v9821_v44 = vpack.c.bf16 %v9813_v61, %v9811_v63  ;;  %v8746_v33 = vld [vmem:[#allocation20 + $0x334] ss:$36 sps:$4 sm:$0xff]   ;;  %v8741_v34 = vld [vmem:[#allocation20 + $0x328] ss:$36 sps:$4 sm:$0xff]  }
 0x359   :  { %v9843_v42 = vpack.c.bf16 %v9837_v36, %v9839_v40  ;;  %v8744_v35 = vld [vmem:[#allocation20 + $0x330] ss:$36 sps:$4 sm:$0xff]  }
 0x35a   :  { %2389 = vmatprep.mubr.bf16.mxu1 %v9817_v0  ;;  %2475 = vmatprep.mubr.bf16.mxu0 %v9817_v0 }
 0x35b   :  { %2390 = vmatmul.mubr.bf16.vlgmr.msra.gmra.mrb[4].mxu1 %v9821_v44  ;;  %2476 = vmatmul.mubr.bf16.vlgmr.msra.gmra.mrb[4].mxu0 %v9821_v44 }
 0x35c   :  { %2401 = vmatpush1.bf16.msra.mxu1 %v8627_v45  ;;  %2487 = vmatpush1.bf16.msra.mxu0 %v8630_v47  ;;  %v8693_v45 = vld [vmem:[#allocation20 + $0xe8] ss:$36 sps:$4 sm:$0xff]   ;;  %v8696_v47 = vld [vmem:[#allocation20 + $0xf0] ss:$36 sps:$4 sm:$0xff]  }
 0x35d   :  { %2402 = vmatprep.subr.bf16.mxu1 %v8635_v1  ;;  %2488 = vmatprep.subr.bf16.mxu0 %v8638_v3  ;;  %v8701_v1 = vld [vmem:[#allocation20 + $0x134] ss:$36 sps:$4 sm:$0xff]   ;;  %v8704_v3 = vld [vmem:[#allocation20 + $0x13c] ss:$36 sps:$4 sm:$0xff]  }
 0x35e   :  { %2432 = vmatprep.mubr.bf16.mxu1 %v9368_v9  ;;  %2518 = vmatprep.mubr.bf16.mxu0 %v9368_v9 }
 0x360   :  { %2403 = vmatpush1.bf16.msra.mxu1 %v8633_v4  ;;  %2489 = vmatpush1.bf16.msra.mxu0 %v8636_v6  ;;  %v8699_v4 = vld [vmem:[#allocation20 + $0x130] ss:$36 sps:$4 sm:$0xff]   ;;  %v8702_v6 = vld [vmem:[#allocation20 + $0x138] ss:$36 sps:$4 sm:$0xff]  }
 0x361   :  { %2404 = vmatprep.subr.bf16.mxu1 %v8641_v7  ;;  %2490 = vmatprep.subr.bf16.mxu0 %v8644_v8  ;;  %v8707_v7 = vld [vmem:[#allocation20 + $0x17c] ss:$36 sps:$4 sm:$0xff]   ;;  %v8710_v8 = vld [vmem:[#allocation20 + $0x184] ss:$36 sps:$4 sm:$0xff]  }
 0x364   :  { %2405 = vmatpush1.bf16.msra.mxu1 %v8639_v10  ;;  %2491 = vmatpush1.bf16.msra.mxu0 %v8642_v11  ;;  %v8705_v10 = vld [vmem:[#allocation20 + $0x178] ss:$36 sps:$4 sm:$0xff]   ;;  %v8708_v11 = vld [vmem:[#allocation20 + $0x180] ss:$36 sps:$4 sm:$0xff]  }
 0x365   :  { %2406 = vmatprep.subr.bf16.mxu1 %v8647_v12  ;;  %2492 = vmatprep.subr.bf16.mxu0 %v8650_v13  ;;  %v8713_v12 = vld [vmem:[#allocation20 + $0x1c4] ss:$36 sps:$4 sm:$0xff]   ;;  %v8716_v13 = vld [vmem:[#allocation20 + $0x1cc] ss:$36 sps:$4 sm:$0xff]  }
 0x368   :  { %2407 = vmatpush1.bf16.msra.mxu1 %v8645_v14  ;;  %2493 = vmatpush1.bf16.msra.mxu0 %v8648_v15  ;;  %v8711_v14 = vld [vmem:[#allocation20 + $0x1c0] ss:$36 sps:$4 sm:$0xff]   ;;  %v8714_v15 = vld [vmem:[#allocation20 + $0x1c8] ss:$36 sps:$4 sm:$0xff]  }
 0x369   :  { %2408 = vmatprep.subr.bf16.mxu1 %v8653_v16  ;;  %2494 = vmatprep.subr.bf16.mxu0 %v8656_v17  ;;  %v8719_v16 = vld [vmem:[#allocation20 + $0x20c] ss:$36 sps:$4 sm:$0xff]   ;;  %v8722_v17 = vld [vmem:[#allocation20 + $0x214] ss:$36 sps:$4 sm:$0xff]  }
 0x36c   :  { %2409 = vmatpush1.bf16.msra.mxu1 %v8651_v18  ;;  %2495 = vmatpush1.bf16.msra.mxu0 %v8654_v19  ;;  %v8717_v18 = vld [vmem:[#allocation20 + $0x208] ss:$36 sps:$4 sm:$0xff]   ;;  %v8720_v19 = vld [vmem:[#allocation20 + $0x210] ss:$36 sps:$4 sm:$0xff]  }
 0x36d   :  { %2410 = vmatprep.subr.bf16.mxu1 %v8659_v20  ;;  %2496 = vmatprep.subr.bf16.mxu0 %v8662_v21  ;;  %v8725_v20 = vld [vmem:[#allocation20 + $0x254] ss:$36 sps:$4 sm:$0xff]   ;;  %v8728_v21 = vld [vmem:[#allocation20 + $0x25c] ss:$36 sps:$4 sm:$0xff]  }
 0x370   :  { %2411 = vmatpush1.bf16.msra.mxu1 %v8657_v22  ;;  %2497 = vmatpush1.bf16.msra.mxu0 %v8660_v23  ;;  %v8723_v22 = vld [vmem:[#allocation20 + $0x250] ss:$36 sps:$4 sm:$0xff]   ;;  %v8726_v23 = vld [vmem:[#allocation20 + $0x258] ss:$36 sps:$4 sm:$0xff]  }
 0x371   :  { %2412 = vmatprep.subr.bf16.mxu1 %v8665_v24  ;;  %2498 = vmatprep.subr.bf16.mxu0 %v8668_v25  ;;  %v8731_v24 = vld [vmem:[#allocation20 + $0x29c] ss:$36 sps:$4 sm:$0xff]   ;;  %v8734_v25 = vld [vmem:[#allocation20 + $0x2a4] ss:$36 sps:$4 sm:$0xff]  }
 0x374   :  { %2413 = vmatpush1.bf16.msra.mxu1 %v8663_v29  ;;  %2499 = vmatpush1.bf16.msra.mxu0 %v8666_v30  ;;  %v8740_v29 = vld [vmem:[#allocation20 + $0x2ec] ss:$36 sps:$4 sm:$0xff]   ;;  %v8735_v30 = vld [vmem:[#allocation20 + $0x2e0] ss:$36 sps:$4 sm:$0xff]  }
 0x375   :  { %2414 = vmatprep.subr.bf16.mxu1 %v8671_v31  ;;  %2500 = vmatprep.subr.bf16.mxu0 %v8674_v32  ;;  %v8738_v31 = vld [vmem:[#allocation20 + $0x2e8] ss:$36 sps:$4 sm:$0xff]  }
 0x376   :  { %v8743_v32 = vld [vmem:[#allocation20 + $0x32c] ss:$36 sps:$4 sm:$0xff]  }
 0x378   :  { %2415 = vmatpush1.bf16.msra.mxu1 %v8669_v50  ;;  %2501 = vmatpush1.bf16.msra.mxu0 %v8672_v49  ;;  %v8749_v50 = vld [vmem:[#allocation20 + $0x374] ss:$36 sps:$4 sm:$0xff]   ;;  %v8752_v49 = vld [vmem:[#allocation20 + $0x37c] ss:$36 sps:$4 sm:$0xff]  }
 0x379   :  { %2529 = vmatprep.subr.bf16.mxu1 %v8677_v37  ;;  %2615 = vmatprep.subr.bf16.mxu0 %v8680_v38  ;;  %v8747_v37 = vld [vmem:[#allocation20 + $0x370] ss:$36 sps:$4 sm:$0xff]   ;;  %v8750_v38 = vld [vmem:[#allocation20 + $0x378] ss:$36 sps:$4 sm:$0xff]  }
 0x37b   :  { %2433 = vmatmul.mubr.bf16.vlgmr.msra.gmra.mrb[4].mxu1 %v9843_v42  ;;  %2519 = vmatmul.mubr.bf16.vlgmr.msra.gmra.mrb[4].mxu0 %v9843_v42 }
 0x37c   :  { %2530 = vmatpush1.bf16.msra.mxu1 %v8675_v41  ;;  %2561 = vmatprep.mubr.bf16.mxu1 %v9817_v0  ;;  %v8755_v41 = vld [vmem:[#allocation20 + $0x3bc] ss:$36 sps:$4 sm:$0xff]  }
 0x37d   :  { %2616 = vmatpush1.bf16.msra.mxu0 %v8678_v39  ;;  %2647 = vmatprep.mubr.bf16.mxu0 %v9817_v0  ;;  %v8758_v39 = vld [vmem:[#allocation20 + $0x3c4] ss:$36 sps:$4 sm:$0xff]  }
 0x37e   :  { %2531 = vmatprep.subr.bf16.mxu1 %v8683_v43  ;;  %2617 = vmatprep.subr.bf16.mxu0 %v8686_v46  ;;  %v8753_v43 = vld [vmem:[#allocation20 + $0x3b8] ss:$36 sps:$4 sm:$0xff]   ;;  %v8756_v46 = vld [vmem:[#allocation20 + $0x3c0] ss:$36 sps:$4 sm:$0xff]  }
 0x380   :  { %2532 = vmatpush1.bf16.msra.mxu1 %v8681_v48  ;;  %v8761_v48 = vld [vmem:[#allocation20 + $0x404] ss:$36 sps:$4 sm:$0xff]  }
 0x381   :  { %2618 = vmatpush1.bf16.msra.mxu0 %v8684_v51  ;;  %2533 = vmatprep.subr.bf16.mxu1 %v8689_v52  ;;  %v8764_v51 = vld [vmem:[#allocation20 + $0x40c] ss:$36 sps:$4 sm:$0xff]   ;;  %v8759_v52 = vld [vmem:[#allocation20 + $0x400] ss:$36 sps:$4 sm:$0xff]  }
 0x382   :  { %2619 = vmatprep.subr.bf16.mxu0 %v8692_v56  ;;  %v8762_v56 = vld [vmem:[#allocation20 + $0x408] ss:$36 sps:$4 sm:$0xff]  }
 0x384   :  { %2534 = vmatpush1.bf16.msra.mxu1 %v8687_v57  ;;  %v8767_v57 = vld [vmem:[#allocation20 + $0x44c] ss:$36 sps:$4 sm:$0xff]  }
 0x385   :  { %2620 = vmatpush1.bf16.msra.mxu0 %v8690_v60  ;;  %2535 = vmatprep.subr.bf16.mxu1 %v8695_v55  ;;  %v8770_v60 = vld [vmem:[#allocation20 + $0x454] ss:$36 sps:$4 sm:$0xff]   ;;  %v8765_v55 = vld [vmem:[#allocation20 + $0x448] ss:$36 sps:$4 sm:$0xff]  }
 0x386   :  { %2621 = vmatprep.subr.bf16.mxu0 %v8698_v62  ;;  %v8768_v62 = vld [vmem:[#allocation20 + $0x450] ss:$36 sps:$4 sm:$0xff]  }
 0x388   :  { %2536 = vmatpush1.bf16.msra.mxu1 %v8693_v45  ;;  %v8773_v45 = vld [vmem:[#allocation20 + $0x494] ss:$36 sps:$4 sm:$0xff]  }
 0x389   :  { %2622 = vmatpush1.bf16.msra.mxu0 %v8696_v47  ;;  %2537 = vmatprep.subr.bf16.mxu1 %v8701_v1  ;;  %v8776_v47 = vld [vmem:[#allocation20 + $0x49c] ss:$36 sps:$4 sm:$0xff]   ;;  %v8771_v1 = vld [vmem:[#allocation20 + $0x490] ss:$36 sps:$4 sm:$0xff]  }
 0x38a   :  { %2623 = vmatprep.subr.bf16.mxu0 %v8704_v3  ;;  %v8774_v3 = vld [vmem:[#allocation20 + $0x498] ss:$36 sps:$4 sm:$0xff]  }
 0x38c   :  { %2538 = vmatpush1.bf16.msra.mxu1 %v8699_v4  ;;  %v8779_v4 = vld [vmem:[#allocation20 + $0x4dc] ss:$36 sps:$4 sm:$0xff]  }
 0x38d   :  { %2624 = vmatpush1.bf16.msra.mxu0 %v8702_v6  ;;  %2539 = vmatprep.subr.bf16.mxu1 %v8707_v7  ;;  %v8782_v6 = vld [vmem:[#allocation20 + $0x4e4] ss:$36 sps:$4 sm:$0xff]   ;;  %v8777_v7 = vld [vmem:[#allocation20 + $0x4d8] ss:$36 sps:$4 sm:$0xff]  }
 0x38e   :  { %2625 = vmatprep.subr.bf16.mxu0 %v8710_v8  ;;  %v8780_v8 = vld [vmem:[#allocation20 + $0x4e0] ss:$36 sps:$4 sm:$0xff]  }
 0x390   :  { %2540 = vmatpush1.bf16.msra.mxu1 %v8705_v10  ;;  %v8785_v10 = vld [vmem:[#allocation20 + $0x524] ss:$36 sps:$4 sm:$0xff]  }
 0x391   :  { %2626 = vmatpush1.bf16.msra.mxu0 %v8708_v11  ;;  %2541 = vmatprep.subr.bf16.mxu1 %v8713_v12  ;;  %v8788_v11 = vld [vmem:[#allocation20 + $0x52c] ss:$36 sps:$4 sm:$0xff]   ;;  %v8783_v12 = vld [vmem:[#allocation20 + $0x520] ss:$36 sps:$4 sm:$0xff]  }
 0x392   :  { %2627 = vmatprep.subr.bf16.mxu0 %v8716_v13  ;;  %v8786_v13 = vld [vmem:[#allocation20 + $0x528] ss:$36 sps:$4 sm:$0xff]  }
 0x394   :  { %2542 = vmatpush1.bf16.msra.mxu1 %v8711_v14  ;;  %v8791_v14 = vld [vmem:[#allocation20 + $0x56c] ss:$36 sps:$4 sm:$0xff]  }
 0x395   :  { %2628 = vmatpush1.bf16.msra.mxu0 %v8714_v15  ;;  %2543 = vmatprep.subr.bf16.mxu1 %v8719_v16  ;;  %v8794_v15 = vld [vmem:[#allocation20 + $0x574] ss:$36 sps:$4 sm:$0xff]   ;;  %v8789_v16 = vld [vmem:[#allocation20 + $0x568] ss:$36 sps:$4 sm:$0xff]  }
 0x396   :  { %2629 = vmatprep.subr.bf16.mxu0 %v8722_v17  ;;  %v8792_v17 = vld [vmem:[#allocation20 + $0x570] ss:$36 sps:$4 sm:$0xff]  }
 0x398   :  { %2544 = vmatpush1.bf16.msra.mxu1 %v8717_v18  ;;  %v8797_v18 = vld [vmem:[#allocation20 + $0x5b4] ss:$36 sps:$4 sm:$0xff]  }
 0x399   :  { %2630 = vmatpush1.bf16.msra.mxu0 %v8720_v19  ;;  %2545 = vmatprep.subr.bf16.mxu1 %v8725_v20  ;;  %v8800_v19 = vld [vmem:[#allocation20 + $0x5bc] ss:$36 sps:$4 sm:$0xff]   ;;  %v8795_v20 = vld [vmem:[#allocation20 + $0x5b0] ss:$36 sps:$4 sm:$0xff]  }
 0x39a   :  { %2631 = vmatprep.subr.bf16.mxu0 %v8728_v21  ;;  %v8798_v21 = vld [vmem:[#allocation20 + $0x5b8] ss:$36 sps:$4 sm:$0xff]  }
 0x39c   :  { %2546 = vmatpush1.bf16.msra.mxu1 %v8723_v22  ;;  %v8803_v22 = vld [vmem:[#allocation20 + $0x5fc] ss:$36 sps:$4 sm:$0xff]  }
 0x39d   :  { %2632 = vmatpush1.bf16.msra.mxu0 %v8726_v23  ;;  %2547 = vmatprep.subr.bf16.mxu1 %v8731_v24  ;;  %v8806_v23 = vld [vmem:[#allocation20 + $0x604] ss:$36 sps:$4 sm:$0xff]   ;;  %v8801_v24 = vld [vmem:[#allocation20 + $0x5f8] ss:$36 sps:$4 sm:$0xff]  }
 0x39e   :  { %2633 = vmatprep.subr.bf16.mxu0 %v8734_v25  ;;  %v8804_v25 = vld [vmem:[#allocation20 + $0x600] ss:$36 sps:$4 sm:$0xff]  }
 0x3a0   :  { %2548 = vmatpush1.bf16.msra.mxu1 %v8729_v26  ;;  %v8809_v26 = vld [vmem:[#allocation20 + $0x644] ss:$36 sps:$4 sm:$0xff]  }
 0x3a1   :  { %2634 = vmatpush1.bf16.msra.mxu0 %v8732_v27  ;;  %2549 = vmatprep.subr.bf16.mxu1 %v8737_v28  ;;  %v8812_v27 = vld [vmem:[#allocation20 + $0x64c] ss:$36 sps:$4 sm:$0xff]   ;;  %v8807_v28 = vld [vmem:[#allocation20 + $0x640] ss:$36 sps:$4 sm:$0xff]  }
 0x3a2   :  { %2635 = vmatprep.subr.bf16.mxu0 %v8740_v29  ;;  %v8810_v29 = vld [vmem:[#allocation20 + $0x648] ss:$36 sps:$4 sm:$0xff]  }
 0x3a4   :  { %2550 = vmatpush1.bf16.msra.mxu1 %v8735_v30  ;;  %v8815_v30 = vld [vmem:[#allocation20 + $0x68c] ss:$36 sps:$4 sm:$0xff]  }
 0x3a5   :  { %2636 = vmatpush1.bf16.msra.mxu0 %v8738_v31  ;;  %2551 = vmatprep.subr.bf16.mxu1 %v8743_v32  ;;  %v8818_v31 = vld [vmem:[#allocation20 + $0x694] ss:$36 sps:$4 sm:$0xff]   ;;  %v8813_v32 = vld [vmem:[#allocation20 + $0x688] ss:$36 sps:$4 sm:$0xff]  }
 0x3a6   :  { %2637 = vmatprep.subr.bf16.mxu0 %v8746_v33  ;;  %v8816_v33 = vld [vmem:[#allocation20 + $0x690] ss:$36 sps:$4 sm:$0xff]  }
 0x3a8   :  { %2552 = vmatpush1.bf16.msra.mxu1 %v8741_v34  ;;  %v8819_v34 = vld [vmem:[#allocation20 + $0x260] ss:$36 sps:$4 sm:$0xff]  }
 0x3a9   :  { %2638 = vmatpush1.bf16.msra.mxu0 %v8744_v35  ;;  %2553 = vmatprep.subr.bf16.mxu1 %v8749_v50  ;;  %v8820_v35 = vld [vmem:[#allocation20 + $0x20] ss:$36 sps:$4 sm:$0xff]  }
 0x3aa   :  { %2639 = vmatprep.subr.bf16.mxu0 %v8752_v49  ;;  %v8821_v50 = vld [vmem:[#allocation20 + $0x4a0] ss:$36 sps:$4 sm:$0xff]   ;;  %v9369_v49 = vmov 0.0  }
 0x3ac   :  { %2554 = vmatpush1.bf16.msra.mxu1 %v8747_v37  ;;  %v8822_v37 = vld [vmem:[#allocation20 + $0x2a8] ss:$36 sps:$4 sm:$0xff]  }
 0x3ad   :  { %2640 = vmatpush1.bf16.msra.mxu0 %v8750_v38  ;;  %2555 = vmatprep.subr.bf16.mxu1 %v8755_v41  ;;  %v8823_v38 = vld [vmem:[#allocation20 + $0x68] ss:$36 sps:$4 sm:$0xff]  }
 0x3ae   :  { %2641 = vmatprep.subr.bf16.mxu0 %v8758_v39  ;;  %v8824_v41 = vld [vmem:[#allocation20 + $0x4e8] ss:$36 sps:$4 sm:$0xff]   ;;  %v8825_v39 = vld [vmem:[#allocation20 + $0x2f0] ss:$36 sps:$4 sm:$0xff]  }
 0x3b0   :  { %2556 = vmatpush1.bf16.msra.mxu1 %v8753_v43  ;;  %v8826_v43 = vld [vmem:[#allocation20 + $0xb0] ss:$36 sps:$4 sm:$0xff]  }
 0x3b1   :  { %2642 = vmatpush1.bf16.msra.mxu0 %v8756_v46  ;;  %2557 = vmatprep.subr.bf16.mxu1 %v8761_v48  ;;  %v8827_v46 = vld [vmem:[#allocation20 + $0x530] ss:$36 sps:$4 sm:$0xff]   ;;  %v8828_v48 = vld [vmem:[#allocation20 + $0x338] ss:$36 sps:$4 sm:$0xff]  }
 0x3b2   :  { %2643 = vmatprep.subr.bf16.mxu0 %v8764_v51  ;;  %v8830_v51 = vld [vmem:[#allocation20 + $0x578] ss:$36 sps:$4 sm:$0xff]  }
 0x3b4   :  { %2558 = vmatpush1.bf16.msra.mxu1 %v8759_v52  ;;  %v8831_v52 = vld [vmem:[#allocation20 + $0x380] ss:$36 sps:$4 sm:$0xff]  }
 0x3b5   :  { %2644 = vmatpush1.bf16.msra.mxu0 %v8762_v56  ;;  %2559 = vmatprep.subr.bf16.mxu1 %v8767_v57  ;;  %v8832_v56 = vld [vmem:[#allocation20 + $0x140] ss:$36 sps:$4 sm:$0xff]  }
 0x3b6   :  { %2645 = vmatprep.subr.bf16.mxu0 %v8770_v60  ;;  %v8833_v57 = vld [vmem:[#allocation20 + $0x5c0] ss:$36 sps:$4 sm:$0xff]   ;;  %v8834_v60 = vld [vmem:[#allocation20 + $0x3c8] ss:$36 sps:$4 sm:$0xff]  }
 0x3b8   :  { %2560 = vmatpush1.bf16.msra.mxu1 %v8765_v55  ;;  %v8835_v55 = vld [vmem:[#allocation20 + $0x188] ss:$36 sps:$4 sm:$0xff]  }
 0x3b9   :  { %2646 = vmatpush1.bf16.msra.mxu0 %v8768_v62  ;;  %2572 = vmatprep.subr.bf16.mxu1 %v8773_v45  ;;  %v8836_v62 = vld [vmem:[#allocation20 + $0x608] ss:$36 sps:$4 sm:$0xff]   ;;  %v8837_v45 = vld [vmem:[#allocation20 + $0x410] ss:$36 sps:$4 sm:$0xff]  }
 0x3ba   :  { %2658 = vmatprep.subr.bf16.mxu0 %v8776_v47  ;;  %v8838_v47 = vld [vmem:[#allocation20 + $0x1d0] ss:$36 sps:$4 sm:$0xff]  }
 0x3bb   :  { %2562 = vmatmul.mubr.bf16.vlgmr.msra.gmra.mrb[8].mxu1 %v9821_v44 }
 0x3bc   :  { %2648 = vmatmul.mubr.bf16.vlgmr.msra.gmra.mrb[8].mxu0 %v9821_v44  ;;  %2573 = vmatpush1.bf16.msra.mxu1 %v8771_v1  ;;  %v8839_v1 = vld [vmem:[#allocation20 + $0x650] ss:$36 sps:$4 sm:$0xff]  }
 0x3bd   :  { %2659 = vmatpush1.bf16.msra.mxu0 %v8774_v3  ;;  %2574 = vmatprep.subr.bf16.mxu1 %v8779_v4  ;;  %v8840_v3 = vld [vmem:[#allocation20 + $0x458] ss:$36 sps:$4 sm:$0xff]  }
 0x3be   :  { %2660 = vmatprep.subr.bf16.mxu0 %v8782_v6  ;;  %2604 = vmatprep.mubr.bf16.mxu1 %v9368_v9  ;;  %v8841_v4 = vld [vmem:[#allocation20 + $0x218] ss:$36 sps:$4 sm:$0xff]  }
 0x3bf   :  { %2690 = vmatprep.mubr.bf16.mxu0 %v9368_v9  ;;  %v8842_v6 = vld [vmem:[#allocation20 + $0x698] ss:$36 sps:$4 sm:$0xff]  }
 0x3c0   :  { %2575 = vmatpush1.bf16.msra.mxu1 %v8777_v7  ;;  %v1204_v7 = vld [vmem:[#allocation21] sm:$0xff] }
 0x3c1   :  { %2661 = vmatpush1.bf16.msra.mxu0 %v8780_v8  ;;  %2576 = vmatprep.subr.bf16.mxu1 %v8785_v10  ;;  %v9869_v8 = vsub.s32 3, %v9669_v58  ;;  %v1211_v10 = vrot.slane %v1204_v7, %v9682_v2 }
 0x3c2   :  { %2662 = vmatprep.subr.bf16.mxu0 %v8788_v11  ;;  %v1219_v11 = vrot.slane %v1204_v7, %v9672_v59 }
 0x3c4   :  { %2577 = vmatpush1.bf16.msra.mxu1 %v8783_v12 }
 0x3c5   :  { %2663 = vmatpush1.bf16.msra.mxu0 %v8786_v13  ;;  %2578 = vmatprep.subr.bf16.mxu1 %v8791_v14  ;;  %v1223_v14 = vrot.slane %v1204_v7, %v9869_v8 }
 0x3c6   :  { %2664 = vmatprep.subr.bf16.mxu0 %v8794_v15 }
 0x3c8   :  { %2579 = vmatpush1.bf16.msra.mxu1 %v8789_v16 }
 0x3c9   :  { %2665 = vmatpush1.bf16.msra.mxu0 %v8792_v17  ;;  %2580 = vmatprep.subr.bf16.mxu1 %v8797_v18 }
 0x3ca   :  { %2666 = vmatprep.subr.bf16.mxu0 %v8800_v19 }
 0x3cc   :  { %2581 = vmatpush1.bf16.msra.mxu1 %v8795_v20 }
 0x3cd   :  { %2667 = vmatpush1.bf16.msra.mxu0 %v8798_v21  ;;  %2582 = vmatprep.subr.bf16.mxu1 %v8803_v22 }
 0x3ce   :  { %2668 = vmatprep.subr.bf16.mxu0 %v8806_v23 }
 0x3d0   :  { %2583 = vmatpush1.bf16.msra.mxu1 %v8801_v24 }
 0x3d1   :  { %2669 = vmatpush1.bf16.msra.mxu0 %v8804_v25  ;;  %2584 = vmatprep.subr.bf16.mxu1 %v8809_v26 }
 0x3d2   :  { %2670 = vmatprep.subr.bf16.mxu0 %v8812_v27 }
 0x3d4   :  { %2585 = vmatpush1.bf16.msra.mxu1 %v8807_v28 }
 0x3d5   :  { %2671 = vmatpush1.bf16.msra.mxu0 %v8810_v29  ;;  %2586 = vmatprep.subr.bf16.mxu1 %v8815_v30 }
 0x3d6   :  { %2672 = vmatprep.subr.bf16.mxu0 %v8818_v31 }
 0x3d8   :  { %2587 = vmatpush1.bf16.msra.mxu1 %v8813_v32 }
 0x3d9   :  { %2673 = vmatpush1.bf16.msra.mxu0 %v8816_v33  ;;  %7657 = vmatprep.subr.bf16.mxu1 %v8819_v34 }
 0x3da   :  { %7982 = vmatprep.subr.bf16.mxu0 %v9369_v49 }
 0x3db   :  { %2605 = vmatmul.mubr.bf16.vlgmr.msra.gmra.mrb[8].mxu1 %v9843_v42 }
 0x3dc   :  { %2691 = vmatmul.mubr.bf16.vlgmr.msra.gmra.mrb[8].mxu0 %v9843_v42  ;;  %7658 = vmatpush3.bf16.msra.mxu1 %v8820_v35  ;;  %v1226_v35 = vsub.s32 4, %v9669_v58 }
 0x3dd   :  { %2733 = vmatprep.mubr.bf16.mxu1 %v9817_v0  ;;  %7983 = vmatpush3.bf16.msra.mxu0 %v8821_v50  ;;  %v8829_v0 = vld [vmem:[#allocation20 + $0xf8] ss:$36 sps:$4 sm:$0xff]   ;;  %v1234_v50 = vsub.s32 6, %v9669_v58 }
 0x3de   :  { %7659 = vmatprep.subr.bf16.mxu1 %v8822_v37  ;;  %7984 = vmatprep.subr.bf16.mxu0 %v9369_v49  ;;  %v1230_v37 = vsub.s32 5, %v9669_v58 }
 0x3df   :  { %7998 = vmatprep.mubr.msk.bf16.mxu0 %vm9370_vm4, %v9369_v49 }
 0x3e0   :  { %7660 = vmatpush3.bf16.msra.mxu1 %v8823_v38  ;;  %v1238_v38 = vsub.s32 7, %v9669_v58 }
 0x3e1   :  { %7985 = vmatpush3.bf16.msra.mxu0 %v8824_v41  ;;  %7661 = vmatprep.subr.bf16.mxu1 %v8825_v39  ;;  %v1227_v41 = vrot.slane %v1204_v7, %v1226_v35 }
 0x3e2   :  { %7986 = vmatprep.subr.bf16.mxu0 %v9369_v49 }
 0x3e4   :  { %7662 = vmatpush3.bf16.msra.mxu1 %v8826_v43  ;;  %v1235_v43 = vrot.slane %v1204_v7, %v1234_v50 }
 0x3e5   :  { %7987 = vmatpush3.bf16.msra.mxu0 %v8827_v46  ;;  %7663 = vmatprep.subr.bf16.mxu1 %v8828_v48  ;;  %v1231_v46 = vrot.slane %v1204_v7, %v1230_v37 }
 0x3e6   :  { %7988 = vmatprep.subr.bf16.mxu0 %v9369_v49 }
 0x3e8   :  { %7664 = vmatpush3.bf16.msra.mxu1 %v8829_v0 }
 0x3e9   :  { %7989 = vmatpush3.bf16.msra.mxu0 %v8830_v51  ;;  %7665 = vmatprep.subr.bf16.mxu1 %v8831_v52  ;;  %v1239_v51 = vrot.slane %v1204_v7, %v1238_v38 }
 0x3ea   :  { %7990 = vmatprep.subr.bf16.mxu0 %v9369_v49 }
 0x3ec   :  { %7666 = vmatpush3.bf16.msra.mxu1 %v8832_v56 }
 0x3ed   :  { %7991 = vmatpush3.bf16.msra.mxu0 %v8833_v57  ;;  %7667 = vmatprep.subr.bf16.mxu1 %v8834_v60 }
 0x3ee   :  { %7992 = vmatprep.subr.bf16.mxu0 %v9369_v49 }
 0x3f0   :  { %7668 = vmatpush3.bf16.msra.mxu1 %v8835_v55 }
 0x3f1   :  { %7993 = vmatpush3.bf16.msra.mxu0 %v8836_v62  ;;  %7669 = vmatprep.subr.bf16.mxu1 %v8837_v45 }
 0x3f2   :  { %7994 = vmatprep.subr.bf16.mxu0 %v9369_v49 }
 0x3f4   :  { %7670 = vmatpush3.bf16.msra.mxu1 %v8838_v47 }
 0x3f5   :  { %7995 = vmatpush3.bf16.msra.mxu0 %v8839_v1  ;;  %7671 = vmatprep.subr.bf16.mxu1 %v8840_v3 }
 0x3f6   :  { %7996 = vmatprep.subr.bf16.mxu0 %v9369_v49 }
 0x3f8   :  { %7672 = vmatpush3.bf16.msra.mxu1 %v8841_v4 }
 0x3f9   :  { %7997 = vmatpush3.bf16.msra.mxu0 %v8842_v6 }
 0x3fb   :  { %2734 = vmatmul.mubr.bf16.vlgmr.msra.gmra.mrb[12].mxu1 %v9821_v44  ;;  %v1215_v44 = vrot.slane %v1204_v7, %v9685_v5 }
 0x3fc   :  { %7999 = vmatmul.mubr.bf16.vlgmr.msra.gmra.mrb[12].mxu0 %v9843_v42 }
 0x44e   :  { %v2434_v12 = vpop.f32.mrb[4].mxu1  ;;  %v2520_v13 = vpop.f32.mrb[4].mxu0 }
 0x44f   :  { %v8289_v15 = vadd.f32 %v2434_v12, %v1211_v10  ;;  %v8293_v16 = vadd.f32 %v2520_v13, %v1219_v11  ;;  %v2436_v17 = vpop.f32.mrb[5].mxu1  ;;  %v2522_v18 = vpop.f32.mrb[5].mxu0 }
 0x450   :  { %v2438_v19 = vpop.f32.mrb[6].mxu1  ;;  %v2524_v42 = vpop.f32.mrb[6].mxu0  ;;  %v8294_v26 = vadd.f32 %v2522_v18, %v1223_v14  ;;  %v8290_v30 = vadd.f32 %v2436_v17, %v1215_v44  ;;  %v8846_v18 = vld [vmem:[#allocation23 + $0x18] ss:$12 sps:$4 sm:$0xff]  }
 0x451   :  { %v2783_v20 = vmul.f32 0.125, %v8289_v15  ;;  %v9875_v21 = vmul.f32 0.125, %v8293_v16  ;;  %v8291_v22 = vadd.f32 %v2438_v19, %v1211_v10  ;;  %v8295_v23 = vadd.f32 %v2524_v42, %v1219_v11  ;;  %v2440_v24 = vpop.f32.mrb[7].mxu1  ;;  %v2526_v25 = vpop.f32.mrb[7].mxu0 }
 0x452   :  { %v8292_v27 = vadd.f32 %v2440_v24, %v1215_v44  ;;  %v8296_v28 = vadd.f32 %v2526_v25, %v1223_v14  ;;  %v9893_v34 = vmul.f32 0.125, %v8290_v30 }
 0x453   :  { %2791 = vrot.lane.b32.xlu1 %v2783_v20, %s9353_s30  ;;  %8006 = vmatprep.mubr.msk.f32.mxu1 %vm2846_vm5, %v2783_v20  ;;  %v2786_v33 = vmul.f32 0.125, %v8291_v22  ;;  %v2788_v19 = vmul.f32 0.125, %v8295_v23 }
 0x454   :  { %v8422_v31 = vpack.i.bf16 %v8296_v28, %v8294_v26  ;;  %v8161_v32 = vpack.c.bf16 %v8296_v28, %v8294_v26  ;;  %8034 = vmatprep.mubr.msk.f32.mxu0 %vm2846_vm5, %v9875_v21  ;;  %v2787_v44 = vmul.f32 0.125, %v8292_v27  ;;  %v7301_v26 = vld [vmem:[#allocation21 + $0x8] ss:$0 sm:$0xff] }
 0x456   :  { %8423 = vrot.lane.b32.xlu0 %v8422_v31, %s9353_s30  ;;  %8163 = vmatprep.subr.msk.bf16.mxu1 %vm9881_vm6, %v8161_v32 }
 0x457   :  { %2793 = vrot.lane.b32.xlu1 %v2786_v33, %s9353_s30  ;;  %8166 = vmatpush3.bf16.xpose.msk.msra.mxu1 %vm9881_vm6, %v8161_v32 }
 0x45a   :  { %2797 = vrot.lane.b32.xlu0 %v9893_v34, %s9353_s30 }
 0x45e   :  { %8007 = vmatmul.mubr.msk.f32.vlgmr.msra.gmra.mrb[16].mxu1 %vm2846_vm5, %v2786_v33 }
 0x4ae   :  { %v2606_v39 = vpop.f32.mrb[8].mxu1 }
 0x4af   :  { %v2692_v48 = vpop.f32.mrb[8].mxu0  ;;  %v2608_v0 = vpop.f32.mrb[9].mxu1  ;;  %v8297_v57 = vadd.f32 %v2606_v39, %v1227_v41 }
 0x4b0   :  { %v2694_v52 = vpop.f32.mrb[9].mxu0  ;;  %v2610_v56 = vpop.f32.mrb[10].mxu1  ;;  %v9910_v45 = vadd.f32 %v2692_v48, %v1235_v43  ;;  %v8298_v47 = vadd.f32 %v2608_v0, %v1231_v46 }
 0x4b1   :  { %v8299_v60 = vadd.f32 %v2610_v56, %v1227_v41  ;;  %v2696_v55 = vpop.f32.mrb[10].mxu0  ;;  %v2612_v62 = vpop.f32.mrb[11].mxu1  ;;  %v9914_v6 = vadd.f32 %v2694_v52, %v1239_v51 }
 0x4b2   :  { %v9912_v1 = vadd.f32 %v2696_v55, %v1235_v43  ;;  %v8300_v3 = vadd.f32 %v2612_v62, %v1231_v46  ;;  %v2698_v4 = vpop.f32.mrb[11].mxu0 }
 0x4b3   :  { %v8427_v10 = vpack.i.bf16 %v8299_v60, %v8297_v57  ;;  %v8173_v11 = vpack.c.bf16 %v8299_v60, %v8297_v57  ;;  %v9916_v12 = vadd.f32 %v2698_v4, %v1239_v51 }
 0x4b4   :  { %v8437_v7 = vpack.i.bf16 %v9912_v1, %v9910_v45  ;;  %v8197_v13 = vpack.c.bf16 %v9912_v1, %v9910_v45  ;;  %v8432_v14 = vpack.i.bf16 %v8300_v3, %v8298_v47  ;;  %v8185_v15 = vpack.c.bf16 %v8300_v3, %v8298_v47 }
 0x4b5   :  { %v8442_v16 = vpack.i.bf16 %v9916_v12, %v9914_v6  ;;  %v9926_v17 = vpack.c.bf16 %v9916_v12, %v9914_v6  ;;  %8428 = vrot.lane.b32.xlu1 %v8427_v10, %s9353_s30 }
 0x4b6   :  { %8187 = vmatprep.subr.msk.bf16.mxu0 %vm9881_vm6, %v8185_v15  ;;  %8433 = vrot.lane.b32.xlu0 %v8432_v14, %s9353_s30 }
 0x4b7   :  { %8190 = vmatpush3.bf16.xpose.msk.msra.mxu0 %vm9881_vm6, %v8185_v15 }
 0x4b8   :  { %8199 = vmatprep.subr.msk.bf16.mxu0 %vm9930_vm8, %v8197_v13 }
 0x4b9   :  { %2799 = vrot.lane.b32.xlu1 %v2787_v44, %s9353_s30 }
 0x4ba   :  { %2805 = vrot.lane.b32.xlu0 %v2788_v19, %s9353_s30 }
 0x4bd   :  { %2803 = vrot.lane.b32.xlu1 %v9875_v21, %s9353_s30 }
 0x4be   :  { %8035 = vmatmul.mubr.msk.f32.vlgmr.msra.gmra.mrb[16].mxu0 %vm2846_vm5, %v2788_v19 }
 0x4bf   :  { %8202 = vmatpush3.bf16.msk.msra.mxu0 %vm9930_vm8, %v8197_v13 }
 0x4c0   :  { %8211 = vmatprep.subr.msk.bf16.mxu0 %vm9930_vm8, %v9926_v17 }
 0x4c5   :  { %v2792_v42 = vpop.permute.xlu1 %2791 }
 0x4c6   :  { %8013 = vmatprep.mubr.msk.f32.mxu1 %vm2846_vm5, %v2792_v42 }
 0x4c8   :  { %v8424_v20 = vpop.permute.xlu0 %8423 }
 0x4c9   :  { %v8426_v22 = vunpack.i.h.bf16 %v8424_v20  ;;  %v8425_v23 = vunpack.i.l.bf16 %v8424_v20  ;;  %v2794_v46 = vpop.permute.xlu1 %2793 }
 0x4cb   :  { %v8167_v24 = vpack.c.bf16 %v8426_v22, %v8425_v23 }
 0x4cc   :  { %v2798_v57 = vpop.permute.xlu0 %2797 }
 0x4cd   :  { %8169 = vmatprep.subr.msk.bf16.mxu1 %vm9881_vm6, %v8167_v24 }
 0x4ce   :  { %v7673_v21 = vpop.f32.mrb[12].mxu1  ;;  %8172 = vmatpush3.bf16.xpose.msk.msra.mxu1 %vm9881_vm6, %v8167_v24 }
 0x4cf   :  { %v2776_v25 = vpop.f32.mrb[12].mxu0  ;;  %v7674_v27 = vpop.f32.mrb[13].mxu1  ;;  %8175 = vmatprep.subr.msk.bf16.mxu1 %vm9881_vm6, %v8173_v11 }
 0x4d0   :  { %v7675_v28 = vadd.f32 %v7674_v27, %v7673_v21  ;;  %v8000_v30 = vpop.f32.mrb[13].mxu0  ;;  %v7676_v31 = vpop.f32.mrb[14].mxu1 }
 0x4d1   :  { %v2779_v32 = vpop.f32.mrb[14].mxu0  ;;  %v7677_v33 = vpop.f32.mrb[15].mxu1 }
 0x4d2   :  { %v2736_v41 = vadd.f32 %v7675_v28, %v7301_v26  ;;  %v7678_v39 = vadd.f32 %v7677_v33, %v7676_v31  ;;  %v8001_v43 = vpop.f32.mrb[15].mxu0 }
 0x4d4   :  { %v9958_v48 = vadd.f32 %v2776_v25, %v2736_v41  ;;  %v2739_v0 = vadd.f32 %v7678_v39, %v7301_v26 }
 0x4d5   :  { %8014 = vmatmul.mubr.msk.f32.vlgmr.msra.gmra.mrb[18].mxu1 %vm2846_vm5, %v2794_v46 }
 0x4d6   :  { %v9961_v51 = vadd.f32 %v2779_v32, %v2739_v0  ;;  %8178 = vmatpush3.bf16.xpose.msk.msra.mxu1 %vm9881_vm6, %v8173_v11  ;;  %8020 = vmatprep.mubr.msk.f32.mxu1 %vm2846_vm5, %v9893_v34 }
 0x4d8   :  { %v9969_v52 = vpack.c.bf16 %v9961_v51, %v9958_v48  ;;  %v8447_v56 = vpack.i.bf16 %v9961_v51, %v9958_v48 }
 0x4dd   :  { %8021 = vmatmul.mubr.msk.f32.vlgmr.msra.gmra.mrb[20].mxu1 %vm2846_vm5, %v2787_v44 }
 0x4de   :  { %8027 = vmatprep.mubr.msk.f32.mxu1 %vm2846_vm5, %v2798_v57 }
 0x527   :  { %v8429_v60 = vpop.permute.xlu1 %8428 }
 0x528   :  { %v8431_v55 = vunpack.i.h.bf16 %v8429_v60  ;;  %v8430_v62 = vunpack.i.l.bf16 %v8429_v60  ;;  %v8434_v47 = vpop.permute.xlu0 %8433 }
 0x529   :  { %v8436_v3 = vunpack.i.h.bf16 %v8434_v47  ;;  %v8435_v4 = vunpack.i.l.bf16 %v8434_v47 }
 0x52a   :  { %v8179_v10 = vpack.c.bf16 %v8431_v55, %v8430_v62 }
 0x52b   :  { %v8191_v34 = vpack.c.bf16 %v8436_v3, %v8435_v4  ;;  %v2800_v11 = vpop.permute.xlu1 %2799 }
 0x52c   :  { %8181 = vmatprep.subr.msk.bf16.mxu1 %vm9881_vm6, %v8179_v10  ;;  %v2806_v44 = vpop.permute.xlu0 %2805 }
 0x52d   :  { %8184 = vmatpush3.bf16.xpose.msk.msra.mxu1 %vm9881_vm6, %v8179_v10 }
 0x52e   :  { %8193 = vmatprep.subr.msk.bf16.mxu1 %vm9881_vm6, %v8191_v34 }
 0x52f   :  { %v2804_v15 = vpop.permute.xlu1 %2803 }
 0x531   :  { %v9981_v13 = vpop.f32.mrb[16].mxu1 }
 0x532   :  { %v9983_v14 = vpop.f32.mrb[17].mxu1  ;;  %v3350_v41 = vsel %vm3349_vm9, %v9981_v13, -inf }
 0x533   :  { %v3346_v39 = vsel %vm3345_vm10, %v9983_v14, -inf }
 0x534   :  { %8028 = vmatmul.mubr.msk.f32.vlgmr.msra.gmra.mrb[22].mxu1 %vm2846_vm5, %v2800_v11 }
 0x535   :  { %8196 = vmatpush3.bf16.xpose.msk.msra.mxu1 %vm9881_vm6, %v8191_v34  ;;  %8041 = vmatprep.mubr.msk.f32.mxu1 %vm2846_vm5, %v2804_v15 }
 0x53c   :  { %8042 = vmatmul.mubr.msk.f32.vlgmr.msra.gmra.mrb[24].mxu1 %vm2846_vm5, %v2806_v44 }
 0x591   :  { %v9990_v19 = vpop.f32.mrb[16].mxu0 }
 0x592   :  { %v9992_v42 = vpop.f32.mrb[17].mxu0  ;;  %v3374_v0 = vsel %vm3349_vm9, %v9990_v19, -inf }
 0x593   :  { %v3371_v57 = vsel %vm3345_vm10, %v9992_v42, -inf }
 0x5a8   :  { %v8015_v20 = vpop.f32.mrb[18].mxu1 }
 0x5a9   :  { %v3004_v22 = vpop.f32.mrb[19].mxu1  ;;  %v3356_v23 = vsel %vm3349_vm9, %v8015_v20, -inf }
 0x5aa   :  { %3357 = vmax.xlane.f32.xlu0 %v3356_v23  ;;  %v3353_v24 = vsel %vm3345_vm10, %v3004_v22, -inf }
 0x5ab   :  { %3354 = vmax.xlane.f32.xlu1 %v3353_v24 }
 0x5b0   :  { %v9996_v29 = vpop.f32.mrb[20].mxu1 }
 0x5b1   :  { %v9998_v21 = vpop.f32.mrb[21].mxu1  ;;  %v3362_v43 = vsel %vm3349_vm9, %v9996_v29, -inf }
 0x5b2   :  { %v3359_v46 = vsel %vm3345_vm10, %v9998_v21, -inf }
 0x607   :  { %v8029_v25 = vpop.f32.mrb[22].mxu1 }
 0x608   :  { %v3170_v26 = vpop.f32.mrb[23].mxu1  ;;  %v3368_v28 = vsel %vm3349_vm9, %v8029_v25, -inf }
 0x609   :  { %v3365_v27 = vsel %vm3345_vm10, %v3170_v26, -inf }
 0x60a   :  { %3366 = vmax.xlane.f32.xlu0 %v3365_v27 }
 0x60e   :  { %3369 = vmax.xlane.f32.xlu0 %v3368_v28 }
 0x60f   :  { %v8043_v30 = vpop.f32.mrb[24].mxu1 }
 0x610   :  { %v3336_v31 = vpop.f32.mrb[25].mxu1  ;;  %v3380_v32 = vsel %vm3349_vm9, %v8043_v30, -inf }
 0x611   :  { %v3377_v33 = vsel %vm3345_vm10, %v3336_v31, -inf }
 0x612   :  { %3381 = vmax.xlane.f32.xlu0 %v3380_v32  ;;  %3378 = vmax.xlane.f32.xlu1 %v3377_v33 }
 0x616   :  { %3351 = vmax.xlane.f32.xlu0 %v3350_v41  ;;  %3347 = vmax.xlane.f32.xlu1 %v3346_v39 }
 0x61a   :  { %3363 = vmax.xlane.f32.xlu0 %v3362_v43  ;;  %3360 = vmax.xlane.f32.xlu1 %v3359_v46 }
 0x61e   :  { %3375 = vmax.xlane.f32.xlu0 %v3374_v0  ;;  %3372 = vmax.xlane.f32.xlu1 %v3371_v57 }
 0x637   :  { %v3358_v60 = vpop.xlane.xlu0 %3357 }
 0x638   :  { %v3386_v55 = vsub.f32 %v8015_v20, %v3358_v60  ;;  %v3355_v62 = vpop.xlane.xlu1 %3354 }
 0x639   :  { %v3385_v47 = vsub.f32 %v3004_v22, %v3355_v62 }
 0x63a   :  { %v3401_v3 = vmul.f32 1.442695, %v3386_v55 }
 0x63b   :  { %v3399_v4 = vmul.f32 1.442695, %v3385_v47 }
 0x63c   :  { %8943 = vpow2.f32 %v3401_v3 }
 0x63d   :  { %8945 = vpow2.f32 %v3399_v4 }
 0x646   :  { %v10016_v10 = vpop.eup %8943 }
 0x647   :  { %v8946_v34 = vpop.eup %8945  ;;  %v3428_v11 = vsel %vm3349_vm9, %v10016_v10, 0.0 }
 0x648   :  { %3429 = vadd.xlane.f32.xlu0 %v3428_v11  ;;  %v3425_v15 = vsel %vm3345_vm10, %v8946_v34, 0.0 }
 0x649   :  { %3426 = vadd.xlane.f32.xlu1 %v3425_v15 }
 0x697   :  { %v3367_v44 = vpop.xlane.xlu0 %3366 }
 0x698   :  { %v3389_v23 = vsub.f32 %v3170_v26, %v3367_v44 }
 0x69a   :  { %v3407_v24 = vmul.f32 1.442695, %v3389_v23 }
 0x69b   :  { %v3370_v20 = vpop.xlane.xlu0 %3369 }
 0x69c   :  { %8947 = vpow2.f32 %v3407_v24  ;;  %v3390_v22 = vsub.f32 %v8029_v25, %v3370_v20 }
 0x69e   :  { %v3409_v27 = vmul.f32 1.442695, %v3390_v22 }
 0x69f   :  { %v3379_v25 = vpop.xlane.xlu1 %3378  ;;  %v3382_v43 = vpop.xlane.xlu0 %3381 }
 0x6a0   :  { %8949 = vpow2.f32 %v3409_v27  ;;  %v3393_v39 = vsub.f32 %v3336_v31, %v3379_v25  ;;  %v3394_v46 = vsub.f32 %v8043_v30, %v3382_v43 }
 0x6a2   :  { %v3415_v0 = vmul.f32 1.442695, %v3393_v39  ;;  %v3417_v55 = vmul.f32 1.442695, %v3394_v46 }
 0x6a3   :  { %v3348_v26 = vpop.xlane.xlu1 %3347  ;;  %v3352_v62 = vpop.xlane.xlu0 %3351 }
 0x6a4   :  { %v3383_v60 = vsub.f32 %v9983_v14, %v3348_v26  ;;  %8951 = vpow2.f32 %v3415_v0  ;;  %v3384_v1 = vsub.f32 %v9981_v13, %v3352_v62 }
 0x6a5   :  { %8953 = vpow2.f32 %v3417_v55 }
 0x6a6   :  { %v10021_v28 = vpop.eup %8947  ;;  %v3395_v47 = vmul.f32 1.442695, %v3383_v60  ;;  %v3397_v12 = vmul.f32 1.442695, %v3384_v1 }
 0x6a7   :  { %v3437_v32 = vsel %vm3345_vm10, %v10021_v28, 0.0  ;;  %v3361_v57 = vpop.xlane.xlu1 %3360 }
 0x6a8   :  { %3438 = vadd.xlane.f32.xlu1 %v3437_v32  ;;  %8955 = vpow2.f32 %v3395_v47 }
 0x6aa   :  { %v10025_v33 = vpop.eup %8949 }
 0x6ab   :  { %v3440_v41 = vsel %vm3349_vm9, %v10025_v33, 0.0  ;;  %v3373_v45 = vpop.xlane.xlu1 %3372 }
 0x6ac   :  { %3441 = vadd.xlane.f32.xlu0 %v3440_v41  ;;  %v3391_v39 = vsub.f32 %v9992_v42, %v3373_v45 }
 0x6ae   :  { %v10040_v30 = vpop.eup %8951  ;;  %v3411_v43 = vmul.f32 1.442695, %v3391_v39 }
 0x6af   :  { %v3449_v4 = vsel %vm3345_vm10, %v10040_v30, 0.0  ;;  %v10045_v11 = vpop.eup %8953 }
 0x6b2   :  { %v10048_v44 = vpop.eup %8955 }
 0x6b3   :  { %v3419_v20 = vsel %vm3345_vm10, %v10048_v44, 0.0 }
 0x6b9   :  { %8438 = vrot.lane.b32.xlu1 %v8437_v7, %s9353_s30  ;;  %v3364_v7 = vpop.xlane.xlu0 %3363 }
 0x6ba   :  { %v3388_v14 = vsub.f32 %v9996_v29, %v3364_v7 }
 0x6bc   :  { %v3405_v13 = vmul.f32 1.442695, %v3388_v14 }
 0x6bd   :  { %v3376_v3 = vpop.xlane.xlu0 %3375 }
 0x6be   :  { %v3392_v15 = vsub.f32 %v9990_v19, %v3376_v3 }
 0x6c0   :  { %v3413_v24 = vmul.f32 1.442695, %v3392_v15 }
 0x6c2   :  { %8443 = vrot.lane.b32.xlu0 %v8442_v16, %s9353_s30  ;;  %v3387_v16 = vsub.f32 %v9998_v21, %v3361_v57  ;;  %v3452_v21 = vsel %vm3349_vm9, %v10045_v11, 0.0 }
 0x6c4   :  { %v3403_v31 = vmul.f32 1.442695, %v3387_v16 }
 0x6d5   :  { %v3430_v51 = vpop.xlane.xlu0 %3429 }
 0x6d6   :  { %v3427_v6 = vpop.xlane.xlu1 %3426 }
 0x6d7   :  { %8957 = vrcp.f32 %v3427_v6 }
 0x6d8   :  { %8959 = vpow2.f32 %v3397_v12 }
 0x6d9   :  { %8961 = vpow2.f32 %v3403_v31 }
 0x6da   :  { %8963 = vpow2.f32 %v3405_v13 }
 0x6db   :  { %8965 = vpow2.f32 %v3413_v24 }
 0x6dc   :  { %8967 = vpow2.f32 %v3411_v43 }
 0x6dd   :  { %3450 = vadd.xlane.f32.xlu1 %v3449_v4  ;;  %8969 = vrcp.f32 %v3430_v51 }
 0x6e1   :  { %v8958_v23 = vpop.eup %8957  ;;  %3453 = vadd.xlane.f32.xlu0 %v3452_v21 }
 0x6e2   :  { %v3469_v29 = vmul.f32 %v8958_v23, %v8946_v34  ;;  %v10055_v22 = vpop.eup %8959 }
 0x6e3   :  { %v3422_v19 = vsel %vm3349_vm9, %v10055_v22, 0.0  ;;  %v10059_v27 = vpop.eup %8961 }
 0x6e4   :  { %8055 = vmatprep.mubr.msk.f32.mxu1 %vm3345_vm10, %v3469_v29  ;;  %v3431_v34 = vsel %vm3345_vm10, %v10059_v27, 0.0  ;;  %v10063_v32 = vpop.eup %8963 }
 0x6e5   :  { %3420 = vadd.xlane.f32.xlu0 %v3419_v20  ;;  %v3434_v41 = vsel %vm3349_vm9, %v10063_v32, 0.0  ;;  %v10071_v25 = vpop.eup %8965 }
 0x6e6   :  { %v3446_v26 = vsel %vm3349_vm9, %v10071_v25, 0.0  ;;  %v10076_v46 = vpop.eup %8967 }
 0x6e7   :  { %v3443_v48 = vsel %vm3345_vm10, %v10076_v46, 0.0  ;;  %v8970_v47 = vpop.eup %8969 }
 0x6e8   :  { %v3470_v6 = vmul.f32 %v8970_v47, %v10016_v10  ;;  %v8870_v47 = vld [vmem:[#allocation23 + $0xc8] ss:$12 sps:$4 sm:$0xff]  }
 0x6e9   :  { %3423 = vadd.xlane.f32.xlu0 %v3422_v19 }
 0x6ed   :  { %3432 = vadd.xlane.f32.xlu0 %v3431_v34 }
 0x6ee   :  { %8448 = vrot.lane.b32.xlu1 %v8447_v56, %s9353_s30 }
 0x6f1   :  { %3435 = vadd.xlane.f32.xlu0 %v3434_v41 }
 0x6f5   :  { %3447 = vadd.xlane.f32.xlu0 %v3446_v26 }
 0x712   :  { %3444 = vadd.xlane.f32.xlu1 %v3443_v48 }
 0x735   :  { %v3439_v56 = vpop.xlane.xlu1 %3438 }
 0x736   :  { %8971 = vrcp.f32 %v3439_v56 }
 0x739   :  { %v3442_v0 = vpop.xlane.xlu0 %3441  ;;  %v8439_v57 = vpop.permute.xlu1 %8438 }
 0x73a   :  { %8973 = vrcp.f32 %v3442_v0  ;;  %v8441_v60 = vunpack.i.h.bf16 %v8439_v57  ;;  %v8440_v55 = vunpack.i.l.bf16 %v8439_v57  ;;  %v8845_v57 = vld [vmem:[#allocation23 + $0x4] ss:$12 sps:$4 sm:$0xff]  }
 0x73c   :  { %v8203_v62 = vpack.c.bf16 %v8441_v60, %v8440_v55  ;;  %v8848_v60 = vld [vmem:[#allocation23 + $0x1c] ss:$12 sps:$4 sm:$0xff]   ;;  %v8851_v55 = vld [vmem:[#allocation23 + $0x34] ss:$12 sps:$4 sm:$0xff]  }
 0x73d   :  { %v8444_v42 = vpop.permute.xlu0 %8443 }
 0x73e   :  { %v8446_v45 = vunpack.i.h.bf16 %v8444_v42  ;;  %v8445_v1 = vunpack.i.l.bf16 %v8444_v42  ;;  %8205 = vmatprep.subr.msk.bf16.mxu1 %vm9930_vm8, %v8203_v62  ;;  %v8871_v42 = vld [vmem:[#allocation23 + $0x8] ss:$12 sps:$4 sm:$0xff]  }
 0x73f   :  { %8208 = vmatpush3.bf16.msk.msra.mxu1 %vm9930_vm8, %v8203_v62  ;;  %v8854_v62 = vld [vmem:[#allocation23 + $0x4c] ss:$12 sps:$4 sm:$0xff]  }
 0x740   :  { %v8972_v7 = vpop.eup %8971  ;;  %v8215_v12 = vpack.c.bf16 %v8446_v45, %v8445_v1  ;;  %v8875_v45 = vld [vmem:[#allocation23 + $0xe0] ss:$12 sps:$4 sm:$0xff]  }
 0x741   :  { %v3473_v16 = vmul.f32 %v8972_v7, %v10021_v28  ;;  %v8855_v1 = vld [vmem:[#allocation23 + $0x60] ss:$12 sps:$4 sm:$0xff]  }
 0x742   :  { %8056 = vmatmul.mubr.msk.f32.vlgmr.msra.gmra.mrb[26].mxu1 %vm3345_vm10, %v3470_v6  ;;  %8217 = vmatprep.subr.msk.bf16.mxu1 %vm9930_vm8, %v8215_v12  ;;  %v8876_v7 = vld [vmem:[#allocation23 + $0x20] ss:$12 sps:$4 sm:$0xff]   ;;  %v8860_v6 = vld [vmem:[#allocation23 + $0x7c] ss:$12 sps:$4 sm:$0xff]  }
 0x743   :  { %8220 = vmatpush3.bf16.msk.msra.mxu1 %vm9930_vm8, %v8215_v12  ;;  %8069 = vmatprep.mubr.msk.f32.mxu1 %vm3345_vm10, %v3473_v16  ;;  %v8858_v12 = vld [vmem:[#allocation23 + $0x78] ss:$12 sps:$4 sm:$0xff]   ;;  %v8863_v16 = vld [vmem:[#allocation23 + $0x94] ss:$12 sps:$4 sm:$0xff]  }
 0x744   :  { %v8974_v14 = vpop.eup %8973 }
 0x745   :  { %v3474_v31 = vmul.f32 %v8974_v14, %v10025_v33  ;;  %v8861_v14 = vld [vmem:[#allocation23 + $0x90] ss:$12 sps:$4 sm:$0xff]  }
 0x747   :  { %8070 = vmatmul.mubr.msk.f32.vlgmr.msra.gmra.mrb[28].mxu1 %vm3345_vm10, %v3474_v31  ;;  %v8866_v31 = vld [vmem:[#allocation23 + $0xac] ss:$12 sps:$4 sm:$0xff]  }
 0x76a   :  { %v3451_v3 = vpop.xlane.xlu1 %3450 }
 0x76b   :  { %8975 = vrcp.f32 %v3451_v3  ;;  %v8864_v3 = vld [vmem:[#allocation23 + $0xa8] ss:$12 sps:$4 sm:$0xff]  }
 0x76e   :  { %v3454_v10 = vpop.xlane.xlu0 %3453  ;;  %v8449_v4 = vpop.permute.xlu1 %8448 }
 0x76f   :  { %8977 = vrcp.f32 %v3454_v10  ;;  %v8451_v28 = vunpack.i.h.bf16 %v8449_v4  ;;  %v8450_v13 = vunpack.i.l.bf16 %v8449_v4  ;;  %v8869_v10 = vld [vmem:[#allocation23 + $0xc4] ss:$12 sps:$4 sm:$0xff]   ;;  %v8867_v4 = vld [vmem:[#allocation23 + $0xc0] ss:$12 sps:$4 sm:$0xff]  }
 0x771   :  { %v8227_v15 = vpack.c.bf16 %v8451_v28, %v8450_v13  ;;  %v8874_v28 = vld [vmem:[#allocation23 + $0xdc] ss:$12 sps:$4 sm:$0xff]   ;;  %v8872_v13 = vld [vmem:[#allocation23 + $0xd8] ss:$12 sps:$4 sm:$0xff]  }
 0x772   :  { %v3421_v21 = vpop.xlane.xlu0 %3420 }
 0x773   :  { %8979 = vrcp.f32 %v3421_v21  ;;  %8229 = vmatprep.subr.msk.bf16.mxu1 %vm9930_vm8, %v8227_v15  ;;  %v8880_v21 = vld [vmem:[#allocation23 + $0xf8] ss:$12 sps:$4 sm:$0xff]  }
 0x774   :  { %8232 = vmatpush3.bf16.msk.msra.mxu1 %vm9930_vm8, %v8227_v15  ;;  %v8879_v15 = vld [vmem:[#allocation23 + $0xf4] ss:$12 sps:$4 sm:$0xff]  }
 0x775   :  { %v8976_v23 = vpop.eup %8975  ;;  %7736 = vmatprep.subr.bf16.mxu1 %v8870_v47 }
 0x776   :  { %v3424_v33 = vpop.xlane.xlu0 %3423  ;;  %v3477_v29 = vmul.f32 %v8976_v23, %v10040_v30  ;;  %v8877_v23 = vld [vmem:[#allocation23 + $0xf0] ss:$12 sps:$4 sm:$0xff]  }
 0x777   :  { %8981 = vrcp.f32 %v3424_v33  ;;  %v8881_v33 = vld [vmem:[#allocation23 + $0x38] ss:$12 sps:$4 sm:$0xff]  }
 0x778   :  { %8083 = vmatprep.mubr.msk.f32.mxu1 %vm3345_vm10, %v3477_v29  ;;  %v8884_v29 = vld [vmem:[#allocation23 + $0x10c] ss:$12 sps:$4 sm:$0xff]  }
 0x779   :  { %v8978_v24 = vpop.eup %8977 }
 0x77a   :  { %v3478_v20 = vmul.f32 %v8978_v24, %v10045_v11  ;;  %v3433_v19 = vpop.xlane.xlu0 %3432  ;;  %v8885_v24 = vld [vmem:[#allocation23 + $0x110] ss:$12 sps:$4 sm:$0xff]  }
 0x77b   :  { %8983 = vrcp.f32 %v3433_v19  ;;  %v8886_v19 = vld [vmem:[#allocation23 + $0x50] ss:$12 sps:$4 sm:$0xff]  }
 0x77c   :  { %8084 = vmatmul.mubr.msk.f32.vlgmr.msra.gmra.mrb[30].mxu1 %vm3345_vm10, %v3478_v20  ;;  %v8882_v20 = vld [vmem:[#allocation23 + $0x108] ss:$12 sps:$4 sm:$0xff]  }
 0x77d   :  { %v8980_v34 = vpop.eup %8979  ;;  %7737 = vmatpush3.bf16.msra.mxu1 %v8871_v42 }
 0x77e   :  { %v3436_v41 = vpop.xlane.xlu0 %3435  ;;  %v3467_v26 = vmul.f32 %v8980_v34, %v10048_v44  ;;  %7738 = vmatprep.subr.bf16.mxu1 %v8875_v45  ;;  %v8889_v34 = vld [vmem:[#allocation23 + $0x124] ss:$12 sps:$4 sm:$0xff]  }
 0x77f   :  { %8985 = vrcp.f32 %v3436_v41  ;;  %v8890_v41 = vld [vmem:[#allocation23 + $0x128] ss:$12 sps:$4 sm:$0xff]  }
 0x780   :  { %8048 = vmatprep.mubr.msk.f32.mxu0 %vm3345_vm10, %v3467_v26  ;;  %v8887_v26 = vld [vmem:[#allocation23 + $0x120] ss:$12 sps:$4 sm:$0xff]  }
 0x781   :  { %v8982_v39 = vpop.eup %8981  ;;  %7739 = vmatpush3.bf16.msra.mxu1 %v8876_v7 }
 0x782   :  { %v3468_v30 = vmul.f32 %v8982_v39, %v10055_v22  ;;  %v3448_v22 = vpop.xlane.xlu0 %3447  ;;  %7740 = vmatprep.subr.bf16.mxu1 %v8880_v21  ;;  %v8891_v39 = vld [vmem:[#allocation23 + $0x68] ss:$12 sps:$4 sm:$0xff]  }
 0x783   :  { %8987 = vrcp.f32 %v3448_v22  ;;  %v8899_v22 = vld [vmem:[#allocation23 + $0x154] ss:$12 sps:$4 sm:$0xff]  }
 0x784   :  { %8049 = vmatmul.mubr.msk.f32.vlgmr.msra.gmra.mrb[18].mxu0 %vm3345_vm10, %v3468_v30  ;;  %v8894_v30 = vld [vmem:[#allocation23 + $0x13c] ss:$12 sps:$4 sm:$0xff]  }
 0x785   :  { %v8984_v43 = vpop.eup %8983  ;;  %8214 = vmatpush3.bf16.msk.msra.mxu0 %vm9930_vm8, %v9926_v17  ;;  %7741 = vmatpush3.bf16.msra.mxu1 %v8881_v33 }
 0x786   :  { %8223 = vmatprep.subr.msk.bf16.mxu0 %vm9930_vm8, %v9969_v52  ;;  %v3471_v11 = vmul.f32 %v8984_v43, %v10059_v27  ;;  %7742 = vmatprep.subr.bf16.mxu1 %v8885_v24  ;;  %v8895_v43 = vld [vmem:[#allocation23 + $0x140] ss:$12 sps:$4 sm:$0xff]   ;;  %v8910_v24 = vld [vmem:[#allocation23 + $0x188] ss:$12 sps:$4 sm:$0xff]  }
 0x788   :  { %8062 = vmatprep.mubr.msk.f32.mxu0 %vm3345_vm10, %v3471_v11  ;;  %v8892_v11 = vld [vmem:[#allocation23 + $0x138] ss:$12 sps:$4 sm:$0xff]  }
 0x789   :  { %v8986_v44 = vpop.eup %8985  ;;  %7743 = vmatpush3.bf16.msra.mxu1 %v8886_v19  ;;  %v8913_v19 = vld [vmem:[#allocation23 + $0x19c] ss:$12 sps:$4 sm:$0xff]  }
 0x78a   :  { %v3472_v48 = vmul.f32 %v8986_v44, %v10063_v32  ;;  %v8843_v32 = vld [vmem:[#allocation23] ss:$12 sps:$4 sm:$0xff]   ;;  %7744 = vmatprep.subr.bf16.mxu1 %v8890_v41 }
 0x78b   :  { %v8896_v44 = vld [vmem:[#allocation23 + $0x80] ss:$12 sps:$4 sm:$0xff]  }
 0x78c   :  { %8063 = vmatmul.mubr.msk.f32.vlgmr.msra.gmra.mrb[20].mxu0 %vm3345_vm10, %v3472_v48  ;;  %v8897_v48 = vld [vmem:[#allocation23 + $0x150] ss:$12 sps:$4 sm:$0xff]   ;;  %v8914_v41 = vld [vmem:[#allocation23 + $0x1a0] ss:$12 sps:$4 sm:$0xff]  }
 0x78d   :  { %8226 = vmatpush3.bf16.msk.msra.mxu0 %vm9930_vm8, %v9969_v52  ;;  %v8988_v51 = vpop.eup %8987  ;;  %v8849_v52 = vld [vmem:[#allocation23 + $0x30] ss:$12 sps:$4 sm:$0xff]   ;;  %7745 = vmatpush3.bf16.msra.mxu1 %v8891_v39 }
 0x78e   :  { %v3476_v27 = vmul.f32 %v8988_v51, %v10071_v25  ;;  %4508 = vmatprep.subr.bf16.mxu0 %v8845_v57  ;;  %v8857_v25 = vld [vmem:[#allocation23 + $0x64] ss:$12 sps:$4 sm:$0xff]   ;;  %7746 = vmatprep.subr.bf16.mxu1 %v8895_v43  ;;  %v8902_v57 = vld [vmem:[#allocation23 + $0x168] ss:$12 sps:$4 sm:$0xff]   ;;  %v8921_v43 = vld [vmem:[#allocation23 + $0x1cc] ss:$12 sps:$4 sm:$0xff]  }
 0x78f   :  { %v8901_v51 = vld [vmem:[#allocation23 + $0x98] ss:$12 sps:$4 sm:$0xff]   ;;  %v8915_v39 = vld [vmem:[#allocation23 + $0x1b0] ss:$12 sps:$4 sm:$0xff]  }
 0x791   :  { %7747 = vmatpush3.bf16.msra.mxu1 %v8896_v44  ;;  %v8922_v44 = vld [vmem:[#allocation23 + $0x1d0] ss:$12 sps:$4 sm:$0xff]  }
 0x79f   :  { %v3445_v17 = vpop.xlane.xlu1 %3444 }
 0x7a0   :  { %8989 = vrcp.f32 %v3445_v17  ;;  %v8900_v17 = vld [vmem:[#allocation23 + $0x158] ss:$12 sps:$4 sm:$0xff]  }
 0x7a1   :  { %7748 = vmatprep.subr.bf16.mxu1 %v8900_v17  ;;  %v8926_v17 = vld [vmem:[#allocation23 + $0x1e8] ss:$12 sps:$4 sm:$0xff]  }
 0x7a2   :  { %7749 = vmatpush3.bf16.msra.mxu1 %v8901_v51  ;;  %v8929_v51 = vld [vmem:[#allocation23 + $0x1fc] ss:$12 sps:$4 sm:$0xff]  }
 0x7aa   :  { %v8990_v56 = vpop.eup %8989 }
 0x7ab   :  { %v3475_v0 = vmul.f32 %v8990_v56, %v10076_v46  ;;  %v8852_v46 = vld [vmem:[#allocation23 + $0x48] ss:$12 sps:$4 sm:$0xff]  }
 0x7ad   :  { %8076 = vmatprep.mubr.msk.f32.mxu0 %vm3345_vm10, %v3475_v0  ;;  %v8904_v0 = vld [vmem:[#allocation23 + $0x16c] ss:$12 sps:$4 sm:$0xff]  }
 0x7ae   :  { %8077 = vmatmul.mubr.msk.f32.vlgmr.msra.gmra.mrb[22].mxu0 %vm3345_vm10, %v3476_v27  ;;  %v8905_v27 = vld [vmem:[#allocation23 + $0x170] ss:$12 sps:$4 sm:$0xff]  }
 0x7af   :  { %4509 = vmatpush1.bf16.msra.mxu0 %v8843_v32  ;;  %7750 = vmatprep.subr.bf16.mxu1 %v8905_v27  ;;  %v8933_v27 = vld [vmem:[#allocation23 + $0x214] ss:$12 sps:$4 sm:$0xff]  }
 0x7b0   :  { %4510 = vmatprep.subr.bf16.mxu0 %v8848_v60  ;;  %v8906_v60 = vld [vmem:[#allocation23 + $0xb0] ss:$12 sps:$4 sm:$0xff]  }
 0x7b1   :  { %7751 = vmatpush3.bf16.msra.mxu1 %v8906_v60  ;;  %v8937_v60 = vld [vmem:[#allocation23 + $0x22c] ss:$12 sps:$4 sm:$0xff]  }
 0x7b2   :  { %8086 = vmatprep.subr.bf16.mxu1 %v9369_v49 }
 0x7b3   :  { %4511 = vmatpush1.bf16.msra.mxu0 %v8846_v18 }
 0x7b4   :  { %4512 = vmatprep.subr.bf16.mxu0 %v8851_v55  ;;  %v8909_v55 = vld [vmem:[#allocation23 + $0x184] ss:$12 sps:$4 sm:$0xff]  }
 0x7b7   :  { %4513 = vmatpush1.bf16.msra.mxu0 %v8849_v52 }
 0x7b8   :  { %4514 = vmatprep.subr.bf16.mxu0 %v8854_v62 }
 0x7bb   :  { %4515 = vmatpush1.bf16.msra.mxu0 %v8852_v46 }
 0x7bc   :  { %4516 = vmatprep.subr.bf16.mxu0 %v8857_v25 }
 0x7bf   :  { %4517 = vmatpush1.bf16.msra.mxu0 %v8855_v1 }
 0x7c0   :  { %4518 = vmatprep.subr.bf16.mxu0 %v8860_v6 }
 0x7c3   :  { %4519 = vmatpush1.bf16.msra.mxu0 %v8858_v12 }
 0x7c4   :  { %4520 = vmatprep.subr.bf16.mxu0 %v8863_v16 }
 0x7c7   :  { %4521 = vmatpush1.bf16.msra.mxu0 %v8861_v14 }
 0x7c8   :  { %4522 = vmatprep.subr.bf16.mxu0 %v8866_v31 }
 0x7cb   :  { %4523 = vmatpush1.bf16.msra.mxu0 %v8864_v3 }
 0x7cc   :  { %4524 = vmatprep.subr.bf16.mxu0 %v8869_v10 }
 0x7cf   :  { %4525 = vmatpush1.bf16.msra.mxu0 %v8867_v4 }
 0x7d0   :  { %4526 = vmatprep.subr.bf16.mxu0 %v8874_v28 }
 0x7d3   :  { %4527 = vmatpush1.bf16.msra.mxu0 %v8872_v13 }
 0x7d4   :  { %4528 = vmatprep.subr.bf16.mxu0 %v8879_v15 }
 0x7d7   :  { %4529 = vmatpush1.bf16.msra.mxu0 %v8877_v23 }
 0x7d8   :  { %4530 = vmatprep.subr.bf16.mxu0 %v8884_v29  ;;  %v8907_v29 = vld [vmem:[#allocation23 + $0x180] ss:$12 sps:$4 sm:$0xff]  }
 0x7db   :  { %4531 = vmatpush1.bf16.msra.mxu0 %v8882_v20 }
 0x7dc   :  { %4532 = vmatprep.subr.bf16.mxu0 %v8889_v34  ;;  %v8911_v34 = vld [vmem:[#allocation23 + $0x198] ss:$12 sps:$4 sm:$0xff]  }
 0x7df   :  { %4533 = vmatpush1.bf16.msra.mxu0 %v8887_v26  ;;  %v8917_v26 = vld [vmem:[#allocation23 + $0x1b4] ss:$12 sps:$4 sm:$0xff]  }
 0x7e0   :  { %4534 = vmatprep.subr.bf16.mxu0 %v8894_v30  ;;  %v8918_v30 = vld [vmem:[#allocation23 + $0x1b8] ss:$12 sps:$4 sm:$0xff]  }
 0x7e3   :  { %4535 = vmatpush1.bf16.msra.mxu0 %v8892_v11  ;;  %v8919_v11 = vld [vmem:[#allocation23 + $0x1c8] ss:$12 sps:$4 sm:$0xff]  }
 0x7e4   :  { %4536 = vmatprep.subr.bf16.mxu0 %v8899_v22  ;;  %v8923_v22 = vld [vmem:[#allocation23 + $0x1e0] ss:$12 sps:$4 sm:$0xff]  }
 0x7e7   :  { %4537 = vmatpush1.bf16.msra.mxu0 %v8897_v48  ;;  %v8925_v48 = vld [vmem:[#allocation23 + $0x1e4] ss:$12 sps:$4 sm:$0xff]  }
 0x7e8   :  { %4538 = vmatprep.subr.bf16.mxu0 %v8904_v0  ;;  %v8930_v0 = vld [vmem:[#allocation23 + $0x200] ss:$12 sps:$4 sm:$0xff]  }
 0x7eb   :  { %4539 = vmatpush1.bf16.msra.mxu0 %v8902_v57  ;;  %v8934_v57 = vld [vmem:[#allocation23 + $0x218] ss:$12 sps:$4 sm:$0xff]  }
 0x7ec   :  { %4551 = vmatprep.subr.bf16.mxu0 %v8909_v55 }
 0x815   :  { %v8057_v56 = vpop.f32.mrb[26].mxu1 }
 0x816   :  { %v3636_v32 = vpop.f32.mrb[27].mxu1 }
 0x817   :  { %v8457_v18 = vpack.i.bf16 %v8057_v56, %v3636_v32  ;;  %v8927_v56 = vld [vmem:[#allocation23 + $0x1f8] ss:$12 sps:$4 sm:$0xff]   ;;  %v8931_v32 = vld [vmem:[#allocation23 + $0x210] ss:$12 sps:$4 sm:$0xff]  }
 0x81a   :  { %v8071_v52 = vpop.f32.mrb[28].mxu1 }
 0x81b   :  { %v3802_v62 = vpop.f32.mrb[29].mxu1 }
 0x81c   :  { %v8452_v46 = vpack.i.bf16 %v8071_v52, %v3802_v62  ;;  %v8938_v52 = vld [vmem:[#allocation23 + $0x230] ss:$12 sps:$4 sm:$0xff]  }
 0x81e   :  { %8453 = vrot.lane.b32.xlu0 %v8452_v46, %s9353_s30 }
 0x822   :  { %8458 = vrot.lane.b32.xlu0 %v8457_v18, %s9353_s30  ;;  %v8935_v18 = vld [vmem:[#allocation23 + $0x228] ss:$12 sps:$4 sm:$0xff]  }
 0x84f   :  { %v8085_v25 = vpop.f32.mrb[30].mxu1 }
 0x850   :  { %v3968_v47 = vpop.f32.mrb[31].mxu1 }
 0x851   :  { %v8462_v42 = vpack.i.bf16 %v8085_v25, %v3968_v47 }
 0x853   :  { %8463 = vrot.lane.b32.xlu0 %v8462_v42, %s9353_s30 }
 0x857   :  { %v8050_v45 = vpop.f32.mrb[18].mxu0 }
 0x858   :  { %v3553_v1 = vpop.f32.mrb[19].mxu0 }
 0x85f   :  { %v8064_v7 = vpop.f32.mrb[20].mxu0 }
 0x860   :  { %v3719_v6 = vpop.f32.mrb[21].mxu0 }
 0x881   :  { %v10127_v12 = vpop.f32.mrb[22].mxu0 }
 0x882   :  { %v10129_v16 = vpop.f32.mrb[23].mxu0 }
 0x890   :  { %v8454_v14 = vpop.permute.xlu0 %8453 }
 0x891   :  { %v8456_v31 = vunpack.i.h.bf16 %v8454_v14  ;;  %v8455_v3 = vunpack.i.l.bf16 %v8454_v14 }
 0x893   :  { %v4003_v10 = vsel %vm2846_vm5, %v3719_v6, %v8455_v3  ;;  %v4004_v4 = vsel %vm2846_vm5, %v8064_v7, %v8456_v31  ;;  %v4107_v3 = vld [vmem:[#allocation17 + $0x4] ss:$8 sm:$0x7] }
 0x894   :  { %v8459_v28 = vpop.permute.xlu0 %8458  ;;  %v4008_v13 = vpack.c.bf16 %v4004_v4, %v4003_v10  ;;  %v4120_v10 = vrot.slane %v4107_v3, %v9672_v59  ;;  %v4112_v4 = vrot.slane %v4107_v3, %v9682_v2 }
 0x895   :  { %v8461_v15 = vunpack.i.h.bf16 %v8459_v28  ;;  %v8460_v21 = vunpack.i.l.bf16 %v8459_v28  ;;  %v4116_v28 = vrot.slane %v4107_v3, %v9685_v5 }
 0x896   :  { %4540 = vmatprep.mubr.bf16.mxu0 %v4008_v13  ;;  %4626 = vmatprep.mubr.bf16.mxu1 %v4008_v13 }
 0x897   :  { %v4002_v23 = vsel %vm2846_vm5, %v8050_v45, %v8461_v15  ;;  %v4001_v33 = vsel %vm2846_vm5, %v3553_v1, %v8460_v21 }
 0x898   :  { %v4007_v20 = vpack.c.bf16 %v4002_v23, %v4001_v33 }
 0x89a   :  { %4541 = vmatmul.mubr.bf16.vlgmr.msra.gmra.mrb[24].mxu0 %v4007_v20  ;;  %4627 = vmatmul.mubr.bf16.vlgmr.msra.gmra.mrb[32].mxu1 %v4007_v20 }
 0x89b   :  { %4552 = vmatpush1.bf16.msra.mxu0 %v8907_v29  ;;  %8087 = vmatpush3.bf16.msra.mxu1 %v8910_v24 }
 0x89c   :  { %4553 = vmatprep.subr.bf16.mxu0 %v8913_v19  ;;  %8088 = vmatprep.subr.bf16.mxu1 %v9369_v49 }
 0x89d   :  { %4583 = vmatprep.mubr.bf16.mxu0 %v9368_v9  ;;  %8102 = vmatprep.mubr.msk.bf16.mxu1 %vm9370_vm4, %v9369_v49 }
 0x89f   :  { %4554 = vmatpush1.bf16.msra.mxu0 %v8911_v34  ;;  %8089 = vmatpush3.bf16.msra.mxu1 %v8914_v41 }
 0x8a0   :  { %4555 = vmatprep.subr.bf16.mxu0 %v8917_v26  ;;  %8090 = vmatprep.subr.bf16.mxu1 %v9369_v49 }
 0x8a3   :  { %4556 = vmatpush1.bf16.msra.mxu0 %v8915_v39  ;;  %8091 = vmatpush3.bf16.msra.mxu1 %v8918_v30 }
 0x8a4   :  { %4557 = vmatprep.subr.bf16.mxu0 %v8921_v43  ;;  %8092 = vmatprep.subr.bf16.mxu1 %v9369_v49 }
 0x8a7   :  { %4558 = vmatpush1.bf16.msra.mxu0 %v8919_v11  ;;  %8093 = vmatpush3.bf16.msra.mxu1 %v8922_v44 }
 0x8a8   :  { %4559 = vmatprep.subr.bf16.mxu0 %v8925_v48  ;;  %8094 = vmatprep.subr.bf16.mxu1 %v9369_v49 }
 0x8ab   :  { %4560 = vmatpush1.bf16.msra.mxu0 %v8923_v22  ;;  %8095 = vmatpush3.bf16.msra.mxu1 %v8926_v17 }
 0x8ac   :  { %4561 = vmatprep.subr.bf16.mxu0 %v8929_v51  ;;  %8096 = vmatprep.subr.bf16.mxu1 %v9369_v49 }
 0x8af   :  { %4562 = vmatpush1.bf16.msra.mxu0 %v8927_v56  ;;  %8097 = vmatpush3.bf16.msra.mxu1 %v8930_v0 }
 0x8b0   :  { %4563 = vmatprep.subr.bf16.mxu0 %v8933_v27  ;;  %8098 = vmatprep.subr.bf16.mxu1 %v9369_v49 }
 0x8b3   :  { %4564 = vmatpush1.bf16.msra.mxu0 %v8931_v32  ;;  %8099 = vmatpush3.bf16.msra.mxu1 %v8934_v57 }
 0x8b4   :  { %4565 = vmatprep.subr.bf16.mxu0 %v8937_v60  ;;  %8100 = vmatprep.subr.bf16.mxu1 %v9369_v49 }
 0x8b7   :  { %4566 = vmatpush1.bf16.msra.mxu0 %v8935_v18  ;;  %8101 = vmatpush3.bf16.msra.mxu1 %v8938_v52 }
 0x8c5   :  { %v8464_v55 = vpop.permute.xlu0 %8463 }
 0x8c6   :  { %v8466_v62 = vunpack.i.h.bf16 %v8464_v55  ;;  %v8465_v46 = vunpack.i.l.bf16 %v8464_v55 }
 0x8c8   :  { %v4006_v25 = vsel %vm2846_vm5, %v10127_v12, %v8466_v62  ;;  %v4005_v47 = vsel %vm2846_vm5, %v10129_v16, %v8465_v46 }
 0x8c9   :  { %v4009_v42 = vpack.c.bf16 %v4006_v25, %v4005_v47 }
 0x8cb   :  { %4584 = vmatmul.mubr.bf16.vlgmr.msra.gmra.mrb[24].mxu0 %v4009_v42  ;;  %8103 = vmatmul.mubr.bf16.vlgmr.msra.gmra.mrb[36].mxu1 %v4009_v42 }
 0x96d   :  { %v7752_v45 = vpop.f32.mrb[32].mxu1 }
 0x96e   :  { %v7753_v1 = vpop.f32.mrb[33].mxu1 }
 0x96f   :  { %v7754_v7 = vadd.f32 %v7753_v1, %v7752_v45  ;;  %v7755_v6 = vpop.f32.mrb[34].mxu1 }
 0x970   :  { %v7756_v14 = vpop.f32.mrb[35].mxu1 }
 0x971   :  { %v7757_v31 = vadd.f32 %v7756_v14, %v7755_v6  ;;  %v4629_v12 = vadd.f32 %v7754_v7, %v4120_v10 }
 0x973   :  { %v4632_v29 = vadd.f32 %v7757_v31, %v4120_v10 }
 0x99e   :  { %v4585_v13 = vpop.f32.mrb[24].mxu0  ;;  %v4669_v15 = vpop.f32.mrb[36].mxu1 }
 0x99f   :  { %v8305_v16 = vadd.f32 %v4585_v13, %v4112_v4  ;;  %v4670_v21 = vadd.f32 %v4669_v15, %v4629_v12  ;;  %v4587_v23 = vpop.f32.mrb[25].mxu0  ;;  %v8104_v33 = vpop.f32.mrb[37].mxu1 }
 0x9a0   :  { %v8306_v24 = vadd.f32 %v4587_v23, %v4116_v28  ;;  %v4589_v20 = vpop.f32.mrb[26].mxu0  ;;  %v4672_v19 = vpop.f32.mrb[38].mxu1  ;;  %v4683_v23 = vld [vmem:[#allocation17 + $0x5] ss:$8 sm:$0x7] }
 0x9a1   :  { %v4676_v34 = vadd.f32 %v8305_v16, %v9811_v63  ;;  %v8307_v41 = vadd.f32 %v4589_v20, %v4112_v4  ;;  %v4673_v26 = vadd.f32 %v4672_v19, %v4632_v29  ;;  %v4591_v39 = vpop.f32.mrb[27].mxu0  ;;  %v8105_v30 = vpop.f32.mrb[39].mxu1  ;;  %v4678_v48 = vadd.f32 %v4670_v21, %v9839_v40  ;;  %v4685_v33 = vld [vmem:[#allocation17 + $0x6] ss:$8 sm:$0x7] }
 0x9a2   :  { %v4677_v43 = vadd.f32 %v8306_v24, %v9807_v53  ;;  %v8308_v11 = vadd.f32 %v4591_v39, %v4116_v28  ;;  %v4738_v29 = vrot.slane %v4683_v23, %v9682_v2  ;;  %v4742_v24 = vrot.slane %v4683_v23, %v9685_v5 }
 0x9a3   :  { %v4679_v44 = vadd.f32 %v8307_v41, %v9813_v61  ;;  %v4681_v22 = vadd.f32 %v4673_v26, %v9837_v36  ;;  %v4746_v20 = vrot.slane %v4683_v23, %v9672_v59  ;;  %v4764_v41 = vrot.slane %v4685_v33, %v9685_v5 }
 0x9a4   :  { %v4680_v17 = vadd.f32 %v8308_v11, %v9809_v54  ;;  %v4686_v51 = vadd.f32 %v4677_v43, %v4676_v34  ;;  %v4768_v26 = vrot.slane %v4685_v33, %v9672_v59 }
 0x9a5   :  { %v4690_v56 = vsel %vm871_vm3, %v4679_v44, 0.0  ;;  %v4693_v32 = vsel %vm871_vm3, %v4681_v22, 0.0 }
 0x9a6   :  { %v4687_v0 = vadd.f32 %v4686_v51, %v4678_v48  ;;  %v4691_v63 = vsel %vm871_vm3, %v4680_v17, 0.0 }
 0x9a7   :  { %v4692_v27 = vadd.f32 %v4691_v63, %v4690_v56 }
 0x9a8   :  { %4688 = vadd.xlane.f32.xlu0 %v4687_v0 }
 0x9a9   :  { %v4694_v53 = vadd.f32 %v4693_v32, %v4692_v27 }
 0x9ab   :  { %4695 = vadd.xlane.f32.xlu1 %v4694_v53 }
 0xa35   :  { %v4689_v57 = vpop.xlane.xlu0 %4688 }
 0xa36   :  { %v4697_v61 = vmul.f32 0.0026041667, %v4689_v57 }
 0xa38   :  { %v4699_v60 = vsub.f32 %v4676_v34, %v4697_v61  ;;  %v4700_v40 = vsub.f32 %v4677_v43, %v4697_v61  ;;  %v4701_v18 = vsub.f32 %v4678_v48, %v4697_v61  ;;  %v4696_v36 = vpop.xlane.xlu1 %4695  ;;  %v4760_v34 = vrot.slane %v4685_v33, %v9682_v2 }
 0xa39   :  { %v4698_v52 = vmul.f32 0.0026041667, %v4696_v36 }
 0xa3a   :  { %v4705_v54 = vmul.f32 %v4699_v60, %v4699_v60  ;;  %v4706_v55 = vmul.f32 %v4700_v40, %v4700_v40  ;;  %v4707_v47 = vmul.f32 %v4701_v18, %v4701_v18 }
 0xa3b   :  { %v4702_v62 = vsub.f32 %v4679_v44, %v4698_v52  ;;  %v4703_v46 = vsub.f32 %v4680_v17, %v4698_v52  ;;  %v4704_v25 = vsub.f32 %v4681_v22, %v4698_v52 }
 0xa3c   :  { %v4711_v42 = vadd.f32 %v4706_v55, %v4705_v54 }
 0xa3d   :  { %v4708_v45 = vmul.f32 %v4702_v62, %v4702_v62  ;;  %v4709_v1 = vmul.f32 %v4703_v46, %v4703_v46  ;;  %v4710_v7 = vmul.f32 %v4704_v25, %v4704_v25 }
 0xa3e   :  { %v4712_v6 = vadd.f32 %v4711_v42, %v4707_v47 }
 0xa3f   :  { %v4715_v14 = vsel %vm871_vm3, %v4708_v45, 0.0  ;;  %v4716_v31 = vsel %vm871_vm3, %v4709_v1, 0.0  ;;  %v4718_v10 = vsel %vm871_vm3, %v4710_v7, 0.0 }
 0xa40   :  { %4713 = vadd.xlane.f32.xlu1 %v4712_v6  ;;  %v4717_v3 = vadd.f32 %v4716_v31, %v4715_v14 }
 0xa42   :  { %v4719_v4 = vadd.f32 %v4718_v10, %v4717_v3 }
 0xa44   :  { %4720 = vadd.xlane.f32.xlu1 %v4719_v4 }
 0xacd   :  { %v4714_v28 = vpop.xlane.xlu1 %4713 }
 0xace   :  { %v4722_v12 = vmul.f32 0.0026041667, %v4714_v28 }
 0xad0   :  { %v4724_v13 = vadd.f32 1e-12, %v4722_v12 }
 0xad1   :  { %v4721_v15 = vpop.xlane.xlu1 %4720 }
 0xad2   :  { %8991 = vrsqrt.f32 %v4724_v13  ;;  %v4723_v16 = vmul.f32 0.0026041667, %v4721_v15 }
 0xad4   :  { %v4725_v21 = vadd.f32 1e-12, %v4723_v16 }
 0xad6   :  { %8993 = vrsqrt.f32 %v4725_v21 }
 0xadc   :  { %v8992_v19 = vpop.eup %8991 }
 0xadd   :  { %v4728_v39 = vmul.f32 %v8992_v19, %v4699_v60  ;;  %v4729_v30 = vmul.f32 %v8992_v19, %v4700_v40  ;;  %v4730_v43 = vmul.f32 %v8992_v19, %v4701_v18 }
 0xadf   :  { %v4750_v11 = vmul.f32 %v4738_v29, %v4728_v39  ;;  %v4751_v44 = vmul.f32 %v4742_v24, %v4729_v30  ;;  %v4752_v48 = vmul.f32 %v4746_v20, %v4730_v43 }
 0xae0   :  { %v8994_v22 = vpop.eup %8993 }
 0xae1   :  { %v10170_v17 = vadd.f32 %v4760_v34, %v4750_v11  ;;  %v10172_v51 = vadd.f32 %v4764_v41, %v4751_v44  ;;  %v10174_v56 = vadd.f32 %v4768_v26, %v4752_v48  ;;  %v4731_v0 = vmul.f32 %v8994_v22, %v4702_v62 }
 0xae2   :  { %v4732_v63 = vmul.f32 %v8994_v22, %v4703_v46  ;;  %v4733_v27 = vmul.f32 %v8994_v22, %v4704_v25 }
 0xae3   :  { %v4753_v32 = vmul.f32 %v4738_v29, %v4731_v0 }
 0xae4   :  { %v4754_v53 = vmul.f32 %v4742_v24, %v4732_v63  ;;  %v4755_v57 = vmul.f32 %v4746_v20, %v4733_v27 }
 0xae5   :  { %v10176_v61 = vadd.f32 %v4760_v34, %v4753_v32 }
 0xae6   :  { %v4776_v60 = vadd.f32 %v4764_v41, %v4754_v53  ;;  %v10178_v40 = vadd.f32 %v4768_v26, %v4755_v57 }
 0xae7   :  { %9327 = dma.done.wait [#allocation5], 36864 }
 0xae8   :  { %9328 = vsyncadd [#allocation5], 4294930432  ;;  %v10181_v18 = vpack.c.bf16 %v4776_v60, %v10172_v51  ;;  %v4786_v36 = vld [vmem:[#allocation2 + $0x8] sm:$0xff]  ;;  %v4788_v52 = vld [vmem:[#allocation2 + $0x18] sm:$0xff] }
 0xae9   :  { %v4785_v54 = vld [vmem:[#allocation2] sm:$0xff]  ;;  %5137 = vmatprep.subr.bf16.mxu1 %v4786_v36  ;;  %5223 = vmatprep.subr.bf16.mxu0 %v4788_v52  ;;  %v4787_v55 = vld [vmem:[#allocation2 + $0x10] sm:$0xff]  ;;  %v4798_v62 = vld [vmem:[#allocation2 + $0x68] sm:$0xff] }
 0xaea   :  { %5169 = vmatprep.mubr.bf16.mxu1 %v10181_v18  ;;  %5255 = vmatprep.mubr.bf16.mxu0 %v10181_v18  ;;  %v4800_v46 = vld [vmem:[#allocation2 + $0x78] sm:$0xff]  ;;  %v4797_v25 = vld [vmem:[#allocation2 + $0x60] sm:$0xff]  ;;  %v4799_v47 = vld [vmem:[#allocation2 + $0x70] sm:$0xff] }
 0xaeb   :  { %5138 = vmatpush1.bf16.msra.mxu1 %v4785_v54  ;;  %5224 = vmatpush1.bf16.msra.mxu0 %v4787_v55  ;;  %v4810_v42 = vld [vmem:[#allocation2 + $0xc8] sm:$0xff]  ;;  %v4812_v45 = vld [vmem:[#allocation2 + $0xd8] sm:$0xff]  ;;  %v4809_v1 = vld [vmem:[#allocation2 + $0xc0] sm:$0xff] }
 0xaec   :  { %5139 = vmatprep.subr.bf16.mxu1 %v4798_v62  ;;  %5225 = vmatprep.subr.bf16.mxu0 %v4800_v46  ;;  %v4811_v7 = vld [vmem:[#allocation2 + $0xd0] sm:$0xff]  ;;  %v4822_v6 = vld [vmem:[#allocation2 + $0x128] sm:$0xff]  ;;  %v4824_v14 = vld [vmem:[#allocation2 + $0x138] sm:$0xff] }
 0xaed   :  { %v4821_v31 = vld [vmem:[#allocation2 + $0x120] sm:$0xff]  ;;  %v4823_v3 = vld [vmem:[#allocation2 + $0x130] sm:$0xff]  ;;  %v4834_v10 = vld [vmem:[#allocation2 + $0x188] sm:$0xff] }
 0xaee   :  { %v4836_v4 = vld [vmem:[#allocation2 + $0x198] sm:$0xff]  ;;  %v4833_v28 = vld [vmem:[#allocation2 + $0x180] sm:$0xff]  ;;  %v4835_v12 = vld [vmem:[#allocation2 + $0x190] sm:$0xff] }
 0xaef   :  { %5140 = vmatpush1.bf16.msra.mxu1 %v4797_v25  ;;  %5226 = vmatpush1.bf16.msra.mxu0 %v4799_v47  ;;  %v4846_v13 = vld [vmem:[#allocation2 + $0x1e8] sm:$0xff]  ;;  %v4848_v15 = vld [vmem:[#allocation2 + $0x1f8] sm:$0xff]  ;;  %v4845_v16 = vld [vmem:[#allocation2 + $0x1e0] sm:$0xff] }
 0xaf0   :  { %5141 = vmatprep.subr.bf16.mxu1 %v4810_v42  ;;  %5227 = vmatprep.subr.bf16.mxu0 %v4812_v45  ;;  %v4847_v21 = vld [vmem:[#allocation2 + $0x1f0] sm:$0xff]  ;;  %v4858_v23 = vld [vmem:[#allocation2 + $0x248] sm:$0xff]  ;;  %v4860_v33 = vld [vmem:[#allocation2 + $0x258] sm:$0xff] }
 0xaf1   :  { %v4857_v29 = vld [vmem:[#allocation2 + $0x240] sm:$0xff]  ;;  %v4859_v24 = vld [vmem:[#allocation2 + $0x250] sm:$0xff]  ;;  %v4870_v20 = vld [vmem:[#allocation2 + $0x2a8] sm:$0xff] }
 0xaf2   :  { %v4872_v19 = vld [vmem:[#allocation2 + $0x2b8] sm:$0xff]  ;;  %v4869_v34 = vld [vmem:[#allocation2 + $0x2a0] sm:$0xff]  ;;  %v4871_v41 = vld [vmem:[#allocation2 + $0x2b0] sm:$0xff] }
 0xaf3   :  { %5142 = vmatpush1.bf16.msra.mxu1 %v4809_v1  ;;  %5228 = vmatpush1.bf16.msra.mxu0 %v4811_v7  ;;  %v4882_v26 = vld [vmem:[#allocation2 + $0x308] sm:$0xff]  ;;  %v4884_v39 = vld [vmem:[#allocation2 + $0x318] sm:$0xff]  ;;  %v4881_v30 = vld [vmem:[#allocation2 + $0x300] sm:$0xff] }
 0xaf4   :  { %5143 = vmatprep.subr.bf16.mxu1 %v4822_v6  ;;  %5229 = vmatprep.subr.bf16.mxu0 %v4824_v14  ;;  %v4883_v43 = vld [vmem:[#allocation2 + $0x310] sm:$0xff]  ;;  %v4894_v11 = vld [vmem:[#allocation2 + $0x368] sm:$0xff]  ;;  %v4896_v44 = vld [vmem:[#allocation2 + $0x378] sm:$0xff] }
 0xaf5   :  { %v4893_v48 = vld [vmem:[#allocation2 + $0x360] sm:$0xff]  ;;  %v4895_v22 = vld [vmem:[#allocation2 + $0x370] sm:$0xff]  ;;  %v4906_v0 = vld [vmem:[#allocation2 + $0x3c8] sm:$0xff] }
 0xaf6   :  { %v4908_v63 = vld [vmem:[#allocation2 + $0x3d8] sm:$0xff]  ;;  %v4905_v27 = vld [vmem:[#allocation2 + $0x3c0] sm:$0xff]  ;;  %v4907_v32 = vld [vmem:[#allocation2 + $0x3d0] sm:$0xff] }
 0xaf7   :  { %5144 = vmatpush1.bf16.msra.mxu1 %v4821_v31  ;;  %5230 = vmatpush1.bf16.msra.mxu0 %v4823_v3  ;;  %v4918_v53 = vld [vmem:[#allocation2 + $0x428] sm:$0xff]  ;;  %v4920_v57 = vld [vmem:[#allocation2 + $0x438] sm:$0xff]  ;;  %v4917_v60 = vld [vmem:[#allocation2 + $0x420] sm:$0xff] }
 0xaf8   :  { %5145 = vmatprep.subr.bf16.mxu1 %v4834_v10  ;;  %5231 = vmatprep.subr.bf16.mxu0 %v4836_v4  ;;  %v4919_v36 = vld [vmem:[#allocation2 + $0x430] sm:$0xff]  ;;  %v4930_v52 = vld [vmem:[#allocation2 + $0x488] sm:$0xff]  ;;  %v4932_v54 = vld [vmem:[#allocation2 + $0x498] sm:$0xff] }
 0xaf9   :  { %v4929_v55 = vld [vmem:[#allocation2 + $0x480] sm:$0xff]  ;;  %v4931_v62 = vld [vmem:[#allocation2 + $0x490] sm:$0xff]  ;;  %v4942_v46 = vld [vmem:[#allocation2 + $0x4e8] sm:$0xff] }
 0xafa   :  { %v4944_v25 = vld [vmem:[#allocation2 + $0x4f8] sm:$0xff]  ;;  %v4941_v47 = vld [vmem:[#allocation2 + $0x4e0] sm:$0xff]  ;;  %v4943_v42 = vld [vmem:[#allocation2 + $0x4f0] sm:$0xff] }
 0xafb   :  { %5146 = vmatpush1.bf16.msra.mxu1 %v4833_v28  ;;  %5232 = vmatpush1.bf16.msra.mxu0 %v4835_v12  ;;  %v4954_v45 = vld [vmem:[#allocation2 + $0x548] sm:$0xff]  ;;  %v4956_v1 = vld [vmem:[#allocation2 + $0x558] sm:$0xff]  ;;  %v4953_v7 = vld [vmem:[#allocation2 + $0x540] sm:$0xff]  ;;  %v10187_v12 = vpack.c.bf16 %v10176_v61, %v10170_v17 }
 0xafc   :  { %5147 = vmatprep.subr.bf16.mxu1 %v4846_v13  ;;  %5233 = vmatprep.subr.bf16.mxu0 %v4848_v15  ;;  %v4955_v6 = vld [vmem:[#allocation2 + $0x550] sm:$0xff]  ;;  %v4966_v14 = vld [vmem:[#allocation2 + $0x5a8] sm:$0xff]  ;;  %v4968_v31 = vld [vmem:[#allocation2 + $0x5b8] sm:$0xff] }
 0xafd   :  { %v4965_v3 = vld [vmem:[#allocation2 + $0x5a0] sm:$0xff]  ;;  %v4967_v10 = vld [vmem:[#allocation2 + $0x5b0] sm:$0xff]  ;;  %v4978_v4 = vld [vmem:[#allocation2 + $0x608] sm:$0xff] }
 0xafe   :  { %v4980_v28 = vld [vmem:[#allocation2 + $0x618] sm:$0xff]  ;;  %v4977_v13 = vld [vmem:[#allocation2 + $0x600] sm:$0xff]  ;;  %v4979_v15 = vld [vmem:[#allocation2 + $0x610] sm:$0xff] }
 0xaff   :  { %5148 = vmatpush1.bf16.msra.mxu1 %v4845_v16  ;;  %5234 = vmatpush1.bf16.msra.mxu0 %v4847_v21  ;;  %v4990_v16 = vld [vmem:[#allocation2 + $0x668] sm:$0xff]  ;;  %v4992_v21 = vld [vmem:[#allocation2 + $0x678] sm:$0xff] }
 0xb00   :  { %5149 = vmatprep.subr.bf16.mxu1 %v4858_v23  ;;  %5235 = vmatprep.subr.bf16.mxu0 %v4860_v33  ;;  %v4989_v23 = vld [vmem:[#allocation2 + $0x660] sm:$0xff]  ;;  %v4991_v33 = vld [vmem:[#allocation2 + $0x670] sm:$0xff]  ;;  %v5002_v61 = vld [vmem:[#allocation2 + $0x6c8] sm:$0xff] }
 0xb03   :  { %5150 = vmatpush1.bf16.msra.mxu1 %v4857_v29  ;;  %5236 = vmatpush1.bf16.msra.mxu0 %v4859_v24  ;;  %v5004_v29 = vld [vmem:[#allocation2 + $0x6d8] sm:$0xff]  ;;  %v5001_v24 = vld [vmem:[#allocation2 + $0x6c0] sm:$0xff] }
 0xb04   :  { %5151 = vmatprep.subr.bf16.mxu1 %v4870_v20  ;;  %5237 = vmatprep.subr.bf16.mxu0 %v4872_v19  ;;  %v5003_v20 = vld [vmem:[#allocation2 + $0x6d0] sm:$0xff]  ;;  %v5014_v19 = vld [vmem:[#allocation2 + $0x728] sm:$0xff] }
 0xb07   :  { %5152 = vmatpush1.bf16.msra.mxu1 %v4869_v34  ;;  %5238 = vmatpush1.bf16.msra.mxu0 %v4871_v41  ;;  %v5016_v34 = vld [vmem:[#allocation2 + $0x738] sm:$0xff]  ;;  %v5013_v41 = vld [vmem:[#allocation2 + $0x720] sm:$0xff] }
 0xb08   :  { %5153 = vmatprep.subr.bf16.mxu1 %v4882_v26  ;;  %5239 = vmatprep.subr.bf16.mxu0 %v4884_v39  ;;  %v5015_v26 = vld [vmem:[#allocation2 + $0x730] sm:$0xff]  ;;  %v5026_v39 = vld [vmem:[#allocation2 + $0x788] sm:$0xff] }
 0xb0b   :  { %5154 = vmatpush1.bf16.msra.mxu1 %v4881_v30  ;;  %5240 = vmatpush1.bf16.msra.mxu0 %v4883_v43  ;;  %v5028_v30 = vld [vmem:[#allocation2 + $0x798] sm:$0xff]  ;;  %v5025_v43 = vld [vmem:[#allocation2 + $0x780] sm:$0xff] }
 0xb0c   :  { %5155 = vmatprep.subr.bf16.mxu1 %v4894_v11  ;;  %5241 = vmatprep.subr.bf16.mxu0 %v4896_v44  ;;  %v5027_v11 = vld [vmem:[#allocation2 + $0x790] sm:$0xff]  ;;  %v5038_v44 = vld [vmem:[#allocation2 + $0x7e8] sm:$0xff] }
 0xb0f   :  { %5156 = vmatpush1.bf16.msra.mxu1 %v4893_v48  ;;  %5242 = vmatpush1.bf16.msra.mxu0 %v4895_v22  ;;  %v5040_v48 = vld [vmem:[#allocation2 + $0x7f8] sm:$0xff]  ;;  %v5037_v22 = vld [vmem:[#allocation2 + $0x7e0] sm:$0xff] }
 0xb10   :  { %5157 = vmatprep.subr.bf16.mxu1 %v4906_v0  ;;  %5243 = vmatprep.subr.bf16.mxu0 %v4908_v63  ;;  %v5039_v0 = vld [vmem:[#allocation2 + $0x7f0] sm:$0xff]  ;;  %v5050_v63 = vld [vmem:[#allocation2 + $0x848] sm:$0xff] }
 0xb13   :  { %5158 = vmatpush1.bf16.msra.mxu1 %v4905_v27  ;;  %5244 = vmatpush1.bf16.msra.mxu0 %v4907_v32  ;;  %v5052_v27 = vld [vmem:[#allocation2 + $0x858] sm:$0xff]  ;;  %v5049_v32 = vld [vmem:[#allocation2 + $0x840] sm:$0xff] }
 0xb14   :  { %5159 = vmatprep.subr.bf16.mxu1 %v4918_v53  ;;  %5245 = vmatprep.subr.bf16.mxu0 %v4920_v57  ;;  %v5051_v53 = vld [vmem:[#allocation2 + $0x850] sm:$0xff]  ;;  %v5062_v57 = vld [vmem:[#allocation2 + $0x8a8] sm:$0xff] }
 0xb17   :  { %5160 = vmatpush1.bf16.msra.mxu1 %v4917_v60  ;;  %5246 = vmatpush1.bf16.msra.mxu0 %v4919_v36  ;;  %v5064_v60 = vld [vmem:[#allocation2 + $0x8b8] sm:$0xff]  ;;  %v5061_v36 = vld [vmem:[#allocation2 + $0x8a0] sm:$0xff] }
 0xb18   :  { %5161 = vmatprep.subr.bf16.mxu1 %v4930_v52  ;;  %5247 = vmatprep.subr.bf16.mxu0 %v4932_v54  ;;  %v5063_v52 = vld [vmem:[#allocation2 + $0x8b0] sm:$0xff]  ;;  %v4790_v54 = vld [vmem:[#allocation2 + $0x28] sm:$0xff] }
 0xb1b   :  { %5162 = vmatpush1.bf16.msra.mxu1 %v4929_v55  ;;  %5248 = vmatpush1.bf16.msra.mxu0 %v4931_v62  ;;  %v4792_v55 = vld [vmem:[#allocation2 + $0x38] sm:$0xff]  ;;  %v10195_v62 = vpack.c.bf16 %v10178_v40, %v10174_v56  ;;  %v4814_v40 = vld [vmem:[#allocation2 + $0xe8] sm:$0xff] }
 0xb1c   :  { %5163 = vmatprep.subr.bf16.mxu1 %v4942_v46  ;;  %5249 = vmatprep.subr.bf16.mxu0 %v4944_v25  ;;  %v4789_v46 = vld [vmem:[#allocation2 + $0x20] sm:$0xff]  ;;  %v4791_v25 = vld [vmem:[#allocation2 + $0x30] sm:$0xff] }
 0xb1f   :  { %5164 = vmatpush1.bf16.msra.mxu1 %v4941_v47  ;;  %5250 = vmatpush1.bf16.msra.mxu0 %v4943_v42  ;;  %v4802_v47 = vld [vmem:[#allocation2 + $0x88] sm:$0xff]  ;;  %v4804_v42 = vld [vmem:[#allocation2 + $0x98] sm:$0xff] }
 0xb20   :  { %5165 = vmatprep.subr.bf16.mxu1 %v4954_v45  ;;  %5251 = vmatprep.subr.bf16.mxu0 %v4956_v1  ;;  %v4801_v45 = vld [vmem:[#allocation2 + $0x80] sm:$0xff]  ;;  %v4803_v1 = vld [vmem:[#allocation2 + $0x90] sm:$0xff] }
 0xb23   :  { %5166 = vmatpush1.bf16.msra.mxu1 %v4953_v7  ;;  %5252 = vmatpush1.bf16.msra.mxu0 %v4955_v6  ;;  %v4816_v7 = vld [vmem:[#allocation2 + $0xf8] sm:$0xff]  ;;  %v4813_v6 = vld [vmem:[#allocation2 + $0xe0] sm:$0xff] }
 0xb24   :  { %5167 = vmatprep.subr.bf16.mxu1 %v4966_v14  ;;  %5253 = vmatprep.subr.bf16.mxu0 %v4968_v31  ;;  %v4815_v14 = vld [vmem:[#allocation2 + $0xf0] sm:$0xff]  ;;  %v4826_v31 = vld [vmem:[#allocation2 + $0x148] sm:$0xff] }
 0xb27   :  { %5168 = vmatpush1.bf16.msra.mxu1 %v4965_v3  ;;  %5254 = vmatpush1.bf16.msra.mxu0 %v4967_v10  ;;  %v4828_v3 = vld [vmem:[#allocation2 + $0x158] sm:$0xff]  ;;  %v4825_v10 = vld [vmem:[#allocation2 + $0x140] sm:$0xff] }
 0xb28   :  { %5180 = vmatprep.subr.bf16.mxu1 %v4978_v4  ;;  %5266 = vmatprep.subr.bf16.mxu0 %v4980_v28  ;;  %v4827_v4 = vld [vmem:[#allocation2 + $0x150] sm:$0xff]  ;;  %v4838_v28 = vld [vmem:[#allocation2 + $0x1a8] sm:$0xff] }
 0xb2a   :  { %5170 = vmatmul.mubr.bf16.vlgmr.msra.gmra.mrb[40].mxu1 %v10187_v12  ;;  %5256 = vmatmul.mubr.bf16.vlgmr.msra.gmra.mrb[28].mxu0 %v10187_v12 }
 0xb2b   :  { %5181 = vmatpush1.bf16.msra.mxu1 %v4977_v13  ;;  %5267 = vmatpush1.bf16.msra.mxu0 %v4979_v15  ;;  %v4840_v13 = vld [vmem:[#allocation2 + $0x1b8] sm:$0xff]  ;;  %v4837_v15 = vld [vmem:[#allocation2 + $0x1a0] sm:$0xff] }
 0xb2c   :  { %5182 = vmatprep.subr.bf16.mxu1 %v4990_v16  ;;  %5268 = vmatprep.subr.bf16.mxu0 %v4992_v21  ;;  %v4839_v16 = vld [vmem:[#allocation2 + $0x1b0] sm:$0xff]  ;;  %v4850_v21 = vld [vmem:[#allocation2 + $0x208] sm:$0xff] }
 0xb2d   :  { %5212 = vmatprep.mubr.bf16.mxu1 %v9368_v9  ;;  %5298 = vmatprep.mubr.bf16.mxu0 %v9368_v9 }
 0xb2f   :  { %5183 = vmatpush1.bf16.msra.mxu1 %v4989_v23  ;;  %5269 = vmatpush1.bf16.msra.mxu0 %v4991_v33  ;;  %v4852_v23 = vld [vmem:[#allocation2 + $0x218] sm:$0xff]  ;;  %v4849_v33 = vld [vmem:[#allocation2 + $0x200] sm:$0xff] }
 0xb30   :  { %5184 = vmatprep.subr.bf16.mxu1 %v5002_v61  ;;  %5270 = vmatprep.subr.bf16.mxu0 %v5004_v29  ;;  %v4851_v61 = vld [vmem:[#allocation2 + $0x210] sm:$0xff]  ;;  %v4862_v29 = vld [vmem:[#allocation2 + $0x268] sm:$0xff] }
 0xb33   :  { %5185 = vmatpush1.bf16.msra.mxu1 %v5001_v24  ;;  %5271 = vmatpush1.bf16.msra.mxu0 %v5003_v20  ;;  %v4864_v24 = vld [vmem:[#allocation2 + $0x278] sm:$0xff]  ;;  %v4861_v20 = vld [vmem:[#allocation2 + $0x260] sm:$0xff] }
 0xb34   :  { %5186 = vmatprep.subr.bf16.mxu1 %v5014_v19  ;;  %5272 = vmatprep.subr.bf16.mxu0 %v5016_v34  ;;  %v4863_v19 = vld [vmem:[#allocation2 + $0x270] sm:$0xff]  ;;  %v4874_v34 = vld [vmem:[#allocation2 + $0x2c8] sm:$0xff] }
 0xb37   :  { %5187 = vmatpush1.bf16.msra.mxu1 %v5013_v41  ;;  %5273 = vmatpush1.bf16.msra.mxu0 %v5015_v26  ;;  %v4876_v41 = vld [vmem:[#allocation2 + $0x2d8] sm:$0xff]  ;;  %v4873_v26 = vld [vmem:[#allocation2 + $0x2c0] sm:$0xff] }
 0xb38   :  { %5188 = vmatprep.subr.bf16.mxu1 %v5026_v39  ;;  %5274 = vmatprep.subr.bf16.mxu0 %v5028_v30  ;;  %v4875_v39 = vld [vmem:[#allocation2 + $0x2d0] sm:$0xff]  ;;  %v4886_v30 = vld [vmem:[#allocation2 + $0x328] sm:$0xff] }
 0xb3b   :  { %5189 = vmatpush1.bf16.msra.mxu1 %v5025_v43  ;;  %5275 = vmatpush1.bf16.msra.mxu0 %v5027_v11  ;;  %v4888_v43 = vld [vmem:[#allocation2 + $0x338] sm:$0xff]  ;;  %v4885_v11 = vld [vmem:[#allocation2 + $0x320] sm:$0xff] }
 0xb3c   :  { %5190 = vmatprep.subr.bf16.mxu1 %v5038_v44  ;;  %5276 = vmatprep.subr.bf16.mxu0 %v5040_v48  ;;  %v4887_v44 = vld [vmem:[#allocation2 + $0x330] sm:$0xff]  ;;  %v4898_v48 = vld [vmem:[#allocation2 + $0x388] sm:$0xff] }
 0xb3f   :  { %5191 = vmatpush1.bf16.msra.mxu1 %v5037_v22  ;;  %5277 = vmatpush1.bf16.msra.mxu0 %v5039_v0  ;;  %v4900_v22 = vld [vmem:[#allocation2 + $0x398] sm:$0xff]  ;;  %v4897_v0 = vld [vmem:[#allocation2 + $0x380] sm:$0xff] }
 0xb40   :  { %5192 = vmatprep.subr.bf16.mxu1 %v5050_v63  ;;  %5278 = vmatprep.subr.bf16.mxu0 %v5052_v27  ;;  %v4899_v63 = vld [vmem:[#allocation2 + $0x390] sm:$0xff]  ;;  %v4910_v27 = vld [vmem:[#allocation2 + $0x3e8] sm:$0xff] }
 0xb43   :  { %5193 = vmatpush1.bf16.msra.mxu1 %v5049_v32  ;;  %5279 = vmatpush1.bf16.msra.mxu0 %v5051_v53  ;;  %v4912_v32 = vld [vmem:[#allocation2 + $0x3f8] sm:$0xff]  ;;  %v4909_v53 = vld [vmem:[#allocation2 + $0x3e0] sm:$0xff] }
 0xb44   :  { %5194 = vmatprep.subr.bf16.mxu1 %v5062_v57  ;;  %5280 = vmatprep.subr.bf16.mxu0 %v5064_v60  ;;  %v4911_v57 = vld [vmem:[#allocation2 + $0x3f0] sm:$0xff]  ;;  %v4922_v60 = vld [vmem:[#allocation2 + $0x448] sm:$0xff] }
 0xb47   :  { %5195 = vmatpush1.bf16.msra.mxu1 %v5061_v36  ;;  %5281 = vmatpush1.bf16.msra.mxu0 %v5063_v52  ;;  %v4924_v36 = vld [vmem:[#allocation2 + $0x458] sm:$0xff]  ;;  %v4921_v52 = vld [vmem:[#allocation2 + $0x440] sm:$0xff] }
 0xb48   :  { %5309 = vmatprep.subr.bf16.mxu1 %v4790_v54  ;;  %5395 = vmatprep.subr.bf16.mxu0 %v4792_v55  ;;  %v4923_v54 = vld [vmem:[#allocation2 + $0x450] sm:$0xff]  ;;  %v4934_v55 = vld [vmem:[#allocation2 + $0x4a8] sm:$0xff] }
 0xb4a   :  { %5213 = vmatmul.mubr.bf16.vlgmr.msra.gmra.mrb[40].mxu1 %v10195_v62  ;;  %5299 = vmatmul.mubr.bf16.vlgmr.msra.gmra.mrb[28].mxu0 %v10195_v62 }
 0xb4b   :  { %5310 = vmatpush1.bf16.msra.mxu1 %v4789_v46  ;;  %5396 = vmatpush1.bf16.msra.mxu0 %v4791_v25  ;;  %v4936_v46 = vld [vmem:[#allocation2 + $0x4b8] sm:$0xff]  ;;  %v4933_v25 = vld [vmem:[#allocation2 + $0x4a0] sm:$0xff] }
 0xb4c   :  { %5311 = vmatprep.subr.bf16.mxu1 %v4802_v47  ;;  %5397 = vmatprep.subr.bf16.mxu0 %v4804_v42  ;;  %v4935_v47 = vld [vmem:[#allocation2 + $0x4b0] sm:$0xff]  ;;  %v4946_v42 = vld [vmem:[#allocation2 + $0x508] sm:$0xff] }
 0xb4d   :  { %5341 = vmatprep.mubr.bf16.mxu1 %v10181_v18  ;;  %5427 = vmatprep.mubr.bf16.mxu0 %v10181_v18 }
 0xb4f   :  { %5312 = vmatpush1.bf16.msra.mxu1 %v4801_v45  ;;  %5398 = vmatpush1.bf16.msra.mxu0 %v4803_v1  ;;  %v4948_v45 = vld [vmem:[#allocation2 + $0x518] sm:$0xff]  ;;  %v4945_v1 = vld [vmem:[#allocation2 + $0x500] sm:$0xff] }
 0xb50   :  { %5313 = vmatprep.subr.bf16.mxu1 %v4814_v40  ;;  %5399 = vmatprep.subr.bf16.mxu0 %v4816_v7  ;;  %v4947_v40 = vld [vmem:[#allocation2 + $0x510] sm:$0xff]  ;;  %v4958_v7 = vld [vmem:[#allocation2 + $0x568] sm:$0xff] }
 0xb53   :  { %5314 = vmatpush1.bf16.msra.mxu1 %v4813_v6  ;;  %5400 = vmatpush1.bf16.msra.mxu0 %v4815_v14  ;;  %v4960_v6 = vld [vmem:[#allocation2 + $0x578] sm:$0xff]  ;;  %v4957_v14 = vld [vmem:[#allocation2 + $0x560] sm:$0xff] }
 0xb54   :  { %5315 = vmatprep.subr.bf16.mxu1 %v4826_v31  ;;  %5401 = vmatprep.subr.bf16.mxu0 %v4828_v3  ;;  %v4959_v31 = vld [vmem:[#allocation2 + $0x570] sm:$0xff]  ;;  %v4970_v3 = vld [vmem:[#allocation2 + $0x5c8] sm:$0xff] }
 0xb57   :  { %5316 = vmatpush1.bf16.msra.mxu1 %v4825_v10  ;;  %5402 = vmatpush1.bf16.msra.mxu0 %v4827_v4  ;;  %v4972_v10 = vld [vmem:[#allocation2 + $0x5d8] sm:$0xff]  ;;  %v4969_v4 = vld [vmem:[#allocation2 + $0x5c0] sm:$0xff] }
 0xb58   :  { %5317 = vmatprep.subr.bf16.mxu1 %v4838_v28  ;;  %5403 = vmatprep.subr.bf16.mxu0 %v4840_v13  ;;  %v4971_v28 = vld [vmem:[#allocation2 + $0x5d0] sm:$0xff]  ;;  %v4982_v13 = vld [vmem:[#allocation2 + $0x628] sm:$0xff] }
 0xb5b   :  { %5318 = vmatpush1.bf16.msra.mxu1 %v4837_v15  ;;  %5404 = vmatpush1.bf16.msra.mxu0 %v4839_v16  ;;  %v4984_v15 = vld [vmem:[#allocation2 + $0x638] sm:$0xff]  ;;  %v4981_v16 = vld [vmem:[#allocation2 + $0x620] sm:$0xff] }
 0xb5c   :  { %5319 = vmatprep.subr.bf16.mxu1 %v4850_v21  ;;  %5405 = vmatprep.subr.bf16.mxu0 %v4852_v23  ;;  %v4983_v21 = vld [vmem:[#allocation2 + $0x630] sm:$0xff]  ;;  %v4994_v23 = vld [vmem:[#allocation2 + $0x688] sm:$0xff] }
 0xb5f   :  { %5320 = vmatpush1.bf16.msra.mxu1 %v4849_v33  ;;  %5406 = vmatpush1.bf16.msra.mxu0 %v4851_v61  ;;  %v4996_v33 = vld [vmem:[#allocation2 + $0x698] sm:$0xff]  ;;  %v4993_v61 = vld [vmem:[#allocation2 + $0x680] sm:$0xff] }
 0xb60   :  { %5321 = vmatprep.subr.bf16.mxu1 %v4862_v29  ;;  %5407 = vmatprep.subr.bf16.mxu0 %v4864_v24  ;;  %v4995_v29 = vld [vmem:[#allocation2 + $0x690] sm:$0xff]  ;;  %v5006_v24 = vld [vmem:[#allocation2 + $0x6e8] sm:$0xff] }
 0xb63   :  { %5322 = vmatpush1.bf16.msra.mxu1 %v4861_v20  ;;  %5408 = vmatpush1.bf16.msra.mxu0 %v4863_v19  ;;  %v5008_v20 = vld [vmem:[#allocation2 + $0x6f8] sm:$0xff]  ;;  %v5005_v19 = vld [vmem:[#allocation2 + $0x6e0] sm:$0xff] }
 0xb64   :  { %5323 = vmatprep.subr.bf16.mxu1 %v4874_v34  ;;  %5409 = vmatprep.subr.bf16.mxu0 %v4876_v41  ;;  %v5007_v34 = vld [vmem:[#allocation2 + $0x6f0] sm:$0xff]  ;;  %v5018_v41 = vld [vmem:[#allocation2 + $0x748] sm:$0xff] }
 0xb67   :  { %5324 = vmatpush1.bf16.msra.mxu1 %v4873_v26  ;;  %5410 = vmatpush1.bf16.msra.mxu0 %v4875_v39  ;;  %v5020_v26 = vld [vmem:[#allocation2 + $0x758] sm:$0xff]  ;;  %v5017_v39 = vld [vmem:[#allocation2 + $0x740] sm:$0xff] }
 0xb68   :  { %5325 = vmatprep.subr.bf16.mxu1 %v4886_v30  ;;  %5411 = vmatprep.subr.bf16.mxu0 %v4888_v43  ;;  %v5019_v30 = vld [vmem:[#allocation2 + $0x750] sm:$0xff]  ;;  %v5030_v43 = vld [vmem:[#allocation2 + $0x7a8] sm:$0xff] }
 0xb6b   :  { %5326 = vmatpush1.bf16.msra.mxu1 %v4885_v11  ;;  %5412 = vmatpush1.bf16.msra.mxu0 %v4887_v44  ;;  %v5032_v11 = vld [vmem:[#allocation2 + $0x7b8] sm:$0xff]  ;;  %v5029_v44 = vld [vmem:[#allocation2 + $0x7a0] sm:$0xff] }
 0xb6c   :  { %5327 = vmatprep.subr.bf16.mxu1 %v4898_v48  ;;  %5413 = vmatprep.subr.bf16.mxu0 %v4900_v22  ;;  %v5031_v48 = vld [vmem:[#allocation2 + $0x7b0] sm:$0xff]  ;;  %v5042_v22 = vld [vmem:[#allocation2 + $0x808] sm:$0xff] }
 0xb6f   :  { %5328 = vmatpush1.bf16.msra.mxu1 %v4897_v0  ;;  %5414 = vmatpush1.bf16.msra.mxu0 %v4899_v63  ;;  %v5044_v0 = vld [vmem:[#allocation2 + $0x818] sm:$0xff]  ;;  %v5041_v63 = vld [vmem:[#allocation2 + $0x800] sm:$0xff] }
 0xb70   :  { %5329 = vmatprep.subr.bf16.mxu1 %v4910_v27  ;;  %5415 = vmatprep.subr.bf16.mxu0 %v4912_v32  ;;  %v5043_v27 = vld [vmem:[#allocation2 + $0x810] sm:$0xff]  ;;  %v5054_v32 = vld [vmem:[#allocation2 + $0x868] sm:$0xff] }
 0xb73   :  { %5330 = vmatpush1.bf16.msra.mxu1 %v4909_v53  ;;  %5416 = vmatpush1.bf16.msra.mxu0 %v4911_v57  ;;  %v5056_v53 = vld [vmem:[#allocation2 + $0x878] sm:$0xff]  ;;  %v5053_v57 = vld [vmem:[#allocation2 + $0x860] sm:$0xff] }
 0xb74   :  { %5331 = vmatprep.subr.bf16.mxu1 %v4922_v60  ;;  %5417 = vmatprep.subr.bf16.mxu0 %v4924_v36  ;;  %v5055_v60 = vld [vmem:[#allocation2 + $0x870] sm:$0xff]  ;;  %v5066_v36 = vld [vmem:[#allocation2 + $0x8c8] sm:$0xff] }
 0xb77   :  { %5332 = vmatpush1.bf16.msra.mxu1 %v4921_v52  ;;  %5418 = vmatpush1.bf16.msra.mxu0 %v4923_v54  ;;  %v5068_v52 = vld [vmem:[#allocation2 + $0x8d8] sm:$0xff]  ;;  %v5065_v54 = vld [vmem:[#allocation2 + $0x8c0] sm:$0xff] }
 0xb78   :  { %5333 = vmatprep.subr.bf16.mxu1 %v4934_v55  ;;  %5419 = vmatprep.subr.bf16.mxu0 %v4936_v46  ;;  %v5067_v55 = vld [vmem:[#allocation2 + $0x8d0] sm:$0xff]  ;;  %v4794_v46 = vld [vmem:[#allocation2 + $0x48] sm:$0xff] }
 0xb7b   :  { %5334 = vmatpush1.bf16.msra.mxu1 %v4933_v25  ;;  %5420 = vmatpush1.bf16.msra.mxu0 %v4935_v47  ;;  %v4796_v25 = vld [vmem:[#allocation2 + $0x58] sm:$0xff]  ;;  %v4793_v47 = vld [vmem:[#allocation2 + $0x40] sm:$0xff] }
 0xb7c   :  { %5335 = vmatprep.subr.bf16.mxu1 %v4946_v42  ;;  %5421 = vmatprep.subr.bf16.mxu0 %v4948_v45  ;;  %v4795_v42 = vld [vmem:[#allocation2 + $0x50] sm:$0xff]  ;;  %v4806_v45 = vld [vmem:[#allocation2 + $0xa8] sm:$0xff] }
 0xb7f   :  { %5336 = vmatpush1.bf16.msra.mxu1 %v4945_v1  ;;  %5422 = vmatpush1.bf16.msra.mxu0 %v4947_v40  ;;  %v4808_v1 = vld [vmem:[#allocation2 + $0xb8] sm:$0xff]  ;;  %v4805_v40 = vld [vmem:[#allocation2 + $0xa0] sm:$0xff] }
 0xb80   :  { %5337 = vmatprep.subr.bf16.mxu1 %v4958_v7  ;;  %5423 = vmatprep.subr.bf16.mxu0 %v4960_v6  ;;  %v4807_v7 = vld [vmem:[#allocation2 + $0xb0] sm:$0xff]  ;;  %v4818_v6 = vld [vmem:[#allocation2 + $0x108] sm:$0xff] }
 0xb83   :  { %5338 = vmatpush1.bf16.msra.mxu1 %v4957_v14  ;;  %5424 = vmatpush1.bf16.msra.mxu0 %v4959_v31  ;;  %v4820_v14 = vld [vmem:[#allocation2 + $0x118] sm:$0xff]  ;;  %v4817_v31 = vld [vmem:[#allocation2 + $0x100] sm:$0xff] }
 0xb84   :  { %5339 = vmatprep.subr.bf16.mxu1 %v4970_v3  ;;  %5425 = vmatprep.subr.bf16.mxu0 %v4972_v10  ;;  %v4819_v3 = vld [vmem:[#allocation2 + $0x110] sm:$0xff]  ;;  %v4830_v10 = vld [vmem:[#allocation2 + $0x168] sm:$0xff] }
 0xb87   :  { %5340 = vmatpush1.bf16.msra.mxu1 %v4969_v4  ;;  %5426 = vmatpush1.bf16.msra.mxu0 %v4971_v28  ;;  %v4832_v4 = vld [vmem:[#allocation2 + $0x178] sm:$0xff]  ;;  %v4829_v28 = vld [vmem:[#allocation2 + $0x160] sm:$0xff] }
 0xb88   :  { %5352 = vmatprep.subr.bf16.mxu1 %v4982_v13  ;;  %5438 = vmatprep.subr.bf16.mxu0 %v4984_v15  ;;  %v4831_v13 = vld [vmem:[#allocation2 + $0x170] sm:$0xff]  ;;  %v4842_v15 = vld [vmem:[#allocation2 + $0x1c8] sm:$0xff] }
 0xb8a   :  { %5342 = vmatmul.mubr.bf16.vlgmr.msra.gmra.mrb[44].mxu1 %v10187_v12  ;;  %5428 = vmatmul.mubr.bf16.vlgmr.msra.gmra.mrb[32].mxu0 %v10187_v12 }
 0xb8b   :  { %5353 = vmatpush1.bf16.msra.mxu1 %v4981_v16  ;;  %5439 = vmatpush1.bf16.msra.mxu0 %v4983_v21  ;;  %v4844_v16 = vld [vmem:[#allocation2 + $0x1d8] sm:$0xff]  ;;  %v4843_v21 = vld [vmem:[#allocation2 + $0x1d0] sm:$0xff] }
 0xb8c   :  { %5354 = vmatprep.subr.bf16.mxu1 %v4994_v23  ;;  %5440 = vmatprep.subr.bf16.mxu0 %v4996_v33  ;;  %v4854_v23 = vld [vmem:[#allocation2 + $0x228] sm:$0xff]  ;;  %v4856_v33 = vld [vmem:[#allocation2 + $0x238] sm:$0xff] }
 0xb8d   :  { %5384 = vmatprep.mubr.bf16.mxu1 %v9368_v9  ;;  %5470 = vmatprep.mubr.bf16.mxu0 %v9368_v9 }
 0xb8f   :  { %5355 = vmatpush1.bf16.msra.mxu1 %v4993_v61  ;;  %5441 = vmatpush1.bf16.msra.mxu0 %v4995_v29  ;;  %v4853_v61 = vld [vmem:[#allocation2 + $0x220] sm:$0xff]  ;;  %v4855_v29 = vld [vmem:[#allocation2 + $0x230] sm:$0xff] }
 0xb90   :  { %5356 = vmatprep.subr.bf16.mxu1 %v5006_v24  ;;  %5442 = vmatprep.subr.bf16.mxu0 %v5008_v20  ;;  %v4866_v24 = vld [vmem:[#allocation2 + $0x288] sm:$0xff]  ;;  %v4868_v20 = vld [vmem:[#allocation2 + $0x298] sm:$0xff] }
 0xb93   :  { %5357 = vmatpush1.bf16.msra.mxu1 %v5005_v19  ;;  %5443 = vmatpush1.bf16.msra.mxu0 %v5007_v34  ;;  %v4865_v19 = vld [vmem:[#allocation2 + $0x280] sm:$0xff]  ;;  %v4867_v34 = vld [vmem:[#allocation2 + $0x290] sm:$0xff] }
 0xb94   :  { %5358 = vmatprep.subr.bf16.mxu1 %v5018_v41  ;;  %5444 = vmatprep.subr.bf16.mxu0 %v5020_v26  ;;  %v4878_v41 = vld [vmem:[#allocation2 + $0x2e8] sm:$0xff]  ;;  %v4880_v26 = vld [vmem:[#allocation2 + $0x2f8] sm:$0xff] }
 0xb97   :  { %5359 = vmatpush1.bf16.msra.mxu1 %v5017_v39  ;;  %5445 = vmatpush1.bf16.msra.mxu0 %v5019_v30  ;;  %v4877_v39 = vld [vmem:[#allocation2 + $0x2e0] sm:$0xff]  ;;  %v4879_v30 = vld [vmem:[#allocation2 + $0x2f0] sm:$0xff] }
 0xb98   :  { %5360 = vmatprep.subr.bf16.mxu1 %v5030_v43  ;;  %5446 = vmatprep.subr.bf16.mxu0 %v5032_v11  ;;  %v4890_v43 = vld [vmem:[#allocation2 + $0x348] sm:$0xff]  ;;  %v4892_v11 = vld [vmem:[#allocation2 + $0x358] sm:$0xff] }
 0xb9b   :  { %5361 = vmatpush1.bf16.msra.mxu1 %v5029_v44  ;;  %5447 = vmatpush1.bf16.msra.mxu0 %v5031_v48  ;;  %v4889_v44 = vld [vmem:[#allocation2 + $0x340] sm:$0xff]  ;;  %v4891_v48 = vld [vmem:[#allocation2 + $0x350] sm:$0xff] }
 0xb9c   :  { %5362 = vmatprep.subr.bf16.mxu1 %v5042_v22  ;;  %5448 = vmatprep.subr.bf16.mxu0 %v5044_v0  ;;  %v4902_v22 = vld [vmem:[#allocation2 + $0x3a8] sm:$0xff]  ;;  %v4904_v0 = vld [vmem:[#allocation2 + $0x3b8] sm:$0xff] }
 0xb9f   :  { %5363 = vmatpush1.bf16.msra.mxu1 %v5041_v63  ;;  %5449 = vmatpush1.bf16.msra.mxu0 %v5043_v27  ;;  %v4901_v63 = vld [vmem:[#allocation2 + $0x3a0] sm:$0xff]  ;;  %v4903_v27 = vld [vmem:[#allocation2 + $0x3b0] sm:$0xff] }
 0xba0   :  { %5364 = vmatprep.subr.bf16.mxu1 %v5054_v32  ;;  %5450 = vmatprep.subr.bf16.mxu0 %v5056_v53  ;;  %v4914_v32 = vld [vmem:[#allocation2 + $0x408] sm:$0xff]  ;;  %v4916_v53 = vld [vmem:[#allocation2 + $0x418] sm:$0xff] }
 0xba3   :  { %5365 = vmatpush1.bf16.msra.mxu1 %v5053_v57  ;;  %5451 = vmatpush1.bf16.msra.mxu0 %v5055_v60  ;;  %v4913_v57 = vld [vmem:[#allocation2 + $0x400] sm:$0xff]  ;;  %v4915_v60 = vld [vmem:[#allocation2 + $0x410] sm:$0xff] }
 0xba4   :  { %5366 = vmatprep.subr.bf16.mxu1 %v5066_v36  ;;  %5452 = vmatprep.subr.bf16.mxu0 %v5068_v52  ;;  %v4926_v36 = vld [vmem:[#allocation2 + $0x468] sm:$0xff]  ;;  %v4928_v52 = vld [vmem:[#allocation2 + $0x478] sm:$0xff] }
 0xba7   :  { %5367 = vmatpush1.bf16.msra.mxu1 %v5065_v54  ;;  %5453 = vmatpush1.bf16.msra.mxu0 %v5067_v55  ;;  %v4925_v54 = vld [vmem:[#allocation2 + $0x460] sm:$0xff]  ;;  %v4927_v55 = vld [vmem:[#allocation2 + $0x470] sm:$0xff] }
 0xba8   :  { %5481 = vmatprep.subr.bf16.mxu1 %v4794_v46  ;;  %5567 = vmatprep.subr.bf16.mxu0 %v4796_v25  ;;  %v4938_v46 = vld [vmem:[#allocation2 + $0x4c8] sm:$0xff]  ;;  %v4940_v25 = vld [vmem:[#allocation2 + $0x4d8] sm:$0xff] }
 0xbaa   :  { %5385 = vmatmul.mubr.bf16.vlgmr.msra.gmra.mrb[44].mxu1 %v10195_v62  ;;  %5471 = vmatmul.mubr.bf16.vlgmr.msra.gmra.mrb[32].mxu0 %v10195_v62 }
 0xbab   :  { %5482 = vmatpush1.bf16.msra.mxu1 %v4793_v47  ;;  %5568 = vmatpush1.bf16.msra.mxu0 %v4795_v42  ;;  %v4937_v47 = vld [vmem:[#allocation2 + $0x4c0] sm:$0xff]  ;;  %v4939_v42 = vld [vmem:[#allocation2 + $0x4d0] sm:$0xff] }
 0xbac   :  { %5483 = vmatprep.subr.bf16.mxu1 %v4806_v45  ;;  %5569 = vmatprep.subr.bf16.mxu0 %v4808_v1  ;;  %v4950_v45 = vld [vmem:[#allocation2 + $0x528] sm:$0xff]  ;;  %v4952_v1 = vld [vmem:[#allocation2 + $0x538] sm:$0xff] }
 0xbad   :  { %5513 = vmatprep.mubr.bf16.mxu1 %v10181_v18  ;;  %5599 = vmatprep.mubr.bf16.mxu0 %v10181_v18  ;;  %v4841_v18 = vld [vmem:[#allocation2 + $0x1c0] sm:$0xff] }
 0xbaf   :  { %5484 = vmatpush1.bf16.msra.mxu1 %v4805_v40  ;;  %5570 = vmatpush1.bf16.msra.mxu0 %v4807_v7  ;;  %v4949_v40 = vld [vmem:[#allocation2 + $0x520] sm:$0xff]  ;;  %v4951_v7 = vld [vmem:[#allocation2 + $0x530] sm:$0xff] }
 0xbb0   :  { %5485 = vmatprep.subr.bf16.mxu1 %v4818_v6  ;;  %5571 = vmatprep.subr.bf16.mxu0 %v4820_v14  ;;  %v4962_v6 = vld [vmem:[#allocation2 + $0x588] sm:$0xff]  ;;  %v4964_v14 = vld [vmem:[#allocation2 + $0x598] sm:$0xff] }
 0xbb3   :  { %5486 = vmatpush1.bf16.msra.mxu1 %v4817_v31  ;;  %5572 = vmatpush1.bf16.msra.mxu0 %v4819_v3  ;;  %v4961_v31 = vld [vmem:[#allocation2 + $0x580] sm:$0xff]  ;;  %v4963_v3 = vld [vmem:[#allocation2 + $0x590] sm:$0xff] }
 0xbb4   :  { %5487 = vmatprep.subr.bf16.mxu1 %v4830_v10  ;;  %5573 = vmatprep.subr.bf16.mxu0 %v4832_v4  ;;  %v4974_v10 = vld [vmem:[#allocation2 + $0x5e8] sm:$0xff]  ;;  %v4976_v4 = vld [vmem:[#allocation2 + $0x5f8] sm:$0xff] }
 0xbb7   :  { %5488 = vmatpush1.bf16.msra.mxu1 %v4829_v28  ;;  %5574 = vmatpush1.bf16.msra.mxu0 %v4831_v13  ;;  %v4973_v28 = vld [vmem:[#allocation2 + $0x5e0] sm:$0xff]  ;;  %v4975_v13 = vld [vmem:[#allocation2 + $0x5f0] sm:$0xff] }
 0xbb8   :  { %5489 = vmatprep.subr.bf16.mxu1 %v4842_v15  ;;  %5575 = vmatprep.subr.bf16.mxu0 %v4844_v16  ;;  %v4986_v15 = vld [vmem:[#allocation2 + $0x648] sm:$0xff]  ;;  %v4988_v16 = vld [vmem:[#allocation2 + $0x658] sm:$0xff] }
 0xbbb   :  { %5490 = vmatpush1.bf16.msra.mxu1 %v4841_v18  ;;  %5576 = vmatpush1.bf16.msra.mxu0 %v4843_v21  ;;  %v4985_v18 = vld [vmem:[#allocation2 + $0x640] sm:$0xff]  ;;  %v4987_v21 = vld [vmem:[#allocation2 + $0x650] sm:$0xff] }
 0xbbc   :  { %5491 = vmatprep.subr.bf16.mxu1 %v4854_v23  ;;  %5577 = vmatprep.subr.bf16.mxu0 %v4856_v33  ;;  %v4998_v23 = vld [vmem:[#allocation2 + $0x6a8] sm:$0xff]  ;;  %v5000_v33 = vld [vmem:[#allocation2 + $0x6b8] sm:$0xff] }
 0xbbf   :  { %5492 = vmatpush1.bf16.msra.mxu1 %v4853_v61  ;;  %5578 = vmatpush1.bf16.msra.mxu0 %v4855_v29  ;;  %v4997_v61 = vld [vmem:[#allocation2 + $0x6a0] sm:$0xff]  ;;  %v4999_v29 = vld [vmem:[#allocation2 + $0x6b0] sm:$0xff] }
 0xbc0   :  { %5493 = vmatprep.subr.bf16.mxu1 %v4866_v24  ;;  %5579 = vmatprep.subr.bf16.mxu0 %v4868_v20  ;;  %v5010_v24 = vld [vmem:[#allocation2 + $0x708] sm:$0xff]  ;;  %v5012_v20 = vld [vmem:[#allocation2 + $0x718] sm:$0xff] }
 0xbc3   :  { %5494 = vmatpush1.bf16.msra.mxu1 %v4865_v19  ;;  %5580 = vmatpush1.bf16.msra.mxu0 %v4867_v34  ;;  %v5009_v19 = vld [vmem:[#allocation2 + $0x700] sm:$0xff]  ;;  %v5011_v34 = vld [vmem:[#allocation2 + $0x710] sm:$0xff] }
 0xbc4   :  { %5495 = vmatprep.subr.bf16.mxu1 %v4878_v41  ;;  %5581 = vmatprep.subr.bf16.mxu0 %v4880_v26  ;;  %v5022_v41 = vld [vmem:[#allocation2 + $0x768] sm:$0xff]  ;;  %v5021_v26 = vld [vmem:[#allocation2 + $0x760] sm:$0xff] }
 0xbc7   :  { %5496 = vmatpush1.bf16.msra.mxu1 %v4877_v39  ;;  %5582 = vmatpush1.bf16.msra.mxu0 %v4879_v30  ;;  %v5023_v39 = vld [vmem:[#allocation2 + $0x770] sm:$0xff]  ;;  %v5034_v30 = vld [vmem:[#allocation2 + $0x7c8] sm:$0xff] }
 0xbc8   :  { %5497 = vmatprep.subr.bf16.mxu1 %v4890_v43  ;;  %5583 = vmatprep.subr.bf16.mxu0 %v4892_v11  ;;  %v5036_v43 = vld [vmem:[#allocation2 + $0x7d8] sm:$0xff]  ;;  %v5033_v11 = vld [vmem:[#allocation2 + $0x7c0] sm:$0xff] }
 0xbcb   :  { %5498 = vmatpush1.bf16.msra.mxu1 %v4889_v44  ;;  %5584 = vmatpush1.bf16.msra.mxu0 %v4891_v48  ;;  %v5035_v44 = vld [vmem:[#allocation2 + $0x7d0] sm:$0xff]  ;;  %v5046_v48 = vld [vmem:[#allocation2 + $0x828] sm:$0xff] }
 0xbcc   :  { %5499 = vmatprep.subr.bf16.mxu1 %v4902_v22  ;;  %5585 = vmatprep.subr.bf16.mxu0 %v4904_v0  ;;  %v5048_v22 = vld [vmem:[#allocation2 + $0x838] sm:$0xff]  ;;  %v5045_v0 = vld [vmem:[#allocation2 + $0x820] sm:$0xff] }
 0xbcf   :  { %5500 = vmatpush1.bf16.msra.mxu1 %v4901_v63  ;;  %5586 = vmatpush1.bf16.msra.mxu0 %v4903_v27  ;;  %v5047_v63 = vld [vmem:[#allocation2 + $0x830] sm:$0xff]  ;;  %v5058_v27 = vld [vmem:[#allocation2 + $0x888] sm:$0xff] }
 0xbd0   :  { %5501 = vmatprep.subr.bf16.mxu1 %v4914_v32  ;;  %5587 = vmatprep.subr.bf16.mxu0 %v4916_v53  ;;  %v5060_v32 = vld [vmem:[#allocation2 + $0x898] sm:$0xff]  ;;  %v5057_v53 = vld [vmem:[#allocation2 + $0x880] sm:$0xff] }
 0xbd3   :  { %5502 = vmatpush1.bf16.msra.mxu1 %v4913_v57  ;;  %5588 = vmatpush1.bf16.msra.mxu0 %v4915_v60  ;;  %v5059_v57 = vld [vmem:[#allocation2 + $0x890] sm:$0xff]  ;;  %v5070_v60 = vld [vmem:[#allocation2 + $0x8e8] sm:$0xff] }
 0xbd4   :  { %5503 = vmatprep.subr.bf16.mxu1 %v4926_v36  ;;  %5589 = vmatprep.subr.bf16.mxu0 %v4928_v52  ;;  %v5072_v36 = vld [vmem:[#allocation2 + $0x8f8] sm:$0xff]  ;;  %v5069_v52 = vld [vmem:[#allocation2 + $0x8e0] sm:$0xff] }
 0xbd7   :  { %5504 = vmatpush1.bf16.msra.mxu1 %v4925_v54  ;;  %5590 = vmatpush1.bf16.msra.mxu0 %v4927_v55  ;;  %v5071_v54 = vld [vmem:[#allocation2 + $0x8f0] sm:$0xff] }
 0xbd8   :  { %5505 = vmatprep.subr.bf16.mxu1 %v4938_v46  ;;  %5591 = vmatprep.subr.bf16.mxu0 %v4940_v25  ;;  %v10215_v55 = vld [vmem:[#allocation24] sm:$0xff] }
 0xbd9   :  { %v5080_v46 = vrot.slane %v10215_v55, %v9682_v2  ;;  %v5088_v25 = vrot.slane %v10215_v55, %v9672_v59 }
 0xbdb   :  { %5506 = vmatpush1.bf16.msra.mxu1 %v4937_v47  ;;  %5592 = vmatpush1.bf16.msra.mxu0 %v4939_v42  ;;  %v5084_v47 = vrot.slane %v10215_v55, %v9685_v5  ;;  %v5092_v42 = vrot.slane %v10215_v55, %v9869_v8 }
 0xbdc   :  { %5507 = vmatprep.subr.bf16.mxu1 %v4950_v45  ;;  %5593 = vmatprep.subr.bf16.mxu0 %v4952_v1 }
 0xbdf   :  { %5508 = vmatpush1.bf16.msra.mxu1 %v4949_v40  ;;  %5594 = vmatpush1.bf16.msra.mxu0 %v4951_v7 }
 0xbe0   :  { %5509 = vmatprep.subr.bf16.mxu1 %v4962_v6  ;;  %5595 = vmatprep.subr.bf16.mxu0 %v4964_v14 }
 0xbe3   :  { %5510 = vmatpush1.bf16.msra.mxu1 %v4961_v31  ;;  %5596 = vmatpush1.bf16.msra.mxu0 %v4963_v3 }
 0xbe4   :  { %5511 = vmatprep.subr.bf16.mxu1 %v4974_v10  ;;  %5597 = vmatprep.subr.bf16.mxu0 %v4976_v4 }
 0xbe7   :  { %5512 = vmatpush1.bf16.msra.mxu1 %v4973_v28  ;;  %5598 = vmatpush1.bf16.msra.mxu0 %v4975_v13 }
 0xbe8   :  { %5524 = vmatprep.subr.bf16.mxu1 %v4986_v15  ;;  %5610 = vmatprep.subr.bf16.mxu0 %v4988_v16 }
 0xbea   :  { %5514 = vmatmul.mubr.bf16.vlgmr.msra.gmra.mrb[48].mxu1 %v10187_v12  ;;  %5600 = vmatmul.mubr.bf16.vlgmr.msra.gmra.mrb[36].mxu0 %v10187_v12  ;;  %v5024_v12 = vld [vmem:[#allocation2 + $0x778] sm:$0xff] }
 0xbeb   :  { %5525 = vmatpush1.bf16.msra.mxu1 %v4985_v18  ;;  %5611 = vmatpush1.bf16.msra.mxu0 %v4987_v21 }
 0xbec   :  { %5526 = vmatprep.subr.bf16.mxu1 %v4998_v23  ;;  %5612 = vmatprep.subr.bf16.mxu0 %v5000_v33 }
 0xbed   :  { %5556 = vmatprep.mubr.bf16.mxu1 %v9368_v9  ;;  %5642 = vmatprep.mubr.bf16.mxu0 %v9368_v9 }
 0xbef   :  { %5527 = vmatpush1.bf16.msra.mxu1 %v4997_v61  ;;  %5613 = vmatpush1.bf16.msra.mxu0 %v4999_v29 }
 0xbf0   :  { %5528 = vmatprep.subr.bf16.mxu1 %v5010_v24  ;;  %5614 = vmatprep.subr.bf16.mxu0 %v5012_v20 }
 0xbf3   :  { %5529 = vmatpush1.bf16.msra.mxu1 %v5009_v19  ;;  %5615 = vmatpush1.bf16.msra.mxu0 %v5011_v34 }
 0xbf4   :  { %5530 = vmatprep.subr.bf16.mxu1 %v5022_v41  ;;  %5616 = vmatprep.subr.bf16.mxu0 %v5024_v12 }
 0xbf7   :  { %5531 = vmatpush1.bf16.msra.mxu1 %v5021_v26  ;;  %5617 = vmatpush1.bf16.msra.mxu0 %v5023_v39 }
 0xbf8   :  { %5532 = vmatprep.subr.bf16.mxu1 %v5034_v30  ;;  %5618 = vmatprep.subr.bf16.mxu0 %v5036_v43 }
 0xbfb   :  { %5533 = vmatpush1.bf16.msra.mxu1 %v5033_v11  ;;  %5619 = vmatpush1.bf16.msra.mxu0 %v5035_v44 }
 0xbfc   :  { %5534 = vmatprep.subr.bf16.mxu1 %v5046_v48  ;;  %5620 = vmatprep.subr.bf16.mxu0 %v5048_v22 }
 0xbff   :  { %5535 = vmatpush1.bf16.msra.mxu1 %v5045_v0  ;;  %5621 = vmatpush1.bf16.msra.mxu0 %v5047_v63 }
 0xc00   :  { %5536 = vmatprep.subr.bf16.mxu1 %v5058_v27  ;;  %5622 = vmatprep.subr.bf16.mxu0 %v5060_v32 }
 0xc03   :  { %5537 = vmatpush1.bf16.msra.mxu1 %v5057_v53  ;;  %5623 = vmatpush1.bf16.msra.mxu0 %v5059_v57 }
 0xc04   :  { %5538 = vmatprep.subr.bf16.mxu1 %v5070_v60  ;;  %5624 = vmatprep.subr.bf16.mxu0 %v5072_v36 }
 0xc07   :  { %5539 = vmatpush1.bf16.msra.mxu1 %v5069_v52  ;;  %5625 = vmatpush1.bf16.msra.mxu0 %v5071_v54 }
 0xc0a   :  { %5557 = vmatmul.mubr.bf16.vlgmr.msra.gmra.mrb[48].mxu1 %v10195_v62  ;;  %5643 = vmatmul.mubr.bf16.vlgmr.msra.gmra.mrb[36].mxu0 %v10195_v62 }
 0xc1d   :  { %v5214_v45 = vpop.f32.mrb[40].mxu1  ;;  %v5300_v1 = vpop.f32.mrb[28].mxu0 }
 0xc1e   :  { %v10225_v40 = vadd.f32 %v5214_v45, %v5080_v46  ;;  %v10227_v7 = vadd.f32 %v5300_v1, %v5088_v25  ;;  %v5216_v62 = vpop.f32.mrb[41].mxu1  ;;  %v5302_v6 = vpop.f32.mrb[29].mxu0 }
 0xc1f   :  { %v10229_v14 = vadd.f32 %v5216_v62, %v5084_v47  ;;  %v10231_v31 = vadd.f32 %v5302_v6, %v5092_v42  ;;  %v5218_v3 = vpop.f32.mrb[42].mxu1  ;;  %v5304_v10 = vpop.f32.mrb[30].mxu0 }
 0xc20   :  { %v5653_v4 = vmul.f32 %v10225_v40, %v10225_v40  ;;  %v5655_v28 = vmul.f32 %v10227_v7, %v10227_v7  ;;  %v10237_v13 = vadd.f32 %v5218_v3, %v5080_v46  ;;  %v10239_v15 = vadd.f32 %v5304_v10, %v5088_v25  ;;  %v5220_v16 = vpop.f32.mrb[43].mxu1  ;;  %v5306_v18 = vpop.f32.mrb[31].mxu0 }
 0xc21   :  { %v5654_v21 = vmul.f32 %v10229_v14, %v10229_v14  ;;  %v5656_v23 = vmul.f32 %v10231_v31, %v10231_v31  ;;  %v10245_v33 = vadd.f32 %v5220_v16, %v5084_v47  ;;  %v10247_v61 = vadd.f32 %v5306_v18, %v5092_v42 }
 0xc22   :  { %v5677_v29 = vmul.f32 %v10225_v40, %v5653_v4  ;;  %v5679_v24 = vmul.f32 %v10227_v7, %v5655_v28  ;;  %v5665_v20 = vmul.f32 %v10237_v13, %v10237_v13  ;;  %v5667_v19 = vmul.f32 %v10239_v15, %v10239_v15 }
 0xc23   :  { %v5678_v34 = vmul.f32 %v10229_v14, %v5654_v21  ;;  %v5680_v41 = vmul.f32 %v10231_v31, %v5656_v23  ;;  %v5666_v12 = vmul.f32 %v10245_v33, %v10245_v33  ;;  %v5668_v26 = vmul.f32 %v10247_v61, %v10247_v61 }
 0xc24   :  { %v5701_v39 = vmul.f32 0.044715, %v5677_v29  ;;  %v5703_v30 = vmul.f32 0.044715, %v5679_v24  ;;  %v5689_v43 = vmul.f32 %v10237_v13, %v5665_v20  ;;  %v5691_v11 = vmul.f32 %v10239_v15, %v5667_v19 }
 0xc25   :  { %v5702_v44 = vmul.f32 0.044715, %v5678_v34  ;;  %v5704_v48 = vmul.f32 0.044715, %v5680_v41  ;;  %v5690_v22 = vmul.f32 %v10245_v33, %v5666_v12  ;;  %v5692_v0 = vmul.f32 %v10247_v61, %v5668_v26 }
 0xc26   :  { %v5725_v63 = vadd.f32 %v10225_v40, %v5701_v39  ;;  %v5727_v27 = vadd.f32 %v10227_v7, %v5703_v30  ;;  %v5713_v32 = vmul.f32 0.044715, %v5689_v43  ;;  %v5715_v53 = vmul.f32 0.044715, %v5691_v11 }
 0xc27   :  { %v5726_v57 = vadd.f32 %v10229_v14, %v5702_v44  ;;  %v5728_v60 = vadd.f32 %v10231_v31, %v5704_v48  ;;  %v5714_v36 = vmul.f32 0.044715, %v5690_v22  ;;  %v5716_v52 = vmul.f32 0.044715, %v5692_v0 }
 0xc28   :  { %v5749_v54 = vmul.f32 0.7978846, %v5725_v63  ;;  %v5751_v46 = vmul.f32 0.7978846, %v5727_v27  ;;  %v5737_v25 = vadd.f32 %v10237_v13, %v5713_v32  ;;  %v5739_v47 = vadd.f32 %v10239_v15, %v5715_v53 }
 0xc29   :  { %v5750_v42 = vmul.f32 0.7978846, %v5726_v57  ;;  %v5752_v45 = vmul.f32 0.7978846, %v5728_v60  ;;  %v5738_v1 = vadd.f32 %v10245_v33, %v5714_v36  ;;  %v5740_v62 = vadd.f32 %v10247_v61, %v5716_v52 }
 0xc2a   :  { %8995 = vtanh.f32 %v5749_v54  ;;  %v5761_v6 = vmul.f32 0.7978846, %v5737_v25  ;;  %v5763_v3 = vmul.f32 0.7978846, %v5739_v47 }
 0xc2b   :  { %8997 = vtanh.f32 %v5751_v46  ;;  %v5762_v10 = vmul.f32 0.7978846, %v5738_v1  ;;  %v5764_v4 = vmul.f32 0.7978846, %v5740_v62 }
 0xc2c   :  { %8999 = vtanh.f32 %v5750_v42 }
 0xc2d   :  { %9001 = vtanh.f32 %v5752_v45 }
 0xc2e   :  { %9003 = vtanh.f32 %v5761_v6 }
 0xc2f   :  { %9005 = vtanh.f32 %v5763_v3 }
 0xc30   :  { %9007 = vtanh.f32 %v5762_v10 }
 0xc31   :  { %9009 = vtanh.f32 %v5764_v4 }
 0xc34   :  { %v8996_v28 = vpop.eup %8995 }
 0xc35   :  { %v8998_v16 = vpop.eup %8997  ;;  %v5797_v18 = vadd.f32 1.0, %v8996_v28 }
 0xc36   :  { %v9000_v21 = vpop.eup %8999  ;;  %v5799_v23 = vadd.f32 1.0, %v8998_v16 }
 0xc37   :  { %v9002_v29 = vpop.eup %9001  ;;  %v5821_v24 = vmul.f32 0.5, %v5797_v18  ;;  %v5798_v20 = vadd.f32 1.0, %v9000_v21 }
 0xc38   :  { %v9004_v19 = vpop.eup %9003  ;;  %v5823_v34 = vmul.f32 0.5, %v5799_v23  ;;  %v5800_v41 = vadd.f32 1.0, %v9002_v29 }
 0xc39   :  { %v9006_v12 = vpop.eup %9005  ;;  %v10274_v26 = vmul.f32 %v10225_v40, %v5821_v24  ;;  %v5822_v39 = vmul.f32 0.5, %v5798_v20  ;;  %v5809_v30 = vadd.f32 1.0, %v9004_v19 }
 0xc3a   :  { %v9008_v43 = vpop.eup %9007  ;;  %v10277_v11 = vmul.f32 %v10227_v7, %v5823_v34  ;;  %v5824_v44 = vmul.f32 0.5, %v5800_v41  ;;  %v5811_v48 = vadd.f32 1.0, %v9006_v12 }
 0xc3b   :  { %v9010_v22 = vpop.eup %9009  ;;  %v10280_v0 = vmul.f32 %v10229_v14, %v5822_v39  ;;  %v5833_v63 = vmul.f32 0.5, %v5809_v30  ;;  %v5810_v27 = vadd.f32 1.0, %v9008_v43 }
 0xc3c   :  { %v10283_v32 = vmul.f32 %v10231_v31, %v5824_v44  ;;  %v5835_v53 = vmul.f32 0.5, %v5811_v48  ;;  %v5812_v40 = vadd.f32 1.0, %v9010_v22  ;;  %v5096_v31 = vrot.slane %v10215_v55, %v1226_v35 }
 0xc3d   :  { %v10286_v57 = vmul.f32 %v10237_v13, %v5833_v63  ;;  %v5834_v60 = vmul.f32 0.5, %v5810_v27  ;;  %v5104_v13 = vrot.slane %v10215_v55, %v1234_v50 }
 0xc3e   :  { %v10289_v7 = vmul.f32 %v10239_v15, %v5835_v53  ;;  %v5836_v36 = vmul.f32 0.5, %v5812_v40  ;;  %v5100_v15 = vrot.slane %v10215_v55, %v1230_v37 }
 0xc3f   :  { %v10292_v52 = vmul.f32 %v10245_v33, %v5834_v60  ;;  %v5108_v33 = vrot.slane %v10215_v55, %v1238_v38 }
 0xc40   :  { %v10295_v14 = vmul.f32 %v10247_v61, %v5836_v36 }
 0xc7d   :  { %v5386_v54 = vpop.f32.mrb[44].mxu1  ;;  %v5472_v46 = vpop.f32.mrb[32].mxu0 }
 0xc7e   :  { %v10309_v61 = vadd.f32 %v5386_v54, %v5096_v31  ;;  %v10311_v25 = vadd.f32 %v5472_v46, %v5104_v13  ;;  %v5388_v47 = vpop.f32.mrb[45].mxu1  ;;  %v5474_v35 = vpop.f32.mrb[33].mxu0 }
 0xc7f   :  { %v10313_v42 = vadd.f32 %v5388_v47, %v5100_v15  ;;  %v10315_v45 = vadd.f32 %v5474_v35, %v5108_v33  ;;  %v5390_v50 = vpop.f32.mrb[46].mxu1  ;;  %v5476_v1 = vpop.f32.mrb[34].mxu0 }
 0xc80   :  { %v5657_v37 = vmul.f32 %v10309_v61, %v10309_v61  ;;  %v5659_v58 = vmul.f32 %v10311_v25, %v10311_v25  ;;  %v10321_v38 = vadd.f32 %v5390_v50, %v5096_v31  ;;  %v10323_v55 = vadd.f32 %v5476_v1, %v5104_v13  ;;  %v5392_v62 = vpop.f32.mrb[47].mxu1  ;;  %v5478_v6 = vpop.f32.mrb[35].mxu0 }
 0xc81   :  { %v5658_v3 = vmul.f32 %v10313_v42, %v10313_v42  ;;  %v5660_v10 = vmul.f32 %v10315_v45, %v10315_v45  ;;  %v10329_v4 = vadd.f32 %v5392_v62, %v5100_v15  ;;  %v10331_v28 = vadd.f32 %v5478_v6, %v5108_v33 }
 0xc82   :  { %v5681_v16 = vmul.f32 %v10309_v61, %v5657_v37  ;;  %v5683_v18 = vmul.f32 %v10311_v25, %v5659_v58  ;;  %v5669_v21 = vmul.f32 %v10321_v38, %v10321_v38  ;;  %v5671_v23 = vmul.f32 %v10323_v55, %v10323_v55 }
 0xc83   :  { %v5682_v29 = vmul.f32 %v10313_v42, %v5658_v3  ;;  %v5684_v24 = vmul.f32 %v10315_v45, %v5660_v10  ;;  %v5670_v20 = vmul.f32 %v10329_v4, %v10329_v4  ;;  %v5672_v19 = vmul.f32 %v10331_v28, %v10331_v28 }
 0xc84   :  { %v5705_v34 = vmul.f32 0.044715, %v5681_v16  ;;  %v5707_v41 = vmul.f32 0.044715, %v5683_v18  ;;  %v5693_v12 = vmul.f32 %v10321_v38, %v5669_v21  ;;  %v5695_v39 = vmul.f32 %v10323_v55, %v5671_v23 }
 0xc85   :  { %v5706_v30 = vmul.f32 0.044715, %v5682_v29  ;;  %v5708_v43 = vmul.f32 0.044715, %v5684_v24  ;;  %v5694_v44 = vmul.f32 %v10329_v4, %v5670_v20  ;;  %v5696_v48 = vmul.f32 %v10331_v28, %v5672_v19 }
 0xc86   :  { %v5729_v22 = vadd.f32 %v10309_v61, %v5705_v34  ;;  %v5731_v63 = vadd.f32 %v10311_v25, %v5707_v41  ;;  %v5717_v27 = vmul.f32 0.044715, %v5693_v12  ;;  %v5719_v53 = vmul.f32 0.044715, %v5695_v39 }
 0xc87   :  { %v5730_v40 = vadd.f32 %v10313_v42, %v5706_v30  ;;  %v5732_v60 = vadd.f32 %v10315_v45, %v5708_v43  ;;  %v5718_v36 = vmul.f32 0.044715, %v5694_v44  ;;  %v5720_v31 = vmul.f32 0.044715, %v5696_v48 }
 0xc88   :  { %v5753_v13 = vmul.f32 0.7978846, %v5729_v22  ;;  %v5755_v15 = vmul.f32 0.7978846, %v5731_v63  ;;  %v5741_v33 = vadd.f32 %v10321_v38, %v5717_v27  ;;  %v5743_v54 = vadd.f32 %v10323_v55, %v5719_v53 }
 0xc89   :  { %v5754_v46 = vmul.f32 0.7978846, %v5730_v40  ;;  %v5756_v47 = vmul.f32 0.7978846, %v5732_v60  ;;  %v5742_v35 = vadd.f32 %v10329_v4, %v5718_v36  ;;  %v5744_v50 = vadd.f32 %v10331_v28, %v5720_v31 }
 0xc8a   :  { %9011 = vtanh.f32 %v5753_v13  ;;  %v5765_v1 = vmul.f32 0.7978846, %v5741_v33  ;;  %v5767_v37 = vmul.f32 0.7978846, %v5743_v54  ;;  %v5074_v33 = vld [vmem:[#allocation24 + $0x8] sm:$0xf] }
 0xc8b   :  { %9013 = vtanh.f32 %v5755_v15  ;;  %v5766_v58 = vmul.f32 0.7978846, %v5742_v35  ;;  %v5768_v62 = vmul.f32 0.7978846, %v5744_v50  ;;  %v5120_v54 = vrot.slane %v5074_v33, %v9672_v59 }
 0xc8c   :  { %9015 = vtanh.f32 %v5754_v46  ;;  %v5116_v46 = vrot.slane %v5074_v33, %v9685_v5 }
 0xc8d   :  { %9017 = vtanh.f32 %v5756_v47 }
 0xc8e   :  { %9019 = vtanh.f32 %v5765_v1 }
 0xc8f   :  { %9021 = vtanh.f32 %v5767_v37 }
 0xc90   :  { %9023 = vtanh.f32 %v5766_v58 }
 0xc91   :  { %9025 = vtanh.f32 %v5768_v62 }
 0xc94   :  { %v9012_v6 = vpop.eup %9011 }
 0xc95   :  { %v9014_v3 = vpop.eup %9013  ;;  %v5801_v10 = vadd.f32 1.0, %v9012_v6 }
 0xc96   :  { %v9016_v16 = vpop.eup %9015  ;;  %v5803_v18 = vadd.f32 1.0, %v9014_v3 }
 0xc97   :  { %v9018_v21 = vpop.eup %9017  ;;  %v5825_v23 = vmul.f32 0.5, %v5801_v10  ;;  %v5802_v29 = vadd.f32 1.0, %v9016_v16 }
 0xc98   :  { %v9020_v24 = vpop.eup %9019  ;;  %v5827_v20 = vmul.f32 0.5, %v5803_v18  ;;  %v5804_v19 = vadd.f32 1.0, %v9018_v21 }
 0xc99   :  { %v9022_v34 = vpop.eup %9021  ;;  %v10358_v41 = vmul.f32 %v10309_v61, %v5825_v23  ;;  %v5826_v12 = vmul.f32 0.5, %v5802_v29  ;;  %v5813_v39 = vadd.f32 1.0, %v9020_v24 }
 0xc9a   :  { %v9024_v30 = vpop.eup %9023  ;;  %v10361_v43 = vmul.f32 %v10311_v25, %v5827_v20  ;;  %v5828_v44 = vmul.f32 0.5, %v5804_v19  ;;  %v5815_v48 = vadd.f32 1.0, %v9022_v34 }
 0xc9b   :  { %v9026_v22 = vpop.eup %9025  ;;  %v10364_v63 = vmul.f32 %v10313_v42, %v5826_v12  ;;  %v5837_v27 = vmul.f32 0.5, %v5813_v39  ;;  %v5814_v53 = vadd.f32 1.0, %v9024_v30 }
 0xc9c   :  { %v10367_v40 = vmul.f32 %v10315_v45, %v5828_v44  ;;  %v5839_v60 = vmul.f32 0.5, %v5815_v48  ;;  %v5816_v61 = vadd.f32 1.0, %v9026_v22  ;;  %v5112_v45 = vrot.slane %v5074_v33, %v9682_v2 }
 0xc9d   :  { %v10370_v36 = vmul.f32 %v10321_v38, %v5837_v27  ;;  %v5838_v31 = vmul.f32 0.5, %v5814_v53  ;;  %v5124_v38 = vrot.slane %v5074_v33, %v9869_v8 }
 0xc9e   :  { %v10373_v25 = vmul.f32 %v10323_v55, %v5839_v60  ;;  %v5840_v13 = vmul.f32 0.5, %v5816_v61 }
 0xc9f   :  { %v10376_v15 = vmul.f32 %v10329_v4, %v5838_v31 }
 0xca0   :  { %v10379_v42 = vmul.f32 %v10331_v28, %v5840_v13 }
 0xcdd   :  { %v5558_v47 = vpop.f32.mrb[48].mxu1  ;;  %v5644_v35 = vpop.f32.mrb[36].mxu0 }
 0xcde   :  { %v10385_v55 = vadd.f32 %v5558_v47, %v5112_v45  ;;  %v10387_v50 = vadd.f32 %v5644_v35, %v5120_v54  ;;  %v5560_v4 = vpop.f32.mrb[49].mxu1  ;;  %v5646_v1 = vpop.f32.mrb[37].mxu0 }
 0xcdf   :  { %v10389_v37 = vadd.f32 %v5560_v4, %v5116_v46  ;;  %v10391_v28 = vadd.f32 %v5646_v1, %v5124_v38  ;;  %v5562_v58 = vpop.f32.mrb[50].mxu1  ;;  %v5648_v62 = vpop.f32.mrb[38].mxu0 }
 0xce0   :  { %v5661_v6 = vmul.f32 %v10385_v55, %v10385_v55  ;;  %v5663_v8 = vmul.f32 %v10387_v50, %v10387_v50  ;;  %v10397_v3 = vadd.f32 %v5562_v58, %v5112_v45  ;;  %v10399_v10 = vadd.f32 %v5648_v62, %v5120_v54  ;;  %v5564_v16 = vpop.f32.mrb[51].mxu1  ;;  %v5650_v18 = vpop.f32.mrb[39].mxu0 }
 0xce1   :  { %v5662_v21 = vmul.f32 %v10389_v37, %v10389_v37  ;;  %v5664_v23 = vmul.f32 %v10391_v28, %v10391_v28  ;;  %v10405_v29 = vadd.f32 %v5564_v16, %v5116_v46  ;;  %v10407_v24 = vadd.f32 %v5650_v18, %v5124_v38 }
 0xce2   :  { %v5685_v20 = vmul.f32 %v10385_v55, %v5661_v6  ;;  %v5687_v19 = vmul.f32 %v10387_v50, %v5663_v8  ;;  %v5673_v34 = vmul.f32 %v10397_v3, %v10397_v3  ;;  %v5675_v12 = vmul.f32 %v10399_v10, %v10399_v10 }
 0xce3   :  { %v5686_v39 = vmul.f32 %v10389_v37, %v5662_v21  ;;  %v5688_v30 = vmul.f32 %v10391_v28, %v5664_v23  ;;  %v5674_v44 = vmul.f32 %v10405_v29, %v10405_v29  ;;  %v5676_v48 = vmul.f32 %v10407_v24, %v10407_v24 }
 0xce4   :  { %v5709_v22 = vmul.f32 0.044715, %v5685_v20  ;;  %v5711_v27 = vmul.f32 0.044715, %v5687_v19  ;;  %v5697_v53 = vmul.f32 %v10397_v3, %v5673_v34  ;;  %v5699_v60 = vmul.f32 %v10399_v10, %v5675_v12 }
 0xce5   :  { %v5710_v61 = vmul.f32 0.044715, %v5686_v39  ;;  %v5712_v31 = vmul.f32 0.044715, %v5688_v30  ;;  %v5698_v13 = vmul.f32 %v10405_v29, %v5674_v44  ;;  %v5700_v33 = vmul.f32 %v10407_v24, %v5676_v48 }
 0xce6   :  { %v5733_v45 = vadd.f32 %v10385_v55, %v5709_v22  ;;  %v5735_v54 = vadd.f32 %v10387_v50, %v5711_v27  ;;  %v5721_v46 = vmul.f32 0.044715, %v5697_v53  ;;  %v5723_v38 = vmul.f32 0.044715, %v5699_v60 }
 0xce7   :  { %v5734_v47 = vadd.f32 %v10389_v37, %v5710_v61  ;;  %v5736_v35 = vadd.f32 %v10391_v28, %v5712_v31  ;;  %v5722_v4 = vmul.f32 0.044715, %v5698_v13  ;;  %v5724_v1 = vmul.f32 0.044715, %v5700_v33 }
 0xce8   :  { %v5757_v58 = vmul.f32 0.7978846, %v5733_v45  ;;  %v5759_v62 = vmul.f32 0.7978846, %v5735_v54  ;;  %v5745_v6 = vadd.f32 %v10397_v3, %v5721_v46  ;;  %v5747_v8 = vadd.f32 %v10399_v10, %v5723_v38 }
 0xce9   :  { %v5758_v16 = vmul.f32 0.7978846, %v5734_v47  ;;  %v5760_v18 = vmul.f32 0.7978846, %v5736_v35  ;;  %v5746_v21 = vadd.f32 %v10405_v29, %v5722_v4  ;;  %v5748_v23 = vadd.f32 %v10407_v24, %v5724_v1 }
 0xcea   :  { %9027 = vtanh.f32 %v5757_v58  ;;  %v5769_v20 = vmul.f32 0.7978846, %v5745_v6  ;;  %v5771_v19 = vmul.f32 0.7978846, %v5747_v8 }
 0xceb   :  { %9029 = vtanh.f32 %v5759_v62  ;;  %v5770_v34 = vmul.f32 0.7978846, %v5746_v21  ;;  %v5772_v12 = vmul.f32 0.7978846, %v5748_v23 }
 0xcec   :  { %9031 = vtanh.f32 %v5758_v16 }
 0xced   :  { %9033 = vtanh.f32 %v5760_v18 }
 0xcee   :  { %9035 = vtanh.f32 %v5769_v20 }
 0xcef   :  { %9037 = vtanh.f32 %v5771_v19 }
 0xcf0   :  { %9039 = vtanh.f32 %v5770_v34 }
 0xcf1   :  { %9041 = vtanh.f32 %v5772_v12 }
 0xcf4   :  { %v9028_v39 = vpop.eup %9027 }
 0xcf5   :  { %v9030_v30 = vpop.eup %9029  ;;  %v5805_v44 = vadd.f32 1.0, %v9028_v39 }
 0xcf6   :  { %v9032_v48 = vpop.eup %9031  ;;  %v5807_v22 = vadd.f32 1.0, %v9030_v30 }
 0xcf7   :  { %v9034_v27 = vpop.eup %9033  ;;  %v5829_v53 = vmul.f32 0.5, %v5805_v44  ;;  %v5806_v60 = vadd.f32 1.0, %v9032_v48 }
 0xcf8   :  { %v9036_v61 = vpop.eup %9035  ;;  %v5831_v31 = vmul.f32 0.5, %v5807_v22  ;;  %v5808_v13 = vadd.f32 1.0, %v9034_v27 }
 0xcf9   :  { %v9038_v33 = vpop.eup %9037  ;;  %v10434_v45 = vmul.f32 %v10385_v55, %v5829_v53  ;;  %v5830_v54 = vmul.f32 0.5, %v5806_v60  ;;  %v5817_v46 = vadd.f32 1.0, %v9036_v61 }
 0xcfa   :  { %v9040_v38 = vpop.eup %9039  ;;  %v10437_v47 = vmul.f32 %v10387_v50, %v5831_v31  ;;  %v5832_v35 = vmul.f32 0.5, %v5808_v13  ;;  %v5819_v4 = vadd.f32 1.0, %v9038_v33 }
 0xcfb   :  { %v9042_v1 = vpop.eup %9041  ;;  %v10440_v58 = vmul.f32 %v10389_v37, %v5830_v54  ;;  %v5841_v62 = vmul.f32 0.5, %v5817_v46  ;;  %v5818_v6 = vadd.f32 1.0, %v9040_v38 }
 0xcfc   :  { %v10443_v8 = vmul.f32 %v10391_v28, %v5832_v35  ;;  %v5843_v16 = vmul.f32 0.5, %v5819_v4  ;;  %v5820_v55 = vadd.f32 1.0, %v9042_v1 }
 0xcfd   :  { %v10446_v18 = vmul.f32 %v10397_v3, %v5841_v62  ;;  %v5842_v21 = vmul.f32 0.5, %v5818_v6 }
 0xcfe   :  { %v10449_v50 = vmul.f32 %v10399_v10, %v5843_v16  ;;  %v5844_v23 = vmul.f32 0.5, %v5820_v55 }
 0xcff   :  { %v10452_v20 = vmul.f32 %v10405_v29, %v5842_v21 }
 0xd00   :  { %v10455_v37 = vmul.f32 %v10407_v24, %v5844_v23 }
 0xd01   :  { %9329 = dma.done.wait [#allocation5 + $0x1], 36864 }
 0xd02   :  { %9330 = vsyncadd [#allocation5 + $0x1], 4294930432  ;;  %v10459_v28 = vpack.c.bf16 %v10292_v52, %v10280_v0  ;;  %v10463_v3 = vpack.c.bf16 %v10295_v14, %v10283_v32  ;;  %v5886_v10 = vld [vmem:[#allocation3 + $0x8] sm:$0xff]  ;;  %v5885_v19 = vld [vmem:[#allocation3] sm:$0xff] }
 0xd03   :  { %v5934_v29 = vld [vmem:[#allocation3 + $0x188] sm:$0xff]  ;;  %6191 = vmatprep.subr.bf16.mxu1 %v5886_v10  ;;  %v5933_v24 = vld [vmem:[#allocation3 + $0x180] sm:$0xff]  ;;  %v5888_v0 = vld [vmem:[#allocation3 + $0x18] sm:$0xff] }
 0xd04   :  { %6223 = vmatprep.mubr.bf16.mxu1 %v10459_v28  ;;  %6264 = vmatprep.mubr.bf16.mxu0 %v10463_v3  ;;  %v5889_v34 = vld [vmem:[#allocation3 + $0x20] sm:$0xff]  ;;  %v5936_v52 = vld [vmem:[#allocation3 + $0x198] sm:$0xff]  ;;  %v5891_v39 = vld [vmem:[#allocation3 + $0x30] sm:$0xff] }
 0xd05   :  { %6232 = vmatprep.subr.bf16.mxu0 %v5934_v29  ;;  %v5937_v12 = vld [vmem:[#allocation3 + $0x1a0] sm:$0xff]  ;;  %6192 = vmatpush1.bf16.msra.mxu1 %v5885_v19  ;;  %v5892_v32 = vld [vmem:[#allocation3 + $0x38] sm:$0xff]  ;;  %v5939_v30 = vld [vmem:[#allocation3 + $0x1b0] sm:$0xff] }
 0xd06   :  { %6233 = vmatpush1.bf16.msra.mxu0 %v5933_v24  ;;  %6193 = vmatprep.subr.bf16.mxu1 %v5889_v34  ;;  %v5940_v14 = vld [vmem:[#allocation3 + $0x1b8] sm:$0xff]  ;;  %v5895_v44 = vld [vmem:[#allocation3 + $0x50] sm:$0xff]  ;;  %v5894_v22 = vld [vmem:[#allocation3 + $0x48] sm:$0xff] }
 0xd07   :  { %6234 = vmatprep.subr.bf16.mxu0 %v5937_v12  ;;  %v5943_v48 = vld [vmem:[#allocation3 + $0x1d0] sm:$0xff]  ;;  %v5942_v27 = vld [vmem:[#allocation3 + $0x1c8] sm:$0xff]  ;;  %v5897_v61 = vld [vmem:[#allocation3 + $0x60] sm:$0xff] }
 0xd08   :  { %v5898_v53 = vld [vmem:[#allocation3 + $0x68] sm:$0xff]  ;;  %v5945_v31 = vld [vmem:[#allocation3 + $0x1e0] sm:$0xff]  ;;  %v5900_v54 = vld [vmem:[#allocation3 + $0x78] sm:$0xff] }
 0xd09   :  { %6194 = vmatpush1.bf16.msra.mxu1 %v5888_v0  ;;  %v5946_v60 = vld [vmem:[#allocation3 + $0x1e8] sm:$0xff]  ;;  %v5901_v13 = vld [vmem:[#allocation3 + $0x80] sm:$0xff]  ;;  %v5948_v46 = vld [vmem:[#allocation3 + $0x1f8] sm:$0xff] }
 0xd0a   :  { %6235 = vmatpush1.bf16.msra.mxu0 %v5936_v52  ;;  %6195 = vmatprep.subr.bf16.mxu1 %v5892_v32  ;;  %v5949_v33 = vld [vmem:[#allocation3 + $0x200] sm:$0xff]  ;;  %v5904_v38 = vld [vmem:[#allocation3 + $0x98] sm:$0xff]  ;;  %v5903_v4 = vld [vmem:[#allocation3 + $0x90] sm:$0xff] }
 0xd0b   :  { %6236 = vmatprep.subr.bf16.mxu0 %v5940_v14  ;;  %v5952_v35 = vld [vmem:[#allocation3 + $0x218] sm:$0xff]  ;;  %v5951_v1 = vld [vmem:[#allocation3 + $0x210] sm:$0xff]  ;;  %v5906_v16 = vld [vmem:[#allocation3 + $0xa8] sm:$0xff] }
 0xd0c   :  { %v5907_v62 = vld [vmem:[#allocation3 + $0xb0] sm:$0xff]  ;;  %v5954_v55 = vld [vmem:[#allocation3 + $0x228] sm:$0xff]  ;;  %v5909_v10 = vld [vmem:[#allocation3 + $0xc0] sm:$0xff] }
 0xd0d   :  { %6196 = vmatpush1.bf16.msra.mxu1 %v5891_v39  ;;  %v5955_v6 = vld [vmem:[#allocation3 + $0x230] sm:$0xff]  ;;  %v5910_v21 = vld [vmem:[#allocation3 + $0xc8] sm:$0xff]  ;;  %v5957_v29 = vld [vmem:[#allocation3 + $0x240] sm:$0xff] }
 0xd0e   :  { %6237 = vmatpush1.bf16.msra.mxu0 %v5939_v30  ;;  %6197 = vmatprep.subr.bf16.mxu1 %v5895_v44  ;;  %v5958_v23 = vld [vmem:[#allocation3 + $0x248] sm:$0xff]  ;;  %v5913_v19 = vld [vmem:[#allocation3 + $0xe0] sm:$0xff]  ;;  %v5912_v34 = vld [vmem:[#allocation3 + $0xd8] sm:$0xff] }
 0xd0f   :  { %6238 = vmatprep.subr.bf16.mxu0 %v5943_v48  ;;  %v5961_v24 = vld [vmem:[#allocation3 + $0x260] sm:$0xff]  ;;  %v5960_v12 = vld [vmem:[#allocation3 + $0x258] sm:$0xff]  ;;  %v5915_v32 = vld [vmem:[#allocation3 + $0xf0] sm:$0xff] }
 0xd10   :  { %v5916_v0 = vld [vmem:[#allocation3 + $0xf8] sm:$0xff]  ;;  %v5963_v14 = vld [vmem:[#allocation3 + $0x270] sm:$0xff]  ;;  %v5918_v44 = vld [vmem:[#allocation3 + $0x108] sm:$0xff] }
 0xd11   :  { %6198 = vmatpush1.bf16.msra.mxu1 %v5894_v22  ;;  %v5964_v52 = vld [vmem:[#allocation3 + $0x278] sm:$0xff]  ;;  %v5919_v39 = vld [vmem:[#allocation3 + $0x110] sm:$0xff]  ;;  %v5966_v48 = vld [vmem:[#allocation3 + $0x288] sm:$0xff] }
 0xd12   :  { %6239 = vmatpush1.bf16.msra.mxu0 %v5942_v27  ;;  %6199 = vmatprep.subr.bf16.mxu1 %v5898_v53  ;;  %v5967_v30 = vld [vmem:[#allocation3 + $0x290] sm:$0xff]  ;;  %v5922_v22 = vld [vmem:[#allocation3 + $0x128] sm:$0xff]  ;;  %v5921_v53 = vld [vmem:[#allocation3 + $0x120] sm:$0xff] }
 0xd13   :  { %6240 = vmatprep.subr.bf16.mxu0 %v5946_v60  ;;  %v5970_v27 = vld [vmem:[#allocation3 + $0x2a8] sm:$0xff]  ;;  %v5969_v60 = vld [vmem:[#allocation3 + $0x2a0] sm:$0xff] }
 0xd15   :  { %6200 = vmatpush1.bf16.msra.mxu1 %v5897_v61  ;;  %v5925_v61 = vld [vmem:[#allocation3 + $0x140] sm:$0xff] }
 0xd16   :  { %6241 = vmatpush1.bf16.msra.mxu0 %v5945_v31  ;;  %6201 = vmatprep.subr.bf16.mxu1 %v5901_v13  ;;  %v5973_v31 = vld [vmem:[#allocation3 + $0x2c0] sm:$0xff]  ;;  %v5924_v13 = vld [vmem:[#allocation3 + $0x138] sm:$0xff] }
 0xd17   :  { %6242 = vmatprep.subr.bf16.mxu0 %v5949_v33  ;;  %v5972_v33 = vld [vmem:[#allocation3 + $0x2b8] sm:$0xff] }
 0xd19   :  { %6202 = vmatpush1.bf16.msra.mxu1 %v5900_v54  ;;  %v5928_v54 = vld [vmem:[#allocation3 + $0x158] sm:$0xff] }
 0xd1a   :  { %6243 = vmatpush1.bf16.msra.mxu0 %v5948_v46  ;;  %6203 = vmatprep.subr.bf16.mxu1 %v5904_v38  ;;  %v5976_v46 = vld [vmem:[#allocation3 + $0x2d8] sm:$0xff]  ;;  %v5927_v38 = vld [vmem:[#allocation3 + $0x150] sm:$0xff] }
 0xd1b   :  { %6244 = vmatprep.subr.bf16.mxu0 %v5952_v35  ;;  %v5975_v35 = vld [vmem:[#allocation3 + $0x2d0] sm:$0xff] }
 0xd1d   :  { %6204 = vmatpush1.bf16.msra.mxu1 %v5903_v4  ;;  %v5931_v4 = vld [vmem:[#allocation3 + $0x170] sm:$0xff] }
 0xd1e   :  { %6245 = vmatpush1.bf16.msra.mxu0 %v5951_v1  ;;  %6205 = vmatprep.subr.bf16.mxu1 %v5907_v62  ;;  %v5979_v1 = vld [vmem:[#allocation3 + $0x2f0] sm:$0xff]  ;;  %v5930_v62 = vld [vmem:[#allocation3 + $0x168] sm:$0xff] }
 0xd1f   :  { %6246 = vmatprep.subr.bf16.mxu0 %v5955_v6  ;;  %v5978_v6 = vld [vmem:[#allocation3 + $0x2e8] sm:$0xff] }
 0xd21   :  { %6206 = vmatpush1.bf16.msra.mxu1 %v5906_v16  ;;  %v5982_v16 = vld [vmem:[#allocation3 + $0x308] sm:$0xff] }
 0xd22   :  { %6247 = vmatpush1.bf16.msra.mxu0 %v5954_v55  ;;  %6207 = vmatprep.subr.bf16.mxu1 %v5910_v21  ;;  %v6030_v55 = vld [vmem:[#allocation3 + $0x488] sm:$0xff]  ;;  %v10469_v21 = vpack.c.bf16 %v10286_v57, %v10274_v26  ;;  %v10481_v26 = vpack.c.bf16 %v10379_v42, %v10367_v40  ;;  %v6032_v57 = vld [vmem:[#allocation3 + $0x498] sm:$0xff]  ;;  %v6035_v40 = vld [vmem:[#allocation3 + $0x4b0] sm:$0xff] }
 0xd23   :  { %6248 = vmatprep.subr.bf16.mxu0 %v5958_v23  ;;  %v10473_v23 = vpack.c.bf16 %v10289_v7, %v10277_v11  ;;  %v5984_v11 = vld [vmem:[#allocation3 + $0x318] sm:$0xff]  ;;  %v6039_v42 = vld [vmem:[#allocation3 + $0x4d0] sm:$0xff] }
 0xd24   :  { %v5988_v7 = vld [vmem:[#allocation3 + $0x338] sm:$0xff] }
 0xd25   :  { %6208 = vmatpush1.bf16.msra.mxu1 %v5909_v10  ;;  %v5981_v10 = vld [vmem:[#allocation3 + $0x300] sm:$0xff] }
 0xd26   :  { %6249 = vmatpush1.bf16.msra.mxu0 %v5957_v29  ;;  %6209 = vmatprep.subr.bf16.mxu1 %v5913_v19  ;;  %v6029_v29 = vld [vmem:[#allocation3 + $0x480] sm:$0xff] }
 0xd27   :  { %6250 = vmatprep.subr.bf16.mxu0 %v5961_v24  ;;  %v5985_v19 = vld [vmem:[#allocation3 + $0x320] sm:$0xff] }
 0xd28   :  { %v6033_v24 = vld [vmem:[#allocation3 + $0x4a0] sm:$0xff] }
 0xd29   :  { %6210 = vmatpush1.bf16.msra.mxu1 %v5912_v34  ;;  %v10477_v34 = vpack.c.bf16 %v10376_v15, %v10364_v63  ;;  %v5987_v63 = vld [vmem:[#allocation3 + $0x330] sm:$0xff] }
 0xd2a   :  { %6251 = vmatpush1.bf16.msra.mxu0 %v5960_v12  ;;  %6211 = vmatprep.subr.bf16.mxu1 %v5916_v0  ;;  %v6036_v12 = vld [vmem:[#allocation3 + $0x4b8] sm:$0xff]  ;;  %v5991_v15 = vld [vmem:[#allocation3 + $0x350] sm:$0xff]  ;;  %v5990_v0 = vld [vmem:[#allocation3 + $0x348] sm:$0xff] }
 0xd2b   :  { %6252 = vmatprep.subr.bf16.mxu0 %v5964_v52  ;;  %v6038_v52 = vld [vmem:[#allocation3 + $0x4c8] sm:$0xff] }
 0xd2d   :  { %6212 = vmatpush1.bf16.msra.mxu1 %v5915_v32  ;;  %v5994_v32 = vld [vmem:[#allocation3 + $0x368] sm:$0xff] }
 0xd2e   :  { %6253 = vmatpush1.bf16.msra.mxu0 %v5963_v14  ;;  %6213 = vmatprep.subr.bf16.mxu1 %v5919_v39  ;;  %v6042_v14 = vld [vmem:[#allocation3 + $0x4e8] sm:$0xff]  ;;  %v5993_v39 = vld [vmem:[#allocation3 + $0x360] sm:$0xff] }
 0xd2f   :  { %6254 = vmatprep.subr.bf16.mxu0 %v5967_v30  ;;  %v6041_v30 = vld [vmem:[#allocation3 + $0x4e0] sm:$0xff] }
 0xd31   :  { %6214 = vmatpush1.bf16.msra.mxu1 %v5918_v44  ;;  %v5997_v44 = vld [vmem:[#allocation3 + $0x380] sm:$0xff] }
 0xd32   :  { %6255 = vmatpush1.bf16.msra.mxu0 %v5966_v48  ;;  %6215 = vmatprep.subr.bf16.mxu1 %v5922_v22  ;;  %v6045_v48 = vld [vmem:[#allocation3 + $0x500] sm:$0xff]  ;;  %v5996_v22 = vld [vmem:[#allocation3 + $0x378] sm:$0xff] }
 0xd33   :  { %6256 = vmatprep.subr.bf16.mxu0 %v5970_v27  ;;  %v6044_v27 = vld [vmem:[#allocation3 + $0x4f8] sm:$0xff] }
 0xd35   :  { %6216 = vmatpush1.bf16.msra.mxu1 %v5921_v53  ;;  %v6000_v53 = vld [vmem:[#allocation3 + $0x398] sm:$0xff] }
 0xd36   :  { %6257 = vmatpush1.bf16.msra.mxu0 %v5969_v60  ;;  %6217 = vmatprep.subr.bf16.mxu1 %v5925_v61  ;;  %v6048_v60 = vld [vmem:[#allocation3 + $0x518] sm:$0xff]  ;;  %v5999_v61 = vld [vmem:[#allocation3 + $0x390] sm:$0xff] }
 0xd37   :  { %6258 = vmatprep.subr.bf16.mxu0 %v5973_v31  ;;  %v6047_v31 = vld [vmem:[#allocation3 + $0x510] sm:$0xff] }
 0xd39   :  { %6218 = vmatpush1.bf16.msra.mxu1 %v5924_v13  ;;  %v6003_v13 = vld [vmem:[#allocation3 + $0x3b0] sm:$0xff] }
 0xd3a   :  { %6259 = vmatpush1.bf16.msra.mxu0 %v5972_v33  ;;  %6219 = vmatprep.subr.bf16.mxu1 %v5928_v54  ;;  %v6051_v33 = vld [vmem:[#allocation3 + $0x530] sm:$0xff]  ;;  %v6002_v54 = vld [vmem:[#allocation3 + $0x3a8] sm:$0xff] }
 0xd3b   :  { %6260 = vmatprep.subr.bf16.mxu0 %v5976_v46  ;;  %v6050_v46 = vld [vmem:[#allocation3 + $0x528] sm:$0xff] }
 0xd3d   :  { %6220 = vmatpush1.bf16.msra.mxu1 %v5927_v38  ;;  %v6006_v38 = vld [vmem:[#allocation3 + $0x3c8] sm:$0xff] }
 0xd3e   :  { %6261 = vmatpush1.bf16.msra.mxu0 %v5975_v35  ;;  %6221 = vmatprep.subr.bf16.mxu1 %v5931_v4  ;;  %v6054_v35 = vld [vmem:[#allocation3 + $0x548] sm:$0xff]  ;;  %v6005_v4 = vld [vmem:[#allocation3 + $0x3c0] sm:$0xff] }
 0xd3f   :  { %6262 = vmatprep.subr.bf16.mxu0 %v5979_v1  ;;  %v6053_v1 = vld [vmem:[#allocation3 + $0x540] sm:$0xff] }
 0xd41   :  { %6222 = vmatpush1.bf16.msra.mxu1 %v5930_v62  ;;  %v6009_v62 = vld [vmem:[#allocation3 + $0x3e0] sm:$0xff] }
 0xd42   :  { %6263 = vmatpush1.bf16.msra.mxu0 %v5978_v6  ;;  %6273 = vmatprep.subr.bf16.mxu1 %v5982_v16  ;;  %v6057_v6 = vld [vmem:[#allocation3 + $0x560] sm:$0xff]  ;;  %v6008_v16 = vld [vmem:[#allocation3 + $0x3d8] sm:$0xff] }
 0xd43   :  { %6314 = vmatprep.subr.bf16.mxu0 %v6030_v55  ;;  %v6056_v55 = vld [vmem:[#allocation3 + $0x558] sm:$0xff] }
 0xd44   :  { %6224 = vmatmul.mubr.bf16.vlgmr.msra.gmra.mrb[52].mxu1 %v10469_v21 }
 0xd45   :  { %6265 = vmatmul.mubr.bf16.vlgmr.msra.gmra.mrb[40].mxu0 %v10473_v23  ;;  %6274 = vmatpush1.bf16.msra.mxu1 %v5981_v10  ;;  %v6012_v10 = vld [vmem:[#allocation3 + $0x3f8] sm:$0xff] }
 0xd46   :  { %6315 = vmatpush1.bf16.msra.mxu0 %v6029_v29  ;;  %6275 = vmatprep.subr.bf16.mxu1 %v5985_v19  ;;  %v6060_v29 = vld [vmem:[#allocation3 + $0x578] sm:$0xff]  ;;  %v6011_v19 = vld [vmem:[#allocation3 + $0x3f0] sm:$0xff] }
 0xd47   :  { %6316 = vmatprep.subr.bf16.mxu0 %v6033_v24  ;;  %6305 = vmatprep.mubr.bf16.mxu1 %v10477_v34  ;;  %v6059_v24 = vld [vmem:[#allocation3 + $0x570] sm:$0xff] }
 0xd48   :  { %6346 = vmatprep.mubr.bf16.mxu0 %v10481_v26 }
 0xd49   :  { %6276 = vmatpush1.bf16.msra.mxu1 %v5984_v11  ;;  %v6015_v11 = vld [vmem:[#allocation3 + $0x410] sm:$0xff] }
 0xd4a   :  { %6317 = vmatpush1.bf16.msra.mxu0 %v6032_v57  ;;  %6277 = vmatprep.subr.bf16.mxu1 %v5988_v7  ;;  %v6063_v57 = vld [vmem:[#allocation3 + $0x590] sm:$0xff]  ;;  %v6014_v7 = vld [vmem:[#allocation3 + $0x408] sm:$0xff] }
 0xd4b   :  { %6318 = vmatprep.subr.bf16.mxu0 %v6036_v12  ;;  %v6062_v12 = vld [vmem:[#allocation3 + $0x588] sm:$0xff] }
 0xd4d   :  { %6278 = vmatpush1.bf16.msra.mxu1 %v5987_v63  ;;  %v6018_v63 = vld [vmem:[#allocation3 + $0x428] sm:$0xff] }
 0xd4e   :  { %6319 = vmatpush1.bf16.msra.mxu0 %v6035_v40  ;;  %6279 = vmatprep.subr.bf16.mxu1 %v5991_v15  ;;  %v6066_v40 = vld [vmem:[#allocation3 + $0x5a8] sm:$0xff]  ;;  %v6017_v15 = vld [vmem:[#allocation3 + $0x420] sm:$0xff] }
 0xd4f   :  { %6320 = vmatprep.subr.bf16.mxu0 %v6039_v42  ;;  %v6065_v42 = vld [vmem:[#allocation3 + $0x5a0] sm:$0xff] }
 0xd51   :  { %6280 = vmatpush1.bf16.msra.mxu1 %v5990_v0  ;;  %v6021_v0 = vld [vmem:[#allocation3 + $0x440] sm:$0xff] }
 0xd52   :  { %6321 = vmatpush1.bf16.msra.mxu0 %v6038_v52  ;;  %6281 = vmatprep.subr.bf16.mxu1 %v5994_v32  ;;  %v6069_v52 = vld [vmem:[#allocation3 + $0x5c0] sm:$0xff]  ;;  %v6020_v32 = vld [vmem:[#allocation3 + $0x438] sm:$0xff] }
 0xd53   :  { %6322 = vmatprep.subr.bf16.mxu0 %v6042_v14  ;;  %v6068_v14 = vld [vmem:[#allocation3 + $0x5b8] sm:$0xff] }
 0xd55   :  { %6282 = vmatpush1.bf16.msra.mxu1 %v5993_v39  ;;  %v6024_v39 = vld [vmem:[#allocation3 + $0x458] sm:$0xff] }
 0xd56   :  { %6323 = vmatpush1.bf16.msra.mxu0 %v6041_v30  ;;  %6283 = vmatprep.subr.bf16.mxu1 %v5997_v44  ;;  %v6072_v30 = vld [vmem:[#allocation3 + $0x5d8] sm:$0xff]  ;;  %v6023_v44 = vld [vmem:[#allocation3 + $0x450] sm:$0xff] }
 0xd57   :  { %6324 = vmatprep.subr.bf16.mxu0 %v6045_v48  ;;  %v6071_v48 = vld [vmem:[#allocation3 + $0x5d0] sm:$0xff] }
 0xd59   :  { %6284 = vmatpush1.bf16.msra.mxu1 %v5996_v22  ;;  %v6027_v22 = vld [vmem:[#allocation3 + $0x470] sm:$0xff] }
 0xd5a   :  { %6325 = vmatpush1.bf16.msra.mxu0 %v6044_v27  ;;  %6285 = vmatprep.subr.bf16.mxu1 %v6000_v53  ;;  %v6075_v27 = vld [vmem:[#allocation3 + $0x5f0] sm:$0xff]  ;;  %v6026_v53 = vld [vmem:[#allocation3 + $0x468] sm:$0xff] }
 0xd5b   :  { %6326 = vmatprep.subr.bf16.mxu0 %v6048_v60  ;;  %v6074_v60 = vld [vmem:[#allocation3 + $0x5e8] sm:$0xff] }
 0xd5d   :  { %6286 = vmatpush1.bf16.msra.mxu1 %v5999_v61  ;;  %v6078_v61 = vld [vmem:[#allocation3 + $0x608] sm:$0xff] }
 0xd5e   :  { %6327 = vmatpush1.bf16.msra.mxu0 %v6047_v31  ;;  %6287 = vmatprep.subr.bf16.mxu1 %v6003_v13  ;;  %v6126_v31 = vld [vmem:[#allocation3 + $0x788] sm:$0xff]  ;;  %v10489_v13 = vpack.c.bf16 %v10370_v36, %v10358_v41  ;;  %v10501_v41 = vpack.c.bf16 %v10455_v37, %v10443_v8  ;;  %v6128_v36 = vld [vmem:[#allocation3 + $0x798] sm:$0xff]  ;;  %v6131_v8 = vld [vmem:[#allocation3 + $0x7b0] sm:$0xff] }
 0xd5f   :  { %6328 = vmatprep.subr.bf16.mxu0 %v6051_v33  ;;  %v10493_v33 = vpack.c.bf16 %v10373_v25, %v10361_v43  ;;  %v6080_v43 = vld [vmem:[#allocation3 + $0x618] sm:$0xff]  ;;  %v6135_v37 = vld [vmem:[#allocation3 + $0x7d0] sm:$0xff] }
 0xd60   :  { %v6084_v25 = vld [vmem:[#allocation3 + $0x638] sm:$0xff] }
 0xd61   :  { %6288 = vmatpush1.bf16.msra.mxu1 %v6002_v54  ;;  %v6077_v54 = vld [vmem:[#allocation3 + $0x600] sm:$0xff] }
 0xd62   :  { %6329 = vmatpush1.bf16.msra.mxu0 %v6050_v46  ;;  %6289 = vmatprep.subr.bf16.mxu1 %v6006_v38  ;;  %v6125_v46 = vld [vmem:[#allocation3 + $0x780] sm:$0xff] }
 0xd63   :  { %6330 = vmatprep.subr.bf16.mxu0 %v6054_v35  ;;  %v6081_v38 = vld [vmem:[#allocation3 + $0x620] sm:$0xff] }
 0xd64   :  { %v6129_v35 = vld [vmem:[#allocation3 + $0x7a0] sm:$0xff] }
 0xd65   :  { %6290 = vmatpush1.bf16.msra.mxu1 %v6005_v4  ;;  %v10497_v4 = vpack.c.bf16 %v10452_v20, %v10440_v58  ;;  %v6083_v58 = vld [vmem:[#allocation3 + $0x630] sm:$0xff] }
 0xd66   :  { %6331 = vmatpush1.bf16.msra.mxu0 %v6053_v1  ;;  %6291 = vmatprep.subr.bf16.mxu1 %v6009_v62  ;;  %v6132_v1 = vld [vmem:[#allocation3 + $0x7b8] sm:$0xff]  ;;  %v6087_v20 = vld [vmem:[#allocation3 + $0x650] sm:$0xff]  ;;  %v6086_v62 = vld [vmem:[#allocation3 + $0x648] sm:$0xff] }
 0xd67   :  { %6332 = vmatprep.subr.bf16.mxu0 %v6057_v6  ;;  %v6134_v6 = vld [vmem:[#allocation3 + $0x7c8] sm:$0xff] }
 0xd69   :  { %6292 = vmatpush1.bf16.msra.mxu1 %v6008_v16  ;;  %v6090_v16 = vld [vmem:[#allocation3 + $0x668] sm:$0xff] }
 0xd6a   :  { %6333 = vmatpush1.bf16.msra.mxu0 %v6056_v55  ;;  %6293 = vmatprep.subr.bf16.mxu1 %v6012_v10  ;;  %v6138_v55 = vld [vmem:[#allocation3 + $0x7e8] sm:$0xff]  ;;  %v6089_v10 = vld [vmem:[#allocation3 + $0x660] sm:$0xff] }
 0xd6b   :  { %6334 = vmatprep.subr.bf16.mxu0 %v6060_v29  ;;  %v6137_v29 = vld [vmem:[#allocation3 + $0x7e0] sm:$0xff] }
 0xd6d   :  { %6294 = vmatpush1.bf16.msra.mxu1 %v6011_v19  ;;  %v6093_v19 = vld [vmem:[#allocation3 + $0x680] sm:$0xff] }
 0xd6e   :  { %6335 = vmatpush1.bf16.msra.mxu0 %v6059_v24  ;;  %6295 = vmatprep.subr.bf16.mxu1 %v6015_v11  ;;  %v6141_v24 = vld [vmem:[#allocation3 + $0x800] sm:$0xff]  ;;  %v6092_v11 = vld [vmem:[#allocation3 + $0x678] sm:$0xff] }
 0xd6f   :  { %6336 = vmatprep.subr.bf16.mxu0 %v6063_v57  ;;  %v6140_v57 = vld [vmem:[#allocation3 + $0x7f8] sm:$0xff] }
 0xd71   :  { %6296 = vmatpush1.bf16.msra.mxu1 %v6014_v7  ;;  %v6096_v7 = vld [vmem:[#allocation3 + $0x698] sm:$0xff] }
 0xd72   :  { %6337 = vmatpush1.bf16.msra.mxu0 %v6062_v12  ;;  %6297 = vmatprep.subr.bf16.mxu1 %v6018_v63  ;;  %v6144_v12 = vld [vmem:[#allocation3 + $0x818] sm:$0xff]  ;;  %v6095_v63 = vld [vmem:[#allocation3 + $0x690] sm:$0xff] }
 0xd73   :  { %6338 = vmatprep.subr.bf16.mxu0 %v6066_v40  ;;  %v6143_v40 = vld [vmem:[#allocation3 + $0x810] sm:$0xff] }
 0xd75   :  { %6298 = vmatpush1.bf16.msra.mxu1 %v6017_v15  ;;  %v6099_v15 = vld [vmem:[#allocation3 + $0x6b0] sm:$0xff] }
 0xd76   :  { %6339 = vmatpush1.bf16.msra.mxu0 %v6065_v42  ;;  %6299 = vmatprep.subr.bf16.mxu1 %v6021_v0  ;;  %v6147_v42 = vld [vmem:[#allocation3 + $0x830] sm:$0xff]  ;;  %v6098_v0 = vld [vmem:[#allocation3 + $0x6a8] sm:$0xff] }
 0xd77   :  { %6340 = vmatprep.subr.bf16.mxu0 %v6069_v52  ;;  %v6146_v52 = vld [vmem:[#allocation3 + $0x828] sm:$0xff] }
 0xd79   :  { %6300 = vmatpush1.bf16.msra.mxu1 %v6020_v32  ;;  %v6102_v32 = vld [vmem:[#allocation3 + $0x6c8] sm:$0xff] }
 0xd7a   :  { %6341 = vmatpush1.bf16.msra.mxu0 %v6068_v14  ;;  %6301 = vmatprep.subr.bf16.mxu1 %v6024_v39  ;;  %v6150_v14 = vld [vmem:[#allocation3 + $0x848] sm:$0xff]  ;;  %v6101_v39 = vld [vmem:[#allocation3 + $0x6c0] sm:$0xff] }
 0xd7b   :  { %6342 = vmatprep.subr.bf16.mxu0 %v6072_v30  ;;  %v6149_v30 = vld [vmem:[#allocation3 + $0x840] sm:$0xff] }
 0xd7d   :  { %6302 = vmatpush1.bf16.msra.mxu1 %v6023_v44  ;;  %v6105_v44 = vld [vmem:[#allocation3 + $0x6e0] sm:$0xff] }
 0xd7e   :  { %6343 = vmatpush1.bf16.msra.mxu0 %v6071_v48  ;;  %6303 = vmatprep.subr.bf16.mxu1 %v6027_v22  ;;  %v6153_v48 = vld [vmem:[#allocation3 + $0x860] sm:$0xff]  ;;  %v6104_v22 = vld [vmem:[#allocation3 + $0x6d8] sm:$0xff] }
 0xd7f   :  { %6344 = vmatprep.subr.bf16.mxu0 %v6075_v27  ;;  %v6152_v27 = vld [vmem:[#allocation3 + $0x858] sm:$0xff] }
 0xd81   :  { %6304 = vmatpush1.bf16.msra.mxu1 %v6026_v53  ;;  %v6108_v53 = vld [vmem:[#allocation3 + $0x6f8] sm:$0xff] }
 0xd82   :  { %6345 = vmatpush1.bf16.msra.mxu0 %v6074_v60  ;;  %6355 = vmatprep.subr.bf16.mxu1 %v6078_v61  ;;  %v6156_v60 = vld [vmem:[#allocation3 + $0x878] sm:$0xff]  ;;  %v6107_v61 = vld [vmem:[#allocation3 + $0x6f0] sm:$0xff] }
 0xd83   :  { %6396 = vmatprep.subr.bf16.mxu0 %v6126_v31  ;;  %v6155_v31 = vld [vmem:[#allocation3 + $0x870] sm:$0xff] }
 0xd84   :  { %6306 = vmatmul.mubr.bf16.vlgmr.msra.gmra.mrb[56].mxu1 %v10489_v13 }
 0xd85   :  { %6347 = vmatmul.mubr.bf16.vlgmr.msra.gmra.mrb[44].mxu0 %v10493_v33  ;;  %6356 = vmatpush1.bf16.msra.mxu1 %v6077_v54  ;;  %v6111_v54 = vld [vmem:[#allocation3 + $0x710] sm:$0xff] }
 0xd86   :  { %6397 = vmatpush1.bf16.msra.mxu0 %v6125_v46  ;;  %6357 = vmatprep.subr.bf16.mxu1 %v6081_v38  ;;  %v6159_v46 = vld [vmem:[#allocation3 + $0x890] sm:$0xff]  ;;  %v6110_v38 = vld [vmem:[#allocation3 + $0x708] sm:$0xff] }
 0xd87   :  { %6398 = vmatprep.subr.bf16.mxu0 %v6129_v35  ;;  %6387 = vmatprep.mubr.bf16.mxu1 %v10497_v4  ;;  %v6158_v35 = vld [vmem:[#allocation3 + $0x888] sm:$0xff] }
 0xd88   :  { %6428 = vmatprep.mubr.bf16.mxu0 %v10501_v41 }
 0xd89   :  { %6358 = vmatpush1.bf16.msra.mxu1 %v6080_v43  ;;  %v6114_v43 = vld [vmem:[#allocation3 + $0x728] sm:$0xff] }
 0xd8a   :  { %6399 = vmatpush1.bf16.msra.mxu0 %v6128_v36  ;;  %6359 = vmatprep.subr.bf16.mxu1 %v6084_v25  ;;  %v6162_v36 = vld [vmem:[#allocation3 + $0x8a8] sm:$0xff]  ;;  %v6113_v25 = vld [vmem:[#allocation3 + $0x720] sm:$0xff] }
 0xd8b   :  { %6400 = vmatprep.subr.bf16.mxu0 %v6132_v1  ;;  %v6161_v1 = vld [vmem:[#allocation3 + $0x8a0] sm:$0xff] }
 0xd8d   :  { %6360 = vmatpush1.bf16.msra.mxu1 %v6083_v58  ;;  %v6117_v58 = vld [vmem:[#allocation3 + $0x740] sm:$0xff] }
 0xd8e   :  { %6401 = vmatpush1.bf16.msra.mxu0 %v6131_v8  ;;  %6361 = vmatprep.subr.bf16.mxu1 %v6087_v20  ;;  %v6165_v8 = vld [vmem:[#allocation3 + $0x8c0] sm:$0xff]  ;;  %v6116_v20 = vld [vmem:[#allocation3 + $0x738] sm:$0xff] }
 0xd8f   :  { %6402 = vmatprep.subr.bf16.mxu0 %v6135_v37  ;;  %v6164_v37 = vld [vmem:[#allocation3 + $0x8b8] sm:$0xff] }
 0xd91   :  { %6362 = vmatpush1.bf16.msra.mxu1 %v6086_v62  ;;  %v6120_v62 = vld [vmem:[#allocation3 + $0x758] sm:$0xff] }
 0xd92   :  { %6403 = vmatpush1.bf16.msra.mxu0 %v6134_v6  ;;  %6363 = vmatprep.subr.bf16.mxu1 %v6090_v16  ;;  %v6168_v6 = vld [vmem:[#allocation3 + $0x8d8] sm:$0xff]  ;;  %v6119_v16 = vld [vmem:[#allocation3 + $0x750] sm:$0xff] }
 0xd93   :  { %6404 = vmatprep.subr.bf16.mxu0 %v6138_v55  ;;  %v6167_v55 = vld [vmem:[#allocation3 + $0x8d0] sm:$0xff] }
 0xd95   :  { %6364 = vmatpush1.bf16.msra.mxu1 %v6089_v10  ;;  %v6123_v10 = vld [vmem:[#allocation3 + $0x770] sm:$0xff] }
 0xd96   :  { %6405 = vmatpush1.bf16.msra.mxu0 %v6137_v29  ;;  %6365 = vmatprep.subr.bf16.mxu1 %v6093_v19  ;;  %v6171_v29 = vld [vmem:[#allocation3 + $0x8f0] sm:$0xff]  ;;  %v6122_v19 = vld [vmem:[#allocation3 + $0x768] sm:$0xff] }
 0xd97   :  { %6406 = vmatprep.subr.bf16.mxu0 %v6141_v24  ;;  %v6170_v24 = vld [vmem:[#allocation3 + $0x8e8] sm:$0xff] }
 0xd99   :  { %6366 = vmatpush1.bf16.msra.mxu1 %v6092_v11  ;;  %v5911_v11 = vld [vmem:[#allocation3 + $0xd0] sm:$0xff] }
 0xd9a   :  { %6407 = vmatpush1.bf16.msra.mxu0 %v6140_v57  ;;  %6367 = vmatprep.subr.bf16.mxu1 %v6096_v7  ;;  %v5959_v57 = vld [vmem:[#allocation3 + $0x250] sm:$0xff]  ;;  %v10509_v7 = vpack.c.bf16 %v10446_v18, %v10434_v45  ;;  %v5890_v45 = vld [vmem:[#allocation3 + $0x28] sm:$0xff] }
 0xd9b   :  { %6408 = vmatprep.subr.bf16.mxu0 %v6144_v12  ;;  %v10513_v12 = vpack.c.bf16 %v10449_v50, %v10437_v47  ;;  %v5938_v18 = vld [vmem:[#allocation3 + $0x1a8] sm:$0xff]  ;;  %v5917_v47 = vld [vmem:[#allocation3 + $0x100] sm:$0xff] }
 0xd9c   :  { %v5965_v50 = vld [vmem:[#allocation3 + $0x280] sm:$0xff] }
 0xd9d   :  { %6368 = vmatpush1.bf16.msra.mxu1 %v6095_v63  ;;  %v5887_v63 = vld [vmem:[#allocation3 + $0x10] sm:$0xff] }
 0xd9e   :  { %6409 = vmatpush1.bf16.msra.mxu0 %v6143_v40  ;;  %6369 = vmatprep.subr.bf16.mxu1 %v6099_v15  ;;  %v5935_v40 = vld [vmem:[#allocation3 + $0x190] sm:$0xff]  ;;  %v5914_v15 = vld [vmem:[#allocation3 + $0xe8] sm:$0xff] }
 0xd9f   :  { %6410 = vmatprep.subr.bf16.mxu0 %v6147_v42  ;;  %v5962_v42 = vld [vmem:[#allocation3 + $0x268] sm:$0xff] }
 0xda1   :  { %6370 = vmatpush1.bf16.msra.mxu1 %v6098_v0  ;;  %v5893_v0 = vld [vmem:[#allocation3 + $0x40] sm:$0xff] }
 0xda2   :  { %6411 = vmatpush1.bf16.msra.mxu0 %v6146_v52  ;;  %6371 = vmatprep.subr.bf16.mxu1 %v6102_v32  ;;  %v5941_v52 = vld [vmem:[#allocation3 + $0x1c0] sm:$0xff]  ;;  %v5920_v32 = vld [vmem:[#allocation3 + $0x118] sm:$0xff] }
 0xda3   :  { %6412 = vmatprep.subr.bf16.mxu0 %v6150_v14  ;;  %v5968_v14 = vld [vmem:[#allocation3 + $0x298] sm:$0xff] }
 0xda5   :  { %6372 = vmatpush1.bf16.msra.mxu1 %v6101_v39  ;;  %v5896_v39 = vld [vmem:[#allocation3 + $0x58] sm:$0xff] }
 0xda6   :  { %6413 = vmatpush1.bf16.msra.mxu0 %v6149_v30  ;;  %6373 = vmatprep.subr.bf16.mxu1 %v6105_v44  ;;  %v5944_v30 = vld [vmem:[#allocation3 + $0x1d8] sm:$0xff]  ;;  %v5923_v44 = vld [vmem:[#allocation3 + $0x130] sm:$0xff] }
 0xda7   :  { %6414 = vmatprep.subr.bf16.mxu0 %v6153_v48  ;;  %v5971_v48 = vld [vmem:[#allocation3 + $0x2b0] sm:$0xff] }
 0xda9   :  { %6374 = vmatpush1.bf16.msra.mxu1 %v6104_v22  ;;  %v5926_v22 = vld [vmem:[#allocation3 + $0x148] sm:$0xff] }
 0xdaa   :  { %6415 = vmatpush1.bf16.msra.mxu0 %v6152_v27  ;;  %6375 = vmatprep.subr.bf16.mxu1 %v6108_v53  ;;  %v5974_v27 = vld [vmem:[#allocation3 + $0x2c8] sm:$0xff] }
 0xdab   :  { %6416 = vmatprep.subr.bf16.mxu0 %v6156_v60  ;;  %v5902_v53 = vld [vmem:[#allocation3 + $0x88] sm:$0xff] }
 0xdac   :  { %v5950_v60 = vld [vmem:[#allocation3 + $0x208] sm:$0xff] }
 0xdad   :  { %6376 = vmatpush1.bf16.msra.mxu1 %v6107_v61  ;;  %v5929_v61 = vld [vmem:[#allocation3 + $0x160] sm:$0xff] }
 0xdae   :  { %6417 = vmatpush1.bf16.msra.mxu0 %v6155_v31  ;;  %6377 = vmatprep.subr.bf16.mxu1 %v6111_v54  ;;  %v5977_v31 = vld [vmem:[#allocation3 + $0x2e0] sm:$0xff] }
 0xdaf   :  { %6418 = vmatprep.subr.bf16.mxu0 %v6159_v46  ;;  %v5905_v54 = vld [vmem:[#allocation3 + $0xa0] sm:$0xff] }
 0xdb0   :  { %v5953_v46 = vld [vmem:[#allocation3 + $0x220] sm:$0xff] }
 0xdb1   :  { %6378 = vmatpush1.bf16.msra.mxu1 %v6110_v38  ;;  %v5932_v38 = vld [vmem:[#allocation3 + $0x178] sm:$0xff] }
 0xdb2   :  { %6419 = vmatpush1.bf16.msra.mxu0 %v6158_v35  ;;  %6379 = vmatprep.subr.bf16.mxu1 %v6114_v43  ;;  %v5980_v35 = vld [vmem:[#allocation3 + $0x2f8] sm:$0xff] }
 0xdb3   :  { %6420 = vmatprep.subr.bf16.mxu0 %v6162_v36  ;;  %v5908_v43 = vld [vmem:[#allocation3 + $0xb8] sm:$0xff] }
 0xdb4   :  { %v5956_v36 = vld [vmem:[#allocation3 + $0x238] sm:$0xff] }
 0xdb5   :  { %6380 = vmatpush1.bf16.msra.mxu1 %v6113_v25  ;;  %v6007_v25 = vld [vmem:[#allocation3 + $0x3d0] sm:$0xff] }
 0xdb6   :  { %6421 = vmatpush1.bf16.msra.mxu0 %v6161_v1  ;;  %6381 = vmatprep.subr.bf16.mxu1 %v6117_v58  ;;  %v6055_v1 = vld [vmem:[#allocation3 + $0x550] sm:$0xff] }
 0xdb7   :  { %6422 = vmatprep.subr.bf16.mxu0 %v6165_v8  ;;  %v5983_v58 = vld [vmem:[#allocation3 + $0x310] sm:$0xff] }
 0xdb8   :  { %v6031_v8 = vld [vmem:[#allocation3 + $0x490] sm:$0xff] }
 0xdb9   :  { %6382 = vmatpush1.bf16.msra.mxu1 %v6116_v20  ;;  %v6010_v20 = vld [vmem:[#allocation3 + $0x3e8] sm:$0xff] }
 0xdba   :  { %6423 = vmatpush1.bf16.msra.mxu0 %v6164_v37  ;;  %6383 = vmatprep.subr.bf16.mxu1 %v6120_v62  ;;  %v6058_v37 = vld [vmem:[#allocation3 + $0x568] sm:$0xff] }
 0xdbb   :  { %6424 = vmatprep.subr.bf16.mxu0 %v6168_v6  ;;  %v5986_v62 = vld [vmem:[#allocation3 + $0x328] sm:$0xff] }
 0xdbc   :  { %v6034_v6 = vld [vmem:[#allocation3 + $0x4a8] sm:$0xff] }
 0xdbd   :  { %6384 = vmatpush1.bf16.msra.mxu1 %v6119_v16  ;;  %v6013_v16 = vld [vmem:[#allocation3 + $0x400] sm:$0xff] }
 0xdbe   :  { %6425 = vmatpush1.bf16.msra.mxu0 %v6167_v55  ;;  %6385 = vmatprep.subr.bf16.mxu1 %v6123_v10  ;;  %v6061_v55 = vld [vmem:[#allocation3 + $0x580] sm:$0xff] }
 0xdbf   :  { %6426 = vmatprep.subr.bf16.mxu0 %v6171_v29  ;;  %v5989_v10 = vld [vmem:[#allocation3 + $0x340] sm:$0xff]  ;;  %v6016_v29 = vld [vmem:[#allocation3 + $0x418] sm:$0xff] }
 0xdc1   :  { %6386 = vmatpush1.bf16.msra.mxu1 %v6122_v19  ;;  %v5992_v19 = vld [vmem:[#allocation3 + $0x358] sm:$0xff] }
 0xdc2   :  { %6427 = vmatpush1.bf16.msra.mxu0 %v6170_v24  ;;  %7767 = vmatprep.subr.bf16.mxu1 %v5911_v11  ;;  %v6040_v24 = vld [vmem:[#allocation3 + $0x4d8] sm:$0xff]  ;;  %v6019_v11 = vld [vmem:[#allocation3 + $0x430] sm:$0xff] }
 0xdc3   :  { %7789 = vmatprep.subr.bf16.mxu0 %v5959_v57  ;;  %v6067_v57 = vld [vmem:[#allocation3 + $0x5b0] sm:$0xff] }
 0xdc4   :  { %6388 = vmatmul.mubr.bf16.vlgmr.msra.gmra.mrb[60].mxu1 %v10509_v7 }
 0xdc5   :  { %6429 = vmatmul.mubr.bf16.vlgmr.msra.gmra.mrb[48].mxu0 %v10513_v12  ;;  %7768 = vmatpush3.bf16.msra.mxu1 %v5887_v63  ;;  %v6022_v63 = vld [vmem:[#allocation3 + $0x448] sm:$0xff] }
 0xdc6   :  { %7790 = vmatpush3.bf16.msra.mxu0 %v5935_v40  ;;  %7769 = vmatprep.subr.bf16.mxu1 %v5914_v15  ;;  %v6070_v40 = vld [vmem:[#allocation3 + $0x5c8] sm:$0xff] }
 0xdc7   :  { %7791 = vmatprep.subr.bf16.mxu0 %v5962_v42  ;;  %6469 = vmatprep.mubr.bf16.mxu1 %v10459_v28  ;;  %v5899_v28 = vld [vmem:[#allocation3 + $0x70] sm:$0xff]  ;;  %v5998_v15 = vld [vmem:[#allocation3 + $0x388] sm:$0xff] }
 0xdc8   :  { %6509 = vmatprep.mubr.bf16.mxu0 %v10463_v3  ;;  %v5947_v3 = vld [vmem:[#allocation3 + $0x1f0] sm:$0xff]  ;;  %v6046_v42 = vld [vmem:[#allocation3 + $0x508] sm:$0xff] }
 0xdc9   :  { %7770 = vmatpush3.bf16.msra.mxu1 %v5890_v45  ;;  %v6025_v45 = vld [vmem:[#allocation3 + $0x460] sm:$0xff] }
 0xdca   :  { %7792 = vmatpush3.bf16.msra.mxu0 %v5938_v18  ;;  %7771 = vmatprep.subr.bf16.mxu1 %v5917_v47  ;;  %v6073_v18 = vld [vmem:[#allocation3 + $0x5e0] sm:$0xff] }
 0xdcb   :  { %7793 = vmatprep.subr.bf16.mxu0 %v5965_v50  ;;  %v6001_v47 = vld [vmem:[#allocation3 + $0x3a0] sm:$0xff] }
 0xdcc   :  { %v6049_v50 = vld [vmem:[#allocation3 + $0x520] sm:$0xff] }
 0xdcd   :  { %7772 = vmatpush3.bf16.msra.mxu1 %v5893_v0  ;;  %v6028_v0 = vld [vmem:[#allocation3 + $0x478] sm:$0xff] }
 0xdce   :  { %7794 = vmatpush3.bf16.msra.mxu0 %v5941_v52  ;;  %7773 = vmatprep.subr.bf16.mxu1 %v5920_v32  ;;  %v6076_v52 = vld [vmem:[#allocation3 + $0x5f8] sm:$0xff] }
 0xdcf   :  { %7795 = vmatprep.subr.bf16.mxu0 %v5968_v14  ;;  %v6004_v32 = vld [vmem:[#allocation3 + $0x3b8] sm:$0xff] }
 0xdd0   :  { %v6052_v14 = vld [vmem:[#allocation3 + $0x538] sm:$0xff] }
 0xdd1   :  { %7774 = vmatpush3.bf16.msra.mxu1 %v5896_v39  ;;  %v6103_v39 = vld [vmem:[#allocation3 + $0x6d0] sm:$0xff] }
 0xdd2   :  { %7796 = vmatpush3.bf16.msra.mxu0 %v5944_v30  ;;  %7775 = vmatprep.subr.bf16.mxu1 %v5923_v44  ;;  %v6151_v30 = vld [vmem:[#allocation3 + $0x850] sm:$0xff] }
 0xdd3   :  { %7797 = vmatprep.subr.bf16.mxu0 %v5971_v48  ;;  %v6079_v44 = vld [vmem:[#allocation3 + $0x610] sm:$0xff] }
 0xdd4   :  { %v6127_v48 = vld [vmem:[#allocation3 + $0x790] sm:$0xff] }
 0xdd5   :  { %7776 = vmatpush3.bf16.msra.mxu1 %v5899_v28  ;;  %v6106_v28 = vld [vmem:[#allocation3 + $0x6e8] sm:$0xff] }
 0xdd6   :  { %7798 = vmatpush3.bf16.msra.mxu0 %v5947_v3  ;;  %7777 = vmatprep.subr.bf16.mxu1 %v5926_v22  ;;  %v6154_v3 = vld [vmem:[#allocation3 + $0x868] sm:$0xff] }
 0xdd7   :  { %7799 = vmatprep.subr.bf16.mxu0 %v5974_v27  ;;  %v6082_v22 = vld [vmem:[#allocation3 + $0x628] sm:$0xff] }
 0xdd8   :  { %v6130_v27 = vld [vmem:[#allocation3 + $0x7a8] sm:$0xff] }
 0xdd9   :  { %7778 = vmatpush3.bf16.msra.mxu1 %v5902_v53  ;;  %v6109_v53 = vld [vmem:[#allocation3 + $0x700] sm:$0xff] }
 0xdda   :  { %7800 = vmatpush3.bf16.msra.mxu0 %v5950_v60  ;;  %7779 = vmatprep.subr.bf16.mxu1 %v5929_v61  ;;  %v6157_v60 = vld [vmem:[#allocation3 + $0x880] sm:$0xff] }
 0xddb   :  { %7801 = vmatprep.subr.bf16.mxu0 %v5977_v31  ;;  %v6085_v61 = vld [vmem:[#allocation3 + $0x640] sm:$0xff]  ;;  %v6112_v31 = vld [vmem:[#allocation3 + $0x718] sm:$0xff] }
 0xddd   :  { %7780 = vmatpush3.bf16.msra.mxu1 %v5905_v54  ;;  %v6088_v54 = vld [vmem:[#allocation3 + $0x658] sm:$0xff] }
 0xdde   :  { %7802 = vmatpush3.bf16.msra.mxu0 %v5953_v46  ;;  %7781 = vmatprep.subr.bf16.mxu1 %v5932_v38  ;;  %v6136_v46 = vld [vmem:[#allocation3 + $0x7d8] sm:$0xff]  ;;  %v6115_v38 = vld [vmem:[#allocation3 + $0x730] sm:$0xff] }
 0xddf   :  { %7803 = vmatprep.subr.bf16.mxu0 %v5980_v35  ;;  %v6163_v35 = vld [vmem:[#allocation3 + $0x8b0] sm:$0xff] }
 0xde1   :  { %7782 = vmatpush3.bf16.msra.mxu1 %v5908_v43  ;;  %v6139_v43 = vld [vmem:[#allocation3 + $0x7f0] sm:$0xff] }
 0xde2   :  { %7804 = vmatpush3.bf16.msra.mxu0 %v5956_v36  ;;  %7811 = vmatprep.subr.bf16.mxu1 %v6007_v25  ;;  %v6118_v36 = vld [vmem:[#allocation3 + $0x748] sm:$0xff] }
 0xde3   :  { %7833 = vmatprep.subr.bf16.mxu0 %v6055_v1  ;;  %v6166_v25 = vld [vmem:[#allocation3 + $0x8c8] sm:$0xff] }
 0xde4   :  { %6470 = vmatmul.mubr.bf16.vlgmr.msra.gmra.mrb[64].mxu1 %v10469_v21  ;;  %v6037_v21 = vld [vmem:[#allocation3 + $0x4c0] sm:$0xff] }
 0xde5   :  { %6510 = vmatmul.mubr.bf16.vlgmr.msra.gmra.mrb[52].mxu0 %v10473_v23  ;;  %7812 = vmatpush3.bf16.msra.mxu1 %v5983_v58  ;;  %v6064_v23 = vld [vmem:[#allocation3 + $0x598] sm:$0xff] }
 0xde6   :  { %7834 = vmatpush3.bf16.msra.mxu0 %v6031_v8  ;;  %7813 = vmatprep.subr.bf16.mxu1 %v6010_v20  ;;  %v6094_v8 = vld [vmem:[#allocation3 + $0x688] sm:$0xff] }
 0xde7   :  { %7835 = vmatprep.subr.bf16.mxu0 %v6058_v37  ;;  %6549 = vmatprep.mubr.bf16.mxu1 %v10477_v34  ;;  %v5995_v34 = vld [vmem:[#allocation3 + $0x370] sm:$0xff]  ;;  %v6142_v20 = vld [vmem:[#allocation3 + $0x808] sm:$0xff] }
 0xde8   :  { %6589 = vmatprep.mubr.bf16.mxu0 %v10481_v26  ;;  %v6043_v26 = vld [vmem:[#allocation3 + $0x4f0] sm:$0xff] }
 0xde9   :  { %7814 = vmatpush3.bf16.msra.mxu1 %v5986_v62 }
 0xdea   :  { %7836 = vmatpush3.bf16.msra.mxu0 %v6034_v6  ;;  %7815 = vmatprep.subr.bf16.mxu1 %v6013_v16  ;;  %v6121_v6 = vld [vmem:[#allocation3 + $0x760] sm:$0xff] }
 0xdeb   :  { %7837 = vmatprep.subr.bf16.mxu0 %v6061_v55  ;;  %v6169_v16 = vld [vmem:[#allocation3 + $0x8e0] sm:$0xff] }
 0xded   :  { %7816 = vmatpush3.bf16.msra.mxu1 %v5989_v10 }
 0xdee   :  { %7838 = vmatpush3.bf16.msra.mxu0 %v6037_v21  ;;  %7817 = vmatprep.subr.bf16.mxu1 %v6016_v29 }
 0xdef   :  { %7839 = vmatprep.subr.bf16.mxu0 %v6064_v23 }
 0xdf1   :  { %7818 = vmatpush3.bf16.msra.mxu1 %v5992_v19 }
 0xdf2   :  { %7840 = vmatpush3.bf16.msra.mxu0 %v6040_v24  ;;  %7819 = vmatprep.subr.bf16.mxu1 %v6019_v11 }
 0xdf3   :  { %7841 = vmatprep.subr.bf16.mxu0 %v6067_v57 }
 0xdf5   :  { %7820 = vmatpush3.bf16.msra.mxu1 %v5995_v34  ;;  %v6097_v34 = vld [vmem:[#allocation3 + $0x6a0] sm:$0xff] }
 0xdf6   :  { %7842 = vmatpush3.bf16.msra.mxu0 %v6043_v26  ;;  %7821 = vmatprep.subr.bf16.mxu1 %v6022_v63  ;;  %v6145_v26 = vld [vmem:[#allocation3 + $0x820] sm:$0xff] }
 0xdf7   :  { %7843 = vmatprep.subr.bf16.mxu0 %v6070_v40  ;;  %v6124_v40 = vld [vmem:[#allocation3 + $0x778] sm:$0xff] }
 0xdf9   :  { %7822 = vmatpush3.bf16.msra.mxu1 %v5998_v15  ;;  %v6172_v15 = vld [vmem:[#allocation3 + $0x8f8] sm:$0xff] }
 0xdfa   :  { %7844 = vmatpush3.bf16.msra.mxu0 %v6046_v42  ;;  %7823 = vmatprep.subr.bf16.mxu1 %v6025_v45  ;;  %v6100_v42 = vld [vmem:[#allocation3 + $0x6b8] sm:$0xff] }
 0xdfb   :  { %7845 = vmatprep.subr.bf16.mxu0 %v6073_v18  ;;  %v6148_v45 = vld [vmem:[#allocation3 + $0x838] sm:$0xff] }
 0xdfd   :  { %7824 = vmatpush3.bf16.msra.mxu1 %v6001_v47 }
 0xdfe   :  { %7846 = vmatpush3.bf16.msra.mxu0 %v6049_v50  ;;  %7825 = vmatprep.subr.bf16.mxu1 %v6028_v0 }
 0xdff   :  { %7847 = vmatprep.subr.bf16.mxu0 %v6076_v52 }
 0xe01   :  { %7826 = vmatpush3.bf16.msra.mxu1 %v6004_v32 }
 0xe02   :  { %7848 = vmatpush3.bf16.msra.mxu0 %v6052_v14  ;;  %7855 = vmatprep.subr.bf16.mxu1 %v6103_v39 }
 0xe03   :  { %7877 = vmatprep.subr.bf16.mxu0 %v6151_v30 }
 0xe04   :  { %6550 = vmatmul.mubr.bf16.vlgmr.msra.gmra.mrb[68].mxu1 %v10489_v13  ;;  %v6133_v13 = vld [vmem:[#allocation3 + $0x7c0] sm:$0xff] }
 0xe05   :  { %6590 = vmatmul.mubr.bf16.vlgmr.msra.gmra.mrb[56].mxu0 %v10493_v33  ;;  %7856 = vmatpush3.bf16.msra.mxu1 %v6079_v44  ;;  %v6160_v33 = vld [vmem:[#allocation3 + $0x898] sm:$0xff] }
 0xe06   :  { %7878 = vmatpush3.bf16.msra.mxu0 %v6127_v48  ;;  %7857 = vmatprep.subr.bf16.mxu1 %v6106_v28 }
 0xe07   :  { %7879 = vmatprep.subr.bf16.mxu0 %v6154_v3  ;;  %6629 = vmatprep.mubr.bf16.mxu1 %v10497_v4  ;;  %v10527_v4 = vld [vmem:[#allocation17 + $0x7] ss:$8 sm:$0x7] }
 0xe08   :  { %6669 = vmatprep.mubr.bf16.mxu0 %v10501_v41  ;;  %v6091_v41 = vld [vmem:[#allocation3 + $0x670] sm:$0xff]  ;;  %v6179_v1 = vrot.slane %v10527_v4, %v9682_v2  ;;  %v6183_v58 = vrot.slane %v10527_v4, %v9685_v5 }
 0xe09   :  { %7858 = vmatpush3.bf16.msra.mxu1 %v6082_v22 }
 0xe0a   :  { %7880 = vmatpush3.bf16.msra.mxu0 %v6130_v27  ;;  %7859 = vmatprep.subr.bf16.mxu1 %v6109_v53 }
 0xe0b   :  { %7881 = vmatprep.subr.bf16.mxu0 %v6157_v60 }
 0xe0d   :  { %7860 = vmatpush3.bf16.msra.mxu1 %v6085_v61 }
 0xe0e   :  { %7882 = vmatpush3.bf16.msra.mxu0 %v6133_v13  ;;  %7861 = vmatprep.subr.bf16.mxu1 %v6112_v31 }
 0xe0f   :  { %7883 = vmatprep.subr.bf16.mxu0 %v6160_v33 }
 0xe11   :  { %7862 = vmatpush3.bf16.msra.mxu1 %v6088_v54 }
 0xe12   :  { %7884 = vmatpush3.bf16.msra.mxu0 %v6136_v46  ;;  %7863 = vmatprep.subr.bf16.mxu1 %v6115_v38 }
 0xe13   :  { %7885 = vmatprep.subr.bf16.mxu0 %v6163_v35  ;;  %v6187_v35 = vrot.slane %v10527_v4, %v9672_v59 }
 0xe15   :  { %7864 = vmatpush3.bf16.msra.mxu1 %v6091_v41 }
 0xe16   :  { %7886 = vmatpush3.bf16.msra.mxu0 %v6139_v43  ;;  %7865 = vmatprep.subr.bf16.mxu1 %v6118_v36 }
 0xe17   :  { %7887 = vmatprep.subr.bf16.mxu0 %v6166_v25  ;;  %v6225_v37 = vpop.f32.mrb[52].mxu1 }
 0xe18   :  { %v6266_v62 = vpop.f32.mrb[40].mxu0  ;;  %v6226_v55 = vadd.f32 %v6225_v37, %v6179_v1  ;;  %v6227_v10 = vpop.f32.mrb[53].mxu1 }
 0xe19   :  { %v6268_v21 = vpop.f32.mrb[41].mxu0  ;;  %v6228_v29 = vadd.f32 %v6227_v10, %v6183_v58  ;;  %v6229_v23 = vpop.f32.mrb[54].mxu1  ;;  %7866 = vmatpush3.bf16.msra.mxu1 %v6094_v8 }
 0xe1a   :  { %v6270_v19 = vpop.f32.mrb[42].mxu0  ;;  %7888 = vmatpush3.bf16.msra.mxu0 %v6142_v20  ;;  %v6267_v24 = vadd.f32 %v6266_v62, %v6226_v55  ;;  %v6230_v11 = vpop.f32.mrb[55].mxu1  ;;  %7867 = vmatprep.subr.bf16.mxu1 %v6121_v6 }
 0xe1b   :  { %v6271_v57 = vpop.f32.mrb[43].mxu0  ;;  %7889 = vmatprep.subr.bf16.mxu0 %v6169_v16  ;;  %v6269_v63 = vadd.f32 %v6268_v21, %v6228_v29 }
 0xe1d   :  { %7868 = vmatpush3.bf16.msra.mxu1 %v6097_v34 }
 0xe1e   :  { %7890 = vmatpush3.bf16.msra.mxu0 %v6145_v26  ;;  %7869 = vmatprep.subr.bf16.mxu1 %v6124_v40 }
 0xe1f   :  { %7891 = vmatprep.subr.bf16.mxu0 %v6172_v15 }
 0xe21   :  { %7870 = vmatpush3.bf16.msra.mxu1 %v6100_v42 }
 0xe22   :  { %7892 = vmatpush3.bf16.msra.mxu0 %v6148_v45 }
 0xe24   :  { %6630 = vmatmul.mubr.bf16.vlgmr.msra.gmra.mrb[72].mxu1 %v10509_v7 }
 0xe25   :  { %6670 = vmatmul.mubr.bf16.vlgmr.msra.gmra.mrb[60].mxu0 %v10513_v12 }
 0xe57   :  { %v6307_v18 = vpop.f32.mrb[56].mxu1 }
 0xe58   :  { %v6348_v47 = vpop.f32.mrb[44].mxu0  ;;  %v6308_v50 = vadd.f32 %v6307_v18, %v6267_v24  ;;  %v6309_v0 = vpop.f32.mrb[57].mxu1 }
 0xe59   :  { %v6350_v52 = vpop.f32.mrb[45].mxu0  ;;  %v6310_v32 = vadd.f32 %v6309_v0, %v6269_v63  ;;  %v6311_v14 = vpop.f32.mrb[58].mxu1 }
 0xe5a   :  { %v6352_v39 = vpop.f32.mrb[46].mxu0  ;;  %v6349_v30 = vadd.f32 %v6348_v47, %v6308_v50  ;;  %v6312_v44 = vpop.f32.mrb[59].mxu1 }
 0xe5b   :  { %v6353_v48 = vpop.f32.mrb[47].mxu0  ;;  %v6351_v28 = vadd.f32 %v6350_v52, %v6310_v32 }
 0xe97   :  { %v6389_v3 = vpop.f32.mrb[60].mxu1 }
 0xe98   :  { %v6430_v22 = vpop.f32.mrb[48].mxu0  ;;  %v6390_v27 = vadd.f32 %v6389_v3, %v6349_v30  ;;  %v6391_v53 = vpop.f32.mrb[61].mxu1 }
 0xe99   :  { %v6432_v60 = vpop.f32.mrb[49].mxu0  ;;  %v6392_v7 = vadd.f32 %v6391_v53, %v6351_v28  ;;  %v6393_v61 = vpop.f32.mrb[62].mxu1 }
 0xe9a   :  { %v6434_v12 = vpop.f32.mrb[50].mxu0  ;;  %v6431_v13 = vadd.f32 %v6430_v22, %v6390_v27  ;;  %v6394_v31 = vpop.f32.mrb[63].mxu1 }
 0xe9b   :  { %v6435_v33 = vpop.f32.mrb[51].mxu0  ;;  %v6433_v54 = vadd.f32 %v6432_v60, %v6392_v7  ;;  %v6681_v31 = vld [vmem:[#allocation17 + $0x18] ss:$8 sm:$0x7] }
 0xe9c   :  { %v6677_v0 = vadd.f32 %v6431_v13, %v10170_v17  ;;  %v6709_v33 = vrot.slane %v6681_v31, %v9682_v2 }
 0xe9d   :  { %v6678_v52 = vadd.f32 %v6433_v54, %v10172_v51  ;;  %v6713_v54 = vrot.slane %v6681_v31, %v9685_v5 }
 0xe9f   :  { %v6684_v30 = vadd.f32 %v6678_v52, %v6677_v0 }
 0xeb7   :  { %v7783_v46 = vpop.f32.mrb[64].mxu1 }
 0xeb8   :  { %v7805_v38 = vpop.f32.mrb[52].mxu0  ;;  %v7784_v41 = vpop.f32.mrb[65].mxu1 }
 0xeb9   :  { %v7806_v43 = vpop.f32.mrb[53].mxu0  ;;  %v7785_v36 = vadd.f32 %v7784_v41, %v7783_v46  ;;  %v7786_v1 = vpop.f32.mrb[66].mxu1  ;;  %v6717_v46 = vrot.slane %v6681_v31, %v9672_v59 }
 0xeba   :  { %v7807_v25 = vadd.f32 %v7806_v43, %v7805_v38  ;;  %v7808_v58 = vpop.f32.mrb[54].mxu0  ;;  %v7787_v8 = vpop.f32.mrb[67].mxu1 }
 0xebb   :  { %v7809_v20 = vpop.f32.mrb[55].mxu0  ;;  %v6472_v37 = vadd.f32 %v7785_v36, %v6187_v35 }
 0xebd   :  { %v6512_v62 = vadd.f32 %v7807_v25, %v6472_v37 }
 0xed7   :  { %v7827_v6 = vpop.f32.mrb[68].mxu1 }
 0xed8   :  { %v7849_v16 = vpop.f32.mrb[56].mxu0  ;;  %v7828_v55 = vpop.f32.mrb[69].mxu1 }
 0xed9   :  { %v7850_v10 = vpop.f32.mrb[57].mxu0  ;;  %v7829_v21 = vadd.f32 %v7828_v55, %v7827_v6  ;;  %v7830_v23 = vpop.f32.mrb[70].mxu1 }
 0xeda   :  { %v7851_v29 = vadd.f32 %v7850_v10, %v7849_v16  ;;  %v7852_v19 = vpop.f32.mrb[58].mxu0  ;;  %v7831_v24 = vpop.f32.mrb[71].mxu1 }
 0xedb   :  { %v7853_v4 = vpop.f32.mrb[59].mxu0  ;;  %v6552_v11 = vadd.f32 %v7829_v21, %v6512_v62 }
 0xedd   :  { %v6592_v57 = vadd.f32 %v7851_v29, %v6552_v11 }
 0xef7   :  { %v7871_v34 = vpop.f32.mrb[72].mxu1 }
 0xef8   :  { %v7893_v26 = vpop.f32.mrb[60].mxu0  ;;  %v7872_v63 = vpop.f32.mrb[73].mxu1 }
 0xef9   :  { %v7894_v40 = vpop.f32.mrb[61].mxu0  ;;  %v7873_v15 = vadd.f32 %v7872_v63, %v7871_v34  ;;  %v7874_v45 = vpop.f32.mrb[74].mxu1 }
 0xefa   :  { %v7895_v42 = vadd.f32 %v7894_v40, %v7893_v26  ;;  %v7896_v18 = vpop.f32.mrb[62].mxu0  ;;  %v7875_v47 = vpop.f32.mrb[75].mxu1 }
 0xefb   :  { %v7897_v50 = vpop.f32.mrb[63].mxu0  ;;  %v6632_v32 = vadd.f32 %v7873_v15, %v6592_v57 }
 0xefd   :  { %v6672_v14 = vadd.f32 %v7895_v42, %v6632_v32 }
 0xeff   :  { %v6679_v39 = vadd.f32 %v6672_v14, %v10174_v56  ;;  %v6683_v56 = vld [vmem:[#allocation17 + $0x19] ss:$8 sm:$0x7] }
 0xf00   :  { %v6728_v35 = vrot.slane %v6683_v56, %v9682_v2  ;;  %v6732_v41 = vrot.slane %v6683_v56, %v9685_v5  ;;  %v6736_v43 = vrot.slane %v6683_v56, %v9672_v59 }
 0xf01   :  { %v6685_v44 = vadd.f32 %v6684_v30, %v6679_v39 }
 0xf03   :  { %6686 = vadd.xlane.f32.xlu0 %v6685_v44 }
 0xf90   :  { %v6687_v48 = vpop.xlane.xlu0 %6686 }
 0xf91   :  { %v6688_v28 = vmul.f32 0.0026041667, %v6687_v48 }
 0xf93   :  { %v6689_v3 = vsub.f32 %v6677_v0, %v6688_v28  ;;  %v6690_v22 = vsub.f32 %v6678_v52, %v6688_v28  ;;  %v6691_v27 = vsub.f32 %v6679_v39, %v6688_v28 }
 0xf95   :  { %v6692_v53 = vmul.f32 %v6689_v3, %v6689_v3  ;;  %v6693_v60 = vmul.f32 %v6690_v22, %v6690_v22  ;;  %v6694_v7 = vmul.f32 %v6691_v27, %v6691_v27 }
 0xf97   :  { %v6695_v61 = vadd.f32 %v6693_v60, %v6692_v53 }
 0xf99   :  { %v6696_v12 = vadd.f32 %v6695_v61, %v6694_v7 }
 0xf9b   :  { %6697 = vadd.xlane.f32.xlu0 %v6696_v12 }
0x1028   :  { %v6698_v17 = vpop.xlane.xlu0 %6697 }
0x1029   :  { %v6699_v51 = vmul.f32 0.0026041667, %v6698_v17 }
0x102b   :  { %v6700_v13 = vadd.f32 1e-12, %v6699_v51 }
0x102d   :  { %9043 = vrsqrt.f32 %v6700_v13 }
0x1037   :  { %v9044_v38 = vpop.eup %9043 }
0x1038   :  { %v6702_v36 = vmul.f32 %v9044_v38, %v6689_v3  ;;  %v6703_v25 = vmul.f32 %v9044_v38, %v6690_v22  ;;  %v6704_v1 = vmul.f32 %v9044_v38, %v6691_v27 }
0x103a   :  { %v6721_v58 = vmul.f32 %v6709_v33, %v6702_v36  ;;  %v6722_v8 = vmul.f32 %v6713_v54, %v6703_v25  ;;  %v6723_v20 = vmul.f32 %v6717_v46, %v6704_v1 }
0x103c   :  { %v10546_v37 = vadd.f32 %v6728_v35, %v6721_v58  ;;  %v6741_v62 = vadd.f32 %v6732_v41, %v6722_v8  ;;  %v10548_v6 = vadd.f32 %v6736_v43, %v6723_v20 }
0x103d   :  { %9331 = dma.done.wait [#allocation5 + $0x2], 9216 }
0x103e   :  { %9332 = vsyncadd [#allocation5 + $0x2], 4294958080  ;;  %v6747_v16 = vpack.c.bf16 %v6741_v62, %v6741_v62  ;;  %v6750_v55 = vld [vmem:[#allocation4 + $0x8] sm:$0xff]  ;;  %v6749_v10 = vld [vmem:[#allocation4] sm:$0xff]  ;;  %v6746_v7 = vpack.c.bf16 %v10546_v37, %v10546_v37  ;;  %vm7193_vm11 = vcmask 8192  }
0x103f   :  { %v6753_v21 = vld [vmem:[#allocation4 + $0x20] sm:$0xff]  ;;  %6839 = vmatprep.subr.bf16.mxu1 %v6750_v55  ;;  %v6775_v29 = vld [vmem:[#allocation4 + $0xd0] sm:$0xff]  ;;  %v6752_v19 = vld [vmem:[#allocation4 + $0x18] sm:$0xff] }
0x1040   :  { %6953 = vmatprep.mubr.bf16.mxu0 %v6747_v16  ;;  %6871 = vmatprep.mubr.bf16.mxu1 %v6747_v16  ;;  %v6751_v23 = vld [vmem:[#allocation4 + $0x10] sm:$0xff]  ;;  %v6778_v24 = vld [vmem:[#allocation4 + $0xe8] sm:$0xff]  ;;  %v6756_v4 = vld [vmem:[#allocation4 + $0x38] sm:$0xff] }
0x1041   :  { %6840 = vmatpush1.bf16.msra.mxu1 %v6749_v10  ;;  %7899 = vmatprep.subr.bf16.mxu0 %v6775_v29  ;;  %v6754_v11 = vld [vmem:[#allocation4 + $0x28] sm:$0xff]  ;;  %v6781_v57 = vld [vmem:[#allocation4 + $0x100] sm:$0xff]  ;;  %v6755_v34 = vld [vmem:[#allocation4 + $0x30] sm:$0xff]  ;;  %v6748_v10 = vpack.c.bf16 %v10548_v6, %v10548_v6 }
0x1042   :  { %6841 = vmatprep.subr.bf16.mxu1 %v6753_v21  ;;  %7900 = vmatpush3.bf16.msra.mxu0 %v6751_v23  ;;  %v6759_v26 = vld [vmem:[#allocation4 + $0x50] sm:$0xff]  ;;  %v6757_v63 = vld [vmem:[#allocation4 + $0x40] sm:$0xff]  ;;  %v6784_v40 = vld [vmem:[#allocation4 + $0x118] sm:$0xff] }
0x1043   :  { %7901 = vmatprep.subr.bf16.mxu0 %v6778_v24  ;;  %v6758_v15 = vld [vmem:[#allocation4 + $0x48] sm:$0xff]  ;;  %v6760_v45 = vld [vmem:[#allocation4 + $0x58] sm:$0xff]  ;;  %v6787_v18 = vld [vmem:[#allocation4 + $0x130] sm:$0xff] }
0x1044   :  { %v6762_v42 = vld [vmem:[#allocation4 + $0x68] sm:$0xff]  ;;  %v6761_v47 = vld [vmem:[#allocation4 + $0x60] sm:$0xff]  ;;  %v6763_v0 = vld [vmem:[#allocation4 + $0x70] sm:$0xff] }
0x1045   :  { %6842 = vmatpush1.bf16.msra.mxu1 %v6752_v19  ;;  %v6765_v50 = vld [vmem:[#allocation4 + $0x80] sm:$0xff]  ;;  %v6790_v52 = vld [vmem:[#allocation4 + $0x148] sm:$0xff]  ;;  %v6764_v32 = vld [vmem:[#allocation4 + $0x78] sm:$0xff] }
0x1046   :  { %6843 = vmatprep.subr.bf16.mxu1 %v6756_v4  ;;  %7902 = vmatpush3.bf16.msra.mxu0 %v6754_v11  ;;  %v6768_v14 = vld [vmem:[#allocation4 + $0x98] sm:$0xff]  ;;  %v6766_v39 = vld [vmem:[#allocation4 + $0x88] sm:$0xff]  ;;  %v6793_v30 = vld [vmem:[#allocation4 + $0x160] sm:$0xff] }
0x1047   :  { %7903 = vmatprep.subr.bf16.mxu0 %v6781_v57  ;;  %v6767_v44 = vld [vmem:[#allocation4 + $0x90] sm:$0xff]  ;;  %v6769_v28 = vld [vmem:[#allocation4 + $0xa0] sm:$0xff]  ;;  %v6796_v3 = vld [vmem:[#allocation4 + $0x178] sm:$0xff] }
0x1048   :  { %v6771_v48 = vld [vmem:[#allocation4 + $0xb0] sm:$0xff]  ;;  %v6770_v22 = vld [vmem:[#allocation4 + $0xa8] sm:$0xff]  ;;  %v6772_v53 = vld [vmem:[#allocation4 + $0xb8] sm:$0xff] }
0x1049   :  { %6844 = vmatpush1.bf16.msra.mxu1 %v6755_v34  ;;  %v6774_v27 = vld [vmem:[#allocation4 + $0xc8] sm:$0xff]  ;;  %v6773_v60 = vld [vmem:[#allocation4 + $0xc0] sm:$0xff]  ;;  %v6799_v12 = vld [vmem:[#allocation4 + $0x190] sm:$0xff] }
0x104a   :  { %6845 = vmatprep.subr.bf16.mxu1 %v6759_v26  ;;  %7904 = vmatpush3.bf16.msra.mxu0 %v6757_v63  ;;  %v6777_v61 = vld [vmem:[#allocation4 + $0xe0] sm:$0xff]  ;;  %v6776_v17 = vld [vmem:[#allocation4 + $0xd8] sm:$0xff]  ;;  %v6802_v13 = vld [vmem:[#allocation4 + $0x1a8] sm:$0xff] }
0x104b   :  { %7905 = vmatprep.subr.bf16.mxu0 %v6784_v40  ;;  %v6780_v51 = vld [vmem:[#allocation4 + $0xf8] sm:$0xff]  ;;  %v6779_v31 = vld [vmem:[#allocation4 + $0xf0] sm:$0xff]  ;;  %v6805_v33 = vld [vmem:[#allocation4 + $0x1c0] sm:$0xff] }
0x104c   :  { %v6783_v56 = vld [vmem:[#allocation4 + $0x110] sm:$0xff]  ;;  %v6782_v54 = vld [vmem:[#allocation4 + $0x108] sm:$0xff]  ;;  %v6808_v38 = vld [vmem:[#allocation4 + $0x1d8] sm:$0xff] }
0x104d   :  { %6846 = vmatpush1.bf16.msra.mxu1 %v6758_v15  ;;  %v6786_v46 = vld [vmem:[#allocation4 + $0x128] sm:$0xff]  ;;  %v6785_v35 = vld [vmem:[#allocation4 + $0x120] sm:$0xff]  ;;  %v6811_v43 = vld [vmem:[#allocation4 + $0x1f0] sm:$0xff] }
0x104e   :  { %6847 = vmatprep.subr.bf16.mxu1 %v6762_v42  ;;  %7906 = vmatpush3.bf16.msra.mxu0 %v6760_v45  ;;  %v6789_v41 = vld [vmem:[#allocation4 + $0x140] sm:$0xff]  ;;  %v6788_v36 = vld [vmem:[#allocation4 + $0x138] sm:$0xff]  ;;  %v6814_v1 = vld [vmem:[#allocation4 + $0x208] sm:$0xff] }
0x104f   :  { %7907 = vmatprep.subr.bf16.mxu0 %v6787_v18  ;;  %v6792_v25 = vld [vmem:[#allocation4 + $0x158] sm:$0xff]  ;;  %v6791_v58 = vld [vmem:[#allocation4 + $0x150] sm:$0xff]  ;;  %v6817_v20 = vld [vmem:[#allocation4 + $0x220] sm:$0xff]  ;;  %v9372_v18 = vmov 0.0|0.0  }
0x1050   :  { %v6795_v8 = vld [vmem:[#allocation4 + $0x170] sm:$0xff]  ;;  %v6794_v37 = vld [vmem:[#allocation4 + $0x168] sm:$0xff]  ;;  %v6820_v16 = vld [vmem:[#allocation4 + $0x238] sm:$0xff] }
0x1051   :  { %6848 = vmatpush1.bf16.msra.mxu1 %v6761_v47  ;;  %v6798_v62 = vld [vmem:[#allocation4 + $0x188] sm:$0xff]  ;;  %v6797_v55 = vld [vmem:[#allocation4 + $0x180] sm:$0xff]  ;;  %v6800_v29 = vld [vmem:[#allocation4 + $0x198] sm:$0xff] }
0x1052   :  { %6849 = vmatprep.subr.bf16.mxu1 %v6765_v50  ;;  %7908 = vmatpush3.bf16.msra.mxu0 %v6763_v0  ;;  %v6801_v21 = vld [vmem:[#allocation4 + $0x1a0] sm:$0xff]  ;;  %v6804_v23 = vld [vmem:[#allocation4 + $0x1b8] sm:$0xff]  ;;  %v6803_v19 = vld [vmem:[#allocation4 + $0x1b0] sm:$0xff] }
0x1053   :  { %7909 = vmatprep.subr.bf16.mxu0 %v6790_v52  ;;  %v6807_v24 = vld [vmem:[#allocation4 + $0x1d0] sm:$0xff]  ;;  %v6806_v4 = vld [vmem:[#allocation4 + $0x1c8] sm:$0xff]  ;;  %v6809_v6 = vld [vmem:[#allocation4 + $0x1e0] sm:$0xff] }
0x1054   :  { %v6810_v11 = vld [vmem:[#allocation4 + $0x1e8] sm:$0xff]  ;;  %v6813_v57 = vld [vmem:[#allocation4 + $0x200] sm:$0xff]  ;;  %v6812_v34 = vld [vmem:[#allocation4 + $0x1f8] sm:$0xff] }
0x1055   :  { %6850 = vmatpush1.bf16.msra.mxu1 %v6764_v32  ;;  %v6815_v26 = vld [vmem:[#allocation4 + $0x210] sm:$0xff]  ;;  %v6818_v40 = vld [vmem:[#allocation4 + $0x228] sm:$0xff]  ;;  %v7036_v15 = vld [vmem:[%s10743_s17 + $0x100] sm:$0xff] }
0x1056   :  { %6851 = vmatprep.subr.bf16.mxu1 %v6768_v14  ;;  %7910 = vmatpush3.bf16.msra.mxu0 %v6766_v39  ;;  %v6819_v63 = vld [vmem:[#allocation4 + $0x230] sm:$0xff]  ;;  %v7037_v42 = vld [vmem:[%s10743_s17 + $0x108] sm:$0xff]  ;;  %v7039_v50 = vld [vmem:[%s10743_s17 + $0x118] sm:$0xff] }
0x1057   :  { %7911 = vmatprep.subr.bf16.mxu0 %v6793_v30  ;;  %v8266_v45 = vpack.c.bf16 %v7037_v42, %v7036_v15  ;;  %v7038_v47 = vld [vmem:[%s10743_s17 + $0x110] sm:$0xff]  ;;  %v7040_v52 = vld [vmem:[%s10743_s17 + $0x120] sm:$0xff]  ;;  %v7041_v32 = vld [vmem:[%s10743_s17 + $0x128] sm:$0xff] }
0x1058   :  { %v8269_v0 = vpack.c.bf16 %v7039_v50, %v7038_v47  ;;  %v8272_v14 = vpack.c.bf16 %v7041_v32, %v7040_v52  ;;  %v7042_v39 = vld [vmem:[%s10743_s17 + $0x130] sm:$0xff]  ;;  %v7032_v15 = vld [vmem:[%s10743_s17 + $0xe0] sm:$0xff]  ;;  %v7033_v42 = vld [vmem:[%s10743_s17 + $0xe8] sm:$0xff] }
0x1059   :  { %6852 = vmatpush1.bf16.msra.mxu1 %v6767_v44  ;;  %v7044_v44 = vld [vmem:[%s10743_s17 + $0x140] sm:$0xff]  ;;  %v7017_v47 = vld [vmem:[%s10743_s17 + $0x68] sm:$0xff]  ;;  %v7034_v50 = vld [vmem:[%s10743_s17 + $0xf0] sm:$0xff] }
0x105a   :  { %6853 = vmatprep.subr.bf16.mxu1 %v6771_v48  ;;  %7912 = vmatpush3.bf16.msra.mxu0 %v6769_v28  ;;  %v7045_v48 = vld [vmem:[%s10743_s17 + $0x148] sm:$0xff] }
0x105b   :  { %7913 = vmatprep.subr.bf16.mxu0 %v6796_v3  ;;  %v8278_v28 = vpack.c.bf16 %v7045_v48, %v7044_v44  ;;  %v7046_v3 = vld [vmem:[%s10743_s17 + $0x150] sm:$0xff] }
0x105d   :  { %6854 = vmatpush1.bf16.msra.mxu1 %v6770_v22  ;;  %v7047_v22 = vld [vmem:[%s10743_s17 + $0x158] sm:$0xff] }
0x105e   :  { %6855 = vmatprep.subr.bf16.mxu1 %v6774_v27  ;;  %7914 = vmatpush3.bf16.msra.mxu0 %v6772_v53  ;;  %v7020_v27 = vld [vmem:[%s10743_s17 + $0x80] sm:$0xff]  ;;  %v8281_v53 = vpack.c.bf16 %v7047_v22, %v7046_v3  ;;  %v6822_v22 = vld [vmem:[#allocation17 + $0x1a] ss:$8 sm:$0x7] }
0x105f   :  { %8106 = vmatprep.subr.bf16.mxu0 %v9369_v49 }
0x1061   :  { %6856 = vmatpush1.bf16.msra.mxu1 %v6773_v60  ;;  %6954 = vmatmul.mubr.bf16.vlgmr.msra.gmra.mrb[64].mxu0 %v6746_v7  ;;  %v7021_v60 = vld [vmem:[%s10743_s17 + $0x88] sm:$0xff] }
0x1062   :  { %6857 = vmatprep.subr.bf16.mxu1 %v6777_v61  ;;  %8107 = vmatpush3.bf16.msra.mxu0 %v6799_v12  ;;  %v7005_v61 = vld [vmem:[%s10743_s17 + $0x8] sm:$0xff]  ;;  %v8233_v12 = vpack.c.bf16 %v7021_v60, %v7020_v27  ;;  %v6835_v27 = vrot.slane %v6822_v22, %v9672_v59 }
0x1063   :  { %8122 = vmatprep.mubr.msk.bf16.mxu0 %vm9370_vm4, %v9369_v49  ;;  %8108 = vmatprep.subr.bf16.mxu0 %v9369_v49 }
0x1065   :  { %6858 = vmatpush1.bf16.msra.mxu1 %v6776_v17 }
0x1066   :  { %6859 = vmatprep.subr.bf16.mxu1 %v6780_v51  ;;  %8109 = vmatpush3.bf16.msra.mxu0 %v6802_v13  ;;  %v7048_v51 = vld [vmem:[%s10743_s17 + $0x160] sm:$0xff]  ;;  %v7049_v13 = vld [vmem:[%s10743_s17 + $0x168] sm:$0xff] }
0x1067   :  { %8110 = vmatprep.subr.bf16.mxu0 %v9369_v49 }
0x1069   :  { %6860 = vmatpush1.bf16.msra.mxu1 %v6779_v31  ;;  %v7022_v31 = vld [vmem:[%s10743_s17 + $0x90] sm:$0xff] }
0x106a   :  { %6861 = vmatprep.subr.bf16.mxu1 %v6783_v56  ;;  %8111 = vmatpush3.bf16.msra.mxu0 %v6805_v33  ;;  %v8284_v56 = vpack.c.bf16 %v7049_v13, %v7048_v51  ;;  %v7023_v33 = vld [vmem:[%s10743_s17 + $0x98] sm:$0xff]  ;;  %v6827_v13 = vrot.slane %v6822_v22, %v9682_v2 }
0x106b   :  { %8112 = vmatprep.subr.bf16.mxu0 %v9369_v49 }
0x106d   :  { %6862 = vmatpush1.bf16.msra.mxu1 %v6782_v54  ;;  %v7006_v54 = vld [vmem:[%s10743_s17 + $0x10] sm:$0xff] }
0x106e   :  { %6863 = vmatprep.subr.bf16.mxu1 %v6786_v46  ;;  %8113 = vmatpush3.bf16.msra.mxu0 %v6808_v38  ;;  %v7007_v46 = vld [vmem:[%s10743_s17 + $0x18] sm:$0xff]  ;;  %v8237_v38 = vpack.c.bf16 %v7023_v33, %v7022_v31  ;;  %v6831_v31 = vrot.slane %v6822_v22, %v9685_v5 }
0x106f   :  { %8114 = vmatprep.subr.bf16.mxu0 %v9369_v49 }
0x1071   :  { %6864 = vmatpush1.bf16.msra.mxu1 %v6785_v35  ;;  %v7050_v35 = vld [vmem:[%s10743_s17 + $0x170] sm:$0xff] }
0x1072   :  { %6865 = vmatprep.subr.bf16.mxu1 %v6789_v41  ;;  %8115 = vmatpush3.bf16.msra.mxu0 %v6811_v43  ;;  %v7051_v41 = vld [vmem:[%s10743_s17 + $0x178] sm:$0xff]  ;;  %v7024_v43 = vld [vmem:[%s10743_s17 + $0xa0] sm:$0xff] }
0x1073   :  { %8116 = vmatprep.subr.bf16.mxu0 %v9369_v49 }
0x1075   :  { %6866 = vmatpush1.bf16.msra.mxu1 %v6788_v36  ;;  %v8239_v36 = vpack.c.bf16 %v7007_v46, %v7006_v54 }
0x1076   :  { %6867 = vmatprep.subr.bf16.mxu1 %v6792_v25  ;;  %8117 = vmatpush3.bf16.msra.mxu0 %v6814_v1  ;;  %v7025_v25 = vld [vmem:[%s10743_s17 + $0xa8] sm:$0xff] }
0x1077   :  { %8118 = vmatprep.subr.bf16.mxu0 %v9369_v49  ;;  %v8241_v1 = vpack.c.bf16 %v7025_v25, %v7024_v43 }
0x1079   :  { %6868 = vmatpush1.bf16.msra.mxu1 %v6791_v58  ;;  %v7008_v58 = vld [vmem:[%s10743_s17 + $0x20] sm:$0xff] }
0x107a   :  { %6869 = vmatprep.subr.bf16.mxu1 %v6795_v8  ;;  %8119 = vmatpush3.bf16.msra.mxu0 %v6817_v20  ;;  %v7009_v8 = vld [vmem:[%s10743_s17 + $0x28] sm:$0xff]  ;;  %v8287_v20 = vpack.c.bf16 %v7051_v41, %v7050_v35 }
0x107b   :  { %8120 = vmatprep.subr.bf16.mxu0 %v9369_v49 }
0x107d   :  { %6870 = vmatpush1.bf16.msra.mxu1 %v6794_v37  ;;  %v8243_v37 = vpack.c.bf16 %v7009_v8, %v7008_v58 }
0x107e   :  { %6880 = vmatprep.subr.bf16.mxu1 %v6798_v62  ;;  %8121 = vmatpush3.bf16.msra.mxu0 %v6820_v16  ;;  %v7026_v62 = vld [vmem:[%s10743_s17 + $0xb0] sm:$0xff]  ;;  %v7027_v16 = vld [vmem:[%s10743_s17 + $0xb8] sm:$0xff] }
0x107f   :  { %8234 = vmatprep.subr.bf16.mxu0 %v8233_v12 }
0x1080   :  { %6872 = vmatmul.mubr.bf16.vlgmr.msra.gmra.mrb[76].mxu1 %v6746_v7  ;;  %v7004_v7 = vld [vmem:[%s10743_s17] sm:$0xff] }
0x1081   :  { %6881 = vmatpush1.bf16.msra.mxu1 %v6797_v55  ;;  %6912 = vmatprep.mubr.bf16.mxu1 %v9368_v9  ;;  %v6816_v9 = vld [vmem:[#allocation4 + $0x218] sm:$0xff]  ;;  %v8235_v17 = vpack.c.bf16 %v7005_v61, %v7004_v7  ;;  %v7010_v55 = vld [vmem:[%s10743_s17 + $0x30] sm:$0xff] }
0x1082   :  { %6882 = vmatprep.subr.bf16.mxu1 %v6801_v21  ;;  %8123 = vmatmul.mubr.bf16.vlgmr.msra.gmra.mrb[68].mxu0 %v6748_v10  ;;  %v7011_v21 = vld [vmem:[%s10743_s17 + $0x38] sm:$0xff] }
0x1083   :  { %8236 = vmatpush3.bf16.msra.mxu0 %v8235_v17 }
0x1084   :  { %8238 = vmatprep.subr.bf16.mxu0 %v8237_v38 }
0x1085   :  { %6883 = vmatpush1.bf16.msra.mxu1 %v6800_v29  ;;  %v8247_v29 = vpack.c.bf16 %v7011_v21, %v7010_v55 }
0x1086   :  { %6884 = vmatprep.subr.bf16.mxu1 %v6804_v23  ;;  %v7028_v23 = vld [vmem:[%s10743_s17 + $0xc0] sm:$0xff] }
0x1087   :  { %8240 = vmatpush3.bf16.msra.mxu0 %v8239_v36 }
0x1088   :  { %8242 = vmatprep.subr.bf16.mxu0 %v8241_v1  ;;  %v7052_v1 = vld [vmem:[#allocation26] sm:$0x1] }
0x1089   :  { %6885 = vmatpush1.bf16.msra.mxu1 %v6803_v19  ;;  %v7029_v19 = vld [vmem:[%s10743_s17 + $0xc8] sm:$0xff] }
0x108a   :  { %6886 = vmatprep.subr.bf16.mxu1 %v6807_v24  ;;  %v8249_v24 = vpack.c.bf16 %v7029_v19, %v7028_v23 }
0x108b   :  { %8244 = vmatpush3.bf16.msra.mxu0 %v8243_v37 }
0x108d   :  { %6887 = vmatpush1.bf16.msra.mxu1 %v6806_v4  ;;  %v7012_v4 = vld [vmem:[%s10743_s17 + $0x40] sm:$0xff] }
0x108e   :  { %6888 = vmatprep.subr.bf16.mxu1 %v6810_v11  ;;  %v7013_v11 = vld [vmem:[%s10743_s17 + $0x48] sm:$0xff] }
0x1091   :  { %6889 = vmatpush1.bf16.msra.mxu1 %v6809_v6  ;;  %v8251_v6 = vpack.c.bf16 %v7013_v11, %v7012_v4 }
0x1092   :  { %6890 = vmatprep.subr.bf16.mxu1 %v6813_v57  ;;  %v7030_v57 = vld [vmem:[%s10743_s17 + $0xd0] sm:$0xff] }
0x1095   :  { %6891 = vmatpush1.bf16.msra.mxu1 %v6812_v34  ;;  %v7031_v34 = vld [vmem:[%s10743_s17 + $0xd8] sm:$0xff] }
0x1096   :  { %6892 = vmatprep.subr.bf16.mxu1 %v6816_v9  ;;  %v8253_v9 = vpack.c.bf16 %v7031_v34, %v7030_v57 }
0x1099   :  { %6893 = vmatpush1.bf16.msra.mxu1 %v6815_v26  ;;  %v7014_v26 = vld [vmem:[%s10743_s17 + $0x50] sm:$0xff] }
0x109a   :  { %6894 = vmatprep.subr.bf16.mxu1 %v6819_v63  ;;  %v7015_v63 = vld [vmem:[%s10743_s17 + $0x58] sm:$0xff] }
0x109d   :  { %6895 = vmatpush1.bf16.msra.mxu1 %v6818_v40  ;;  %v8255_v40 = vpack.c.bf16 %v7015_v63, %v7014_v26 }
0x109e   :  { %8265 = vmatprep.subr.bf16.mxu1 %v9372_v18 }
0x10a0   :  { %6913 = vmatmul.mubr.bf16.vlgmr.msra.gmra.mrb[76].mxu1 %v6748_v10  ;;  %v8245_v10 = vpack.c.bf16 %v7027_v16, %v7026_v62 }
0x10a1   :  { %8267 = vmatpush3.bf16.msra.mxu1 %v8266_v45  ;;  %8158 = vmatprep.mubr.msk.f32.mxu1 %vm9370_vm4, %v9369_v49  ;;  %v7043_v49 = vld [vmem:[%s10743_s17 + $0x138] sm:$0xff]  ;;  %v7016_v45 = vld [vmem:[%s10743_s17 + $0x60] sm:$0xff] }
0x10a2   :  { %8268 = vmatprep.subr.bf16.mxu1 %v9372_v18  ;;  %v8275_v30 = vpack.c.bf16 %v7043_v49, %v7042_v39  ;;  %8246 = vmatprep.subr.bf16.mxu0 %v8245_v10  ;;  %v8259_v52 = vpack.c.bf16 %v7017_v47, %v7016_v45  ;;  %v7019_v39 = vld [vmem:[%s10743_s17 + $0x78] sm:$0xff] }
0x10a3   :  { %8248 = vmatpush3.bf16.msra.mxu0 %v8247_v29 }
0x10a4   :  { %8250 = vmatprep.subr.bf16.mxu0 %v8249_v24 }
0x10a5   :  { %8270 = vmatpush3.bf16.msra.mxu1 %v8269_v0  ;;  %v7035_v0 = vld [vmem:[%s10743_s17 + $0xf8] sm:$0xff] }
0x10a6   :  { %8271 = vmatprep.subr.bf16.mxu1 %v9372_v18  ;;  %v8261_v32 = vpack.c.bf16 %v7035_v0, %v7034_v50 }
0x10a7   :  { %8252 = vmatpush3.bf16.msra.mxu0 %v8251_v6 }
0x10a8   :  { %8254 = vmatprep.subr.bf16.mxu0 %v8253_v9 }
0x10a9   :  { %8273 = vmatpush3.bf16.msra.mxu1 %v8272_v14  ;;  %v7018_v14 = vld [vmem:[%s10743_s17 + $0x70] sm:$0xff]  ;;  %s9373_s17 = smov [#allocation27]  }
0x10aa   :  { %8274 = vmatprep.subr.bf16.mxu1 %v9372_v18  ;;  %v8263_v49 = vpack.c.bf16 %v7019_v39, %v7018_v14  ;;  %s7201_s9 = sshll.u32 %s9373_s17, 4  ;;  %s7202_s9 = int_to_ptr.vmem [resolvable:$true] %s7201_s9 }
0x10ab   :  { %8256 = vmatpush3.bf16.msra.mxu0 %v8255_v40  ;;  %s9293_s15 = scalar_lea.vmem %s7202_s9, 16  ;;  %s9297_s2 = scalar_lea.vmem %s7202_s9, 32 }
0x10ac   :  { %p9294_p4 = scmp.ne.s32.totalorder %s7202_s9, %s9293_s15  ;;  %p9298_p5 = scmp.lt.s32.totalorder %s7202_s9, %s7202_s9 }
0x10ad   :  { %8276 = vmatpush3.bf16.msra.mxu1 %v8275_v30  ;;  %p9299_p6 = scmp.lt.s32.totalorder %s9297_s2, %s9293_s15 }
0x10ae   :  { %8277 = vmatprep.subr.bf16.mxu1 %v9372_v18 }
0x10af   :  { %p9300_p7 = por %p9299_p6, %p9298_p5 }
0x10b1   :  { %8279 = vmatpush3.bf16.msra.mxu1 %v8278_v28  ;;  %p9301_p8 = pnand %p9300_p7, %p9294_p4 }
0x10b2   :  { %8280 = vmatprep.subr.bf16.mxu1 %v9372_v18 }
0x10b5   :  { %8282 = vmatpush3.bf16.msra.mxu1 %v8281_v53 }
0x10b6   :  { %8283 = vmatprep.subr.bf16.mxu1 %v9372_v18 }
0x10b9   :  { %8285 = vmatpush3.bf16.msra.mxu1 %v8284_v56 }
0x10ba   :  { %8286 = vmatprep.subr.bf16.mxu1 %v9372_v18  ;;  %v8257_v18 = vpack.c.bf16 %v7033_v42, %v7032_v15 }
0x10bc   :  { %8258 = vmatprep.subr.bf16.mxu0 %v8257_v18 }
0x10bd   :  { %8288 = vmatpush3.bf16.msra.mxu1 %v8287_v20  ;;  %8260 = vmatpush3.bf16.msra.mxu0 %v8259_v52 }
0x10be   :  { %8262 = vmatprep.subr.bf16.mxu0 %v8261_v32 }
0x10c1   :  { %8264 = vmatpush3.bf16.msra.mxu0 %v8263_v49 }
0x1134   :  { %v7915_v30 = vpop.f32.mrb[64].mxu0 }
0x1135   :  { %v7916_v44 = vpop.f32.mrb[65].mxu0 }
0x1136   :  { %v7917_v48 = vadd.f32 %v7916_v44, %v7915_v30  ;;  %v7918_v28 = vpop.f32.mrb[66].mxu0 }
0x1137   :  { %v7919_v3 = vpop.f32.mrb[67].mxu0 }
0x1138   :  { %v6956_v53 = vadd.f32 %v7917_v48, %v6835_v27 }
0x1155   :  { %v6995_v60 = vpop.f32.mrb[68].mxu0 }
0x1156   :  { %v6996_v7 = vadd.f32 %v6995_v60, %v6956_v53  ;;  %v8124_v61 = vpop.f32.mrb[69].mxu0 }
0x1157   :  { %v6998_v12 = vpop.f32.mrb[70].mxu0 }
0x1158   :  { %9045 = vtanh.f32 %v6996_v7  ;;  %v8125_v17 = vpop.f32.mrb[71].mxu0 }
0x1162   :  { %v9046_v51 = vpop.eup %9045 }
0x1163   :  { %8159 = vmatmul.mubr.f32.vlgmr.msra.gmra.mrb[80].mxu1 %v9046_v51 }
0x1173   :  { %v6914_v56 = vpop.f32.mrb[76].mxu1 }
0x1174   :  { %v8333_v33 = vadd.f32 %v6914_v56, %v6827_v13  ;;  %v6916_v54 = vpop.f32.mrb[77].mxu1 }
0x1175   :  { %v8334_v46 = vadd.f32 %v6916_v54, %v6831_v31  ;;  %v6918_v38 = vpop.f32.mrb[78].mxu1 }
0x1176   :  { %v6919_v35 = vpop.f32.mrb[79].mxu1 }
0x1177   :  { %9047 = vtanh.f32 %v8334_v46 }
0x1178   :  { %9049 = vtanh.f32 %v8333_v33 }
0x1181   :  { %v9048_v59 = vpop.eup %9047 }
0x1182   :  { %v9050_v41 = vpop.eup %9049  ;;  %7117 = vmatprep.mubr.f32.mxu0 %v9048_v59 }
0x1183   :  { %7118 = vmatmul.mubr.f32.vlgmr.msra.gmra.mrb[72].mxu0 %v9050_v41 }
0x1236   :  { %v7189_v43 = vpop.f32.mrb[80].mxu1 }
0x1237   :  { %v8160_v36 = vpop.f32.mrb[81].mxu1 }
0x1256   :  { %v7962_v25 = vpop.f32.mrb[72].mxu0 }
0x1257   :  { %v7963_v58 = vpop.f32.mrb[73].mxu0 }
0x1258   :  { %v7964_v2 = vadd.f32 %v7963_v58, %v7962_v25 }
0x125a   :  { %v7120_v5 = vadd.f32 %v7964_v2, %v7052_v1 }
0x125c   :  { %v7190_v8 = vadd.f32 %v7189_v43, %v7120_v5 }
0x125e   :  { %7194 = vst.msk [vmem:[#allocation27] sm:$0x1] %vm7193_vm11, %v7190_v8 }
0x125f   :  { %9304 = shalt.err (!%p9301_p8)
}
0x1260   :  { %s9305_s16 = scalar_lea.hbm %s10745_s19, 16 }
0x1261   :  { %p9306_p9 = scmp.ne.s32.totalorder %s10745_s19, %s9305_s16  ;;  %p9309_p10 = scmp.lt.u32.totalorder %s9305_s16, %s10745_s19 }
0x1263   :  { %p9311_p11 = pnand %p9309_p10, %p9306_p9 }
0x1265   :  { %9314 = shalt.err (!%p9311_p11)
}
0x1266   :  { %7204 = dma.vmem_to_hbm [thread:$0]  %s7202_s9, 16, %s10745_s19, [#allocation11]  }
0x1267   :  { %9333 = dma.done.wait [#allocation11], 16  }
0x1268   :  { %9334 = vsyncadd [#allocation11], 4294967280 }
0x1269   :  { %7208 = vsyncpa [#allocation10], 1 }
0x126a   :  { %7209 = vsyncpa [#allocation13], 1 }
0x126b   :  { %7210 = vsyncpa [#allocation16], 1 }
0x126c   :  { %7211 = vsyncpa [#allocation19], 1 }
0x126d   :  { %7212 = vsyncpa [#allocation22], 1 }
0x126e   :  { %7213 = vsyncpa [#allocation25], 1 }
0x126f   :  { %7214 = vsyncpa [#allocation11], 1 }
0x1270   :  { %7215 = vsyncmov [#allocation5] }
0x1273   :  { %s7216_s10 = vpop.sfrf %7215 }
0x1274   :  { %p7632_p12 = scmp.ne.s32.totalorder %s7216_s10, 0 }
0x1276   :  { %7220 = shalt.err (%p7632_p12)  }
0x1277   :  { %7222 = vsyncmov [#allocation5 + $0x1] }
0x127a   :  { %s7223_s25 = vpop.sfrf %7222 }
0x127b   :  { %p7633_p13 = scmp.ne.s32.totalorder %s7223_s25, 0 }
0x127d   :  { %7227 = shalt.err (%p7633_p13)  }
0x127e   :  { %7229 = vsyncmov [#allocation5 + $0x2] }
0x1281   :  { %s7230_s21 = vpop.sfrf %7229 }
0x1282   :  { %p7634_p0 = scmp.ne.s32.totalorder %s7230_s21, 0 }
0x1284   :  { %7234 = shalt.err (%p7634_p0)  }

</bundles_post_ra>
